<compile_context>
chip_gen: v7x
topology: tpu7x:2x2x1
jax: 0.10.0
libtpu: 0.0.40
codegen_flags: <defaults>
</compile_context>

<pallas_src>
import jax
import jax.numpy as jnp
from jax.experimental import pallas as pl
from jax.experimental.pallas import tpu as pltpu


_NEG = -3.0e38  # effectively -inf for the max-pool padding (f32-safe)


def _round_up(v, m):
    return (v + m - 1) // m * m


def _block2_kernel(x_ref, xsub_ref, w1_ref, s1_ref, b1_ref,
                   dw2_ref, pw2_ref, s2_ref, b2_ref,
                   wr_ref, sr_ref, br_ref,
                   out_ref,
                   xpad_ref, h1pad_ref, h2pad_ref, mmax_ref):
    _, H, W, Cin = x_ref.shape
    C = pw2_ref.shape[1]                       # 128
    _, Ho, Wo, _ = out_ref.shape
    f32, bf16 = jnp.float32, jnp.bfloat16

    # =====================================================================
    # conv1: SeparableConv2D(Cin->128, 3x3, pad=1) + BN1 + ReLU.
    # depthwise*pointwise folded into per-tap (H*W, Cin) @ (Cin, 128) MXU
    # matmuls (bf16 operands, f32 accumulation) instead of 4-lane VPU
    # broadcasts.  Zero padding done in-kernel via a VMEM scratch (no
    # wrapper jnp.pad / HBM round trip).
    # =====================================================================
    xpad_ref[...] = jnp.zeros_like(xpad_ref)
    xpad_ref[1:H + 1, 1:W + 1, :] = x_ref[0]
    xp = xpad_ref[...]

    acc1 = jnp.zeros((H * W, C), f32)
    for dx in range(3):
        # Hoist the (sublane) horizontal shift: one shifted strip per dx,
        # reused by all three dy taps (instead of 9 independent shifted reads).
        xsl = xp[:, dx:dx + W, :]                          # (H+2, W, Cin)
        for dy in range(3):
            tap = xsl[dy:dy + H, :, :].reshape(H * W, Cin)
            acc1 = acc1 + jnp.dot(tap.astype(bf16),
                                  w1_ref[dy * 3 + dx].astype(bf16),
                                  preferred_element_type=f32)
    h1 = jnp.maximum(acc1 * s1_ref[0] + b1_ref[0], 0.0)    # BN1 + ReLU (f32 VPU)

    # =====================================================================
    # conv2: SeparableConv2D(128->128, 3x3, pad=1) + BN2.
    # depthwise on the VPU in f32; pointwise on the MXU (bf16 operands).
    # =====================================================================
    h1pad_ref[...] = jnp.zeros_like(h1pad_ref)
    h1pad_ref[1:H + 1, 1:W + 1, :] = h1.reshape(H, W, C)
    hp = h1pad_ref[...]

    acc2 = jnp.zeros((H, W, C), f32)
    for dx in range(3):
        hsl = hp[:, dx:dx + W, :]                          # hoisted dx shift
        for dy in range(3):
            acc2 = acc2 + hsl[dy:dy + H, :, :] * dw2_ref[dy * 3 + dx]
    h2 = jnp.dot(acc2.reshape(H * W, C).astype(bf16),
                 pw2_ref[...].astype(bf16),
                 preferred_element_type=f32)
    h2 = h2 * s2_ref[0] + b2_ref[0]                        # BN2

    # =====================================================================
    # MaxPool2d(3x3, stride=2, pad=1), fully in-kernel (-inf padded scratch,
    # no 9x replicated window tensor).  Vectorized 3x3 window maxima at every
    # position (same hoisted strips), then gather the stride-2 anchors.
    # =====================================================================
    h2pad_ref[...] = jnp.full(h2pad_ref.shape, _NEG, f32)
    h2pad_ref[1:H + 1, 1:W + 1, :] = h2.reshape(H, W, C)
    pp = h2pad_ref[...]

    fm = None
    for dx in range(3):
        psl = pp[:, dx:dx + W, :]
        for dy in range(3):
            t = psl[dy:dy + H, :, :]
            fm = t if fm is None else jnp.maximum(fm, t)
    mmax_ref[...] = fm                                     # (H, W, C)

    # =====================================================================
    # Residual branch: 1x1 stride-2 conv (MXU) + BN, added to the pooled
    # maxima.  Output stays channels-last => lane-dense (128) stores.
    # =====================================================================
    rx = jnp.dot(xsub_ref[0].reshape(Ho * Wo, Cin).astype(bf16),
                 wr_ref[...].astype(bf16),
                 preferred_element_type=f32)
    rx = rx * sr_ref[0] + br_ref[0]
    out_ref[0] = rx.reshape(Ho, Wo, C)

    # Stride-2 gather of the window maxima.  Ho=Wo=8 here, so these 64
    # full-lane single-row read/add/stores are negligible; for larger spatial
    # sizes this would become a wider strided-row gather.
    for i in range(Ho):
        for j in range(Wo):
            out_ref[0, i, j, :] = (out_ref[0, i, j, :]
                                   + mmax_ref[2 * i, 2 * j, :])


# --------------------------------------------------------------------------
# Block2 forward (NCHW in / NCHW out, PyTorch convention)
# --------------------------------------------------------------------------
def _fold_bn(gamma, beta, mean, var, eps=1e-5):
    scale = gamma * jax.lax.rsqrt(var + eps)
    shift = beta - mean * scale
    return scale[None, :], shift[None, :]


def block2_forward(x_nchw, params):
    x = jnp.transpose(x_nchw, (0, 2, 3, 1)).astype(jnp.float32)     # NHWC
    B, H, W, Cin = x.shape
    C = params['w_pw2'].shape[0]                                    # 128
    Ho = (H + 2 - 3) // 2 + 1
    Wo = (W + 2 - 3) // 2 + 1
    Wp = _round_up(W + 2, 8)          # sublane-friendly width of VMEM scratches

    # ---- torch-layout -> kernel-layout parameter prep (tiny; jit-folded) ----
    d1 = params['w_dw1'][:, 0]                                      # (Cin,3,3)
    p1 = params['w_pw1'][:, :, 0, 0]                                # (C,Cin)
    w1 = jnp.einsum('cyx,oc->yxco', d1, p1).reshape(9, Cin, C)      # fused dw*pw taps
    dw2 = jnp.transpose(params['w_dw2'][:, 0], (1, 2, 0)).reshape(9, C)
    pw2 = jnp.transpose(params['w_pw2'][:, :, 0, 0], (1, 0))        # (C,C)
    wr = jnp.transpose(params['w_r'][:, :, 0, 0], (1, 0))           # (Cin,C)
    s1, b1 = _fold_bn(*params['bn1'])
    s2, b2 = _fold_bn(*params['bn2'])
    sr, br = _fold_bn(*params['bn_r'])

    # stride-2 sample of x feeding the residual 1x1 conv (tiny: B*Ho*Wo*Cin)
    xsub = x[:, ::2, ::2, :]

    out = pl.pallas_call(
        _block2_kernel,
        out_shape=jax.ShapeDtypeStruct((B, Ho, Wo, C), jnp.float32),
        grid=(B,),
        in_specs=[
            pl.BlockSpec((1, H, W, Cin), lambda b: (b, 0, 0, 0)),
            pl.BlockSpec((1, Ho, Wo, Cin), lambda b: (b, 0, 0, 0)),
            pl.BlockSpec((9, Cin, C), lambda b: (0, 0, 0)),
            pl.BlockSpec((1, C), lambda b: (0, 0)),
            pl.BlockSpec((1, C), lambda b: (0, 0)),
            pl.BlockSpec((9, C), lambda b: (0, 0)),
            pl.BlockSpec((C, C), lambda b: (0, 0)),
            pl.BlockSpec((1, C), lambda b: (0, 0)),
            pl.BlockSpec((1, C), lambda b: (0, 0)),
            pl.BlockSpec((Cin, C), lambda b: (0, 0)),
            pl.BlockSpec((1, C), lambda b: (0, 0)),
            pl.BlockSpec((1, C), lambda b: (0, 0)),
        ],
        out_specs=pl.BlockSpec((1, Ho, Wo, C), lambda b: (b, 0, 0, 0)),
        scratch_shapes=[
            pltpu.VMEM((H + 2, Wp, Cin), jnp.float32),   # zero-padded x
            pltpu.VMEM((H + 2, Wp, C), jnp.float32),     # zero-padded h1
            pltpu.VMEM((H + 2, Wp, C), jnp.float32),     # -inf-padded h2
            pltpu.VMEM((H, W, C), jnp.float32),          # dense 3x3 window maxima
        ],
        compiler_params=pltpu.CompilerParams(
            dimension_semantics=("parallel",)),
    )(x, xsub, w1, s1, b1, dw2, pw2, s2, b2, wr, sr, br)
    # TODO(synk): for realistic Xception resolutions (H,W >= 128) switch to
    # row-strip tiling with a 2-row halo and set vmem_limit_bytes explicitly.
    return jnp.transpose(out, (0, 3, 1, 2))                         # back to NCHW


# --------------------------------------------------------------------------
# Pure-JAX reference (torch layouts, lax convs) used only as a correctness check
# --------------------------------------------------------------------------
def _reference_forward(x, params):
    def conv(x, w, stride=1, padding=0, groups=1):
        return jax.lax.conv_general_dilated(
            x, w, window_strides=(stride, stride),
            padding=((padding, padding), (padding, padding)),
            dimension_numbers=('NCHW', 'OIHW', 'NCHW'),
            feature_group_count=groups,
            precision=jax.lax.Precision.HIGHEST)

    def bn(y, p, eps=1e-5):
        g, b, m, v = (a[None, :, None, None] for a in p)
        return (y - m) * g * jax.lax.rsqrt(v + eps) + b

    c_in = x.shape[1]
    c_mid = params['w_dw2'].shape[0]
    rx = bn(conv(x, params['w_r'], stride=2), params['bn_r'])
    h = conv(conv(x, params['w_dw1'], padding=1, groups=c_in), params['w_pw1'])
    h = jnp.maximum(bn(h, params['bn1']), 0.0)
    h = conv(conv(h, params['w_dw2'], padding=1, groups=c_mid), params['w_pw2'])
    h = bn(h, params['bn2'])
    hp = jnp.pad(h, ((0, 0), (0, 0), (1, 1), (1, 1)),
                 constant_values=-jnp.inf)
    pooled = jax.lax.reduce_window(hp, -jnp.inf, jax.lax.max,
                                   (1, 1, 3, 3), (1, 1, 2, 2), 'VALID')
    return pooled + rx


if __name__ == "__main__":
    B, C_in, H, W = 2, 4, 16, 16
    key = jax.random.PRNGKey(0)
    ks = jax.random.split(key, 9)

    x = jax.random.normal(ks[0], (B, C_in, H, W), jnp.float32)

    def bn_init(k, c=128):
        k1, k2, k3, k4 = jax.random.split(k, 4)
        gamma = 1.0 + 0.1 * jax.random.normal(k1, (c,), jnp.float32)
        beta = 0.1 * jax.random.normal(k2, (c,), jnp.float32)
        mean = 0.1 * jax.random.normal(k3, (c,), jnp.float32)
        var = jax.random.uniform(k4, (c,), jnp.float32, minval=0.5, maxval=1.5)
        return gamma, beta, mean, var

    params = {
        # parameters in PyTorch weight layouts, deterministic synthetic init
        'w_r':   0.1 * jax.random.normal(ks[1], (128, C_in, 1, 1), jnp.float32),
        'w_dw1': 0.1 * jax.random.normal(ks[2], (C_in, 1, 3, 3), jnp.float32),
        'w_pw1': 0.1 * jax.random.normal(ks[3], (128, C_in, 1, 1), jnp.float32),
        'w_dw2': 0.1 * jax.random.normal(ks[4], (128, 1, 3, 3), jnp.float32),
        'w_pw2': 0.1 * jax.random.normal(ks[5], (128, 128, 1, 1), jnp.float32),
        'bn_r': bn_init(ks[6]),
        'bn1': bn_init(ks[7]),
        'bn2': bn_init(ks[8]),
    }

    out = jax.jit(block2_forward)(x, params)
    out = jax.block_until_ready(out)
    assert out.shape == (B, 128, H // 2, W // 2), out.shape

    ref = _reference_forward(x, params)
    err = float(jnp.max(jnp.abs(out - ref)))
    assert err < 5e-2, f"max abs error too large: {err}"
    print("KERNEL_OK")
</pallas_src>

<mosaic_0001>
module attributes {stable_mosaic.version = 11 : i64} {
  func.func @_block2_kernel(%arg0: i32, %arg1: memref<1x16x16x4xf32, #tpu.memory_space<vmem>>, %arg2: memref<1x8x8x4xf32, #tpu.memory_space<vmem>>, %arg3: memref<9x4x128xf32, #tpu.memory_space<vmem>>, %arg4: memref<1x128xf32, #tpu.memory_space<vmem>>, %arg5: memref<1x128xf32, #tpu.memory_space<vmem>>, %arg6: memref<9x128xf32, #tpu.memory_space<vmem>>, %arg7: memref<128x128xf32, #tpu.memory_space<vmem>>, %arg8: memref<1x128xf32, #tpu.memory_space<vmem>>, %arg9: memref<1x128xf32, #tpu.memory_space<vmem>>, %arg10: memref<4x128xf32, #tpu.memory_space<vmem>>, %arg11: memref<1x128xf32, #tpu.memory_space<vmem>>, %arg12: memref<1x128xf32, #tpu.memory_space<vmem>>, %arg13: memref<1x8x8x128xf32, #tpu.memory_space<vmem>>, %arg14: memref<18x24x4xf32, #tpu.memory_space<vmem>>, %arg15: memref<18x24x128xf32, #tpu.memory_space<vmem>>, %arg16: memref<18x24x128xf32, #tpu.memory_space<vmem>>, %arg17: memref<16x16x128xf32, #tpu.memory_space<vmem>>) attributes {dimension_semantics = [#tpu.dimension_semantics<parallel>], iteration_bounds = array<i64: 2>, scalar_prefetch = 0 : i64, scratch_operands = 4 : i64, tpu.core_type = #tpu.core_type<tc>, window_params = [{transform_indices = @transform_0, window_bounds = array<i64: 1, 16, 16, 4>}, {transform_indices = @transform_1, window_bounds = array<i64: 1, 8, 8, 4>}, {pipeline_mode = #tpu.pipeline_mode<synchronous>, transform_indices = @transform_2, window_bounds = array<i64: 9, 4, 128>}, {pipeline_mode = #tpu.pipeline_mode<synchronous>, transform_indices = @transform_3, window_bounds = array<i64: 1, 128>}, {pipeline_mode = #tpu.pipeline_mode<synchronous>, transform_indices = @transform_4, window_bounds = array<i64: 1, 128>}, {pipeline_mode = #tpu.pipeline_mode<synchronous>, transform_indices = @transform_5, window_bounds = array<i64: 9, 128>}, {pipeline_mode = #tpu.pipeline_mode<synchronous>, transform_indices = @transform_6, window_bounds = array<i64: 128, 128>}, {pipeline_mode = #tpu.pipeline_mode<synchronous>, transform_indices = @transform_7, window_bounds = array<i64: 1, 128>}, {pipeline_mode = #tpu.pipeline_mode<synchronous>, transform_indices = @transform_8, window_bounds = array<i64: 1, 128>}, {pipeline_mode = #tpu.pipeline_mode<synchronous>, transform_indices = @transform_9, window_bounds = array<i64: 4, 128>}, {pipeline_mode = #tpu.pipeline_mode<synchronous>, transform_indices = @transform_10, window_bounds = array<i64: 1, 128>}, {pipeline_mode = #tpu.pipeline_mode<synchronous>, transform_indices = @transform_11, window_bounds = array<i64: 1, 128>}, {transform_indices = @transform_12, window_bounds = array<i64: 1, 8, 8, 128>}]} {
    %cst = arith.constant 0.000000e+00 : f32
    %0 = vector.broadcast %cst : f32 to vector<18x24x4xf32>
    %c0 = arith.constant 0 : index
    %c0_0 = arith.constant 0 : index
    %c0_1 = arith.constant 0 : index
    %1 = vector.load %arg14[%c0, %c0_0, %c0_1] : memref<18x24x4xf32, #tpu.memory_space<vmem>>, vector<18x24x4xf32>
    tpu.vector_store %arg14[%c0, %c0_0, %c0_1], %0 {strides = array<i32>} : memref<18x24x4xf32, #tpu.memory_space<vmem>>, vector<18x24x4xf32>,
    %c0_2 = arith.constant 0 : index
    %c0_3 = arith.constant 0 : index
    %c0_4 = arith.constant 0 : index
    %c0_5 = arith.constant 0 : index
    %2 = vector.load %arg1[%c0_2, %c0_3, %c0_4, %c0_5] : memref<1x16x16x4xf32, #tpu.memory_space<vmem>>, vector<1x16x16x4xf32>
    %3 = vector.shape_cast %2 : vector<1x16x16x4xf32> to vector<16x16x4xf32>
    %c1 = arith.constant 1 : index
    %c1_6 = arith.constant 1 : index
    %c0_7 = arith.constant 0 : index
    %4 = vector.load %arg14[%c1, %c1_6, %c0_7] : memref<18x24x4xf32, #tpu.memory_space<vmem>>, vector<16x16x4xf32>
    tpu.vector_store %arg14[%c1, %c1_6, %c0_7], %3 {strides = array<i32>} : memref<18x24x4xf32, #tpu.memory_space<vmem>>, vector<16x16x4xf32>,
    %c0_8 = arith.constant 0 : index
    %c0_9 = arith.constant 0 : index
    %c0_10 = arith.constant 0 : index
    %5 = vector.load %arg14[%c0_8, %c0_9, %c0_10] : memref<18x24x4xf32, #tpu.memory_space<vmem>>, vector<18x24x4xf32>
    %cst_11 = arith.constant 0.000000e+00 : f32
    %6 = vector.broadcast %cst_11 : f32 to vector<256x128xf32>
    %7 = vector.extract_strided_slice %5 {offsets = [0, 0, 0], sizes = [18, 16, 4], strides = [1, 1, 1]} : vector<18x24x4xf32> to vector<18x16x4xf32>
    %8 = vector.extract_strided_slice %7 {offsets = [0, 0, 0], sizes = [16, 16, 4], strides = [1, 1, 1]} : vector<18x16x4xf32> to vector<16x16x4xf32>
    %9 = vector.shape_cast %8 : vector<16x16x4xf32> to vector<256x4xf32>
    %10 = arith.truncf %9 : vector<256x4xf32> to vector<256x4xbf16>
    %c0_12 = arith.constant 0 : index
    %c0_13 = arith.constant 0 : index
    %c0_14 = arith.constant 0 : index
    %11 = vector.load %arg3[%c0_12, %c0_13, %c0_14] : memref<9x4x128xf32, #tpu.memory_space<vmem>>, vector<1x4x128xf32>
    %12 = vector.shape_cast %11 : vector<1x4x128xf32> to vector<4x128xf32>
    %13 = arith.truncf %12 : vector<4x128xf32> to vector<4x128xbf16>
    %cst_15 = arith.constant dense<0.000000e+00> : vector<256x128xf32>
    %14 = tpu.matmul %10, %13, %cst_15 {dimension_numbers = #tpu.dot_dimension_numbers<[1], [0], [0], [1], [0, 0, 1, 1], [], []>} : vector<256x4xbf16>, vector<4x128xbf16>, vector<256x128xf32> -> vector<256x128xf32>
    %15 = arith.addf %6, %14 : vector<256x128xf32>
    %16 = vector.extract_strided_slice %7 {offsets = [1, 0, 0], sizes = [16, 16, 4], strides = [1, 1, 1]} : vector<18x16x4xf32> to vector<16x16x4xf32>
    %17 = vector.shape_cast %16 : vector<16x16x4xf32> to vector<256x4xf32>
    %18 = arith.truncf %17 : vector<256x4xf32> to vector<256x4xbf16>
    %c3 = arith.constant 3 : index
    %c0_16 = arith.constant 0 : index
    %c0_17 = arith.constant 0 : index
    %19 = vector.load %arg3[%c3, %c0_16, %c0_17] : memref<9x4x128xf32, #tpu.memory_space<vmem>>, vector<1x4x128xf32>
    %20 = vector.shape_cast %19 : vector<1x4x128xf32> to vector<4x128xf32>
    %21 = arith.truncf %20 : vector<4x128xf32> to vector<4x128xbf16>
    %cst_18 = arith.constant dense<0.000000e+00> : vector<256x128xf32>
    %22 = tpu.matmul %18, %21, %cst_18 {dimension_numbers = #tpu.dot_dimension_numbers<[1], [0], [0], [1], [0, 0, 1, 1], [], []>} : vector<256x4xbf16>, vector<4x128xbf16>, vector<256x128xf32> -> vector<256x128xf32>
    %23 = arith.addf %15, %22 : vector<256x128xf32>
    %24 = vector.extract_strided_slice %7 {offsets = [2, 0, 0], sizes = [16, 16, 4], strides = [1, 1, 1]} : vector<18x16x4xf32> to vector<16x16x4xf32>
    %25 = vector.shape_cast %24 : vector<16x16x4xf32> to vector<256x4xf32>
    %26 = arith.truncf %25 : vector<256x4xf32> to vector<256x4xbf16>
    %c6 = arith.constant 6 : index
    %c0_19 = arith.constant 0 : index
    %c0_20 = arith.constant 0 : index
    %27 = vector.load %arg3[%c6, %c0_19, %c0_20] : memref<9x4x128xf32, #tpu.memory_space<vmem>>, vector<1x4x128xf32>
    %28 = vector.shape_cast %27 : vector<1x4x128xf32> to vector<4x128xf32>
    %29 = arith.truncf %28 : vector<4x128xf32> to vector<4x128xbf16>
    %cst_21 = arith.constant dense<0.000000e+00> : vector<256x128xf32>
    %30 = tpu.matmul %26, %29, %cst_21 {dimension_numbers = #tpu.dot_dimension_numbers<[1], [0], [0], [1], [0, 0, 1, 1], [], []>} : vector<256x4xbf16>, vector<4x128xbf16>, vector<256x128xf32> -> vector<256x128xf32>
    %31 = arith.addf %23, %30 : vector<256x128xf32>
    %32 = vector.extract_strided_slice %5 {offsets = [0, 1, 0], sizes = [18, 16, 4], strides = [1, 1, 1]} : vector<18x24x4xf32> to vector<18x16x4xf32>
    %33 = vector.extract_strided_slice %32 {offsets = [0, 0, 0], sizes = [16, 16, 4], strides = [1, 1, 1]} : vector<18x16x4xf32> to vector<16x16x4xf32>
    %34 = vector.shape_cast %33 : vector<16x16x4xf32> to vector<256x4xf32>
    %35 = arith.truncf %34 : vector<256x4xf32> to vector<256x4xbf16>
    %c1_22 = arith.constant 1 : index
    %c0_23 = arith.constant 0 : index
    %c0_24 = arith.constant 0 : index
    %36 = vector.load %arg3[%c1_22, %c0_23, %c0_24] : memref<9x4x128xf32, #tpu.memory_space<vmem>>, vector<1x4x128xf32>
    %37 = vector.shape_cast %36 : vector<1x4x128xf32> to vector<4x128xf32>
    %38 = arith.truncf %37 : vector<4x128xf32> to vector<4x128xbf16>
    %cst_25 = arith.constant dense<0.000000e+00> : vector<256x128xf32>
    %39 = tpu.matmul %35, %38, %cst_25 {dimension_numbers = #tpu.dot_dimension_numbers<[1], [0], [0], [1], [0, 0, 1, 1], [], []>} : vector<256x4xbf16>, vector<4x128xbf16>, vector<256x128xf32> -> vector<256x128xf32>
    %40 = arith.addf %31, %39 : vector<256x128xf32>
    %41 = vector.extract_strided_slice %32 {offsets = [1, 0, 0], sizes = [16, 16, 4], strides = [1, 1, 1]} : vector<18x16x4xf32> to vector<16x16x4xf32>
    %42 = vector.shape_cast %41 : vector<16x16x4xf32> to vector<256x4xf32>
    %43 = arith.truncf %42 : vector<256x4xf32> to vector<256x4xbf16>
    %c4 = arith.constant 4 : index
    %c0_26 = arith.constant 0 : index
    %c0_27 = arith.constant 0 : index
    %44 = vector.load %arg3[%c4, %c0_26, %c0_27] : memref<9x4x128xf32, #tpu.memory_space<vmem>>, vector<1x4x128xf32>
    %45 = vector.shape_cast %44 : vector<1x4x128xf32> to vector<4x128xf32>
    %46 = arith.truncf %45 : vector<4x128xf32> to vector<4x128xbf16>
    %cst_28 = arith.constant dense<0.000000e+00> : vector<256x128xf32>
    %47 = tpu.matmul %43, %46, %cst_28 {dimension_numbers = #tpu.dot_dimension_numbers<[1], [0], [0], [1], [0, 0, 1, 1], [], []>} : vector<256x4xbf16>, vector<4x128xbf16>, vector<256x128xf32> -> vector<256x128xf32>
    %48 = arith.addf %40, %47 : vector<256x128xf32>
    %49 = vector.extract_strided_slice %32 {offsets = [2, 0, 0], sizes = [16, 16, 4], strides = [1, 1, 1]} : vector<18x16x4xf32> to vector<16x16x4xf32>
    %50 = vector.shape_cast %49 : vector<16x16x4xf32> to vector<256x4xf32>
    %51 = arith.truncf %50 : vector<256x4xf32> to vector<256x4xbf16>
    %c7 = arith.constant 7 : index
    %c0_29 = arith.constant 0 : index
    %c0_30 = arith.constant 0 : index
    %52 = vector.load %arg3[%c7, %c0_29, %c0_30] : memref<9x4x128xf32, #tpu.memory_space<vmem>>, vector<1x4x128xf32>
    %53 = vector.shape_cast %52 : vector<1x4x128xf32> to vector<4x128xf32>
    %54 = arith.truncf %53 : vector<4x128xf32> to vector<4x128xbf16>
    %cst_31 = arith.constant dense<0.000000e+00> : vector<256x128xf32>
    %55 = tpu.matmul %51, %54, %cst_31 {dimension_numbers = #tpu.dot_dimension_numbers<[1], [0], [0], [1], [0, 0, 1, 1], [], []>} : vector<256x4xbf16>, vector<4x128xbf16>, vector<256x128xf32> -> vector<256x128xf32>
    %56 = arith.addf %48, %55 : vector<256x128xf32>
    %57 = vector.extract_strided_slice %5 {offsets = [0, 2, 0], sizes = [18, 16, 4], strides = [1, 1, 1]} : vector<18x24x4xf32> to vector<18x16x4xf32>
    %58 = vector.extract_strided_slice %57 {offsets = [0, 0, 0], sizes = [16, 16, 4], strides = [1, 1, 1]} : vector<18x16x4xf32> to vector<16x16x4xf32>
    %59 = vector.shape_cast %58 : vector<16x16x4xf32> to vector<256x4xf32>
    %60 = arith.truncf %59 : vector<256x4xf32> to vector<256x4xbf16>
    %c2 = arith.constant 2 : index
    %c0_32 = arith.constant 0 : index
    %c0_33 = arith.constant 0 : index
    %61 = vector.load %arg3[%c2, %c0_32, %c0_33] : memref<9x4x128xf32, #tpu.memory_space<vmem>>, vector<1x4x128xf32>
    %62 = vector.shape_cast %61 : vector<1x4x128xf32> to vector<4x128xf32>
    %63 = arith.truncf %62 : vector<4x128xf32> to vector<4x128xbf16>
    %cst_34 = arith.constant dense<0.000000e+00> : vector<256x128xf32>
    %64 = tpu.matmul %60, %63, %cst_34 {dimension_numbers = #tpu.dot_dimension_numbers<[1], [0], [0], [1], [0, 0, 1, 1], [], []>} : vector<256x4xbf16>, vector<4x128xbf16>, vector<256x128xf32> -> vector<256x128xf32>
    %65 = arith.addf %56, %64 : vector<256x128xf32>
    %66 = vector.extract_strided_slice %57 {offsets = [1, 0, 0], sizes = [16, 16, 4], strides = [1, 1, 1]} : vector<18x16x4xf32> to vector<16x16x4xf32>
    %67 = vector.shape_cast %66 : vector<16x16x4xf32> to vector<256x4xf32>
    %68 = arith.truncf %67 : vector<256x4xf32> to vector<256x4xbf16>
    %c5 = arith.constant 5 : index
    %c0_35 = arith.constant 0 : index
    %c0_36 = arith.constant 0 : index
    %69 = vector.load %arg3[%c5, %c0_35, %c0_36] : memref<9x4x128xf32, #tpu.memory_space<vmem>>, vector<1x4x128xf32>
    %70 = vector.shape_cast %69 : vector<1x4x128xf32> to vector<4x128xf32>
    %71 = arith.truncf %70 : vector<4x128xf32> to vector<4x128xbf16>
    %cst_37 = arith.constant dense<0.000000e+00> : vector<256x128xf32>
    %72 = tpu.matmul %68, %71, %cst_37 {dimension_numbers = #tpu.dot_dimension_numbers<[1], [0], [0], [1], [0, 0, 1, 1], [], []>} : vector<256x4xbf16>, vector<4x128xbf16>, vector<256x128xf32> -> vector<256x128xf32>
    %73 = arith.addf %65, %72 : vector<256x128xf32>
    %74 = vector.extract_strided_slice %57 {offsets = [2, 0, 0], sizes = [16, 16, 4], strides = [1, 1, 1]} : vector<18x16x4xf32> to vector<16x16x4xf32>
    %75 = vector.shape_cast %74 : vector<16x16x4xf32> to vector<256x4xf32>
    %76 = arith.truncf %75 : vector<256x4xf32> to vector<256x4xbf16>
    %c8 = arith.constant 8 : index
    %c0_38 = arith.constant 0 : index
    %c0_39 = arith.constant 0 : index
    %77 = vector.load %arg3[%c8, %c0_38, %c0_39] : memref<9x4x128xf32, #tpu.memory_space<vmem>>, vector<1x4x128xf32>
    %78 = vector.shape_cast %77 : vector<1x4x128xf32> to vector<4x128xf32>
    %79 = arith.truncf %78 : vector<4x128xf32> to vector<4x128xbf16>
    %cst_40 = arith.constant dense<0.000000e+00> : vector<256x128xf32>
    %80 = tpu.matmul %76, %79, %cst_40 {dimension_numbers = #tpu.dot_dimension_numbers<[1], [0], [0], [1], [0, 0, 1, 1], [], []>} : vector<256x4xbf16>, vector<4x128xbf16>, vector<256x128xf32> -> vector<256x128xf32>
    %81 = arith.addf %73, %80 : vector<256x128xf32>
    %c0_41 = arith.constant 0 : index
    %c0_42 = arith.constant 0 : index
    %82 = vector.load %arg4[%c0_41, %c0_42] : memref<1x128xf32, #tpu.memory_space<vmem>>, vector<1x128xf32>
    %83 = vector.shape_cast %82 : vector<1x128xf32> to vector<128xf32>
    %84 = vector.shape_cast %83 : vector<128xf32> to vector<1x128xf32>
    %85 = vector.broadcast %84 : vector<1x128xf32> to vector<256x128xf32>
    %86 = arith.mulf %81, %85 : vector<256x128xf32>
    %c0_43 = arith.constant 0 : index
    %c0_44 = arith.constant 0 : index
    %87 = vector.load %arg5[%c0_43, %c0_44] : memref<1x128xf32, #tpu.memory_space<vmem>>, vector<1x128xf32>
    %88 = vector.shape_cast %87 : vector<1x128xf32> to vector<128xf32>
    %89 = vector.shape_cast %88 : vector<128xf32> to vector<1x128xf32>
    %90 = vector.broadcast %89 : vector<1x128xf32> to vector<256x128xf32>
    %91 = arith.addf %86, %90 : vector<256x128xf32>
    %cst_45 = arith.constant 0.000000e+00 : f32
    %92 = vector.broadcast %cst_45 : f32 to vector<256x128xf32>
    %93 = arith.maximumf %91, %92 : vector<256x128xf32>
    %cst_46 = arith.constant 0.000000e+00 : f32
    %94 = vector.broadcast %cst_46 : f32 to vector<18x24x128xf32>
    %c0_47 = arith.constant 0 : index
    %c0_48 = arith.constant 0 : index
    %c0_49 = arith.constant 0 : index
    %95 = vector.load %arg15[%c0_47, %c0_48, %c0_49] : memref<18x24x128xf32, #tpu.memory_space<vmem>>, vector<18x24x128xf32>
    tpu.vector_store %arg15[%c0_47, %c0_48, %c0_49], %94 {strides = array<i32>} : memref<18x24x128xf32, #tpu.memory_space<vmem>>, vector<18x24x128xf32>,
    %96 = vector.shape_cast %93 : vector<256x128xf32> to vector<16x16x128xf32>
    %c1_50 = arith.constant 1 : index
    %c1_51 = arith.constant 1 : index
    %c0_52 = arith.constant 0 : index
    %97 = vector.load %arg15[%c1_50, %c1_51, %c0_52] : memref<18x24x128xf32, #tpu.memory_space<vmem>>, vector<16x16x128xf32>
    tpu.vector_store %arg15[%c1_50, %c1_51, %c0_52], %96 {strides = array<i32>} : memref<18x24x128xf32, #tpu.memory_space<vmem>>, vector<16x16x128xf32>,
    %c0_53 = arith.constant 0 : index
    %c0_54 = arith.constant 0 : index
    %c0_55 = arith.constant 0 : index
    %98 = vector.load %arg15[%c0_53, %c0_54, %c0_55] : memref<18x24x128xf32, #tpu.memory_space<vmem>>, vector<18x24x128xf32>
    %cst_56 = arith.constant 0.000000e+00 : f32
    %99 = vector.broadcast %cst_56 : f32 to vector<16x16x128xf32>
    %100 = vector.extract_strided_slice %98 {offsets = [0, 0, 0], sizes = [18, 16, 128], strides = [1, 1, 1]} : vector<18x24x128xf32> to vector<18x16x128xf32>
    %101 = vector.extract_strided_slice %100 {offsets = [0, 0, 0], sizes = [16, 16, 128], strides = [1, 1, 1]} : vector<18x16x128xf32> to vector<16x16x128xf32>
    %c0_57 = arith.constant 0 : index
    %c0_58 = arith.constant 0 : index
    %102 = vector.load %arg6[%c0_57, %c0_58] : memref<9x128xf32, #tpu.memory_space<vmem>>, vector<1x128xf32>
    %103 = vector.shape_cast %102 : vector<1x128xf32> to vector<128xf32>
    %104 = vector.shape_cast %103 : vector<128xf32> to vector<1x1x128xf32>
    %105 = vector.broadcast %104 : vector<1x1x128xf32> to vector<16x16x128xf32>
    %106 = arith.mulf %101, %105 : vector<16x16x128xf32>
    %107 = arith.addf %99, %106 : vector<16x16x128xf32>
    %108 = vector.extract_strided_slice %100 {offsets = [1, 0, 0], sizes = [16, 16, 128], strides = [1, 1, 1]} : vector<18x16x128xf32> to vector<16x16x128xf32>
    %c3_59 = arith.constant 3 : index
    %c0_60 = arith.constant 0 : index
    %109 = vector.load %arg6[%c3_59, %c0_60] : memref<9x128xf32, #tpu.memory_space<vmem>>, vector<1x128xf32>
    %110 = vector.shape_cast %109 : vector<1x128xf32> to vector<128xf32>
    %111 = vector.shape_cast %110 : vector<128xf32> to vector<1x1x128xf32>
    %112 = vector.broadcast %111 : vector<1x1x128xf32> to vector<16x16x128xf32>
    %113 = arith.mulf %108, %112 : vector<16x16x128xf32>
    %114 = arith.addf %107, %113 : vector<16x16x128xf32>
    %115 = vector.extract_strided_slice %100 {offsets = [2, 0, 0], sizes = [16, 16, 128], strides = [1, 1, 1]} : vector<18x16x128xf32> to vector<16x16x128xf32>
    %c6_61 = arith.constant 6 : index
    %c0_62 = arith.constant 0 : index
    %116 = vector.load %arg6[%c6_61, %c0_62] : memref<9x128xf32, #tpu.memory_space<vmem>>, vector<1x128xf32>
    %117 = vector.shape_cast %116 : vector<1x128xf32> to vector<128xf32>
    %118 = vector.shape_cast %117 : vector<128xf32> to vector<1x1x128xf32>
    %119 = vector.broadcast %118 : vector<1x1x128xf32> to vector<16x16x128xf32>
    %120 = arith.mulf %115, %119 : vector<16x16x128xf32>
    %121 = arith.addf %114, %120 : vector<16x16x128xf32>
    %122 = vector.extract_strided_slice %98 {offsets = [0, 1, 0], sizes = [18, 16, 128], strides = [1, 1, 1]} : vector<18x24x128xf32> to vector<18x16x128xf32>
    %123 = vector.extract_strided_slice %122 {offsets = [0, 0, 0], sizes = [16, 16, 128], strides = [1, 1, 1]} : vector<18x16x128xf32> to vector<16x16x128xf32>
    %c1_63 = arith.constant 1 : index
    %c0_64 = arith.constant 0 : index
    %124 = vector.load %arg6[%c1_63, %c0_64] : memref<9x128xf32, #tpu.memory_space<vmem>>, vector<1x128xf32>
    %125 = vector.shape_cast %124 : vector<1x128xf32> to vector<128xf32>
    %126 = vector.shape_cast %125 : vector<128xf32> to vector<1x1x128xf32>
    %127 = vector.broadcast %126 : vector<1x1x128xf32> to vector<16x16x128xf32>
    %128 = arith.mulf %123, %127 : vector<16x16x128xf32>
    %129 = arith.addf %121, %128 : vector<16x16x128xf32>
    %130 = vector.extract_strided_slice %122 {offsets = [1, 0, 0], sizes = [16, 16, 128], strides = [1, 1, 1]} : vector<18x16x128xf32> to vector<16x16x128xf32>
    %c4_65 = arith.constant 4 : index
    %c0_66 = arith.constant 0 : index
    %131 = vector.load %arg6[%c4_65, %c0_66] : memref<9x128xf32, #tpu.memory_space<vmem>>, vector<1x128xf32>
    %132 = vector.shape_cast %131 : vector<1x128xf32> to vector<128xf32>
    %133 = vector.shape_cast %132 : vector<128xf32> to vector<1x1x128xf32>
    %134 = vector.broadcast %133 : vector<1x1x128xf32> to vector<16x16x128xf32>
    %135 = arith.mulf %130, %134 : vector<16x16x128xf32>
    %136 = arith.addf %129, %135 : vector<16x16x128xf32>
    %137 = vector.extract_strided_slice %122 {offsets = [2, 0, 0], sizes = [16, 16, 128], strides = [1, 1, 1]} : vector<18x16x128xf32> to vector<16x16x128xf32>
    %c7_67 = arith.constant 7 : index
    %c0_68 = arith.constant 0 : index
    %138 = vector.load %arg6[%c7_67, %c0_68] : memref<9x128xf32, #tpu.memory_space<vmem>>, vector<1x128xf32>
    %139 = vector.shape_cast %138 : vector<1x128xf32> to vector<128xf32>
    %140 = vector.shape_cast %139 : vector<128xf32> to vector<1x1x128xf32>
    %141 = vector.broadcast %140 : vector<1x1x128xf32> to vector<16x16x128xf32>
    %142 = arith.mulf %137, %141 : vector<16x16x128xf32>
    %143 = arith.addf %136, %142 : vector<16x16x128xf32>
    %144 = vector.extract_strided_slice %98 {offsets = [0, 2, 0], sizes = [18, 16, 128], strides = [1, 1, 1]} : vector<18x24x128xf32> to vector<18x16x128xf32>
    %145 = vector.extract_strided_slice %144 {offsets = [0, 0, 0], sizes = [16, 16, 128], strides = [1, 1, 1]} : vector<18x16x128xf32> to vector<16x16x128xf32>
    %c2_69 = arith.constant 2 : index
    %c0_70 = arith.constant 0 : index
    %146 = vector.load %arg6[%c2_69, %c0_70] : memref<9x128xf32, #tpu.memory_space<vmem>>, vector<1x128xf32>
    %147 = vector.shape_cast %146 : vector<1x128xf32> to vector<128xf32>
    %148 = vector.shape_cast %147 : vector<128xf32> to vector<1x1x128xf32>
    %149 = vector.broadcast %148 : vector<1x1x128xf32> to vector<16x16x128xf32>
    %150 = arith.mulf %145, %149 : vector<16x16x128xf32>
    %151 = arith.addf %143, %150 : vector<16x16x128xf32>
    %152 = vector.extract_strided_slice %144 {offsets = [1, 0, 0], sizes = [16, 16, 128], strides = [1, 1, 1]} : vector<18x16x128xf32> to vector<16x16x128xf32>
    %c5_71 = arith.constant 5 : index
    %c0_72 = arith.constant 0 : index
    %153 = vector.load %arg6[%c5_71, %c0_72] : memref<9x128xf32, #tpu.memory_space<vmem>>, vector<1x128xf32>
    %154 = vector.shape_cast %153 : vector<1x128xf32> to vector<128xf32>
    %155 = vector.shape_cast %154 : vector<128xf32> to vector<1x1x128xf32>
    %156 = vector.broadcast %155 : vector<1x1x128xf32> to vector<16x16x128xf32>
    %157 = arith.mulf %152, %156 : vector<16x16x128xf32>
    %158 = arith.addf %151, %157 : vector<16x16x128xf32>
    %159 = vector.extract_strided_slice %144 {offsets = [2, 0, 0], sizes = [16, 16, 128], strides = [1, 1, 1]} : vector<18x16x128xf32> to vector<16x16x128xf32>
    %c8_73 = arith.constant 8 : index
    %c0_74 = arith.constant 0 : index
    %160 = vector.load %arg6[%c8_73, %c0_74] : memref<9x128xf32, #tpu.memory_space<vmem>>, vector<1x128xf32>
    %161 = vector.shape_cast %160 : vector<1x128xf32> to vector<128xf32>
    %162 = vector.shape_cast %161 : vector<128xf32> to vector<1x1x128xf32>
    %163 = vector.broadcast %162 : vector<1x1x128xf32> to vector<16x16x128xf32>
    %164 = arith.mulf %159, %163 : vector<16x16x128xf32>
    %165 = arith.addf %158, %164 : vector<16x16x128xf32>
    %166 = vector.shape_cast %165 : vector<16x16x128xf32> to vector<256x128xf32>
    %167 = arith.truncf %166 : vector<256x128xf32> to vector<256x128xbf16>
    %c0_75 = arith.constant 0 : index
    %c0_76 = arith.constant 0 : index
    %168 = vector.load %arg7[%c0_75, %c0_76] : memref<128x128xf32, #tpu.memory_space<vmem>>, vector<128x128xf32>
    %169 = arith.truncf %168 : vector<128x128xf32> to vector<128x128xbf16>
    %cst_77 = arith.constant dense<0.000000e+00> : vector<256x128xf32>
    %170 = tpu.matmul %167, %169, %cst_77 {dimension_numbers = #tpu.dot_dimension_numbers<[1], [0], [0], [1], [0, 0, 1, 1], [], []>} : vector<256x128xbf16>, vector<128x128xbf16>, vector<256x128xf32> -> vector<256x128xf32>
    %c0_78 = arith.constant 0 : index
    %c0_79 = arith.constant 0 : index
    %171 = vector.load %arg8[%c0_78, %c0_79] : memref<1x128xf32, #tpu.memory_space<vmem>>, vector<1x128xf32>
    %172 = vector.shape_cast %171 : vector<1x128xf32> to vector<128xf32>
    %173 = vector.shape_cast %172 : vector<128xf32> to vector<1x128xf32>
    %174 = vector.broadcast %173 : vector<1x128xf32> to vector<256x128xf32>
    %175 = arith.mulf %170, %174 : vector<256x128xf32>
    %c0_80 = arith.constant 0 : index
    %c0_81 = arith.constant 0 : index
    %176 = vector.load %arg9[%c0_80, %c0_81] : memref<1x128xf32, #tpu.memory_space<vmem>>, vector<1x128xf32>
    %177 = vector.shape_cast %176 : vector<1x128xf32> to vector<128xf32>
    %178 = vector.shape_cast %177 : vector<128xf32> to vector<1x128xf32>
    %179 = vector.broadcast %178 : vector<1x128xf32> to vector<256x128xf32>
    %180 = arith.addf %175, %179 : vector<256x128xf32>
    %cst_82 = arith.constant -3.000000e+38 : f32
    %181 = vector.broadcast %cst_82 : f32 to vector<18x24x128xf32>
    %c0_83 = arith.constant 0 : index
    %c0_84 = arith.constant 0 : index
    %c0_85 = arith.constant 0 : index
    %182 = vector.load %arg16[%c0_83, %c0_84, %c0_85] : memref<18x24x128xf32, #tpu.memory_space<vmem>>, vector<18x24x128xf32>
    tpu.vector_store %arg16[%c0_83, %c0_84, %c0_85], %181 {strides = array<i32>} : memref<18x24x128xf32, #tpu.memory_space<vmem>>, vector<18x24x128xf32>,
    %183 = vector.shape_cast %180 : vector<256x128xf32> to vector<16x16x128xf32>
    %c1_86 = arith.constant 1 : index
    %c1_87 = arith.constant 1 : index
    %c0_88 = arith.constant 0 : index
    %184 = vector.load %arg16[%c1_86, %c1_87, %c0_88] : memref<18x24x128xf32, #tpu.memory_space<vmem>>, vector<16x16x128xf32>
    tpu.vector_store %arg16[%c1_86, %c1_87, %c0_88], %183 {strides = array<i32>} : memref<18x24x128xf32, #tpu.memory_space<vmem>>, vector<16x16x128xf32>,
    %c0_89 = arith.constant 0 : index
    %c0_90 = arith.constant 0 : index
    %c0_91 = arith.constant 0 : index
    %185 = vector.load %arg16[%c0_89, %c0_90, %c0_91] : memref<18x24x128xf32, #tpu.memory_space<vmem>>, vector<18x24x128xf32>
    %186 = vector.extract_strided_slice %185 {offsets = [0, 0, 0], sizes = [18, 16, 128], strides = [1, 1, 1]} : vector<18x24x128xf32> to vector<18x16x128xf32>
    %187 = vector.extract_strided_slice %186 {offsets = [0, 0, 0], sizes = [16, 16, 128], strides = [1, 1, 1]} : vector<18x16x128xf32> to vector<16x16x128xf32>
    %188 = vector.extract_strided_slice %186 {offsets = [1, 0, 0], sizes = [16, 16, 128], strides = [1, 1, 1]} : vector<18x16x128xf32> to vector<16x16x128xf32>
    %189 = arith.maximumf %187, %188 : vector<16x16x128xf32>
    %190 = vector.extract_strided_slice %186 {offsets = [2, 0, 0], sizes = [16, 16, 128], strides = [1, 1, 1]} : vector<18x16x128xf32> to vector<16x16x128xf32>
    %191 = arith.maximumf %189, %190 : vector<16x16x128xf32>
    %192 = vector.extract_strided_slice %185 {offsets = [0, 1, 0], sizes = [18, 16, 128], strides = [1, 1, 1]} : vector<18x24x128xf32> to vector<18x16x128xf32>
    %193 = vector.extract_strided_slice %192 {offsets = [0, 0, 0], sizes = [16, 16, 128], strides = [1, 1, 1]} : vector<18x16x128xf32> to vector<16x16x128xf32>
    %194 = arith.maximumf %191, %193 : vector<16x16x128xf32>
    %195 = vector.extract_strided_slice %192 {offsets = [1, 0, 0], sizes = [16, 16, 128], strides = [1, 1, 1]} : vector<18x16x128xf32> to vector<16x16x128xf32>
    %196 = arith.maximumf %194, %195 : vector<16x16x128xf32>
    %197 = vector.extract_strided_slice %192 {offsets = [2, 0, 0], sizes = [16, 16, 128], strides = [1, 1, 1]} : vector<18x16x128xf32> to vector<16x16x128xf32>
    %198 = arith.maximumf %196, %197 : vector<16x16x128xf32>
    %199 = vector.extract_strided_slice %185 {offsets = [0, 2, 0], sizes = [18, 16, 128], strides = [1, 1, 1]} : vector<18x24x128xf32> to vector<18x16x128xf32>
    %200 = vector.extract_strided_slice %199 {offsets = [0, 0, 0], sizes = [16, 16, 128], strides = [1, 1, 1]} : vector<18x16x128xf32> to vector<16x16x128xf32>
    %201 = arith.maximumf %198, %200 : vector<16x16x128xf32>
    %202 = vector.extract_strided_slice %199 {offsets = [1, 0, 0], sizes = [16, 16, 128], strides = [1, 1, 1]} : vector<18x16x128xf32> to vector<16x16x128xf32>
    %203 = arith.maximumf %201, %202 : vector<16x16x128xf32>
    %204 = vector.extract_strided_slice %199 {offsets = [2, 0, 0], sizes = [16, 16, 128], strides = [1, 1, 1]} : vector<18x16x128xf32> to vector<16x16x128xf32>
    %205 = arith.maximumf %203, %204 : vector<16x16x128xf32>
    %c0_92 = arith.constant 0 : index
    %c0_93 = arith.constant 0 : index
    %c0_94 = arith.constant 0 : index
    %206 = vector.load %arg17[%c0_92, %c0_93, %c0_94] : memref<16x16x128xf32, #tpu.memory_space<vmem>>, vector<16x16x128xf32>
    tpu.vector_store %arg17[%c0_92, %c0_93, %c0_94], %205 {strides = array<i32>} : memref<16x16x128xf32, #tpu.memory_space<vmem>>, vector<16x16x128xf32>,
    %c0_95 = arith.constant 0 : index
    %c0_96 = arith.constant 0 : index
    %c0_97 = arith.constant 0 : index
    %c0_98 = arith.constant 0 : index
    %207 = vector.load %arg2[%c0_95, %c0_96, %c0_97, %c0_98] : memref<1x8x8x4xf32, #tpu.memory_space<vmem>>, vector<1x8x8x4xf32>
    %208 = vector.shape_cast %207 : vector<1x8x8x4xf32> to vector<8x8x4xf32>
    %209 = vector.shape_cast %208 : vector<8x8x4xf32> to vector<64x4xf32>
    %210 = arith.truncf %209 : vector<64x4xf32> to vector<64x4xbf16>
    %c0_99 = arith.constant 0 : index
    %c0_100 = arith.constant 0 : index
    %211 = vector.load %arg10[%c0_99, %c0_100] : memref<4x128xf32, #tpu.memory_space<vmem>>, vector<4x128xf32>
    %212 = arith.truncf %211 : vector<4x128xf32> to vector<4x128xbf16>
    %cst_101 = arith.constant dense<0.000000e+00> : vector<64x128xf32>
    %213 = tpu.matmul %210, %212, %cst_101 {dimension_numbers = #tpu.dot_dimension_numbers<[1], [0], [0], [1], [0, 0, 1, 1], [], []>} : vector<64x4xbf16>, vector<4x128xbf16>, vector<64x128xf32> -> vector<64x128xf32>
    %c0_102 = arith.constant 0 : index
    %c0_103 = arith.constant 0 : index
    %214 = vector.load %arg11[%c0_102, %c0_103] : memref<1x128xf32, #tpu.memory_space<vmem>>, vector<1x128xf32>
    %215 = vector.shape_cast %214 : vector<1x128xf32> to vector<128xf32>
    %216 = vector.shape_cast %215 : vector<128xf32> to vector<1x128xf32>
    %217 = vector.broadcast %216 : vector<1x128xf32> to vector<64x128xf32>
    %218 = arith.mulf %213, %217 : vector<64x128xf32>
    %c0_104 = arith.constant 0 : index
    %c0_105 = arith.constant 0 : index
    %219 = vector.load %arg12[%c0_104, %c0_105] : memref<1x128xf32, #tpu.memory_space<vmem>>, vector<1x128xf32>
    %220 = vector.shape_cast %219 : vector<1x128xf32> to vector<128xf32>
    %221 = vector.shape_cast %220 : vector<128xf32> to vector<1x128xf32>
    %222 = vector.broadcast %221 : vector<1x128xf32> to vector<64x128xf32>
    %223 = arith.addf %218, %222 : vector<64x128xf32>
    %224 = vector.shape_cast %223 : vector<64x128xf32> to vector<8x8x128xf32>
    %c0_106 = arith.constant 0 : index
    %c0_107 = arith.constant 0 : index
    %c0_108 = arith.constant 0 : index
    %c0_109 = arith.constant 0 : index
    %225 = vector.load %arg13[%c0_106, %c0_107, %c0_108, %c0_109] : memref<1x8x8x128xf32, #tpu.memory_space<vmem>>, vector<1x8x8x128xf32>
    %226 = vector.shape_cast %225 : vector<1x8x8x128xf32> to vector<8x8x128xf32>
    %227 = vector.shape_cast %224 : vector<8x8x128xf32> to vector<1x8x8x128xf32>
    tpu.vector_store %arg13[%c0_106, %c0_107, %c0_108, %c0_109], %227 {strides = array<i32>} : memref<1x8x8x128xf32, #tpu.memory_space<vmem>>, vector<1x8x8x128xf32>,
    %c0_110 = arith.constant 0 : index
    %c0_111 = arith.constant 0 : index
    %c0_112 = arith.constant 0 : index
    %c0_113 = arith.constant 0 : index
    %228 = vector.load %arg13[%c0_110, %c0_111, %c0_112, %c0_113] : memref<1x8x8x128xf32, #tpu.memory_space<vmem>>, vector<1x1x1x128xf32>
    %229 = vector.shape_cast %228 : vector<1x1x1x128xf32> to vector<128xf32>
    %c0_114 = arith.constant 0 : index
    %c0_115 = arith.constant 0 : index
    %c0_116 = arith.constant 0 : index
    %230 = vector.load %arg17[%c0_114, %c0_115, %c0_116] : memref<16x16x128xf32, #tpu.memory_space<vmem>>, vector<1x1x128xf32>
    %231 = vector.shape_cast %230 : vector<1x1x128xf32> to vector<128xf32>
    %232 = arith.addf %229, %231 : vector<128xf32>
    %c0_117 = arith.constant 0 : index
    %c0_118 = arith.constant 0 : index
    %c0_119 = arith.constant 0 : index
    %c0_120 = arith.constant 0 : index
    %233 = vector.load %arg13[%c0_117, %c0_118, %c0_119, %c0_120] : memref<1x8x8x128xf32, #tpu.memory_space<vmem>>, vector<1x1x1x128xf32>
    %234 = vector.shape_cast %233 : vector<1x1x1x128xf32> to vector<128xf32>
    %235 = vector.shape_cast %232 : vector<128xf32> to vector<1x1x1x128xf32>
    tpu.vector_store %arg13[%c0_117, %c0_118, %c0_119, %c0_120], %235 {strides = array<i32>} : memref<1x8x8x128xf32, #tpu.memory_space<vmem>>, vector<1x1x1x128xf32>,
    %c0_121 = arith.constant 0 : index
    %c0_122 = arith.constant 0 : index
    %c1_123 = arith.constant 1 : index
    %c0_124 = arith.constant 0 : index
    %236 = vector.load %arg13[%c0_121, %c0_122, %c1_123, %c0_124] : memref<1x8x8x128xf32, #tpu.memory_space<vmem>>, vector<1x1x1x128xf32>
    %237 = vector.shape_cast %236 : vector<1x1x1x128xf32> to vector<128xf32>
    %c0_125 = arith.constant 0 : index
    %c2_126 = arith.constant 2 : index
    %c0_127 = arith.constant 0 : index
    %238 = vector.load %arg17[%c0_125, %c2_126, %c0_127] : memref<16x16x128xf32, #tpu.memory_space<vmem>>, vector<1x1x128xf32>
    %239 = vector.shape_cast %238 : vector<1x1x128xf32> to vector<128xf32>
    %240 = arith.addf %237, %239 : vector<128xf32>
    %c0_128 = arith.constant 0 : index
    %c0_129 = arith.constant 0 : index
    %c1_130 = arith.constant 1 : index
    %c0_131 = arith.constant 0 : index
    %241 = vector.load %arg13[%c0_128, %c0_129, %c1_130, %c0_131] : memref<1x8x8x128xf32, #tpu.memory_space<vmem>>, vector<1x1x1x128xf32>
    %242 = vector.shape_cast %241 : vector<1x1x1x128xf32> to vector<128xf32>
    %243 = vector.shape_cast %240 : vector<128xf32> to vector<1x1x1x128xf32>
    tpu.vector_store %arg13[%c0_128, %c0_129, %c1_130, %c0_131], %243 {strides = array<i32>} : memref<1x8x8x128xf32, #tpu.memory_space<vmem>>, vector<1x1x1x128xf32>,
    %c0_132 = arith.constant 0 : index
    %c0_133 = arith.constant 0 : index
    %c2_134 = arith.constant 2 : index
    %c0_135 = arith.constant 0 : index
    %244 = vector.load %arg13[%c0_132, %c0_133, %c2_134, %c0_135] : memref<1x8x8x128xf32, #tpu.memory_space<vmem>>, vector<1x1x1x128xf32>
    %245 = vector.shape_cast %244 : vector<1x1x1x128xf32> to vector<128xf32>
    %c0_136 = arith.constant 0 : index
    %c4_137 = arith.constant 4 : index
    %c0_138 = arith.constant 0 : index
    %246 = vector.load %arg17[%c0_136, %c4_137, %c0_138] : memref<16x16x128xf32, #tpu.memory_space<vmem>>, vector<1x1x128xf32>
    %247 = vector.shape_cast %246 : vector<1x1x128xf32> to vector<128xf32>
    %248 = arith.addf %245, %247 : vector<128xf32>
    %c0_139 = arith.constant 0 : index
    %c0_140 = arith.constant 0 : index
    %c2_141 = arith.constant 2 : index
    %c0_142 = arith.constant 0 : index
    %249 = vector.load %arg13[%c0_139, %c0_140, %c2_141, %c0_142] : memref<1x8x8x128xf32, #tpu.memory_space<vmem>>, vector<1x1x1x128xf32>
    %250 = vector.shape_cast %249 : vector<1x1x1x128xf32> to vector<128xf32>
    %251 = vector.shape_cast %248 : vector<128xf32> to vector<1x1x1x128xf32>
    tpu.vector_store %arg13[%c0_139, %c0_140, %c2_141, %c0_142], %251 {strides = array<i32>} : memref<1x8x8x128xf32, #tpu.memory_space<vmem>>, vector<1x1x1x128xf32>,
    %c0_143 = arith.constant 0 : index
    %c0_144 = arith.constant 0 : index
    %c3_145 = arith.constant 3 : index
    %c0_146 = arith.constant 0 : index
    %252 = vector.load %arg13[%c0_143, %c0_144, %c3_145, %c0_146] : memref<1x8x8x128xf32, #tpu.memory_space<vmem>>, vector<1x1x1x128xf32>
    %253 = vector.shape_cast %252 : vector<1x1x1x128xf32> to vector<128xf32>
    %c0_147 = arith.constant 0 : index
    %c6_148 = arith.constant 6 : index
    %c0_149 = arith.constant 0 : index
    %254 = vector.load %arg17[%c0_147, %c6_148, %c0_149] : memref<16x16x128xf32, #tpu.memory_space<vmem>>, vector<1x1x128xf32>
    %255 = vector.shape_cast %254 : vector<1x1x128xf32> to vector<128xf32>
    %256 = arith.addf %253, %255 : vector<128xf32>
    %c0_150 = arith.constant 0 : index
    %c0_151 = arith.constant 0 : index
    %c3_152 = arith.constant 3 : index
    %c0_153 = arith.constant 0 : index
    %257 = vector.load %arg13[%c0_150, %c0_151, %c3_152, %c0_153] : memref<1x8x8x128xf32, #tpu.memory_space<vmem>>, vector<1x1x1x128xf32>
    %258 = vector.shape_cast %257 : vector<1x1x1x128xf32> to vector<128xf32>
    %259 = vector.shape_cast %256 : vector<128xf32> to vector<1x1x1x128xf32>
    tpu.vector_store %arg13[%c0_150, %c0_151, %c3_152, %c0_153], %259 {strides = array<i32>} : memref<1x8x8x128xf32, #tpu.memory_space<vmem>>, vector<1x1x1x128xf32>,
    %c0_154 = arith.constant 0 : index
    %c0_155 = arith.constant 0 : index
    %c4_156 = arith.constant 4 : index
    %c0_157 = arith.constant 0 : index
    %260 = vector.load %arg13[%c0_154, %c0_155, %c4_156, %c0_157] : memref<1x8x8x128xf32, #tpu.memory_space<vmem>>, vector<1x1x1x128xf32>
    %261 = vector.shape_cast %260 : vector<1x1x1x128xf32> to vector<128xf32>
    %c0_158 = arith.constant 0 : index
    %c8_159 = arith.constant 8 : index
    %c0_160 = arith.constant 0 : index
    %262 = vector.load %arg17[%c0_158, %c8_159, %c0_160] : memref<16x16x128xf32, #tpu.memory_space<vmem>>, vector<1x1x128xf32>
    %263 = vector.shape_cast %262 : vector<1x1x128xf32> to vector<128xf32>
    %264 = arith.addf %261, %263 : vector<128xf32>
    %c0_161 = arith.constant 0 : index
    %c0_162 = arith.constant 0 : index
    %c4_163 = arith.constant 4 : index
    %c0_164 = arith.constant 0 : index
    %265 = vector.load %arg13[%c0_161, %c0_162, %c4_163, %c0_164] : memref<1x8x8x128xf32, #tpu.memory_space<vmem>>, vector<1x1x1x128xf32>
    %266 = vector.shape_cast %265 : vector<1x1x1x128xf32> to vector<128xf32>
    %267 = vector.shape_cast %264 : vector<128xf32> to vector<1x1x1x128xf32>
    tpu.vector_store %arg13[%c0_161, %c0_162, %c4_163, %c0_164], %267 {strides = array<i32>} : memref<1x8x8x128xf32, #tpu.memory_space<vmem>>, vector<1x1x1x128xf32>,
    %c0_165 = arith.constant 0 : index
    %c0_166 = arith.constant 0 : index
    %c5_167 = arith.constant 5 : index
    %c0_168 = arith.constant 0 : index
    %268 = vector.load %arg13[%c0_165, %c0_166, %c5_167, %c0_168] : memref<1x8x8x128xf32, #tpu.memory_space<vmem>>, vector<1x1x1x128xf32>
    %269 = vector.shape_cast %268 : vector<1x1x1x128xf32> to vector<128xf32>
    %c0_169 = arith.constant 0 : index
    %c10 = arith.constant 10 : index
    %c0_170 = arith.constant 0 : index
    %270 = vector.load %arg17[%c0_169, %c10, %c0_170] : memref<16x16x128xf32, #tpu.memory_space<vmem>>, vector<1x1x128xf32>
    %271 = vector.shape_cast %270 : vector<1x1x128xf32> to vector<128xf32>
    %272 = arith.addf %269, %271 : vector<128xf32>
    %c0_171 = arith.constant 0 : index
    %c0_172 = arith.constant 0 : index
    %c5_173 = arith.constant 5 : index
    %c0_174 = arith.constant 0 : index
    %273 = vector.load %arg13[%c0_171, %c0_172, %c5_173, %c0_174] : memref<1x8x8x128xf32, #tpu.memory_space<vmem>>, vector<1x1x1x128xf32>
    %274 = vector.shape_cast %273 : vector<1x1x1x128xf32> to vector<128xf32>
    %275 = vector.shape_cast %272 : vector<128xf32> to vector<1x1x1x128xf32>
    tpu.vector_store %arg13[%c0_171, %c0_172, %c5_173, %c0_174], %275 {strides = array<i32>} : memref<1x8x8x128xf32, #tpu.memory_space<vmem>>, vector<1x1x1x128xf32>,
    %c0_175 = arith.constant 0 : index
    %c0_176 = arith.constant 0 : index
    %c6_177 = arith.constant 6 : index
    %c0_178 = arith.constant 0 : index
    %276 = vector.load %arg13[%c0_175, %c0_176, %c6_177, %c0_178] : memref<1x8x8x128xf32, #tpu.memory_space<vmem>>, vector<1x1x1x128xf32>
    %277 = vector.shape_cast %276 : vector<1x1x1x128xf32> to vector<128xf32>
    %c0_179 = arith.constant 0 : index
    %c12 = arith.constant 12 : index
    %c0_180 = arith.constant 0 : index
    %278 = vector.load %arg17[%c0_179, %c12, %c0_180] : memref<16x16x128xf32, #tpu.memory_space<vmem>>, vector<1x1x128xf32>
    %279 = vector.shape_cast %278 : vector<1x1x128xf32> to vector<128xf32>
    %280 = arith.addf %277, %279 : vector<128xf32>
    %c0_181 = arith.constant 0 : index
    %c0_182 = arith.constant 0 : index
    %c6_183 = arith.constant 6 : index
    %c0_184 = arith.constant 0 : index
    %281 = vector.load %arg13[%c0_181, %c0_182, %c6_183, %c0_184] : memref<1x8x8x128xf32, #tpu.memory_space<vmem>>, vector<1x1x1x128xf32>
    %282 = vector.shape_cast %281 : vector<1x1x1x128xf32> to vector<128xf32>
    %283 = vector.shape_cast %280 : vector<128xf32> to vector<1x1x1x128xf32>
    tpu.vector_store %arg13[%c0_181, %c0_182, %c6_183, %c0_184], %283 {strides = array<i32>} : memref<1x8x8x128xf32, #tpu.memory_space<vmem>>, vector<1x1x1x128xf32>,
    %c0_185 = arith.constant 0 : index
    %c0_186 = arith.constant 0 : index
    %c7_187 = arith.constant 7 : index
    %c0_188 = arith.constant 0 : index
    %284 = vector.load %arg13[%c0_185, %c0_186, %c7_187, %c0_188] : memref<1x8x8x128xf32, #tpu.memory_space<vmem>>, vector<1x1x1x128xf32>
    %285 = vector.shape_cast %284 : vector<1x1x1x128xf32> to vector<128xf32>
    %c0_189 = arith.constant 0 : index
    %c14 = arith.constant 14 : index
    %c0_190 = arith.constant 0 : index
    %286 = vector.load %arg17[%c0_189, %c14, %c0_190] : memref<16x16x128xf32, #tpu.memory_space<vmem>>, vector<1x1x128xf32>
    %287 = vector.shape_cast %286 : vector<1x1x128xf32> to vector<128xf32>
    %288 = arith.addf %285, %287 : vector<128xf32>
    %c0_191 = arith.constant 0 : index
    %c0_192 = arith.constant 0 : index
    %c7_193 = arith.constant 7 : index
    %c0_194 = arith.constant 0 : index
    %289 = vector.load %arg13[%c0_191, %c0_192, %c7_193, %c0_194] : memref<1x8x8x128xf32, #tpu.memory_space<vmem>>, vector<1x1x1x128xf32>
    %290 = vector.shape_cast %289 : vector<1x1x1x128xf32> to vector<128xf32>
    %291 = vector.shape_cast %288 : vector<128xf32> to vector<1x1x1x128xf32>
    tpu.vector_store %arg13[%c0_191, %c0_192, %c7_193, %c0_194], %291 {strides = array<i32>} : memref<1x8x8x128xf32, #tpu.memory_space<vmem>>, vector<1x1x1x128xf32>,
    %c0_195 = arith.constant 0 : index
    %c1_196 = arith.constant 1 : index
    %c0_197 = arith.constant 0 : index
    %c0_198 = arith.constant 0 : index
    %292 = vector.load %arg13[%c0_195, %c1_196, %c0_197, %c0_198] : memref<1x8x8x128xf32, #tpu.memory_space<vmem>>, vector<1x1x1x128xf32>
    %293 = vector.shape_cast %292 : vector<1x1x1x128xf32> to vector<128xf32>
    %c2_199 = arith.constant 2 : index
    %c0_200 = arith.constant 0 : index
    %c0_201 = arith.constant 0 : index
    %294 = vector.load %arg17[%c2_199, %c0_200, %c0_201] : memref<16x16x128xf32, #tpu.memory_space<vmem>>, vector<1x1x128xf32>
    %295 = vector.shape_cast %294 : vector<1x1x128xf32> to vector<128xf32>
    %296 = arith.addf %293, %295 : vector<128xf32>
    %c0_202 = arith.constant 0 : index
    %c1_203 = arith.constant 1 : index
    %c0_204 = arith.constant 0 : index
    %c0_205 = arith.constant 0 : index
    %297 = vector.load %arg13[%c0_202, %c1_203, %c0_204, %c0_205] : memref<1x8x8x128xf32, #tpu.memory_space<vmem>>, vector<1x1x1x128xf32>
    %298 = vector.shape_cast %297 : vector<1x1x1x128xf32> to vector<128xf32>
    %299 = vector.shape_cast %296 : vector<128xf32> to vector<1x1x1x128xf32>
    tpu.vector_store %arg13[%c0_202, %c1_203, %c0_204, %c0_205], %299 {strides = array<i32>} : memref<1x8x8x128xf32, #tpu.memory_space<vmem>>, vector<1x1x1x128xf32>,
    %c0_206 = arith.constant 0 : index
    %c1_207 = arith.constant 1 : index
    %c1_208 = arith.constant 1 : index
    %c0_209 = arith.constant 0 : index
    %300 = vector.load %arg13[%c0_206, %c1_207, %c1_208, %c0_209] : memref<1x8x8x128xf32, #tpu.memory_space<vmem>>, vector<1x1x1x128xf32>
    %301 = vector.shape_cast %300 : vector<1x1x1x128xf32> to vector<128xf32>
    %c2_210 = arith.constant 2 : index
    %c2_211 = arith.constant 2 : index
    %c0_212 = arith.constant 0 : index
    %302 = vector.load %arg17[%c2_210, %c2_211, %c0_212] : memref<16x16x128xf32, #tpu.memory_space<vmem>>, vector<1x1x128xf32>
    %303 = vector.shape_cast %302 : vector<1x1x128xf32> to vector<128xf32>
    %304 = arith.addf %301, %303 : vector<128xf32>
    %c0_213 = arith.constant 0 : index
    %c1_214 = arith.constant 1 : index
    %c1_215 = arith.constant 1 : index
    %c0_216 = arith.constant 0 : index
    %305 = vector.load %arg13[%c0_213, %c1_214, %c1_215, %c0_216] : memref<1x8x8x128xf32, #tpu.memory_space<vmem>>, vector<1x1x1x128xf32>
    %306 = vector.shape_cast %305 : vector<1x1x1x128xf32> to vector<128xf32>
    %307 = vector.shape_cast %304 : vector<128xf32> to vector<1x1x1x128xf32>
    tpu.vector_store %arg13[%c0_213, %c1_214, %c1_215, %c0_216], %307 {strides = array<i32>} : memref<1x8x8x128xf32, #tpu.memory_space<vmem>>, vector<1x1x1x128xf32>,
    %c0_217 = arith.constant 0 : index
    %c1_218 = arith.constant 1 : index
    %c2_219 = arith.constant 2 : index
    %c0_220 = arith.constant 0 : index
    %308 = vector.load %arg13[%c0_217, %c1_218, %c2_219, %c0_220] : memref<1x8x8x128xf32, #tpu.memory_space<vmem>>, vector<1x1x1x128xf32>
    %309 = vector.shape_cast %308 : vector<1x1x1x128xf32> to vector<128xf32>
    %c2_221 = arith.constant 2 : index
    %c4_222 = arith.constant 4 : index
    %c0_223 = arith.constant 0 : index
    %310 = vector.load %arg17[%c2_221, %c4_222, %c0_223] : memref<16x16x128xf32, #tpu.memory_space<vmem>>, vector<1x1x128xf32>
    %311 = vector.shape_cast %310 : vector<1x1x128xf32> to vector<128xf32>
    %312 = arith.addf %309, %311 : vector<128xf32>
    %c0_224 = arith.constant 0 : index
    %c1_225 = arith.constant 1 : index
    %c2_226 = arith.constant 2 : index
    %c0_227 = arith.constant 0 : index
    %313 = vector.load %arg13[%c0_224, %c1_225, %c2_226, %c0_227] : memref<1x8x8x128xf32, #tpu.memory_space<vmem>>, vector<1x1x1x128xf32>
    %314 = vector.shape_cast %313 : vector<1x1x1x128xf32> to vector<128xf32>
    %315 = vector.shape_cast %312 : vector<128xf32> to vector<1x1x1x128xf32>
    tpu.vector_store %arg13[%c0_224, %c1_225, %c2_226, %c0_227], %315 {strides = array<i32>} : memref<1x8x8x128xf32, #tpu.memory_space<vmem>>, vector<1x1x1x128xf32>,
    %c0_228 = arith.constant 0 : index
    %c1_229 = arith.constant 1 : index
    %c3_230 = arith.constant 3 : index
    %c0_231 = arith.constant 0 : index
    %316 = vector.load %arg13[%c0_228, %c1_229, %c3_230, %c0_231] : memref<1x8x8x128xf32, #tpu.memory_space<vmem>>, vector<1x1x1x128xf32>
    %317 = vector.shape_cast %316 : vector<1x1x1x128xf32> to vector<128xf32>
    %c2_232 = arith.constant 2 : index
    %c6_233 = arith.constant 6 : index
    %c0_234 = arith.constant 0 : index
    %318 = vector.load %arg17[%c2_232, %c6_233, %c0_234] : memref<16x16x128xf32, #tpu.memory_space<vmem>>, vector<1x1x128xf32>
    %319 = vector.shape_cast %318 : vector<1x1x128xf32> to vector<128xf32>
    %320 = arith.addf %317, %319 : vector<128xf32>
    %c0_235 = arith.constant 0 : index
    %c1_236 = arith.constant 1 : index
    %c3_237 = arith.constant 3 : index
    %c0_238 = arith.constant 0 : index
    %321 = vector.load %arg13[%c0_235, %c1_236, %c3_237, %c0_238] : memref<1x8x8x128xf32, #tpu.memory_space<vmem>>, vector<1x1x1x128xf32>
    %322 = vector.shape_cast %321 : vector<1x1x1x128xf32> to vector<128xf32>
    %323 = vector.shape_cast %320 : vector<128xf32> to vector<1x1x1x128xf32>
    tpu.vector_store %arg13[%c0_235, %c1_236, %c3_237, %c0_238], %323 {strides = array<i32>} : memref<1x8x8x128xf32, #tpu.memory_space<vmem>>, vector<1x1x1x128xf32>,
    %c0_239 = arith.constant 0 : index
    %c1_240 = arith.constant 1 : index
    %c4_241 = arith.constant 4 : index
    %c0_242 = arith.constant 0 : index
    %324 = vector.load %arg13[%c0_239, %c1_240, %c4_241, %c0_242] : memref<1x8x8x128xf32, #tpu.memory_space<vmem>>, vector<1x1x1x128xf32>
    %325 = vector.shape_cast %324 : vector<1x1x1x128xf32> to vector<128xf32>
    %c2_243 = arith.constant 2 : index
    %c8_244 = arith.constant 8 : index
    %c0_245 = arith.constant 0 : index
    %326 = vector.load %arg17[%c2_243, %c8_244, %c0_245] : memref<16x16x128xf32, #tpu.memory_space<vmem>>, vector<1x1x128xf32>
    %327 = vector.shape_cast %326 : vector<1x1x128xf32> to vector<128xf32>
    %328 = arith.addf %325, %327 : vector<128xf32>
    %c0_246 = arith.constant 0 : index
    %c1_247 = arith.constant 1 : index
    %c4_248 = arith.constant 4 : index
    %c0_249 = arith.constant 0 : index
    %329 = vector.load %arg13[%c0_246, %c1_247, %c4_248, %c0_249] : memref<1x8x8x128xf32, #tpu.memory_space<vmem>>, vector<1x1x1x128xf32>
    %330 = vector.shape_cast %329 : vector<1x1x1x128xf32> to vector<128xf32>
    %331 = vector.shape_cast %328 : vector<128xf32> to vector<1x1x1x128xf32>
    tpu.vector_store %arg13[%c0_246, %c1_247, %c4_248, %c0_249], %331 {strides = array<i32>} : memref<1x8x8x128xf32, #tpu.memory_space<vmem>>, vector<1x1x1x128xf32>,
    %c0_250 = arith.constant 0 : index
    %c1_251 = arith.constant 1 : index
    %c5_252 = arith.constant 5 : index
    %c0_253 = arith.constant 0 : index
    %332 = vector.load %arg13[%c0_250, %c1_251, %c5_252, %c0_253] : memref<1x8x8x128xf32, #tpu.memory_space<vmem>>, vector<1x1x1x128xf32>
    %333 = vector.shape_cast %332 : vector<1x1x1x128xf32> to vector<128xf32>
    %c2_254 = arith.constant 2 : index
    %c10_255 = arith.constant 10 : index
    %c0_256 = arith.constant 0 : index
    %334 = vector.load %arg17[%c2_254, %c10_255, %c0_256] : memref<16x16x128xf32, #tpu.memory_space<vmem>>, vector<1x1x128xf32>
    %335 = vector.shape_cast %334 : vector<1x1x128xf32> to vector<128xf32>
    %336 = arith.addf %333, %335 : vector<128xf32>
    %c0_257 = arith.constant 0 : index
    %c1_258 = arith.constant 1 : index
    %c5_259 = arith.constant 5 : index
    %c0_260 = arith.constant 0 : index
    %337 = vector.load %arg13[%c0_257, %c1_258, %c5_259, %c0_260] : memref<1x8x8x128xf32, #tpu.memory_space<vmem>>, vector<1x1x1x128xf32>
    %338 = vector.shape_cast %337 : vector<1x1x1x128xf32> to vector<128xf32>
    %339 = vector.shape_cast %336 : vector<128xf32> to vector<1x1x1x128xf32>
    tpu.vector_store %arg13[%c0_257, %c1_258, %c5_259, %c0_260], %339 {strides = array<i32>} : memref<1x8x8x128xf32, #tpu.memory_space<vmem>>, vector<1x1x1x128xf32>,
    %c0_261 = arith.constant 0 : index
    %c1_262 = arith.constant 1 : index
    %c6_263 = arith.constant 6 : index
    %c0_264 = arith.constant 0 : index
    %340 = vector.load %arg13[%c0_261, %c1_262, %c6_263, %c0_264] : memref<1x8x8x128xf32, #tpu.memory_space<vmem>>, vector<1x1x1x128xf32>
    %341 = vector.shape_cast %340 : vector<1x1x1x128xf32> to vector<128xf32>
    %c2_265 = arith.constant 2 : index
    %c12_266 = arith.constant 12 : index
    %c0_267 = arith.constant 0 : index
    %342 = vector.load %arg17[%c2_265, %c12_266, %c0_267] : memref<16x16x128xf32, #tpu.memory_space<vmem>>, vector<1x1x128xf32>
    %343 = vector.shape_cast %342 : vector<1x1x128xf32> to vector<128xf32>
    %344 = arith.addf %341, %343 : vector<128xf32>
    %c0_268 = arith.constant 0 : index
    %c1_269 = arith.constant 1 : index
    %c6_270 = arith.constant 6 : index
    %c0_271 = arith.constant 0 : index
    %345 = vector.load %arg13[%c0_268, %c1_269, %c6_270, %c0_271] : memref<1x8x8x128xf32, #tpu.memory_space<vmem>>, vector<1x1x1x128xf32>
    %346 = vector.shape_cast %345 : vector<1x1x1x128xf32> to vector<128xf32>
    %347 = vector.shape_cast %344 : vector<128xf32> to vector<1x1x1x128xf32>
    tpu.vector_store %arg13[%c0_268, %c1_269, %c6_270, %c0_271], %347 {strides = array<i32>} : memref<1x8x8x128xf32, #tpu.memory_space<vmem>>, vector<1x1x1x128xf32>,
    %c0_272 = arith.constant 0 : index
    %c1_273 = arith.constant 1 : index
    %c7_274 = arith.constant 7 : index
    %c0_275 = arith.constant 0 : index
    %348 = vector.load %arg13[%c0_272, %c1_273, %c7_274, %c0_275] : memref<1x8x8x128xf32, #tpu.memory_space<vmem>>, vector<1x1x1x128xf32>
    %349 = vector.shape_cast %348 : vector<1x1x1x128xf32> to vector<128xf32>
    %c2_276 = arith.constant 2 : index
    %c14_277 = arith.constant 14 : index
    %c0_278 = arith.constant 0 : index
    %350 = vector.load %arg17[%c2_276, %c14_277, %c0_278] : memref<16x16x128xf32, #tpu.memory_space<vmem>>, vector<1x1x128xf32>
    %351 = vector.shape_cast %350 : vector<1x1x128xf32> to vector<128xf32>
    %352 = arith.addf %349, %351 : vector<128xf32>
    %c0_279 = arith.constant 0 : index
    %c1_280 = arith.constant 1 : index
    %c7_281 = arith.constant 7 : index
    %c0_282 = arith.constant 0 : index
    %353 = vector.load %arg13[%c0_279, %c1_280, %c7_281, %c0_282] : memref<1x8x8x128xf32, #tpu.memory_space<vmem>>, vector<1x1x1x128xf32>
    %354 = vector.shape_cast %353 : vector<1x1x1x128xf32> to vector<128xf32>
    %355 = vector.shape_cast %352 : vector<128xf32> to vector<1x1x1x128xf32>
    tpu.vector_store %arg13[%c0_279, %c1_280, %c7_281, %c0_282], %355 {strides = array<i32>} : memref<1x8x8x128xf32, #tpu.memory_space<vmem>>, vector<1x1x1x128xf32>,
    %c0_283 = arith.constant 0 : index
    %c2_284 = arith.constant 2 : index
    %c0_285 = arith.constant 0 : index
    %c0_286 = arith.constant 0 : index
    %356 = vector.load %arg13[%c0_283, %c2_284, %c0_285, %c0_286] : memref<1x8x8x128xf32, #tpu.memory_space<vmem>>, vector<1x1x1x128xf32>
    %357 = vector.shape_cast %356 : vector<1x1x1x128xf32> to vector<128xf32>
    %c4_287 = arith.constant 4 : index
    %c0_288 = arith.constant 0 : index
    %c0_289 = arith.constant 0 : index
    %358 = vector.load %arg17[%c4_287, %c0_288, %c0_289] : memref<16x16x128xf32, #tpu.memory_space<vmem>>, vector<1x1x128xf32>
    %359 = vector.shape_cast %358 : vector<1x1x128xf32> to vector<128xf32>
    %360 = arith.addf %357, %359 : vector<128xf32>
    %c0_290 = arith.constant 0 : index
    %c2_291 = arith.constant 2 : index
    %c0_292 = arith.constant 0 : index
    %c0_293 = arith.constant 0 : index
    %361 = vector.load %arg13[%c0_290, %c2_291, %c0_292, %c0_293] : memref<1x8x8x128xf32, #tpu.memory_space<vmem>>, vector<1x1x1x128xf32>
    %362 = vector.shape_cast %361 : vector<1x1x1x128xf32> to vector<128xf32>
    %363 = vector.shape_cast %360 : vector<128xf32> to vector<1x1x1x128xf32>
    tpu.vector_store %arg13[%c0_290, %c2_291, %c0_292, %c0_293], %363 {strides = array<i32>} : memref<1x8x8x128xf32, #tpu.memory_space<vmem>>, vector<1x1x1x128xf32>,
    %c0_294 = arith.constant 0 : index
    %c2_295 = arith.constant 2 : index
    %c1_296 = arith.constant 1 : index
    %c0_297 = arith.constant 0 : index
    %364 = vector.load %arg13[%c0_294, %c2_295, %c1_296, %c0_297] : memref<1x8x8x128xf32, #tpu.memory_space<vmem>>, vector<1x1x1x128xf32>
    %365 = vector.shape_cast %364 : vector<1x1x1x128xf32> to vector<128xf32>
    %c4_298 = arith.constant 4 : index
    %c2_299 = arith.constant 2 : index
    %c0_300 = arith.constant 0 : index
    %366 = vector.load %arg17[%c4_298, %c2_299, %c0_300] : memref<16x16x128xf32, #tpu.memory_space<vmem>>, vector<1x1x128xf32>
    %367 = vector.shape_cast %366 : vector<1x1x128xf32> to vector<128xf32>
    %368 = arith.addf %365, %367 : vector<128xf32>
    %c0_301 = arith.constant 0 : index
    %c2_302 = arith.constant 2 : index
    %c1_303 = arith.constant 1 : index
    %c0_304 = arith.constant 0 : index
    %369 = vector.load %arg13[%c0_301, %c2_302, %c1_303, %c0_304] : memref<1x8x8x128xf32, #tpu.memory_space<vmem>>, vector<1x1x1x128xf32>
    %370 = vector.shape_cast %369 : vector<1x1x1x128xf32> to vector<128xf32>
    %371 = vector.shape_cast %368 : vector<128xf32> to vector<1x1x1x128xf32>
    tpu.vector_store %arg13[%c0_301, %c2_302, %c1_303, %c0_304], %371 {strides = array<i32>} : memref<1x8x8x128xf32, #tpu.memory_space<vmem>>, vector<1x1x1x128xf32>,
    %c0_305 = arith.constant 0 : index
    %c2_306 = arith.constant 2 : index
    %c2_307 = arith.constant 2 : index
    %c0_308 = arith.constant 0 : index
    %372 = vector.load %arg13[%c0_305, %c2_306, %c2_307, %c0_308] : memref<1x8x8x128xf32, #tpu.memory_space<vmem>>, vector<1x1x1x128xf32>
    %373 = vector.shape_cast %372 : vector<1x1x1x128xf32> to vector<128xf32>
    %c4_309 = arith.constant 4 : index
    %c4_310 = arith.constant 4 : index
    %c0_311 = arith.constant 0 : index
    %374 = vector.load %arg17[%c4_309, %c4_310, %c0_311] : memref<16x16x128xf32, #tpu.memory_space<vmem>>, vector<1x1x128xf32>
    %375 = vector.shape_cast %374 : vector<1x1x128xf32> to vector<128xf32>
    %376 = arith.addf %373, %375 : vector<128xf32>
    %c0_312 = arith.constant 0 : index
    %c2_313 = arith.constant 2 : index
    %c2_314 = arith.constant 2 : index
    %c0_315 = arith.constant 0 : index
    %377 = vector.load %arg13[%c0_312, %c2_313, %c2_314, %c0_315] : memref<1x8x8x128xf32, #tpu.memory_space<vmem>>, vector<1x1x1x128xf32>
    %378 = vector.shape_cast %377 : vector<1x1x1x128xf32> to vector<128xf32>
    %379 = vector.shape_cast %376 : vector<128xf32> to vector<1x1x1x128xf32>
    tpu.vector_store %arg13[%c0_312, %c2_313, %c2_314, %c0_315], %379 {strides = array<i32>} : memref<1x8x8x128xf32, #tpu.memory_space<vmem>>, vector<1x1x1x128xf32>,
    %c0_316 = arith.constant 0 : index
    %c2_317 = arith.constant 2 : index
    %c3_318 = arith.constant 3 : index
    %c0_319 = arith.constant 0 : index
    %380 = vector.load %arg13[%c0_316, %c2_317, %c3_318, %c0_319] : memref<1x8x8x128xf32, #tpu.memory_space<vmem>>, vector<1x1x1x128xf32>
    %381 = vector.shape_cast %380 : vector<1x1x1x128xf32> to vector<128xf32>
    %c4_320 = arith.constant 4 : index
    %c6_321 = arith.constant 6 : index
    %c0_322 = arith.constant 0 : index
    %382 = vector.load %arg17[%c4_320, %c6_321, %c0_322] : memref<16x16x128xf32, #tpu.memory_space<vmem>>, vector<1x1x128xf32>
    %383 = vector.shape_cast %382 : vector<1x1x128xf32> to vector<128xf32>
    %384 = arith.addf %381, %383 : vector<128xf32>
    %c0_323 = arith.constant 0 : index
    %c2_324 = arith.constant 2 : index
    %c3_325 = arith.constant 3 : index
    %c0_326 = arith.constant 0 : index
    %385 = vector.load %arg13[%c0_323, %c2_324, %c3_325, %c0_326] : memref<1x8x8x128xf32, #tpu.memory_space<vmem>>, vector<1x1x1x128xf32>
    %386 = vector.shape_cast %385 : vector<1x1x1x128xf32> to vector<128xf32>
    %387 = vector.shape_cast %384 : vector<128xf32> to vector<1x1x1x128xf32>
    tpu.vector_store %arg13[%c0_323, %c2_324, %c3_325, %c0_326], %387 {strides = array<i32>} : memref<1x8x8x128xf32, #tpu.memory_space<vmem>>, vector<1x1x1x128xf32>,
    %c0_327 = arith.constant 0 : index
    %c2_328 = arith.constant 2 : index
    %c4_329 = arith.constant 4 : index
    %c0_330 = arith.constant 0 : index
    %388 = vector.load %arg13[%c0_327, %c2_328, %c4_329, %c0_330] : memref<1x8x8x128xf32, #tpu.memory_space<vmem>>, vector<1x1x1x128xf32>
    %389 = vector.shape_cast %388 : vector<1x1x1x128xf32> to vector<128xf32>
    %c4_331 = arith.constant 4 : index
    %c8_332 = arith.constant 8 : index
    %c0_333 = arith.constant 0 : index
    %390 = vector.load %arg17[%c4_331, %c8_332, %c0_333] : memref<16x16x128xf32, #tpu.memory_space<vmem>>, vector<1x1x128xf32>
    %391 = vector.shape_cast %390 : vector<1x1x128xf32> to vector<128xf32>
    %392 = arith.addf %389, %391 : vector<128xf32>
    %c0_334 = arith.constant 0 : index
    %c2_335 = arith.constant 2 : index
    %c4_336 = arith.constant 4 : index
    %c0_337 = arith.constant 0 : index
    %393 = vector.load %arg13[%c0_334, %c2_335, %c4_336, %c0_337] : memref<1x8x8x128xf32, #tpu.memory_space<vmem>>, vector<1x1x1x128xf32>
    %394 = vector.shape_cast %393 : vector<1x1x1x128xf32> to vector<128xf32>
    %395 = vector.shape_cast %392 : vector<128xf32> to vector<1x1x1x128xf32>
    tpu.vector_store %arg13[%c0_334, %c2_335, %c4_336, %c0_337], %395 {strides = array<i32>} : memref<1x8x8x128xf32, #tpu.memory_space<vmem>>, vector<1x1x1x128xf32>,
    %c0_338 = arith.constant 0 : index
    %c2_339 = arith.constant 2 : index
    %c5_340 = arith.constant 5 : index
    %c0_341 = arith.constant 0 : index
    %396 = vector.load %arg13[%c0_338, %c2_339, %c5_340, %c0_341] : memref<1x8x8x128xf32, #tpu.memory_space<vmem>>, vector<1x1x1x128xf32>
    %397 = vector.shape_cast %396 : vector<1x1x1x128xf32> to vector<128xf32>
    %c4_342 = arith.constant 4 : index
    %c10_343 = arith.constant 10 : index
    %c0_344 = arith.constant 0 : index
    %398 = vector.load %arg17[%c4_342, %c10_343, %c0_344] : memref<16x16x128xf32, #tpu.memory_space<vmem>>, vector<1x1x128xf32>
    %399 = vector.shape_cast %398 : vector<1x1x128xf32> to vector<128xf32>
    %400 = arith.addf %397, %399 : vector<128xf32>
    %c0_345 = arith.constant 0 : index
    %c2_346 = arith.constant 2 : index
    %c5_347 = arith.constant 5 : index
    %c0_348 = arith.constant 0 : index
    %401 = vector.load %arg13[%c0_345, %c2_346, %c5_347, %c0_348] : memref<1x8x8x128xf32, #tpu.memory_space<vmem>>, vector<1x1x1x128xf32>
    %402 = vector.shape_cast %401 : vector<1x1x1x128xf32> to vector<128xf32>
    %403 = vector.shape_cast %400 : vector<128xf32> to vector<1x1x1x128xf32>
    tpu.vector_store %arg13[%c0_345, %c2_346, %c5_347, %c0_348], %403 {strides = array<i32>} : memref<1x8x8x128xf32, #tpu.memory_space<vmem>>, vector<1x1x1x128xf32>,
    %c0_349 = arith.constant 0 : index
    %c2_350 = arith.constant 2 : index
    %c6_351 = arith.constant 6 : index
    %c0_352 = arith.constant 0 : index
    %404 = vector.load %arg13[%c0_349, %c2_350, %c6_351, %c0_352] : memref<1x8x8x128xf32, #tpu.memory_space<vmem>>, vector<1x1x1x128xf32>
    %405 = vector.shape_cast %404 : vector<1x1x1x128xf32> to vector<128xf32>
    %c4_353 = arith.constant 4 : index
    %c12_354 = arith.constant 12 : index
    %c0_355 = arith.constant 0 : index
    %406 = vector.load %arg17[%c4_353, %c12_354, %c0_355] : memref<16x16x128xf32, #tpu.memory_space<vmem>>, vector<1x1x128xf32>
    %407 = vector.shape_cast %406 : vector<1x1x128xf32> to vector<128xf32>
    %408 = arith.addf %405, %407 : vector<128xf32>
    %c0_356 = arith.constant 0 : index
    %c2_357 = arith.constant 2 : index
    %c6_358 = arith.constant 6 : index
    %c0_359 = arith.constant 0 : index
    %409 = vector.load %arg13[%c0_356, %c2_357, %c6_358, %c0_359] : memref<1x8x8x128xf32, #tpu.memory_space<vmem>>, vector<1x1x1x128xf32>
    %410 = vector.shape_cast %409 : vector<1x1x1x128xf32> to vector<128xf32>
    %411 = vector.shape_cast %408 : vector<128xf32> to vector<1x1x1x128xf32>
    tpu.vector_store %arg13[%c0_356, %c2_357, %c6_358, %c0_359], %411 {strides = array<i32>} : memref<1x8x8x128xf32, #tpu.memory_space<vmem>>, vector<1x1x1x128xf32>,
    %c0_360 = arith.constant 0 : index
    %c2_361 = arith.constant 2 : index
    %c7_362 = arith.constant 7 : index
    %c0_363 = arith.constant 0 : index
    %412 = vector.load %arg13[%c0_360, %c2_361, %c7_362, %c0_363] : memref<1x8x8x128xf32, #tpu.memory_space<vmem>>, vector<1x1x1x128xf32>
    %413 = vector.shape_cast %412 : vector<1x1x1x128xf32> to vector<128xf32>
    %c4_364 = arith.constant 4 : index
    %c14_365 = arith.constant 14 : index
    %c0_366 = arith.constant 0 : index
    %414 = vector.load %arg17[%c4_364, %c14_365, %c0_366] : memref<16x16x128xf32, #tpu.memory_space<vmem>>, vector<1x1x128xf32>
    %415 = vector.shape_cast %414 : vector<1x1x128xf32> to vector<128xf32>
    %416 = arith.addf %413, %415 : vector<128xf32>
    %c0_367 = arith.constant 0 : index
    %c2_368 = arith.constant 2 : index
    %c7_369 = arith.constant 7 : index
    %c0_370 = arith.constant 0 : index
    %417 = vector.load %arg13[%c0_367, %c2_368, %c7_369, %c0_370] : memref<1x8x8x128xf32, #tpu.memory_space<vmem>>, vector<1x1x1x128xf32>
    %418 = vector.shape_cast %417 : vector<1x1x1x128xf32> to vector<128xf32>
    %419 = vector.shape_cast %416 : vector<128xf32> to vector<1x1x1x128xf32>
    tpu.vector_store %arg13[%c0_367, %c2_368, %c7_369, %c0_370], %419 {strides = array<i32>} : memref<1x8x8x128xf32, #tpu.memory_space<vmem>>, vector<1x1x1x128xf32>,
    %c0_371 = arith.constant 0 : index
    %c3_372 = arith.constant 3 : index
    %c0_373 = arith.constant 0 : index
    %c0_374 = arith.constant 0 : index
    %420 = vector.load %arg13[%c0_371, %c3_372, %c0_373, %c0_374] : memref<1x8x8x128xf32, #tpu.memory_space<vmem>>, vector<1x1x1x128xf32>
    %421 = vector.shape_cast %420 : vector<1x1x1x128xf32> to vector<128xf32>
    %c6_375 = arith.constant 6 : index
    %c0_376 = arith.constant 0 : index
    %c0_377 = arith.constant 0 : index
    %422 = vector.load %arg17[%c6_375, %c0_376, %c0_377] : memref<16x16x128xf32, #tpu.memory_space<vmem>>, vector<1x1x128xf32>
    %423 = vector.shape_cast %422 : vector<1x1x128xf32> to vector<128xf32>
    %424 = arith.addf %421, %423 : vector<128xf32>
    %c0_378 = arith.constant 0 : index
    %c3_379 = arith.constant 3 : index
    %c0_380 = arith.constant 0 : index
    %c0_381 = arith.constant 0 : index
    %425 = vector.load %arg13[%c0_378, %c3_379, %c0_380, %c0_381] : memref<1x8x8x128xf32, #tpu.memory_space<vmem>>, vector<1x1x1x128xf32>
    %426 = vector.shape_cast %425 : vector<1x1x1x128xf32> to vector<128xf32>
    %427 = vector.shape_cast %424 : vector<128xf32> to vector<1x1x1x128xf32>
    tpu.vector_store %arg13[%c0_378, %c3_379, %c0_380, %c0_381], %427 {strides = array<i32>} : memref<1x8x8x128xf32, #tpu.memory_space<vmem>>, vector<1x1x1x128xf32>,
    %c0_382 = arith.constant 0 : index
    %c3_383 = arith.constant 3 : index
    %c1_384 = arith.constant 1 : index
    %c0_385 = arith.constant 0 : index
    %428 = vector.load %arg13[%c0_382, %c3_383, %c1_384, %c0_385] : memref<1x8x8x128xf32, #tpu.memory_space<vmem>>, vector<1x1x1x128xf32>
    %429 = vector.shape_cast %428 : vector<1x1x1x128xf32> to vector<128xf32>
    %c6_386 = arith.constant 6 : index
    %c2_387 = arith.constant 2 : index
    %c0_388 = arith.constant 0 : index
    %430 = vector.load %arg17[%c6_386, %c2_387, %c0_388] : memref<16x16x128xf32, #tpu.memory_space<vmem>>, vector<1x1x128xf32>
    %431 = vector.shape_cast %430 : vector<1x1x128xf32> to vector<128xf32>
    %432 = arith.addf %429, %431 : vector<128xf32>
    %c0_389 = arith.constant 0 : index
    %c3_390 = arith.constant 3 : index
    %c1_391 = arith.constant 1 : index
    %c0_392 = arith.constant 0 : index
    %433 = vector.load %arg13[%c0_389, %c3_390, %c1_391, %c0_392] : memref<1x8x8x128xf32, #tpu.memory_space<vmem>>, vector<1x1x1x128xf32>
    %434 = vector.shape_cast %433 : vector<1x1x1x128xf32> to vector<128xf32>
    %435 = vector.shape_cast %432 : vector<128xf32> to vector<1x1x1x128xf32>
    tpu.vector_store %arg13[%c0_389, %c3_390, %c1_391, %c0_392], %435 {strides = array<i32>} : memref<1x8x8x128xf32, #tpu.memory_space<vmem>>, vector<1x1x1x128xf32>,
    %c0_393 = arith.constant 0 : index
    %c3_394 = arith.constant 3 : index
    %c2_395 = arith.constant 2 : index
    %c0_396 = arith.constant 0 : index
    %436 = vector.load %arg13[%c0_393, %c3_394, %c2_395, %c0_396] : memref<1x8x8x128xf32, #tpu.memory_space<vmem>>, vector<1x1x1x128xf32>
    %437 = vector.shape_cast %436 : vector<1x1x1x128xf32> to vector<128xf32>
    %c6_397 = arith.constant 6 : index
    %c4_398 = arith.constant 4 : index
    %c0_399 = arith.constant 0 : index
    %438 = vector.load %arg17[%c6_397, %c4_398, %c0_399] : memref<16x16x128xf32, #tpu.memory_space<vmem>>, vector<1x1x128xf32>
    %439 = vector.shape_cast %438 : vector<1x1x128xf32> to vector<128xf32>
    %440 = arith.addf %437, %439 : vector<128xf32>
    %c0_400 = arith.constant 0 : index
    %c3_401 = arith.constant 3 : index
    %c2_402 = arith.constant 2 : index
    %c0_403 = arith.constant 0 : index
    %441 = vector.load %arg13[%c0_400, %c3_401, %c2_402, %c0_403] : memref<1x8x8x128xf32, #tpu.memory_space<vmem>>, vector<1x1x1x128xf32>
    %442 = vector.shape_cast %441 : vector<1x1x1x128xf32> to vector<128xf32>
    %443 = vector.shape_cast %440 : vector<128xf32> to vector<1x1x1x128xf32>
    tpu.vector_store %arg13[%c0_400, %c3_401, %c2_402, %c0_403], %443 {strides = array<i32>} : memref<1x8x8x128xf32, #tpu.memory_space<vmem>>, vector<1x1x1x128xf32>,
    %c0_404 = arith.constant 0 : index
    %c3_405 = arith.constant 3 : index
    %c3_406 = arith.constant 3 : index
    %c0_407 = arith.constant 0 : index
    %444 = vector.load %arg13[%c0_404, %c3_405, %c3_406, %c0_407] : memref<1x8x8x128xf32, #tpu.memory_space<vmem>>, vector<1x1x1x128xf32>
    %445 = vector.shape_cast %444 : vector<1x1x1x128xf32> to vector<128xf32>
    %c6_408 = arith.constant 6 : index
    %c6_409 = arith.constant 6 : index
    %c0_410 = arith.constant 0 : index
    %446 = vector.load %arg17[%c6_408, %c6_409, %c0_410] : memref<16x16x128xf32, #tpu.memory_space<vmem>>, vector<1x1x128xf32>
    %447 = vector.shape_cast %446 : vector<1x1x128xf32> to vector<128xf32>
    %448 = arith.addf %445, %447 : vector<128xf32>
    %c0_411 = arith.constant 0 : index
    %c3_412 = arith.constant 3 : index
    %c3_413 = arith.constant 3 : index
    %c0_414 = arith.constant 0 : index
    %449 = vector.load %arg13[%c0_411, %c3_412, %c3_413, %c0_414] : memref<1x8x8x128xf32, #tpu.memory_space<vmem>>, vector<1x1x1x128xf32>
    %450 = vector.shape_cast %449 : vector<1x1x1x128xf32> to vector<128xf32>
    %451 = vector.shape_cast %448 : vector<128xf32> to vector<1x1x1x128xf32>
    tpu.vector_store %arg13[%c0_411, %c3_412, %c3_413, %c0_414], %451 {strides = array<i32>} : memref<1x8x8x128xf32, #tpu.memory_space<vmem>>, vector<1x1x1x128xf32>,
    %c0_415 = arith.constant 0 : index
    %c3_416 = arith.constant 3 : index
    %c4_417 = arith.constant 4 : index
    %c0_418 = arith.constant 0 : index
    %452 = vector.load %arg13[%c0_415, %c3_416, %c4_417, %c0_418] : memref<1x8x8x128xf32, #tpu.memory_space<vmem>>, vector<1x1x1x128xf32>
    %453 = vector.shape_cast %452 : vector<1x1x1x128xf32> to vector<128xf32>
    %c6_419 = arith.constant 6 : index
    %c8_420 = arith.constant 8 : index
    %c0_421 = arith.constant 0 : index
    %454 = vector.load %arg17[%c6_419, %c8_420, %c0_421] : memref<16x16x128xf32, #tpu.memory_space<vmem>>, vector<1x1x128xf32>
    %455 = vector.shape_cast %454 : vector<1x1x128xf32> to vector<128xf32>
    %456 = arith.addf %453, %455 : vector<128xf32>
    %c0_422 = arith.constant 0 : index
    %c3_423 = arith.constant 3 : index
    %c4_424 = arith.constant 4 : index
    %c0_425 = arith.constant 0 : index
    %457 = vector.load %arg13[%c0_422, %c3_423, %c4_424, %c0_425] : memref<1x8x8x128xf32, #tpu.memory_space<vmem>>, vector<1x1x1x128xf32>
    %458 = vector.shape_cast %457 : vector<1x1x1x128xf32> to vector<128xf32>
    %459 = vector.shape_cast %456 : vector<128xf32> to vector<1x1x1x128xf32>
    tpu.vector_store %arg13[%c0_422, %c3_423, %c4_424, %c0_425], %459 {strides = array<i32>} : memref<1x8x8x128xf32, #tpu.memory_space<vmem>>, vector<1x1x1x128xf32>,
    %c0_426 = arith.constant 0 : index
    %c3_427 = arith.constant 3 : index
    %c5_428 = arith.constant 5 : index
    %c0_429 = arith.constant 0 : index
    %460 = vector.load %arg13[%c0_426, %c3_427, %c5_428, %c0_429] : memref<1x8x8x128xf32, #tpu.memory_space<vmem>>, vector<1x1x1x128xf32>
    %461 = vector.shape_cast %460 : vector<1x1x1x128xf32> to vector<128xf32>
    %c6_430 = arith.constant 6 : index
    %c10_431 = arith.constant 10 : index
    %c0_432 = arith.constant 0 : index
    %462 = vector.load %arg17[%c6_430, %c10_431, %c0_432] : memref<16x16x128xf32, #tpu.memory_space<vmem>>, vector<1x1x128xf32>
    %463 = vector.shape_cast %462 : vector<1x1x128xf32> to vector<128xf32>
    %464 = arith.addf %461, %463 : vector<128xf32>
    %c0_433 = arith.constant 0 : index
    %c3_434 = arith.constant 3 : index
    %c5_435 = arith.constant 5 : index
    %c0_436 = arith.constant 0 : index
    %465 = vector.load %arg13[%c0_433, %c3_434, %c5_435, %c0_436] : memref<1x8x8x128xf32, #tpu.memory_space<vmem>>, vector<1x1x1x128xf32>
    %466 = vector.shape_cast %465 : vector<1x1x1x128xf32> to vector<128xf32>
    %467 = vector.shape_cast %464 : vector<128xf32> to vector<1x1x1x128xf32>
    tpu.vector_store %arg13[%c0_433, %c3_434, %c5_435, %c0_436], %467 {strides = array<i32>} : memref<1x8x8x128xf32, #tpu.memory_space<vmem>>, vector<1x1x1x128xf32>,
    %c0_437 = arith.constant 0 : index
    %c3_438 = arith.constant 3 : index
    %c6_439 = arith.constant 6 : index
    %c0_440 = arith.constant 0 : index
    %468 = vector.load %arg13[%c0_437, %c3_438, %c6_439, %c0_440] : memref<1x8x8x128xf32, #tpu.memory_space<vmem>>, vector<1x1x1x128xf32>
    %469 = vector.shape_cast %468 : vector<1x1x1x128xf32> to vector<128xf32>
    %c6_441 = arith.constant 6 : index
    %c12_442 = arith.constant 12 : index
    %c0_443 = arith.constant 0 : index
    %470 = vector.load %arg17[%c6_441, %c12_442, %c0_443] : memref<16x16x128xf32, #tpu.memory_space<vmem>>, vector<1x1x128xf32>
    %471 = vector.shape_cast %470 : vector<1x1x128xf32> to vector<128xf32>
    %472 = arith.addf %469, %471 : vector<128xf32>
    %c0_444 = arith.constant 0 : index
    %c3_445 = arith.constant 3 : index
    %c6_446 = arith.constant 6 : index
    %c0_447 = arith.constant 0 : index
    %473 = vector.load %arg13[%c0_444, %c3_445, %c6_446, %c0_447] : memref<1x8x8x128xf32, #tpu.memory_space<vmem>>, vector<1x1x1x128xf32>
    %474 = vector.shape_cast %473 : vector<1x1x1x128xf32> to vector<128xf32>
    %475 = vector.shape_cast %472 : vector<128xf32> to vector<1x1x1x128xf32>
    tpu.vector_store %arg13[%c0_444, %c3_445, %c6_446, %c0_447], %475 {strides = array<i32>} : memref<1x8x8x128xf32, #tpu.memory_space<vmem>>, vector<1x1x1x128xf32>,
    %c0_448 = arith.constant 0 : index
    %c3_449 = arith.constant 3 : index
    %c7_450 = arith.constant 7 : index
    %c0_451 = arith.constant 0 : index
    %476 = vector.load %arg13[%c0_448, %c3_449, %c7_450, %c0_451] : memref<1x8x8x128xf32, #tpu.memory_space<vmem>>, vector<1x1x1x128xf32>
    %477 = vector.shape_cast %476 : vector<1x1x1x128xf32> to vector<128xf32>
    %c6_452 = arith.constant 6 : index
    %c14_453 = arith.constant 14 : index
    %c0_454 = arith.constant 0 : index
    %478 = vector.load %arg17[%c6_452, %c14_453, %c0_454] : memref<16x16x128xf32, #tpu.memory_space<vmem>>, vector<1x1x128xf32>
    %479 = vector.shape_cast %478 : vector<1x1x128xf32> to vector<128xf32>
    %480 = arith.addf %477, %479 : vector<128xf32>
    %c0_455 = arith.constant 0 : index
    %c3_456 = arith.constant 3 : index
    %c7_457 = arith.constant 7 : index
    %c0_458 = arith.constant 0 : index
    %481 = vector.load %arg13[%c0_455, %c3_456, %c7_457, %c0_458] : memref<1x8x8x128xf32, #tpu.memory_space<vmem>>, vector<1x1x1x128xf32>
    %482 = vector.shape_cast %481 : vector<1x1x1x128xf32> to vector<128xf32>
    %483 = vector.shape_cast %480 : vector<128xf32> to vector<1x1x1x128xf32>
    tpu.vector_store %arg13[%c0_455, %c3_456, %c7_457, %c0_458], %483 {strides = array<i32>} : memref<1x8x8x128xf32, #tpu.memory_space<vmem>>, vector<1x1x1x128xf32>,
    %c0_459 = arith.constant 0 : index
    %c4_460 = arith.constant 4 : index
    %c0_461 = arith.constant 0 : index
    %c0_462 = arith.constant 0 : index
    %484 = vector.load %arg13[%c0_459, %c4_460, %c0_461, %c0_462] : memref<1x8x8x128xf32, #tpu.memory_space<vmem>>, vector<1x1x1x128xf32>
    %485 = vector.shape_cast %484 : vector<1x1x1x128xf32> to vector<128xf32>
    %c8_463 = arith.constant 8 : index
    %c0_464 = arith.constant 0 : index
    %c0_465 = arith.constant 0 : index
    %486 = vector.load %arg17[%c8_463, %c0_464, %c0_465] : memref<16x16x128xf32, #tpu.memory_space<vmem>>, vector<1x1x128xf32>
    %487 = vector.shape_cast %486 : vector<1x1x128xf32> to vector<128xf32>
    %488 = arith.addf %485, %487 : vector<128xf32>
    %c0_466 = arith.constant 0 : index
    %c4_467 = arith.constant 4 : index
    %c0_468 = arith.constant 0 : index
    %c0_469 = arith.constant 0 : index
    %489 = vector.load %arg13[%c0_466, %c4_467, %c0_468, %c0_469] : memref<1x8x8x128xf32, #tpu.memory_space<vmem>>, vector<1x1x1x128xf32>
    %490 = vector.shape_cast %489 : vector<1x1x1x128xf32> to vector<128xf32>
    %491 = vector.shape_cast %488 : vector<128xf32> to vector<1x1x1x128xf32>
    tpu.vector_store %arg13[%c0_466, %c4_467, %c0_468, %c0_469], %491 {strides = array<i32>} : memref<1x8x8x128xf32, #tpu.memory_space<vmem>>, vector<1x1x1x128xf32>,
    %c0_470 = arith.constant 0 : index
    %c4_471 = arith.constant 4 : index
    %c1_472 = arith.constant 1 : index
    %c0_473 = arith.constant 0 : index
    %492 = vector.load %arg13[%c0_470, %c4_471, %c1_472, %c0_473] : memref<1x8x8x128xf32, #tpu.memory_space<vmem>>, vector<1x1x1x128xf32>
    %493 = vector.shape_cast %492 : vector<1x1x1x128xf32> to vector<128xf32>
    %c8_474 = arith.constant 8 : index
    %c2_475 = arith.constant 2 : index
    %c0_476 = arith.constant 0 : index
    %494 = vector.load %arg17[%c8_474, %c2_475, %c0_476] : memref<16x16x128xf32, #tpu.memory_space<vmem>>, vector<1x1x128xf32>
    %495 = vector.shape_cast %494 : vector<1x1x128xf32> to vector<128xf32>
    %496 = arith.addf %493, %495 : vector<128xf32>
    %c0_477 = arith.constant 0 : index
    %c4_478 = arith.constant 4 : index
    %c1_479 = arith.constant 1 : index
    %c0_480 = arith.constant 0 : index
    %497 = vector.load %arg13[%c0_477, %c4_478, %c1_479, %c0_480] : memref<1x8x8x128xf32, #tpu.memory_space<vmem>>, vector<1x1x1x128xf32>
    %498 = vector.shape_cast %497 : vector<1x1x1x128xf32> to vector<128xf32>
    %499 = vector.shape_cast %496 : vector<128xf32> to vector<1x1x1x128xf32>
    tpu.vector_store %arg13[%c0_477, %c4_478, %c1_479, %c0_480], %499 {strides = array<i32>} : memref<1x8x8x128xf32, #tpu.memory_space<vmem>>, vector<1x1x1x128xf32>,
    %c0_481 = arith.constant 0 : index
    %c4_482 = arith.constant 4 : index
    %c2_483 = arith.constant 2 : index
    %c0_484 = arith.constant 0 : index
    %500 = vector.load %arg13[%c0_481, %c4_482, %c2_483, %c0_484] : memref<1x8x8x128xf32, #tpu.memory_space<vmem>>, vector<1x1x1x128xf32>
    %501 = vector.shape_cast %500 : vector<1x1x1x128xf32> to vector<128xf32>
    %c8_485 = arith.constant 8 : index
    %c4_486 = arith.constant 4 : index
    %c0_487 = arith.constant 0 : index
    %502 = vector.load %arg17[%c8_485, %c4_486, %c0_487] : memref<16x16x128xf32, #tpu.memory_space<vmem>>, vector<1x1x128xf32>
    %503 = vector.shape_cast %502 : vector<1x1x128xf32> to vector<128xf32>
    %504 = arith.addf %501, %503 : vector<128xf32>
    %c0_488 = arith.constant 0 : index
    %c4_489 = arith.constant 4 : index
    %c2_490 = arith.constant 2 : index
    %c0_491 = arith.constant 0 : index
    %505 = vector.load %arg13[%c0_488, %c4_489, %c2_490, %c0_491] : memref<1x8x8x128xf32, #tpu.memory_space<vmem>>, vector<1x1x1x128xf32>
    %506 = vector.shape_cast %505 : vector<1x1x1x128xf32> to vector<128xf32>
    %507 = vector.shape_cast %504 : vector<128xf32> to vector<1x1x1x128xf32>
    tpu.vector_store %arg13[%c0_488, %c4_489, %c2_490, %c0_491], %507 {strides = array<i32>} : memref<1x8x8x128xf32, #tpu.memory_space<vmem>>, vector<1x1x1x128xf32>,
    %c0_492 = arith.constant 0 : index
    %c4_493 = arith.constant 4 : index
    %c3_494 = arith.constant 3 : index
    %c0_495 = arith.constant 0 : index
    %508 = vector.load %arg13[%c0_492, %c4_493, %c3_494, %c0_495] : memref<1x8x8x128xf32, #tpu.memory_space<vmem>>, vector<1x1x1x128xf32>
    %509 = vector.shape_cast %508 : vector<1x1x1x128xf32> to vector<128xf32>
    %c8_496 = arith.constant 8 : index
    %c6_497 = arith.constant 6 : index
    %c0_498 = arith.constant 0 : index
    %510 = vector.load %arg17[%c8_496, %c6_497, %c0_498] : memref<16x16x128xf32, #tpu.memory_space<vmem>>, vector<1x1x128xf32>
    %511 = vector.shape_cast %510 : vector<1x1x128xf32> to vector<128xf32>
    %512 = arith.addf %509, %511 : vector<128xf32>
    %c0_499 = arith.constant 0 : index
    %c4_500 = arith.constant 4 : index
    %c3_501 = arith.constant 3 : index
    %c0_502 = arith.constant 0 : index
    %513 = vector.load %arg13[%c0_499, %c4_500, %c3_501, %c0_502] : memref<1x8x8x128xf32, #tpu.memory_space<vmem>>, vector<1x1x1x128xf32>
    %514 = vector.shape_cast %513 : vector<1x1x1x128xf32> to vector<128xf32>
    %515 = vector.shape_cast %512 : vector<128xf32> to vector<1x1x1x128xf32>
    tpu.vector_store %arg13[%c0_499, %c4_500, %c3_501, %c0_502], %515 {strides = array<i32>} : memref<1x8x8x128xf32, #tpu.memory_space<vmem>>, vector<1x1x1x128xf32>,
    %c0_503 = arith.constant 0 : index
    %c4_504 = arith.constant 4 : index
    %c4_505 = arith.constant 4 : index
    %c0_506 = arith.constant 0 : index
    %516 = vector.load %arg13[%c0_503, %c4_504, %c4_505, %c0_506] : memref<1x8x8x128xf32, #tpu.memory_space<vmem>>, vector<1x1x1x128xf32>
    %517 = vector.shape_cast %516 : vector<1x1x1x128xf32> to vector<128xf32>
    %c8_507 = arith.constant 8 : index
    %c8_508 = arith.constant 8 : index
    %c0_509 = arith.constant 0 : index
    %518 = vector.load %arg17[%c8_507, %c8_508, %c0_509] : memref<16x16x128xf32, #tpu.memory_space<vmem>>, vector<1x1x128xf32>
    %519 = vector.shape_cast %518 : vector<1x1x128xf32> to vector<128xf32>
    %520 = arith.addf %517, %519 : vector<128xf32>
    %c0_510 = arith.constant 0 : index
    %c4_511 = arith.constant 4 : index
    %c4_512 = arith.constant 4 : index
    %c0_513 = arith.constant 0 : index
    %521 = vector.load %arg13[%c0_510, %c4_511, %c4_512, %c0_513] : memref<1x8x8x128xf32, #tpu.memory_space<vmem>>, vector<1x1x1x128xf32>
    %522 = vector.shape_cast %521 : vector<1x1x1x128xf32> to vector<128xf32>
    %523 = vector.shape_cast %520 : vector<128xf32> to vector<1x1x1x128xf32>
    tpu.vector_store %arg13[%c0_510, %c4_511, %c4_512, %c0_513], %523 {strides = array<i32>} : memref<1x8x8x128xf32, #tpu.memory_space<vmem>>, vector<1x1x1x128xf32>,
    %c0_514 = arith.constant 0 : index
    %c4_515 = arith.constant 4 : index
    %c5_516 = arith.constant 5 : index
    %c0_517 = arith.constant 0 : index
    %524 = vector.load %arg13[%c0_514, %c4_515, %c5_516, %c0_517] : memref<1x8x8x128xf32, #tpu.memory_space<vmem>>, vector<1x1x1x128xf32>
    %525 = vector.shape_cast %524 : vector<1x1x1x128xf32> to vector<128xf32>
    %c8_518 = arith.constant 8 : index
    %c10_519 = arith.constant 10 : index
    %c0_520 = arith.constant 0 : index
    %526 = vector.load %arg17[%c8_518, %c10_519, %c0_520] : memref<16x16x128xf32, #tpu.memory_space<vmem>>, vector<1x1x128xf32>
    %527 = vector.shape_cast %526 : vector<1x1x128xf32> to vector<128xf32>
    %528 = arith.addf %525, %527 : vector<128xf32>
    %c0_521 = arith.constant 0 : index
    %c4_522 = arith.constant 4 : index
    %c5_523 = arith.constant 5 : index
    %c0_524 = arith.constant 0 : index
    %529 = vector.load %arg13[%c0_521, %c4_522, %c5_523, %c0_524] : memref<1x8x8x128xf32, #tpu.memory_space<vmem>>, vector<1x1x1x128xf32>
    %530 = vector.shape_cast %529 : vector<1x1x1x128xf32> to vector<128xf32>
    %531 = vector.shape_cast %528 : vector<128xf32> to vector<1x1x1x128xf32>
    tpu.vector_store %arg13[%c0_521, %c4_522, %c5_523, %c0_524], %531 {strides = array<i32>} : memref<1x8x8x128xf32, #tpu.memory_space<vmem>>, vector<1x1x1x128xf32>,
    %c0_525 = arith.constant 0 : index
    %c4_526 = arith.constant 4 : index
    %c6_527 = arith.constant 6 : index
    %c0_528 = arith.constant 0 : index
    %532 = vector.load %arg13[%c0_525, %c4_526, %c6_527, %c0_528] : memref<1x8x8x128xf32, #tpu.memory_space<vmem>>, vector<1x1x1x128xf32>
    %533 = vector.shape_cast %532 : vector<1x1x1x128xf32> to vector<128xf32>
    %c8_529 = arith.constant 8 : index
    %c12_530 = arith.constant 12 : index
    %c0_531 = arith.constant 0 : index
    %534 = vector.load %arg17[%c8_529, %c12_530, %c0_531] : memref<16x16x128xf32, #tpu.memory_space<vmem>>, vector<1x1x128xf32>
    %535 = vector.shape_cast %534 : vector<1x1x128xf32> to vector<128xf32>
    %536 = arith.addf %533, %535 : vector<128xf32>
    %c0_532 = arith.constant 0 : index
    %c4_533 = arith.constant 4 : index
    %c6_534 = arith.constant 6 : index
    %c0_535 = arith.constant 0 : index
    %537 = vector.load %arg13[%c0_532, %c4_533, %c6_534, %c0_535] : memref<1x8x8x128xf32, #tpu.memory_space<vmem>>, vector<1x1x1x128xf32>
    %538 = vector.shape_cast %537 : vector<1x1x1x128xf32> to vector<128xf32>
    %539 = vector.shape_cast %536 : vector<128xf32> to vector<1x1x1x128xf32>
    tpu.vector_store %arg13[%c0_532, %c4_533, %c6_534, %c0_535], %539 {strides = array<i32>} : memref<1x8x8x128xf32, #tpu.memory_space<vmem>>, vector<1x1x1x128xf32>,
    %c0_536 = arith.constant 0 : index
    %c4_537 = arith.constant 4 : index
    %c7_538 = arith.constant 7 : index
    %c0_539 = arith.constant 0 : index
    %540 = vector.load %arg13[%c0_536, %c4_537, %c7_538, %c0_539] : memref<1x8x8x128xf32, #tpu.memory_space<vmem>>, vector<1x1x1x128xf32>
    %541 = vector.shape_cast %540 : vector<1x1x1x128xf32> to vector<128xf32>
    %c8_540 = arith.constant 8 : index
    %c14_541 = arith.constant 14 : index
    %c0_542 = arith.constant 0 : index
    %542 = vector.load %arg17[%c8_540, %c14_541, %c0_542] : memref<16x16x128xf32, #tpu.memory_space<vmem>>, vector<1x1x128xf32>
    %543 = vector.shape_cast %542 : vector<1x1x128xf32> to vector<128xf32>
    %544 = arith.addf %541, %543 : vector<128xf32>
    %c0_543 = arith.constant 0 : index
    %c4_544 = arith.constant 4 : index
    %c7_545 = arith.constant 7 : index
    %c0_546 = arith.constant 0 : index
    %545 = vector.load %arg13[%c0_543, %c4_544, %c7_545, %c0_546] : memref<1x8x8x128xf32, #tpu.memory_space<vmem>>, vector<1x1x1x128xf32>
    %546 = vector.shape_cast %545 : vector<1x1x1x128xf32> to vector<128xf32>
    %547 = vector.shape_cast %544 : vector<128xf32> to vector<1x1x1x128xf32>
    tpu.vector_store %arg13[%c0_543, %c4_544, %c7_545, %c0_546], %547 {strides = array<i32>} : memref<1x8x8x128xf32, #tpu.memory_space<vmem>>, vector<1x1x1x128xf32>,
    %c0_547 = arith.constant 0 : index
    %c5_548 = arith.constant 5 : index
    %c0_549 = arith.constant 0 : index
    %c0_550 = arith.constant 0 : index
    %548 = vector.load %arg13[%c0_547, %c5_548, %c0_549, %c0_550] : memref<1x8x8x128xf32, #tpu.memory_space<vmem>>, vector<1x1x1x128xf32>
    %549 = vector.shape_cast %548 : vector<1x1x1x128xf32> to vector<128xf32>
    %c10_551 = arith.constant 10 : index
    %c0_552 = arith.constant 0 : index
    %c0_553 = arith.constant 0 : index
    %550 = vector.load %arg17[%c10_551, %c0_552, %c0_553] : memref<16x16x128xf32, #tpu.memory_space<vmem>>, vector<1x1x128xf32>
    %551 = vector.shape_cast %550 : vector<1x1x128xf32> to vector<128xf32>
    %552 = arith.addf %549, %551 : vector<128xf32>
    %c0_554 = arith.constant 0 : index
    %c5_555 = arith.constant 5 : index
    %c0_556 = arith.constant 0 : index
    %c0_557 = arith.constant 0 : index
    %553 = vector.load %arg13[%c0_554, %c5_555, %c0_556, %c0_557] : memref<1x8x8x128xf32, #tpu.memory_space<vmem>>, vector<1x1x1x128xf32>
    %554 = vector.shape_cast %553 : vector<1x1x1x128xf32> to vector<128xf32>
    %555 = vector.shape_cast %552 : vector<128xf32> to vector<1x1x1x128xf32>
    tpu.vector_store %arg13[%c0_554, %c5_555, %c0_556, %c0_557], %555 {strides = array<i32>} : memref<1x8x8x128xf32, #tpu.memory_space<vmem>>, vector<1x1x1x128xf32>,
    %c0_558 = arith.constant 0 : index
    %c5_559 = arith.constant 5 : index
    %c1_560 = arith.constant 1 : index
    %c0_561 = arith.constant 0 : index
    %556 = vector.load %arg13[%c0_558, %c5_559, %c1_560, %c0_561] : memref<1x8x8x128xf32, #tpu.memory_space<vmem>>, vector<1x1x1x128xf32>
    %557 = vector.shape_cast %556 : vector<1x1x1x128xf32> to vector<128xf32>
    %c10_562 = arith.constant 10 : index
    %c2_563 = arith.constant 2 : index
    %c0_564 = arith.constant 0 : index
    %558 = vector.load %arg17[%c10_562, %c2_563, %c0_564] : memref<16x16x128xf32, #tpu.memory_space<vmem>>, vector<1x1x128xf32>
    %559 = vector.shape_cast %558 : vector<1x1x128xf32> to vector<128xf32>
    %560 = arith.addf %557, %559 : vector<128xf32>
    %c0_565 = arith.constant 0 : index
    %c5_566 = arith.constant 5 : index
    %c1_567 = arith.constant 1 : index
    %c0_568 = arith.constant 0 : index
    %561 = vector.load %arg13[%c0_565, %c5_566, %c1_567, %c0_568] : memref<1x8x8x128xf32, #tpu.memory_space<vmem>>, vector<1x1x1x128xf32>
    %562 = vector.shape_cast %561 : vector<1x1x1x128xf32> to vector<128xf32>
    %563 = vector.shape_cast %560 : vector<128xf32> to vector<1x1x1x128xf32>
    tpu.vector_store %arg13[%c0_565, %c5_566, %c1_567, %c0_568], %563 {strides = array<i32>} : memref<1x8x8x128xf32, #tpu.memory_space<vmem>>, vector<1x1x1x128xf32>,
    %c0_569 = arith.constant 0 : index
    %c5_570 = arith.constant 5 : index
    %c2_571 = arith.constant 2 : index
    %c0_572 = arith.constant 0 : index
    %564 = vector.load %arg13[%c0_569, %c5_570, %c2_571, %c0_572] : memref<1x8x8x128xf32, #tpu.memory_space<vmem>>, vector<1x1x1x128xf32>
    %565 = vector.shape_cast %564 : vector<1x1x1x128xf32> to vector<128xf32>
    %c10_573 = arith.constant 10 : index
    %c4_574 = arith.constant 4 : index
    %c0_575 = arith.constant 0 : index
    %566 = vector.load %arg17[%c10_573, %c4_574, %c0_575] : memref<16x16x128xf32, #tpu.memory_space<vmem>>, vector<1x1x128xf32>
    %567 = vector.shape_cast %566 : vector<1x1x128xf32> to vector<128xf32>
    %568 = arith.addf %565, %567 : vector<128xf32>
    %c0_576 = arith.constant 0 : index
    %c5_577 = arith.constant 5 : index
    %c2_578 = arith.constant 2 : index
    %c0_579 = arith.constant 0 : index
    %569 = vector.load %arg13[%c0_576, %c5_577, %c2_578, %c0_579] : memref<1x8x8x128xf32, #tpu.memory_space<vmem>>, vector<1x1x1x128xf32>
    %570 = vector.shape_cast %569 : vector<1x1x1x128xf32> to vector<128xf32>
    %571 = vector.shape_cast %568 : vector<128xf32> to vector<1x1x1x128xf32>
    tpu.vector_store %arg13[%c0_576, %c5_577, %c2_578, %c0_579], %571 {strides = array<i32>} : memref<1x8x8x128xf32, #tpu.memory_space<vmem>>, vector<1x1x1x128xf32>,
    %c0_580 = arith.constant 0 : index
    %c5_581 = arith.constant 5 : index
    %c3_582 = arith.constant 3 : index
    %c0_583 = arith.constant 0 : index
    %572 = vector.load %arg13[%c0_580, %c5_581, %c3_582, %c0_583] : memref<1x8x8x128xf32, #tpu.memory_space<vmem>>, vector<1x1x1x128xf32>
    %573 = vector.shape_cast %572 : vector<1x1x1x128xf32> to vector<128xf32>
    %c10_584 = arith.constant 10 : index
    %c6_585 = arith.constant 6 : index
    %c0_586 = arith.constant 0 : index
    %574 = vector.load %arg17[%c10_584, %c6_585, %c0_586] : memref<16x16x128xf32, #tpu.memory_space<vmem>>, vector<1x1x128xf32>
    %575 = vector.shape_cast %574 : vector<1x1x128xf32> to vector<128xf32>
    %576 = arith.addf %573, %575 : vector<128xf32>
    %c0_587 = arith.constant 0 : index
    %c5_588 = arith.constant 5 : index
    %c3_589 = arith.constant 3 : index
    %c0_590 = arith.constant 0 : index
    %577 = vector.load %arg13[%c0_587, %c5_588, %c3_589, %c0_590] : memref<1x8x8x128xf32, #tpu.memory_space<vmem>>, vector<1x1x1x128xf32>
    %578 = vector.shape_cast %577 : vector<1x1x1x128xf32> to vector<128xf32>
    %579 = vector.shape_cast %576 : vector<128xf32> to vector<1x1x1x128xf32>
    tpu.vector_store %arg13[%c0_587, %c5_588, %c3_589, %c0_590], %579 {strides = array<i32>} : memref<1x8x8x128xf32, #tpu.memory_space<vmem>>, vector<1x1x1x128xf32>,
    %c0_591 = arith.constant 0 : index
    %c5_592 = arith.constant 5 : index
    %c4_593 = arith.constant 4 : index
    %c0_594 = arith.constant 0 : index
    %580 = vector.load %arg13[%c0_591, %c5_592, %c4_593, %c0_594] : memref<1x8x8x128xf32, #tpu.memory_space<vmem>>, vector<1x1x1x128xf32>
    %581 = vector.shape_cast %580 : vector<1x1x1x128xf32> to vector<128xf32>
    %c10_595 = arith.constant 10 : index
    %c8_596 = arith.constant 8 : index
    %c0_597 = arith.constant 0 : index
    %582 = vector.load %arg17[%c10_595, %c8_596, %c0_597] : memref<16x16x128xf32, #tpu.memory_space<vmem>>, vector<1x1x128xf32>
    %583 = vector.shape_cast %582 : vector<1x1x128xf32> to vector<128xf32>
    %584 = arith.addf %581, %583 : vector<128xf32>
    %c0_598 = arith.constant 0 : index
    %c5_599 = arith.constant 5 : index
    %c4_600 = arith.constant 4 : index
    %c0_601 = arith.constant 0 : index
    %585 = vector.load %arg13[%c0_598, %c5_599, %c4_600, %c0_601] : memref<1x8x8x128xf32, #tpu.memory_space<vmem>>, vector<1x1x1x128xf32>
    %586 = vector.shape_cast %585 : vector<1x1x1x128xf32> to vector<128xf32>
    %587 = vector.shape_cast %584 : vector<128xf32> to vector<1x1x1x128xf32>
    tpu.vector_store %arg13[%c0_598, %c5_599, %c4_600, %c0_601], %587 {strides = array<i32>} : memref<1x8x8x128xf32, #tpu.memory_space<vmem>>, vector<1x1x1x128xf32>,
    %c0_602 = arith.constant 0 : index
    %c5_603 = arith.constant 5 : index
    %c5_604 = arith.constant 5 : index
    %c0_605 = arith.constant 0 : index
    %588 = vector.load %arg13[%c0_602, %c5_603, %c5_604, %c0_605] : memref<1x8x8x128xf32, #tpu.memory_space<vmem>>, vector<1x1x1x128xf32>
    %589 = vector.shape_cast %588 : vector<1x1x1x128xf32> to vector<128xf32>
    %c10_606 = arith.constant 10 : index
    %c10_607 = arith.constant 10 : index
    %c0_608 = arith.constant 0 : index
    %590 = vector.load %arg17[%c10_606, %c10_607, %c0_608] : memref<16x16x128xf32, #tpu.memory_space<vmem>>, vector<1x1x128xf32>
    %591 = vector.shape_cast %590 : vector<1x1x128xf32> to vector<128xf32>
    %592 = arith.addf %589, %591 : vector<128xf32>
    %c0_609 = arith.constant 0 : index
    %c5_610 = arith.constant 5 : index
    %c5_611 = arith.constant 5 : index
    %c0_612 = arith.constant 0 : index
    %593 = vector.load %arg13[%c0_609, %c5_610, %c5_611, %c0_612] : memref<1x8x8x128xf32, #tpu.memory_space<vmem>>, vector<1x1x1x128xf32>
    %594 = vector.shape_cast %593 : vector<1x1x1x128xf32> to vector<128xf32>
    %595 = vector.shape_cast %592 : vector<128xf32> to vector<1x1x1x128xf32>
    tpu.vector_store %arg13[%c0_609, %c5_610, %c5_611, %c0_612], %595 {strides = array<i32>} : memref<1x8x8x128xf32, #tpu.memory_space<vmem>>, vector<1x1x1x128xf32>,
    %c0_613 = arith.constant 0 : index
    %c5_614 = arith.constant 5 : index
    %c6_615 = arith.constant 6 : index
    %c0_616 = arith.constant 0 : index
    %596 = vector.load %arg13[%c0_613, %c5_614, %c6_615, %c0_616] : memref<1x8x8x128xf32, #tpu.memory_space<vmem>>, vector<1x1x1x128xf32>
    %597 = vector.shape_cast %596 : vector<1x1x1x128xf32> to vector<128xf32>
    %c10_617 = arith.constant 10 : index
    %c12_618 = arith.constant 12 : index
    %c0_619 = arith.constant 0 : index
    %598 = vector.load %arg17[%c10_617, %c12_618, %c0_619] : memref<16x16x128xf32, #tpu.memory_space<vmem>>, vector<1x1x128xf32>
    %599 = vector.shape_cast %598 : vector<1x1x128xf32> to vector<128xf32>
    %600 = arith.addf %597, %599 : vector<128xf32>
    %c0_620 = arith.constant 0 : index
    %c5_621 = arith.constant 5 : index
    %c6_622 = arith.constant 6 : index
    %c0_623 = arith.constant 0 : index
    %601 = vector.load %arg13[%c0_620, %c5_621, %c6_622, %c0_623] : memref<1x8x8x128xf32, #tpu.memory_space<vmem>>, vector<1x1x1x128xf32>
    %602 = vector.shape_cast %601 : vector<1x1x1x128xf32> to vector<128xf32>
    %603 = vector.shape_cast %600 : vector<128xf32> to vector<1x1x1x128xf32>
    tpu.vector_store %arg13[%c0_620, %c5_621, %c6_622, %c0_623], %603 {strides = array<i32>} : memref<1x8x8x128xf32, #tpu.memory_space<vmem>>, vector<1x1x1x128xf32>,
    %c0_624 = arith.constant 0 : index
    %c5_625 = arith.constant 5 : index
    %c7_626 = arith.constant 7 : index
    %c0_627 = arith.constant 0 : index
    %604 = vector.load %arg13[%c0_624, %c5_625, %c7_626, %c0_627] : memref<1x8x8x128xf32, #tpu.memory_space<vmem>>, vector<1x1x1x128xf32>
    %605 = vector.shape_cast %604 : vector<1x1x1x128xf32> to vector<128xf32>
    %c10_628 = arith.constant 10 : index
    %c14_629 = arith.constant 14 : index
    %c0_630 = arith.constant 0 : index
    %606 = vector.load %arg17[%c10_628, %c14_629, %c0_630] : memref<16x16x128xf32, #tpu.memory_space<vmem>>, vector<1x1x128xf32>
    %607 = vector.shape_cast %606 : vector<1x1x128xf32> to vector<128xf32>
    %608 = arith.addf %605, %607 : vector<128xf32>
    %c0_631 = arith.constant 0 : index
    %c5_632 = arith.constant 5 : index
    %c7_633 = arith.constant 7 : index
    %c0_634 = arith.constant 0 : index
    %609 = vector.load %arg13[%c0_631, %c5_632, %c7_633, %c0_634] : memref<1x8x8x128xf32, #tpu.memory_space<vmem>>, vector<1x1x1x128xf32>
    %610 = vector.shape_cast %609 : vector<1x1x1x128xf32> to vector<128xf32>
    %611 = vector.shape_cast %608 : vector<128xf32> to vector<1x1x1x128xf32>
    tpu.vector_store %arg13[%c0_631, %c5_632, %c7_633, %c0_634], %611 {strides = array<i32>} : memref<1x8x8x128xf32, #tpu.memory_space<vmem>>, vector<1x1x1x128xf32>,
    %c0_635 = arith.constant 0 : index
    %c6_636 = arith.constant 6 : index
    %c0_637 = arith.constant 0 : index
    %c0_638 = arith.constant 0 : index
    %612 = vector.load %arg13[%c0_635, %c6_636, %c0_637, %c0_638] : memref<1x8x8x128xf32, #tpu.memory_space<vmem>>, vector<1x1x1x128xf32>
    %613 = vector.shape_cast %612 : vector<1x1x1x128xf32> to vector<128xf32>
    %c12_639 = arith.constant 12 : index
    %c0_640 = arith.constant 0 : index
    %c0_641 = arith.constant 0 : index
    %614 = vector.load %arg17[%c12_639, %c0_640, %c0_641] : memref<16x16x128xf32, #tpu.memory_space<vmem>>, vector<1x1x128xf32>
    %615 = vector.shape_cast %614 : vector<1x1x128xf32> to vector<128xf32>
    %616 = arith.addf %613, %615 : vector<128xf32>
    %c0_642 = arith.constant 0 : index
    %c6_643 = arith.constant 6 : index
    %c0_644 = arith.constant 0 : index
    %c0_645 = arith.constant 0 : index
    %617 = vector.load %arg13[%c0_642, %c6_643, %c0_644, %c0_645] : memref<1x8x8x128xf32, #tpu.memory_space<vmem>>, vector<1x1x1x128xf32>
    %618 = vector.shape_cast %617 : vector<1x1x1x128xf32> to vector<128xf32>
    %619 = vector.shape_cast %616 : vector<128xf32> to vector<1x1x1x128xf32>
    tpu.vector_store %arg13[%c0_642, %c6_643, %c0_644, %c0_645], %619 {strides = array<i32>} : memref<1x8x8x128xf32, #tpu.memory_space<vmem>>, vector<1x1x1x128xf32>,
    %c0_646 = arith.constant 0 : index
    %c6_647 = arith.constant 6 : index
    %c1_648 = arith.constant 1 : index
    %c0_649 = arith.constant 0 : index
    %620 = vector.load %arg13[%c0_646, %c6_647, %c1_648, %c0_649] : memref<1x8x8x128xf32, #tpu.memory_space<vmem>>, vector<1x1x1x128xf32>
    %621 = vector.shape_cast %620 : vector<1x1x1x128xf32> to vector<128xf32>
    %c12_650 = arith.constant 12 : index
    %c2_651 = arith.constant 2 : index
    %c0_652 = arith.constant 0 : index
    %622 = vector.load %arg17[%c12_650, %c2_651, %c0_652] : memref<16x16x128xf32, #tpu.memory_space<vmem>>, vector<1x1x128xf32>
    %623 = vector.shape_cast %622 : vector<1x1x128xf32> to vector<128xf32>
    %624 = arith.addf %621, %623 : vector<128xf32>
    %c0_653 = arith.constant 0 : index
    %c6_654 = arith.constant 6 : index
    %c1_655 = arith.constant 1 : index
    %c0_656 = arith.constant 0 : index
    %625 = vector.load %arg13[%c0_653, %c6_654, %c1_655, %c0_656] : memref<1x8x8x128xf32, #tpu.memory_space<vmem>>, vector<1x1x1x128xf32>
    %626 = vector.shape_cast %625 : vector<1x1x1x128xf32> to vector<128xf32>
    %627 = vector.shape_cast %624 : vector<128xf32> to vector<1x1x1x128xf32>
    tpu.vector_store %arg13[%c0_653, %c6_654, %c1_655, %c0_656], %627 {strides = array<i32>} : memref<1x8x8x128xf32, #tpu.memory_space<vmem>>, vector<1x1x1x128xf32>,
    %c0_657 = arith.constant 0 : index
    %c6_658 = arith.constant 6 : index
    %c2_659 = arith.constant 2 : index
    %c0_660 = arith.constant 0 : index
    %628 = vector.load %arg13[%c0_657, %c6_658, %c2_659, %c0_660] : memref<1x8x8x128xf32, #tpu.memory_space<vmem>>, vector<1x1x1x128xf32>
    %629 = vector.shape_cast %628 : vector<1x1x1x128xf32> to vector<128xf32>
    %c12_661 = arith.constant 12 : index
    %c4_662 = arith.constant 4 : index
    %c0_663 = arith.constant 0 : index
    %630 = vector.load %arg17[%c12_661, %c4_662, %c0_663] : memref<16x16x128xf32, #tpu.memory_space<vmem>>, vector<1x1x128xf32>
    %631 = vector.shape_cast %630 : vector<1x1x128xf32> to vector<128xf32>
    %632 = arith.addf %629, %631 : vector<128xf32>
    %c0_664 = arith.constant 0 : index
    %c6_665 = arith.constant 6 : index
    %c2_666 = arith.constant 2 : index
    %c0_667 = arith.constant 0 : index
    %633 = vector.load %arg13[%c0_664, %c6_665, %c2_666, %c0_667] : memref<1x8x8x128xf32, #tpu.memory_space<vmem>>, vector<1x1x1x128xf32>
    %634 = vector.shape_cast %633 : vector<1x1x1x128xf32> to vector<128xf32>
    %635 = vector.shape_cast %632 : vector<128xf32> to vector<1x1x1x128xf32>
    tpu.vector_store %arg13[%c0_664, %c6_665, %c2_666, %c0_667], %635 {strides = array<i32>} : memref<1x8x8x128xf32, #tpu.memory_space<vmem>>, vector<1x1x1x128xf32>,
    %c0_668 = arith.constant 0 : index
    %c6_669 = arith.constant 6 : index
    %c3_670 = arith.constant 3 : index
    %c0_671 = arith.constant 0 : index
    %636 = vector.load %arg13[%c0_668, %c6_669, %c3_670, %c0_671] : memref<1x8x8x128xf32, #tpu.memory_space<vmem>>, vector<1x1x1x128xf32>
    %637 = vector.shape_cast %636 : vector<1x1x1x128xf32> to vector<128xf32>
    %c12_672 = arith.constant 12 : index
    %c6_673 = arith.constant 6 : index
    %c0_674 = arith.constant 0 : index
    %638 = vector.load %arg17[%c12_672, %c6_673, %c0_674] : memref<16x16x128xf32, #tpu.memory_space<vmem>>, vector<1x1x128xf32>
    %639 = vector.shape_cast %638 : vector<1x1x128xf32> to vector<128xf32>
    %640 = arith.addf %637, %639 : vector<128xf32>
    %c0_675 = arith.constant 0 : index
    %c6_676 = arith.constant 6 : index
    %c3_677 = arith.constant 3 : index
    %c0_678 = arith.constant 0 : index
    %641 = vector.load %arg13[%c0_675, %c6_676, %c3_677, %c0_678] : memref<1x8x8x128xf32, #tpu.memory_space<vmem>>, vector<1x1x1x128xf32>
    %642 = vector.shape_cast %641 : vector<1x1x1x128xf32> to vector<128xf32>
    %643 = vector.shape_cast %640 : vector<128xf32> to vector<1x1x1x128xf32>
    tpu.vector_store %arg13[%c0_675, %c6_676, %c3_677, %c0_678], %643 {strides = array<i32>} : memref<1x8x8x128xf32, #tpu.memory_space<vmem>>, vector<1x1x1x128xf32>,
    %c0_679 = arith.constant 0 : index
    %c6_680 = arith.constant 6 : index
    %c4_681 = arith.constant 4 : index
    %c0_682 = arith.constant 0 : index
    %644 = vector.load %arg13[%c0_679, %c6_680, %c4_681, %c0_682] : memref<1x8x8x128xf32, #tpu.memory_space<vmem>>, vector<1x1x1x128xf32>
    %645 = vector.shape_cast %644 : vector<1x1x1x128xf32> to vector<128xf32>
    %c12_683 = arith.constant 12 : index
    %c8_684 = arith.constant 8 : index
    %c0_685 = arith.constant 0 : index
    %646 = vector.load %arg17[%c12_683, %c8_684, %c0_685] : memref<16x16x128xf32, #tpu.memory_space<vmem>>, vector<1x1x128xf32>
    %647 = vector.shape_cast %646 : vector<1x1x128xf32> to vector<128xf32>
    %648 = arith.addf %645, %647 : vector<128xf32>
    %c0_686 = arith.constant 0 : index
    %c6_687 = arith.constant 6 : index
    %c4_688 = arith.constant 4 : index
    %c0_689 = arith.constant 0 : index
    %649 = vector.load %arg13[%c0_686, %c6_687, %c4_688, %c0_689] : memref<1x8x8x128xf32, #tpu.memory_space<vmem>>, vector<1x1x1x128xf32>
    %650 = vector.shape_cast %649 : vector<1x1x1x128xf32> to vector<128xf32>
    %651 = vector.shape_cast %648 : vector<128xf32> to vector<1x1x1x128xf32>
    tpu.vector_store %arg13[%c0_686, %c6_687, %c4_688, %c0_689], %651 {strides = array<i32>} : memref<1x8x8x128xf32, #tpu.memory_space<vmem>>, vector<1x1x1x128xf32>,
    %c0_690 = arith.constant 0 : index
    %c6_691 = arith.constant 6 : index
    %c5_692 = arith.constant 5 : index
    %c0_693 = arith.constant 0 : index
    %652 = vector.load %arg13[%c0_690, %c6_691, %c5_692, %c0_693] : memref<1x8x8x128xf32, #tpu.memory_space<vmem>>, vector<1x1x1x128xf32>
    %653 = vector.shape_cast %652 : vector<1x1x1x128xf32> to vector<128xf32>
    %c12_694 = arith.constant 12 : index
    %c10_695 = arith.constant 10 : index
    %c0_696 = arith.constant 0 : index
    %654 = vector.load %arg17[%c12_694, %c10_695, %c0_696] : memref<16x16x128xf32, #tpu.memory_space<vmem>>, vector<1x1x128xf32>
    %655 = vector.shape_cast %654 : vector<1x1x128xf32> to vector<128xf32>
    %656 = arith.addf %653, %655 : vector<128xf32>
    %c0_697 = arith.constant 0 : index
    %c6_698 = arith.constant 6 : index
    %c5_699 = arith.constant 5 : index
    %c0_700 = arith.constant 0 : index
    %657 = vector.load %arg13[%c0_697, %c6_698, %c5_699, %c0_700] : memref<1x8x8x128xf32, #tpu.memory_space<vmem>>, vector<1x1x1x128xf32>
    %658 = vector.shape_cast %657 : vector<1x1x1x128xf32> to vector<128xf32>
    %659 = vector.shape_cast %656 : vector<128xf32> to vector<1x1x1x128xf32>
    tpu.vector_store %arg13[%c0_697, %c6_698, %c5_699, %c0_700], %659 {strides = array<i32>} : memref<1x8x8x128xf32, #tpu.memory_space<vmem>>, vector<1x1x1x128xf32>,
    %c0_701 = arith.constant 0 : index
    %c6_702 = arith.constant 6 : index
    %c6_703 = arith.constant 6 : index
    %c0_704 = arith.constant 0 : index
    %660 = vector.load %arg13[%c0_701, %c6_702, %c6_703, %c0_704] : memref<1x8x8x128xf32, #tpu.memory_space<vmem>>, vector<1x1x1x128xf32>
    %661 = vector.shape_cast %660 : vector<1x1x1x128xf32> to vector<128xf32>
    %c12_705 = arith.constant 12 : index
    %c12_706 = arith.constant 12 : index
    %c0_707 = arith.constant 0 : index
    %662 = vector.load %arg17[%c12_705, %c12_706, %c0_707] : memref<16x16x128xf32, #tpu.memory_space<vmem>>, vector<1x1x128xf32>
    %663 = vector.shape_cast %662 : vector<1x1x128xf32> to vector<128xf32>
    %664 = arith.addf %661, %663 : vector<128xf32>
    %c0_708 = arith.constant 0 : index
    %c6_709 = arith.constant 6 : index
    %c6_710 = arith.constant 6 : index
    %c0_711 = arith.constant 0 : index
    %665 = vector.load %arg13[%c0_708, %c6_709, %c6_710, %c0_711] : memref<1x8x8x128xf32, #tpu.memory_space<vmem>>, vector<1x1x1x128xf32>
    %666 = vector.shape_cast %665 : vector<1x1x1x128xf32> to vector<128xf32>
    %667 = vector.shape_cast %664 : vector<128xf32> to vector<1x1x1x128xf32>
    tpu.vector_store %arg13[%c0_708, %c6_709, %c6_710, %c0_711], %667 {strides = array<i32>} : memref<1x8x8x128xf32, #tpu.memory_space<vmem>>, vector<1x1x1x128xf32>,
    %c0_712 = arith.constant 0 : index
    %c6_713 = arith.constant 6 : index
    %c7_714 = arith.constant 7 : index
    %c0_715 = arith.constant 0 : index
    %668 = vector.load %arg13[%c0_712, %c6_713, %c7_714, %c0_715] : memref<1x8x8x128xf32, #tpu.memory_space<vmem>>, vector<1x1x1x128xf32>
    %669 = vector.shape_cast %668 : vector<1x1x1x128xf32> to vector<128xf32>
    %c12_716 = arith.constant 12 : index
    %c14_717 = arith.constant 14 : index
    %c0_718 = arith.constant 0 : index
    %670 = vector.load %arg17[%c12_716, %c14_717, %c0_718] : memref<16x16x128xf32, #tpu.memory_space<vmem>>, vector<1x1x128xf32>
    %671 = vector.shape_cast %670 : vector<1x1x128xf32> to vector<128xf32>
    %672 = arith.addf %669, %671 : vector<128xf32>
    %c0_719 = arith.constant 0 : index
    %c6_720 = arith.constant 6 : index
    %c7_721 = arith.constant 7 : index
    %c0_722 = arith.constant 0 : index
    %673 = vector.load %arg13[%c0_719, %c6_720, %c7_721, %c0_722] : memref<1x8x8x128xf32, #tpu.memory_space<vmem>>, vector<1x1x1x128xf32>
    %674 = vector.shape_cast %673 : vector<1x1x1x128xf32> to vector<128xf32>
    %675 = vector.shape_cast %672 : vector<128xf32> to vector<1x1x1x128xf32>
    tpu.vector_store %arg13[%c0_719, %c6_720, %c7_721, %c0_722], %675 {strides = array<i32>} : memref<1x8x8x128xf32, #tpu.memory_space<vmem>>, vector<1x1x1x128xf32>,
    %c0_723 = arith.constant 0 : index
    %c7_724 = arith.constant 7 : index
    %c0_725 = arith.constant 0 : index
    %c0_726 = arith.constant 0 : index
    %676 = vector.load %arg13[%c0_723, %c7_724, %c0_725, %c0_726] : memref<1x8x8x128xf32, #tpu.memory_space<vmem>>, vector<1x1x1x128xf32>
    %677 = vector.shape_cast %676 : vector<1x1x1x128xf32> to vector<128xf32>
    %c14_727 = arith.constant 14 : index
    %c0_728 = arith.constant 0 : index
    %c0_729 = arith.constant 0 : index
    %678 = vector.load %arg17[%c14_727, %c0_728, %c0_729] : memref<16x16x128xf32, #tpu.memory_space<vmem>>, vector<1x1x128xf32>
    %679 = vector.shape_cast %678 : vector<1x1x128xf32> to vector<128xf32>
    %680 = arith.addf %677, %679 : vector<128xf32>
    %c0_730 = arith.constant 0 : index
    %c7_731 = arith.constant 7 : index
    %c0_732 = arith.constant 0 : index
    %c0_733 = arith.constant 0 : index
    %681 = vector.load %arg13[%c0_730, %c7_731, %c0_732, %c0_733] : memref<1x8x8x128xf32, #tpu.memory_space<vmem>>, vector<1x1x1x128xf32>
    %682 = vector.shape_cast %681 : vector<1x1x1x128xf32> to vector<128xf32>
    %683 = vector.shape_cast %680 : vector<128xf32> to vector<1x1x1x128xf32>
    tpu.vector_store %arg13[%c0_730, %c7_731, %c0_732, %c0_733], %683 {strides = array<i32>} : memref<1x8x8x128xf32, #tpu.memory_space<vmem>>, vector<1x1x1x128xf32>,
    %c0_734 = arith.constant 0 : index
    %c7_735 = arith.constant 7 : index
    %c1_736 = arith.constant 1 : index
    %c0_737 = arith.constant 0 : index
    %684 = vector.load %arg13[%c0_734, %c7_735, %c1_736, %c0_737] : memref<1x8x8x128xf32, #tpu.memory_space<vmem>>, vector<1x1x1x128xf32>
    %685 = vector.shape_cast %684 : vector<1x1x1x128xf32> to vector<128xf32>
    %c14_738 = arith.constant 14 : index
    %c2_739 = arith.constant 2 : index
    %c0_740 = arith.constant 0 : index
    %686 = vector.load %arg17[%c14_738, %c2_739, %c0_740] : memref<16x16x128xf32, #tpu.memory_space<vmem>>, vector<1x1x128xf32>
    %687 = vector.shape_cast %686 : vector<1x1x128xf32> to vector<128xf32>
    %688 = arith.addf %685, %687 : vector<128xf32>
    %c0_741 = arith.constant 0 : index
    %c7_742 = arith.constant 7 : index
    %c1_743 = arith.constant 1 : index
    %c0_744 = arith.constant 0 : index
    %689 = vector.load %arg13[%c0_741, %c7_742, %c1_743, %c0_744] : memref<1x8x8x128xf32, #tpu.memory_space<vmem>>, vector<1x1x1x128xf32>
    %690 = vector.shape_cast %689 : vector<1x1x1x128xf32> to vector<128xf32>
    %691 = vector.shape_cast %688 : vector<128xf32> to vector<1x1x1x128xf32>
    tpu.vector_store %arg13[%c0_741, %c7_742, %c1_743, %c0_744], %691 {strides = array<i32>} : memref<1x8x8x128xf32, #tpu.memory_space<vmem>>, vector<1x1x1x128xf32>,
    %c0_745 = arith.constant 0 : index
    %c7_746 = arith.constant 7 : index
    %c2_747 = arith.constant 2 : index
    %c0_748 = arith.constant 0 : index
    %692 = vector.load %arg13[%c0_745, %c7_746, %c2_747, %c0_748] : memref<1x8x8x128xf32, #tpu.memory_space<vmem>>, vector<1x1x1x128xf32>
    %693 = vector.shape_cast %692 : vector<1x1x1x128xf32> to vector<128xf32>
    %c14_749 = arith.constant 14 : index
    %c4_750 = arith.constant 4 : index
    %c0_751 = arith.constant 0 : index
    %694 = vector.load %arg17[%c14_749, %c4_750, %c0_751] : memref<16x16x128xf32, #tpu.memory_space<vmem>>, vector<1x1x128xf32>
    %695 = vector.shape_cast %694 : vector<1x1x128xf32> to vector<128xf32>
    %696 = arith.addf %693, %695 : vector<128xf32>
    %c0_752 = arith.constant 0 : index
    %c7_753 = arith.constant 7 : index
    %c2_754 = arith.constant 2 : index
    %c0_755 = arith.constant 0 : index
    %697 = vector.load %arg13[%c0_752, %c7_753, %c2_754, %c0_755] : memref<1x8x8x128xf32, #tpu.memory_space<vmem>>, vector<1x1x1x128xf32>
    %698 = vector.shape_cast %697 : vector<1x1x1x128xf32> to vector<128xf32>
    %699 = vector.shape_cast %696 : vector<128xf32> to vector<1x1x1x128xf32>
    tpu.vector_store %arg13[%c0_752, %c7_753, %c2_754, %c0_755], %699 {strides = array<i32>} : memref<1x8x8x128xf32, #tpu.memory_space<vmem>>, vector<1x1x1x128xf32>,
    %c0_756 = arith.constant 0 : index
    %c7_757 = arith.constant 7 : index
    %c3_758 = arith.constant 3 : index
    %c0_759 = arith.constant 0 : index
    %700 = vector.load %arg13[%c0_756, %c7_757, %c3_758, %c0_759] : memref<1x8x8x128xf32, #tpu.memory_space<vmem>>, vector<1x1x1x128xf32>
    %701 = vector.shape_cast %700 : vector<1x1x1x128xf32> to vector<128xf32>
    %c14_760 = arith.constant 14 : index
    %c6_761 = arith.constant 6 : index
    %c0_762 = arith.constant 0 : index
    %702 = vector.load %arg17[%c14_760, %c6_761, %c0_762] : memref<16x16x128xf32, #tpu.memory_space<vmem>>, vector<1x1x128xf32>
    %703 = vector.shape_cast %702 : vector<1x1x128xf32> to vector<128xf32>
    %704 = arith.addf %701, %703 : vector<128xf32>
    %c0_763 = arith.constant 0 : index
    %c7_764 = arith.constant 7 : index
    %c3_765 = arith.constant 3 : index
    %c0_766 = arith.constant 0 : index
    %705 = vector.load %arg13[%c0_763, %c7_764, %c3_765, %c0_766] : memref<1x8x8x128xf32, #tpu.memory_space<vmem>>, vector<1x1x1x128xf32>
    %706 = vector.shape_cast %705 : vector<1x1x1x128xf32> to vector<128xf32>
    %707 = vector.shape_cast %704 : vector<128xf32> to vector<1x1x1x128xf32>
    tpu.vector_store %arg13[%c0_763, %c7_764, %c3_765, %c0_766], %707 {strides = array<i32>} : memref<1x8x8x128xf32, #tpu.memory_space<vmem>>, vector<1x1x1x128xf32>,
    %c0_767 = arith.constant 0 : index
    %c7_768 = arith.constant 7 : index
    %c4_769 = arith.constant 4 : index
    %c0_770 = arith.constant 0 : index
    %708 = vector.load %arg13[%c0_767, %c7_768, %c4_769, %c0_770] : memref<1x8x8x128xf32, #tpu.memory_space<vmem>>, vector<1x1x1x128xf32>
    %709 = vector.shape_cast %708 : vector<1x1x1x128xf32> to vector<128xf32>
    %c14_771 = arith.constant 14 : index
    %c8_772 = arith.constant 8 : index
    %c0_773 = arith.constant 0 : index
    %710 = vector.load %arg17[%c14_771, %c8_772, %c0_773] : memref<16x16x128xf32, #tpu.memory_space<vmem>>, vector<1x1x128xf32>
    %711 = vector.shape_cast %710 : vector<1x1x128xf32> to vector<128xf32>
    %712 = arith.addf %709, %711 : vector<128xf32>
    %c0_774 = arith.constant 0 : index
    %c7_775 = arith.constant 7 : index
    %c4_776 = arith.constant 4 : index
    %c0_777 = arith.constant 0 : index
    %713 = vector.load %arg13[%c0_774, %c7_775, %c4_776, %c0_777] : memref<1x8x8x128xf32, #tpu.memory_space<vmem>>, vector<1x1x1x128xf32>
    %714 = vector.shape_cast %713 : vector<1x1x1x128xf32> to vector<128xf32>
    %715 = vector.shape_cast %712 : vector<128xf32> to vector<1x1x1x128xf32>
    tpu.vector_store %arg13[%c0_774, %c7_775, %c4_776, %c0_777], %715 {strides = array<i32>} : memref<1x8x8x128xf32, #tpu.memory_space<vmem>>, vector<1x1x1x128xf32>,
    %c0_778 = arith.constant 0 : index
    %c7_779 = arith.constant 7 : index
    %c5_780 = arith.constant 5 : index
    %c0_781 = arith.constant 0 : index
    %716 = vector.load %arg13[%c0_778, %c7_779, %c5_780, %c0_781] : memref<1x8x8x128xf32, #tpu.memory_space<vmem>>, vector<1x1x1x128xf32>
    %717 = vector.shape_cast %716 : vector<1x1x1x128xf32> to vector<128xf32>
    %c14_782 = arith.constant 14 : index
    %c10_783 = arith.constant 10 : index
    %c0_784 = arith.constant 0 : index
    %718 = vector.load %arg17[%c14_782, %c10_783, %c0_784] : memref<16x16x128xf32, #tpu.memory_space<vmem>>, vector<1x1x128xf32>
    %719 = vector.shape_cast %718 : vector<1x1x128xf32> to vector<128xf32>
    %720 = arith.addf %717, %719 : vector<128xf32>
    %c0_785 = arith.constant 0 : index
    %c7_786 = arith.constant 7 : index
    %c5_787 = arith.constant 5 : index
    %c0_788 = arith.constant 0 : index
    %721 = vector.load %arg13[%c0_785, %c7_786, %c5_787, %c0_788] : memref<1x8x8x128xf32, #tpu.memory_space<vmem>>, vector<1x1x1x128xf32>
    %722 = vector.shape_cast %721 : vector<1x1x1x128xf32> to vector<128xf32>
    %723 = vector.shape_cast %720 : vector<128xf32> to vector<1x1x1x128xf32>
    tpu.vector_store %arg13[%c0_785, %c7_786, %c5_787, %c0_788], %723 {strides = array<i32>} : memref<1x8x8x128xf32, #tpu.memory_space<vmem>>, vector<1x1x1x128xf32>,
    %c0_789 = arith.constant 0 : index
    %c7_790 = arith.constant 7 : index
    %c6_791 = arith.constant 6 : index
    %c0_792 = arith.constant 0 : index
    %724 = vector.load %arg13[%c0_789, %c7_790, %c6_791, %c0_792] : memref<1x8x8x128xf32, #tpu.memory_space<vmem>>, vector<1x1x1x128xf32>
    %725 = vector.shape_cast %724 : vector<1x1x1x128xf32> to vector<128xf32>
    %c14_793 = arith.constant 14 : index
    %c12_794 = arith.constant 12 : index
    %c0_795 = arith.constant 0 : index
    %726 = vector.load %arg17[%c14_793, %c12_794, %c0_795] : memref<16x16x128xf32, #tpu.memory_space<vmem>>, vector<1x1x128xf32>
    %727 = vector.shape_cast %726 : vector<1x1x128xf32> to vector<128xf32>
    %728 = arith.addf %725, %727 : vector<128xf32>
    %c0_796 = arith.constant 0 : index
    %c7_797 = arith.constant 7 : index
    %c6_798 = arith.constant 6 : index
    %c0_799 = arith.constant 0 : index
    %729 = vector.load %arg13[%c0_796, %c7_797, %c6_798, %c0_799] : memref<1x8x8x128xf32, #tpu.memory_space<vmem>>, vector<1x1x1x128xf32>
    %730 = vector.shape_cast %729 : vector<1x1x1x128xf32> to vector<128xf32>
    %731 = vector.shape_cast %728 : vector<128xf32> to vector<1x1x1x128xf32>
    tpu.vector_store %arg13[%c0_796, %c7_797, %c6_798, %c0_799], %731 {strides = array<i32>} : memref<1x8x8x128xf32, #tpu.memory_space<vmem>>, vector<1x1x1x128xf32>,
    %c0_800 = arith.constant 0 : index
    %c7_801 = arith.constant 7 : index
    %c7_802 = arith.constant 7 : index
    %c0_803 = arith.constant 0 : index
    %732 = vector.load %arg13[%c0_800, %c7_801, %c7_802, %c0_803] : memref<1x8x8x128xf32, #tpu.memory_space<vmem>>, vector<1x1x1x128xf32>
    %733 = vector.shape_cast %732 : vector<1x1x1x128xf32> to vector<128xf32>
    %c14_804 = arith.constant 14 : index
    %c14_805 = arith.constant 14 : index
    %c0_806 = arith.constant 0 : index
    %734 = vector.load %arg17[%c14_804, %c14_805, %c0_806] : memref<16x16x128xf32, #tpu.memory_space<vmem>>, vector<1x1x128xf32>
    %735 = vector.shape_cast %734 : vector<1x1x128xf32> to vector<128xf32>
    %736 = arith.addf %733, %735 : vector<128xf32>
    %c0_807 = arith.constant 0 : index
    %c7_808 = arith.constant 7 : index
    %c7_809 = arith.constant 7 : index
    %c0_810 = arith.constant 0 : index
    %737 = vector.load %arg13[%c0_807, %c7_808, %c7_809, %c0_810] : memref<1x8x8x128xf32, #tpu.memory_space<vmem>>, vector<1x1x1x128xf32>
    %738 = vector.shape_cast %737 : vector<1x1x1x128xf32> to vector<128xf32>
    %739 = vector.shape_cast %736 : vector<128xf32> to vector<1x1x1x128xf32>
    tpu.vector_store %arg13[%c0_807, %c7_808, %c7_809, %c0_810], %739 {strides = array<i32>} : memref<1x8x8x128xf32, #tpu.memory_space<vmem>>, vector<1x1x1x128xf32>,
    return
  }
  func.func @transform_0(%arg0: i32) -> (i32, i32, i32, i32) {
    %c0_i32 = arith.constant 0 : i32
    %c0_i32_0 = arith.constant 0 : i32
    %c0_i32_1 = arith.constant 0 : i32
    %c0_i32_2 = arith.constant 0 : i32
    return %arg0, %c0_i32, %c0_i32_0, %c0_i32_1 : i32, i32, i32, i32
  }
  func.func @transform_1(%arg0: i32) -> (i32, i32, i32, i32) {
    %c0_i32 = arith.constant 0 : i32
    %c0_i32_0 = arith.constant 0 : i32
    %c0_i32_1 = arith.constant 0 : i32
    %c0_i32_2 = arith.constant 0 : i32
    return %arg0, %c0_i32, %c0_i32_0, %c0_i32_1 : i32, i32, i32, i32
  }
  func.func @transform_2(%arg0: i32) -> (i32, i32, i32) {
    %c0_i32 = arith.constant 0 : i32
    %c0_i32_0 = arith.constant 0 : i32
    %c0_i32_1 = arith.constant 0 : i32
    %c0_i32_2 = arith.constant 0 : i32
    return %c0_i32, %c0_i32_0, %c0_i32_1 : i32, i32, i32
  }
  func.func @transform_3(%arg0: i32) -> (i32, i32) {
    %c0_i32 = arith.constant 0 : i32
    %c0_i32_0 = arith.constant 0 : i32
    %c0_i32_1 = arith.constant 0 : i32
    return %c0_i32, %c0_i32_0 : i32, i32
  }
  func.func @transform_4(%arg0: i32) -> (i32, i32) {
    %c0_i32 = arith.constant 0 : i32
    %c0_i32_0 = arith.constant 0 : i32
    %c0_i32_1 = arith.constant 0 : i32
    return %c0_i32, %c0_i32_0 : i32, i32
  }
  func.func @transform_5(%arg0: i32) -> (i32, i32) {
    %c0_i32 = arith.constant 0 : i32
    %c0_i32_0 = arith.constant 0 : i32
    %c0_i32_1 = arith.constant 0 : i32
    return %c0_i32, %c0_i32_0 : i32, i32
  }
  func.func @transform_6(%arg0: i32) -> (i32, i32) {
    %c0_i32 = arith.constant 0 : i32
    %c0_i32_0 = arith.constant 0 : i32
    %c0_i32_1 = arith.constant 0 : i32
    return %c0_i32, %c0_i32_0 : i32, i32
  }
  func.func @transform_7(%arg0: i32) -> (i32, i32) {
    %c0_i32 = arith.constant 0 : i32
    %c0_i32_0 = arith.constant 0 : i32
    %c0_i32_1 = arith.constant 0 : i32
    return %c0_i32, %c0_i32_0 : i32, i32
  }
  func.func @transform_8(%arg0: i32) -> (i32, i32) {
    %c0_i32 = arith.constant 0 : i32
    %c0_i32_0 = arith.constant 0 : i32
    %c0_i32_1 = arith.constant 0 : i32
    return %c0_i32, %c0_i32_0 : i32, i32
  }
  func.func @transform_9(%arg0: i32) -> (i32, i32) {
    %c0_i32 = arith.constant 0 : i32
    %c0_i32_0 = arith.constant 0 : i32
    %c0_i32_1 = arith.constant 0 : i32
    return %c0_i32, %c0_i32_0 : i32, i32
  }
  func.func @transform_10(%arg0: i32) -> (i32, i32) {
    %c0_i32 = arith.constant 0 : i32
    %c0_i32_0 = arith.constant 0 : i32
    %c0_i32_1 = arith.constant 0 : i32
    return %c0_i32, %c0_i32_0 : i32, i32
  }
  func.func @transform_11(%arg0: i32) -> (i32, i32) {
    %c0_i32 = arith.constant 0 : i32
    %c0_i32_0 = arith.constant 0 : i32
    %c0_i32_1 = arith.constant 0 : i32
    return %c0_i32, %c0_i32_0 : i32, i32
  }
  func.func @transform_12(%arg0: i32) -> (i32, i32, i32, i32) {
    %c0_i32 = arith.constant 0 : i32
    %c0_i32_0 = arith.constant 0 : i32
    %c0_i32_1 = arith.constant 0 : i32
    %c0_i32_2 = arith.constant 0 : i32
    return %arg0, %c0_i32, %c0_i32_0, %c0_i32_1 : i32, i32, i32, i32
  }
}

</mosaic_0001>

<bundles_post_ra>
// kernel: block2_forward.1
= control target key start
LH: loop header
LB: loop body
LE: loop exit
PB: predicated region body
PF: predicated region fallthrough
CT: control target
= control target key end

     0   :  { %s10729_s0 = inlined_call_operand.vmem [shape: f32[2,16,16,4], index: 0, kind: input, shape index: {}]   ;;  %s10730_s1 = inlined_call_operand.vmem [shape: f32[2,8,8,4], index: 1, kind: input, shape index: {}]   ;;  %s10731_s2 = inlined_call_operand.vmem [shape: f32[9,4,128], index: 2, kind: input, shape index: {}]   ;;  %s10732_s3 = inlined_call_operand.vmem [shape: f32[1,128], index: 3, kind: input, shape index: {}]   ;;  %s10733_s4 = inlined_call_operand.vmem [shape: f32[1,128], index: 4, kind: input, shape index: {}]   ;;  %s10734_s5 = inlined_call_operand.vmem [shape: f32[9,128], index: 5, kind: input, shape index: {}]   ;;  %s10735_s6 = inlined_call_operand.vmem [shape: f32[128,128], index: 6, kind: input, shape index: {}]   ;;  %s10736_s7 = inlined_call_operand.vmem [shape: f32[1,128], index: 7, kind: input, shape index: {}]   ;;  %s10737_s8 = inlined_call_operand.vmem [shape: f32[1,128], index: 8, kind: input, shape index: {}]   ;;  %s10738_s9 = inlined_call_operand.vmem [shape: f32[4,128], index: 9, kind: input, shape index: {}]   ;;  %s10739_s10 = inlined_call_operand.vmem [shape: f32[1,128], index: 10, kind: input, shape index: {}]   ;;  %s10740_s11 = inlined_call_operand.vmem [shape: f32[1,128], index: 11, kind: input, shape index: {}]   ;;  %s10741_s12 = inlined_call_operand.hbm [shape: f32[2,8,8,128], index: 12, kind: output, shape index: {}]  }
   0x1   :  { %10773 = sst [smem:[#allocation26_spill]] %s10729_s0 }
   0x2   :  { %17 = vsyncpa [#allocation7], 0 }
   0x3   :  { %19 = vsyncpa [#allocation7 + $0x1], 0  ;;  %s7607_s21 = smov 0   ;;  %s7609_s22 = smov 0  }
   0x4   :  { %s7611_s23 = smov 0   ;;  %s7613_s24 = smov 0  }
   0x5 LB: > { %s7628_s25 = sadd.s32 4294967295, %s7535_s24   ;;  %s6290_s26 = sadd.s32 4294967294, %s7535_s24   ;;  %s7535_s24 = sphi %s7613_s24, %s10857_s24   ;;  %s7531_s23 = sphi %s7611_s23, %s10856_s23   ;;  %s7527_s22 = sphi %s7609_s22, %s10855_s22   ;;  %s7523_s21 = sphi %s7607_s21, %s10854_s21  }
   0x6   : > { %s7632_s27 = sadd.s32 1, %s7535_s24   ;;  %s294_s28 = sadd.s32 1, %s7531_s23 }
   0x7   : > { %s291_s29 = ssub.s32 %s7535_s24, %s7632_s27  ;;  %p304_p0 = scmp.ne.s32.totalorder %s7531_s23, %s7527_s22 }
   0x8   : > { %p292_p1 = scmp.eq.s32.totalorder %s291_s29, 0  ;;  %p305_p2 = scmp.eq.s32.totalorder %s7628_s25, 1 }
   0x9   : > { %p310_p3 = scmp.ne.s32.totalorder %s7527_s22, %s7523_s21  ;;  %p311_p4 = scmp.eq.s32.totalorder %s6290_s26, 1 }
   0xa   : > { %s7643_s30 = scalar_select %p292_p1, %s7531_s23, %s294_s28  }
   0xb   : > { %p7645_p5 = por %p305_p2, %p304_p0  ;;  %p7649_p6 = por %p311_p4, %p310_p3 }
   0xc   : > { %p6293_p7 = scmp.ge.s32.totalorder %s7535_s24, 1  ;;  %p375_p8 = scmp.lt.s32.totalorder %s7535_s24, 3 }
   0xe   : > { %p376_p9 = pnand %p6293_p7, %p375_p8 }
  0x10   : > { %379 = sbr.rel (%p376_p9) target bundleno = 1205 (0x4b5), region = 68 }
  0x17   : > { %v6299_v0 = vld [vmem:[%s10731_s2 + $0xc] sm:$0xf]  ;;  %vm677_vm0 = vcmask 1041408   ;;  %v6349_v1 = vld [vmem:[%s10731_s2 + $0x4] sm:$0xf]  ;;  %p422_p10 = scmp.lt.s32.totalorder %s7628_s25, 1 }
  0x18   : > { %v7662_v2 = vpack.c.bf16 %v6299_v0, %v6299_v0  ;;  %v7664_v3 = vpack.c.bf16 %v6349_v1, %v6349_v1  ;;  %vm433_vm1 = vcmask 31744   ;;  %v7669_v4 = vld [vmem:[%s10731_s2 + $0x10] sm:$0xf]  ;;  %v7537_v5 = vmov 0.0   ;;  %v623_v7 = vld [vmem:[%s10731_s2] sm:$0xf] }
  0x19   : > { %s7672_s26 = scalar_select %p422_p10, %s7628_s25, 1  ;;  %437 = vst.msk [vmem:[#allocation2 + $0x18] sm:$0xff] %vm433_vm1, %v7537_v5  ;;  %438 = vst.msk [vmem:[#allocation2 + $0x20] sm:$0xff] %vm433_vm1, %v7537_v5  ;;  %v7833_v6 = vpack.c.bf16 %v7669_v4, %v7669_v4  ;;  %v7848_v10 = vpack.c.bf16 %v623_v7, %v623_v7  ;;  %vm1260_vm2 = vcmask 1046528   ;;  %vm2062_vm3 = vcmask 1045504  }
  0x1a   : > { %439 = vst.msk [vmem:[#allocation2 + $0x28] sm:$0xff] %vm433_vm1, %v7537_v5  ;;  %434 = vst.msk [vmem:[#allocation2] sm:$0xff] %vm433_vm1, %v7537_v5  ;;  %7394 = vmatprep.subr.msk.bf16.mxu1 %vm677_vm0, %v7662_v2  ;;  %v679_v8 = vsel %vm677_vm0, %v7662_v2, 0  ;;  %7397 = vmatprep.subr.msk.bf16.mxu0 %vm677_vm0, %v7664_v3  ;;  %v7846_v9 = vsel %vm677_vm0, %v7664_v3, 0  ;;  %s10777_s0 = sld [smem:[#allocation26_spill]]  ;;  %s6589_s29 = sshll.u32 %s7628_s25, 10 }
  0x1b   : > { %435 = vst.msk [vmem:[#allocation2 + $0x8] sm:$0xff] %vm433_vm1, %v7537_v5  ;;  %436 = vst.msk [vmem:[#allocation2 + $0x10] sm:$0xff] %vm433_vm1, %v7537_v5  ;;  %6773 = vmatpush3.bf16.msra.mxu1 %v679_v8  ;;  %6875 = vmatpush3.bf16.msra.mxu0 %v7846_v9  ;;  %s6587_s15 = sshll.u32 %s7672_s26, 8  ;;  %v846_v54 = vsel %vm677_vm0, %v7848_v10, 0  ;;  %v6383_v60 = vld [vmem:[%s10731_s2 + $0x1c] sm:$0xf] }
  0x1c   : > { %440 = vst.msk [vmem:[#allocation2 + $0x30] sm:$0xff] %vm433_vm1, %v7537_v5  ;;  %441 = vst.msk [vmem:[#allocation2 + $0x38] sm:$0xff] %vm433_vm1, %v7537_v5  ;;  %7399 = vmatprep.subr.msk.bf16.mxu0 %vm677_vm0, %v7833_v6  ;;  %7395 = vmatprep.subr.msk.bf16.mxu1 %vm677_vm0, %v7848_v10  ;;  %v1862_v7 = vpack.c.bf16 %v6383_v60, %v6383_v60  ;;  %s6588_s28 = sshll.u32 %s7672_s26, 6  ;;  %s419_s26 = sand.u32 1, %s7527_s22  }
  0x1d   : > { %442 = vst.msk [vmem:[#allocation2 + $0x40] sm:$0xff] %vm433_vm1, %v7537_v5  ;;  %443 = vst.msk [vmem:[#allocation2 + $0x48] sm:$0xff] %vm433_vm1, %v7537_v5  ;;  %s10166_s17 = scalar_lea.vmem %s10730_s1, %s6588_s28  ;;  %s10688_s25 = scalar_lea.sflag [#allocation7], %s419_s26 }
  0x1e   : > { %444 = vst.msk [vmem:[#allocation2 + $0x50] sm:$0xff] %vm433_vm1, %v7537_v5  ;;  %445 = vst.msk [vmem:[#allocation2 + $0x58] sm:$0xff] %vm433_vm1, %v7537_v5  ;;  %s7539_s20 = smov [#allocation6]  }
  0x1f   : > { %446 = vst.msk [vmem:[#allocation2 + $0x60] sm:$0xff] %vm433_vm1, %v7537_v5  ;;  %447 = vst.msk [vmem:[#allocation2 + $0x68] sm:$0xff] %vm433_vm1, %v7537_v5 }
  0x20   : > { %448 = vst.msk [vmem:[#allocation2 + $0x70] sm:$0xff] %vm433_vm1, %v7537_v5  ;;  %449 = vst.msk [vmem:[#allocation2 + $0x78] sm:$0xff] %vm433_vm1, %v7537_v5  ;;  %s7855_s18 = scalar_lea.vmem %s10777_s0, %s6587_s15 }
  0x21   : > { %450 = vst.msk [vmem:[#allocation2 + $0x80] sm:$0xff] %vm433_vm1, %v7537_v5  ;;  %451 = vst.msk [vmem:[#allocation2 + $0x88] sm:$0xff] %vm433_vm1, %v7537_v5  ;;  %v488_v11 = vld [vmem:[%s7855_s18] sm:$0xff]  ;;  %v489_v12 = vld [vmem:[%s7855_s18 + $0x8] sm:$0xff] }
  0x22   : > { %452 = vst.msk [vmem:[#allocation2 + $0x90] sm:$0xff] %vm433_vm1, %v7537_v5  ;;  %453 = vst.msk [vmem:[#allocation2 + $0x98] sm:$0xff] %vm433_vm1, %v7537_v5  ;;  %v490_v13 = vld [vmem:[%s7855_s18 + $0x10] sm:$0xff]  ;;  %v491_v14 = vld [vmem:[%s7855_s18 + $0x18] sm:$0xff] }
  0x23   : > { %454 = vst.msk [vmem:[#allocation2 + $0xa0] sm:$0xff] %vm433_vm1, %v7537_v5  ;;  %455 = vst.msk [vmem:[#allocation2 + $0xa8] sm:$0xff] %vm433_vm1, %v7537_v5  ;;  %v492_v15 = vld [vmem:[%s7855_s18 + $0x20] sm:$0xff]  ;;  %v493_v16 = vld [vmem:[%s7855_s18 + $0x28] sm:$0xff] }
  0x24   : > { %456 = vst.msk [vmem:[#allocation2 + $0xb0] sm:$0xff] %vm433_vm1, %v7537_v5  ;;  %457 = vst.msk [vmem:[#allocation2 + $0xb8] sm:$0xff] %vm433_vm1, %v7537_v5  ;;  %v494_v17 = vld [vmem:[%s7855_s18 + $0x30] sm:$0xff]  ;;  %v495_v18 = vld [vmem:[%s7855_s18 + $0x38] sm:$0xff] }
  0x25   : > { %458 = vst.msk [vmem:[#allocation2 + $0xc0] sm:$0xff] %vm433_vm1, %v7537_v5  ;;  %459 = vst.msk [vmem:[#allocation2 + $0xc8] sm:$0xff] %vm433_vm1, %v7537_v5  ;;  %v496_v19 = vld [vmem:[%s7855_s18 + $0x40] sm:$0xff]  ;;  %v7878_v21 = vld [vmem:[#allocation2 + $0x8] sm:$0xff] }
  0x26   : > { %460 = vst.msk [vmem:[#allocation2 + $0xd0] sm:$0xff] %vm433_vm1, %v7537_v5  ;;  %461 = vst.msk [vmem:[#allocation2 + $0xd8] sm:$0xff] %vm433_vm1, %v7537_v5  ;;  %v7876_v20 = vld [vmem:[#allocation2] sm:$0xff]  ;;  %v7880_v22 = vld [vmem:[#allocation2 + $0x10] sm:$0xff]  ;;  %v1262_v24 = vrot.slane %v7878_v21, 1 }
  0x27   : > { %462 = vst.msk [vmem:[#allocation2 + $0xe0] sm:$0xff] %vm433_vm1, %v7537_v5  ;;  %463 = vst.msk [vmem:[#allocation2 + $0xe8] sm:$0xff] %vm433_vm1, %v7537_v5  ;;  %v1261_v23 = vrot.slane %v7876_v20, 1  ;;  %v1264_v25 = vrot.slane %v7880_v22, 1  ;;  %v497_v26 = vld [vmem:[%s7855_s18 + $0x48] sm:$0xff]  ;;  %v498_v27 = vld [vmem:[%s7855_s18 + $0x50] sm:$0xff] }
  0x28   : > { %464 = vst.msk [vmem:[#allocation2 + $0xf0] sm:$0xff] %vm433_vm1, %v7537_v5  ;;  %465 = vst.msk [vmem:[#allocation2 + $0xf8] sm:$0xff] %vm433_vm1, %v7537_v5  ;;  %v499_v28 = vld [vmem:[%s7855_s18 + $0x58] sm:$0xff]  ;;  %v500_v29 = vld [vmem:[%s7855_s18 + $0x60] sm:$0xff] }
  0x29   : > { %466 = vst.msk [vmem:[#allocation2 + $0x100] sm:$0xff] %vm433_vm1, %v7537_v5  ;;  %467 = vst.msk [vmem:[#allocation2 + $0x108] sm:$0xff] %vm433_vm1, %v7537_v5  ;;  %v501_v30 = vld [vmem:[%s7855_s18 + $0x68] sm:$0xff]  ;;  %v1263_v31 = vsel %vm1260_vm2, %v1261_v23, %v1262_v24  ;;  %v1265_v32 = vsel %vm1260_vm2, %v1262_v24, %v1264_v25  ;;  %v502_v33 = vld [vmem:[%s7855_s18 + $0x70] sm:$0xff] }
  0x2a   : > { %468 = vst.msk [vmem:[#allocation2 + $0x110] sm:$0xff] %vm433_vm1, %v7537_v5  ;;  %469 = vst.msk [vmem:[#allocation2 + $0x118] sm:$0xff] %vm433_vm1, %v7537_v5  ;;  %v503_v34 = vld [vmem:[%s7855_s18 + $0x78] sm:$0xff]  ;;  %v504_v35 = vld [vmem:[%s7855_s18 + $0x80] sm:$0xff]  ;;  %v1373_v36 = vpack.c.bf16 %v1265_v32, %v1263_v31 }
  0x2b   : > { %470 = vst.msk [vmem:[#allocation2 + $0x120] sm:$0xff] %vm433_vm1, %v7537_v5  ;;  %471 = vst.msk [vmem:[#allocation2 + $0x128] sm:$0xff] %vm433_vm1, %v7537_v5  ;;  %v505_v37 = vld [vmem:[%s7855_s18 + $0x88] sm:$0xff]  ;;  %v506_v38 = vld [vmem:[%s7855_s18 + $0x90] sm:$0xff] }
  0x2c   : > { %472 = vst.msk [vmem:[#allocation2 + $0x130] sm:$0xff] %vm433_vm1, %v7537_v5  ;;  %473 = vst.msk [vmem:[#allocation2 + $0x138] sm:$0xff] %vm433_vm1, %v7537_v5  ;;  %v507_v39 = vld [vmem:[%s7855_s18 + $0x98] sm:$0xff]  ;;  %6876 = vmatprep.mubr.msk.bf16.mxu0 %vm433_vm1, %v1373_v36  ;;  %v516_v31 = vld [vmem:[%s7855_s18 + $0xe0] sm:$0xff] }
  0x2d   : > { %474 = vst.msk [vmem:[#allocation2 + $0x140] sm:$0xff] %vm433_vm1, %v7537_v5  ;;  %475 = vst.msk [vmem:[#allocation2 + $0x148] sm:$0xff] %vm433_vm1, %v7537_v5  ;;  %v517_v32 = vld [vmem:[%s7855_s18 + $0xe8] sm:$0xff] }
  0x2e   : > { %476 = vst.msk [vmem:[#allocation2 + $0x150] sm:$0xff] %vm433_vm1, %v7537_v5  ;;  %477 = vst.msk [vmem:[#allocation2 + $0x158] sm:$0xff] %vm433_vm1, %v7537_v5 }
  0x2f   : > { %478 = vst.msk [vmem:[#allocation2 + $0x160] sm:$0xff] %vm433_vm1, %v7537_v5  ;;  %479 = vst.msk [vmem:[#allocation2 + $0x168] sm:$0xff] %vm433_vm1, %v7537_v5 }
  0x30   : > { %480 = vst.msk [vmem:[#allocation2 + $0x170] sm:$0xff] %vm433_vm1, %v7537_v5  ;;  %481 = vst.msk [vmem:[#allocation2 + $0x178] sm:$0xff] %vm433_vm1, %v7537_v5 }
  0x31   : > { %482 = vst.msk [vmem:[#allocation2 + $0x180] sm:$0xff] %vm433_vm1, %v7537_v5  ;;  %483 = vst.msk [vmem:[#allocation2 + $0x188] sm:$0xff] %vm433_vm1, %v7537_v5 }
  0x32   : > { %484 = vst.msk [vmem:[#allocation2 + $0x190] sm:$0xff] %vm433_vm1, %v7537_v5  ;;  %485 = vst.msk [vmem:[#allocation2 + $0x198] sm:$0xff] %vm433_vm1, %v7537_v5 }
  0x33   : > { %486 = vst.msk [vmem:[#allocation2 + $0x1a0] sm:$0xff] %vm433_vm1, %v7537_v5  ;;  %487 = vst.msk [vmem:[#allocation2 + $0x1a8] sm:$0xff] %vm433_vm1, %v7537_v5 }
  0x34   : > { %2968 = vst [vmem:[#allocation3] sm:$0xff] %v7537_v5  ;;  %2971 = vst [vmem:[#allocation3 + $0x18] sm:$0xff] %v7537_v5 }
  0x35   : > { %2972 = vst [vmem:[#allocation3 + $0x20] sm:$0xff] %v7537_v5  ;;  %2973 = vst [vmem:[#allocation3 + $0x28] sm:$0xff] %v7537_v5 }
  0x36   : > { %2974 = vst [vmem:[#allocation3 + $0x30] sm:$0xff] %v7537_v5  ;;  %2975 = vst [vmem:[#allocation3 + $0x38] sm:$0xff] %v7537_v5 }
  0x37   : > { %2976 = vst [vmem:[#allocation3 + $0x40] sm:$0xff] %v7537_v5  ;;  %2977 = vst [vmem:[#allocation3 + $0x48] sm:$0xff] %v7537_v5 }
  0x38   : > { %2978 = vst [vmem:[#allocation3 + $0x50] sm:$0xff] %v7537_v5  ;;  %2979 = vst [vmem:[#allocation3 + $0x58] sm:$0xff] %v7537_v5 }
  0x39   : > { %2980 = vst [vmem:[#allocation3 + $0x60] sm:$0xff] %v7537_v5  ;;  %2981 = vst [vmem:[#allocation3 + $0x68] sm:$0xff] %v7537_v5 }
  0x3a   : > { %2982 = vst [vmem:[#allocation3 + $0x70] sm:$0xff] %v7537_v5  ;;  %2983 = vst [vmem:[#allocation3 + $0x78] sm:$0xff] %v7537_v5 }
  0x3b   : > { %2984 = vst [vmem:[#allocation3 + $0x80] sm:$0xff] %v7537_v5  ;;  %2985 = vst [vmem:[#allocation3 + $0x88] sm:$0xff] %v7537_v5 }
  0x3c   : > { %2986 = vst [vmem:[#allocation3 + $0x90] sm:$0xff] %v7537_v5  ;;  %2987 = vst [vmem:[#allocation3 + $0x98] sm:$0xff] %v7537_v5 }
  0x3d   : > { %2988 = vst [vmem:[#allocation3 + $0xa0] sm:$0xff] %v7537_v5  ;;  %2989 = vst [vmem:[#allocation3 + $0xa8] sm:$0xff] %v7537_v5 }
  0x3e   : > { %2990 = vst [vmem:[#allocation3 + $0xb0] sm:$0xff] %v7537_v5  ;;  %2991 = vst [vmem:[#allocation3 + $0xb8] sm:$0xff] %v7537_v5 }
  0x3f   : > { %2992 = vst [vmem:[#allocation3 + $0xc0] sm:$0xff] %v7537_v5  ;;  %2993 = vst [vmem:[#allocation3 + $0xc8] sm:$0xff] %v7537_v5 }
  0x40   : > { %2994 = vst [vmem:[#allocation3 + $0xd0] sm:$0xff] %v7537_v5  ;;  %2995 = vst [vmem:[#allocation3 + $0xd8] sm:$0xff] %v7537_v5 }
  0x41   : > { %2996 = vst [vmem:[#allocation3 + $0xe0] sm:$0xff] %v7537_v5  ;;  %2997 = vst [vmem:[#allocation3 + $0xe8] sm:$0xff] %v7537_v5 }
  0x42   : > { %2998 = vst [vmem:[#allocation3 + $0xf0] sm:$0xff] %v7537_v5  ;;  %2999 = vst [vmem:[#allocation3 + $0xf8] sm:$0xff] %v7537_v5 }
  0x43   : > { %3000 = vst [vmem:[#allocation3 + $0x100] sm:$0xff] %v7537_v5  ;;  %3001 = vst [vmem:[#allocation3 + $0x108] sm:$0xff] %v7537_v5 }
  0x44   : > { %3002 = vst [vmem:[#allocation3 + $0x110] sm:$0xff] %v7537_v5  ;;  %3003 = vst [vmem:[#allocation3 + $0x118] sm:$0xff] %v7537_v5 }
  0x45   : > { %3004 = vst [vmem:[#allocation3 + $0x120] sm:$0xff] %v7537_v5  ;;  %3005 = vst [vmem:[#allocation3 + $0x128] sm:$0xff] %v7537_v5 }
  0x46   : > { %3006 = vst [vmem:[#allocation3 + $0x130] sm:$0xff] %v7537_v5  ;;  %3007 = vst [vmem:[#allocation3 + $0x138] sm:$0xff] %v7537_v5 }
  0x47   : > { %3008 = vst [vmem:[#allocation3 + $0x140] sm:$0xff] %v7537_v5  ;;  %3009 = vst [vmem:[#allocation3 + $0x148] sm:$0xff] %v7537_v5 }
  0x48   : > { %3010 = vst [vmem:[#allocation3 + $0x150] sm:$0xff] %v7537_v5  ;;  %3011 = vst [vmem:[#allocation3 + $0x158] sm:$0xff] %v7537_v5 }
  0x49   : > { %3012 = vst [vmem:[#allocation3 + $0x160] sm:$0xff] %v7537_v5  ;;  %3013 = vst [vmem:[#allocation3 + $0x168] sm:$0xff] %v7537_v5 }
  0x4a   : > { %3014 = vst [vmem:[#allocation3 + $0x170] sm:$0xff] %v7537_v5  ;;  %3015 = vst [vmem:[#allocation3 + $0x178] sm:$0xff] %v7537_v5 }
  0x4b   : > { %3016 = vst [vmem:[#allocation3 + $0x180] sm:$0xff] %v7537_v5  ;;  %3017 = vst [vmem:[#allocation3 + $0x188] sm:$0xff] %v7537_v5 }
  0x4c   : > { %3018 = vst [vmem:[#allocation3 + $0x190] sm:$0xff] %v7537_v5  ;;  %10776 = vst [vmem:[#allocation9_spill] sm:$0xff] %v7846_v9  ;;  %v1654_v5 = vsel %vm677_vm0, %v7833_v6, 0 }
  0x4d   : > { %521 = vst.msk [vmem:[#allocation2 + $0x19] sm:$0xff] %vm433_vm1, %v488_v11  ;;  %522 = vst.msk [vmem:[#allocation2 + $0x21] sm:$0xff] %vm433_vm1, %v489_v12 }
  0x4e   : > { %523 = vst.msk [vmem:[#allocation2 + $0x31] sm:$0xff] %vm433_vm1, %v490_v13  ;;  %524 = vst.msk [vmem:[#allocation2 + $0x39] sm:$0xff] %vm433_vm1, %v491_v14  ;;  %v508_v13 = vld [vmem:[%s7855_s18 + $0xa0] sm:$0xff]  ;;  %v509_v14 = vld [vmem:[%s7855_s18 + $0xa8] sm:$0xff] }
  0x4f   : > { %525 = vst.msk [vmem:[#allocation2 + $0x49] sm:$0xff] %vm433_vm1, %v492_v15  ;;  %526 = vst.msk [vmem:[#allocation2 + $0x51] sm:$0xff] %vm433_vm1, %v493_v16 }
  0x50   : > { %527 = vst.msk [vmem:[#allocation2 + $0x61] sm:$0xff] %vm433_vm1, %v494_v17  ;;  %528 = vst.msk [vmem:[#allocation2 + $0x69] sm:$0xff] %vm433_vm1, %v495_v18  ;;  %v510_v17 = vld [vmem:[%s7855_s18 + $0xb0] sm:$0xff]  ;;  %v511_v18 = vld [vmem:[%s7855_s18 + $0xb8] sm:$0xff] }
  0x51   : > { %529 = vst.msk [vmem:[#allocation2 + $0x79] sm:$0xff] %vm433_vm1, %v496_v19  ;;  %530 = vst.msk [vmem:[#allocation2 + $0x81] sm:$0xff] %vm433_vm1, %v497_v26 }
  0x52   : > { %531 = vst.msk [vmem:[#allocation2 + $0x91] sm:$0xff] %vm433_vm1, %v498_v27  ;;  %532 = vst.msk [vmem:[#allocation2 + $0x99] sm:$0xff] %vm433_vm1, %v499_v28  ;;  %v512_v27 = vld [vmem:[%s7855_s18 + $0xc0] sm:$0xff]  ;;  %v513_v28 = vld [vmem:[%s7855_s18 + $0xc8] sm:$0xff] }
  0x53   : > { %533 = vst.msk [vmem:[#allocation2 + $0xa9] sm:$0xff] %vm433_vm1, %v500_v29  ;;  %534 = vst.msk [vmem:[#allocation2 + $0xb1] sm:$0xff] %vm433_vm1, %v501_v30  ;;  %v514_v29 = vld [vmem:[%s7855_s18 + $0xd0] sm:$0xff]  ;;  %v515_v30 = vld [vmem:[%s7855_s18 + $0xd8] sm:$0xff] }
  0x54   : > { %535 = vst.msk [vmem:[#allocation2 + $0xc1] sm:$0xff] %vm433_vm1, %v502_v33  ;;  %536 = vst.msk [vmem:[#allocation2 + $0xc9] sm:$0xff] %vm433_vm1, %v503_v34  ;;  %v556_v40 = vld [vmem:[#allocation2 + $0x18] sm:$0xff]  ;;  %v557_v41 = vld [vmem:[#allocation2 + $0x20] sm:$0xff] }
  0x55   : > { %537 = vst.msk [vmem:[#allocation2 + $0xd9] sm:$0xff] %vm433_vm1, %v504_v35  ;;  %v558_v42 = vld [vmem:[#allocation2 + $0x28] sm:$0xff]  ;;  %538 = vst.msk [vmem:[#allocation2 + $0xe1] sm:$0xff] %vm433_vm1, %v505_v37  ;;  %v7912_v43 = vpack.c.bf16 %v557_v41, %v556_v40  ;;  %v1266_v44 = vrot.slane %v556_v40, 1  ;;  %v1267_v45 = vrot.slane %v557_v41, 1  ;;  %v2068_v46 = vrot.slane %v556_v40, 2 }
  0x56   : > { %539 = vst.msk [vmem:[#allocation2 + $0xf1] sm:$0xff] %vm433_vm1, %v506_v38  ;;  %540 = vst.msk [vmem:[#allocation2 + $0xf9] sm:$0xff] %vm433_vm1, %v507_v39  ;;  %v7914_v47 = vld [vmem:[#allocation2 + $0x30] sm:$0xff]  ;;  %v7916_v48 = vld [vmem:[#allocation2 + $0x38] sm:$0xff]  ;;  %v2069_v50 = vrot.slane %v557_v41, 2  ;;  %v2071_v51 = vrot.slane %v558_v42, 2 }
  0x57   : > { %v7919_v49 = vld [vmem:[#allocation2 + $0x48] sm:$0xff]  ;;  %v7923_v52 = vpack.c.bf16 %v7916_v48, %v7914_v47  ;;  %v7925_v53 = vld [vmem:[#allocation2 + $0x50] sm:$0xff]  ;;  %6774 = vmatprep.mubr.msk.bf16.mxu1 %vm433_vm1, %v7912_v43  ;;  %v1268_v55 = vsel %vm1260_vm2, %v1266_v44, %v1267_v45  ;;  %v1269_v58 = vrot.slane %v558_v42, 1  ;;  %v7945_v62 = vld [vmem:[#allocation2 + $0x60] sm:$0xff]  ;;  %v1271_v6 = vrot.slane %v7914_v47, 1  ;;  %541 = vst.msk [vmem:[#allocation2 + $0x109] sm:$0xff] %vm433_vm1, %v508_v13 }
  0x58   : > { %v2070_v56 = vsel %vm2062_vm3, %v2068_v46, %v2069_v50  ;;  %v2072_v57 = vsel %vm2062_vm3, %v2069_v50, %v2071_v51  ;;  %v7938_v59 = vpack.c.bf16 %v7925_v53, %v7919_v49  ;;  %v7947_v63 = vld [vmem:[#allocation2 + $0x68] sm:$0xff]  ;;  %v7952_v1 = vld [vmem:[#allocation2 + $0x78] sm:$0xff]  ;;  %v7954_v2 = vld [vmem:[#allocation2 + $0x80] sm:$0xff]  ;;  %v1272_v15 = vrot.slane %v7916_v48, 1  ;;  %542 = vst.msk [vmem:[#allocation2 + $0x111] sm:$0xff] %vm433_vm1, %v509_v14 }
  0x59   : > { %6775 = vmatmul.mubr.msk.bf16.vlgmr.msra.gmra.mrb[0].mxu1 %vm433_vm1, %v7923_v52  ;;  %v7943_v61 = vpack.c.bf16 %v2072_v57, %v2070_v56  ;;  %v1270_v0 = vsel %vm1260_vm2, %v1267_v45, %v1269_v58  ;;  %v7958_v8 = vld [vmem:[#allocation2 + $0x40] sm:$0xff]  ;;  %v7962_v10 = vpack.c.bf16 %v7947_v63, %v7945_v62  ;;  %v7964_v11 = vld [vmem:[#allocation2 + $0x58] sm:$0xff]  ;;  %v7969_v12 = vpack.c.bf16 %v7954_v2, %v7952_v1  ;;  %v7984_v24 = vld [vmem:[#allocation2 + $0x90] sm:$0xff] }
  0x5a   : > { %6807 = vmatpush3.bf16.msra.mxu1 %v846_v54  ;;  %6778 = vmatprep.mubr.msk.bf16.mxu1 %vm433_vm1, %v7938_v59  ;;  %v1374_v4 = vpack.c.bf16 %v1270_v0, %v1268_v55  ;;  %v1274_v16 = vrot.slane %v7958_v8, 1  ;;  %v1276_v19 = vrot.slane %v7919_v49, 1  ;;  %v1277_v23 = vrot.slane %v7925_v53, 1  ;;  %v7986_v25 = vld [vmem:[#allocation2 + $0x98] sm:$0xff]  ;;  %543 = vst.msk [vmem:[#allocation2 + $0x121] sm:$0xff] %vm433_vm1, %v510_v17  ;;  %544 = vst.msk [vmem:[#allocation2 + $0x129] sm:$0xff] %vm433_vm1, %v511_v18 }
  0x5b   : > { %10778 = vst [vmem:[#allocation10_spill] sm:$0xff] %v7943_v61  ;;  %10779 = vst [vmem:[#allocation11_spill] sm:$0xff] %v7962_v10  ;;  %v1279_v26 = vrot.slane %v7964_v11, 1  ;;  %v518_v33 = vld [vmem:[%s7855_s18 + $0xf0] sm:$0xff]  ;;  %v519_v34 = vld [vmem:[%s7855_s18 + $0xf8] sm:$0xff]  ;;  %v1273_v35 = vsel %vm1260_vm2, %v1271_v6, %v1272_v15  ;;  %v8023_v42 = vpack.c.bf16 %v7986_v25, %v7984_v24  ;;  %v1867_v50 = vsel %vm677_vm0, %v1862_v7, 0 }
  0x5c   : > { %6877 = vmatmul.mubr.msk.bf16.vlgmr.msra.gmra.mrb[0].mxu0 %vm433_vm1, %v1374_v4  ;;  %10780 = vst [vmem:[#allocation12_spill] sm:$0xff] %v7969_v12  ;;  %545 = vst.msk [vmem:[#allocation2 + $0x139] sm:$0xff] %vm433_vm1, %v512_v27  ;;  %v1275_v36 = vsel %vm1260_vm2, %v1272_v15, %v1274_v16  ;;  %v8010_v37 = vld [vmem:[#allocation2 + $0xa8] sm:$0xff]  ;;  %v8012_v38 = vld [vmem:[#allocation2 + $0xb0] sm:$0xff]  ;;  %v1278_v39 = vsel %vm1260_vm2, %v1276_v19, %v1277_v23  ;;  %v1281_v54 = vrot.slane %v7945_v62, 1  ;;  %v1282_v55 = vrot.slane %v7947_v63, 1 }
  0x5d   : > { %6909 = vmatpush3.bf16.msra.mxu0 %v1654_v5  ;;  %6910 = vmatprep.mubr.msk.bf16.mxu0 %vm433_vm1, %v1374_v4  ;;  %546 = vst.msk [vmem:[#allocation2 + $0x141] sm:$0xff] %vm433_vm1, %v513_v28  ;;  %547 = vst.msk [vmem:[#allocation2 + $0x151] sm:$0xff] %vm433_vm1, %v514_v29  ;;  %v1280_v40 = vsel %vm1260_vm2, %v1277_v23, %v1279_v26  ;;  %v8019_v41 = vld [vmem:[#allocation2 + $0x70] sm:$0xff]  ;;  %v8025_v44 = vld [vmem:[#allocation2 + $0x88] sm:$0xff]  ;;  %v8030_v46 = vpack.c.bf16 %v1275_v36, %v1273_v35  ;;  %v1286_v58 = vrot.slane %v7952_v1, 1  ;;  %s6294_s18 = sshll.u32 %s419_s26, 6 }
  0x5e   : > { %7400 = vmatprep.subr.msk.bf16.mxu0 %vm677_vm0, %v1862_v7  ;;  %548 = vst.msk [vmem:[#allocation2 + $0x159] sm:$0xff] %vm433_vm1, %v515_v30  ;;  %549 = vst.msk [vmem:[#allocation2 + $0x169] sm:$0xff] %vm433_vm1, %v516_v31  ;;  %v6400_v45 = vld [vmem:[%s10731_s2 + $0x8] sm:$0xf]  ;;  %v8035_v51 = vpack.c.bf16 %v8012_v38, %v8010_v37  ;;  %v8039_v56 = vpack.c.bf16 %v1280_v40, %v1278_v39  ;;  %v1284_v57 = vrot.slane %v8019_v41, 1  ;;  %v1287_v60 = vrot.slane %v7954_v2, 1 }
  0x5f   : > { %550 = vst.msk [vmem:[#allocation2 + $0x171] sm:$0xff] %vm433_vm1, %v517_v32  ;;  %551 = vst.msk [vmem:[#allocation2 + $0x181] sm:$0xff] %vm433_vm1, %v518_v33  ;;  %v1289_v0 = vrot.slane %v8025_v44, 1  ;;  %v8045_v4 = vpack.c.bf16 %v6400_v45, %v6400_v45  ;;  %v8053_v5 = vld [vmem:[#allocation2 + $0xc0] sm:$0xff]  ;;  %v8055_v7 = vld [vmem:[#allocation2 + $0xc8] sm:$0xff]  ;;  %v1283_v13 = vsel %vm1260_vm2, %v1281_v54, %v1282_v55  ;;  %v1291_v33 = vrot.slane %v7984_v24, 1 }
  0x60   : > { %552 = vst.msk [vmem:[#allocation2 + $0x189] sm:$0xff] %vm433_vm1, %v519_v34  ;;  %10781 = vst [vmem:[#allocation13_spill] sm:$0xff] %v8023_v42  ;;  %v1285_v14 = vsel %vm1260_vm2, %v1282_v55, %v1284_v57  ;;  %v8061_v6 = vld [vmem:[#allocation2 + $0xd8] sm:$0xff]  ;;  %v8063_v15 = vld [vmem:[#allocation2 + $0xe0] sm:$0xff]  ;;  %v1288_v16 = vsel %vm1260_vm2, %v1286_v58, %v1287_v60  ;;  %v8076_v27 = vpack.c.bf16 %v8055_v7, %v8053_v5  ;;  %v1292_v34 = vrot.slane %v7986_v25, 1  ;;  %s10492_s28 = scalar_lea.vmem [#allocation6], %s6294_s18  ;;  %s10672_s18 = scalar_lea.hbm %s10741_s12, %s6589_s29 }
  0x61   : > { %6779 = vmatmul.mubr.msk.bf16.gmra.mrb[4].mxu1 %vm433_vm1, %v7962_v10  ;;  %10782 = vst [vmem:[#allocation14_spill] sm:$0xff] %v8030_v46  ;;  %10783 = vst [vmem:[#allocation15_spill] sm:$0xff] %v8035_v51  ;;  %v1290_v17 = vsel %vm1260_vm2, %v1287_v60, %v1289_v0  ;;  %v8067_v18 = vld [vmem:[#allocation2 + $0xa0] sm:$0xff]  ;;  %v8078_v28 = vld [vmem:[#allocation2 + $0xb8] sm:$0xff]  ;;  %v8082_v31 = vpack.c.bf16 %v1285_v14, %v1283_v13  ;;  %v8086_v32 = vpack.c.bf16 %v8063_v15, %v8061_v6  ;;  %s6216_s15 = sshll.u32 %s10492_s28, 4  ;;  %s7477_s29 = sshll.u32 %s7539_s20, 4  ;;  %s10676_s15 = int_to_ptr.vmem [resolvable:$true] %s6216_s15  ;;  %s7478_s29 = int_to_ptr.vmem [resolvable:$false] %s7477_s29 }
  0x62   : > { %6782 = vmatprep.mubr.msk.bf16.mxu1 %vm433_vm1, %v7969_v12  ;;  %10784 = vst [vmem:[#allocation16_spill] sm:$0xff] %v8039_v56  ;;  %10785 = vst [vmem:[#allocation17_spill] sm:$0xff] %v8045_v4  ;;  %v8090_v35 = vpack.c.bf16 %v1290_v17, %v1288_v16  ;;  %v1294_v36 = vrot.slane %v8067_v18, 1  ;;  %v1296_v40 = vrot.slane %v8010_v37, 1  ;;  %v1297_v45 = vrot.slane %v8012_v38, 1  ;;  %v8103_v60 = vld [vmem:[#allocation2 + $0xd0] sm:$0xff]  ;;  %p7480_p0 = scmp.lt.s32.totalorder %s10676_s15, %s7478_s29 }
  0x63   : > { %10786 = vst [vmem:[#allocation18_spill] sm:$0xff] %v8076_v27  ;;  %10787 = vst [vmem:[#allocation19_spill] sm:$0xff] %v8082_v31  ;;  %v8113_v17 = vld [vmem:[#allocation2 + $0xf0] sm:$0xff]  ;;  %v8115_v58 = vld [vmem:[#allocation2 + $0xf8] sm:$0xff]  ;;  %v1301_v0 = vrot.slane %v8053_v5, 1  ;;  %v1293_v13 = vsel %vm1260_vm2, %v1291_v33, %v1292_v34  ;;  %v1302_v54 = vrot.slane %v8055_v7, 1 }
  0x64   : > { %10788 = vst [vmem:[#allocation20_spill] sm:$0xff] %v8086_v32  ;;  %10789 = vst [vmem:[#allocation21_spill] sm:$0xff] %v8090_v35  ;;  %v1295_v14 = vsel %vm1260_vm2, %v1292_v34, %v1294_v36  ;;  %v8123_v57 = vld [vmem:[#allocation2 + $0x108] sm:$0xff]  ;;  %v8125_v16 = vld [vmem:[#allocation2 + $0x110] sm:$0xff]  ;;  %v1298_v29 = vsel %vm1260_vm2, %v1296_v40, %v1297_v45  ;;  %v1304_v30 = vrot.slane %v8103_v60, 1  ;;  %v1306_v34 = vrot.slane %v8061_v6, 1 }
  0x65   : > { %v8127_v39 = vld [vmem:[#allocation2 + $0xe8] sm:$0xff]  ;;  %v8138_v36 = vpack.c.bf16 %v8115_v58, %v8113_v17  ;;  %v8140_v19 = vpack.c.bf16 %v1295_v14, %v1293_v13  ;;  %v1307_v23 = vrot.slane %v8063_v15, 1  ;;  %v8145_v40 = vpack.c.bf16 %v8125_v16, %v8123_v57  ;;  %v6332_v26 = vld [vmem:[%s10731_s2 + $0x18] sm:$0xf]  ;;  %s7473_s19 = scalar_lea.vmem %s10676_s15, 1024  ;;  %s7479_s16 = scalar_lea.vmem %s7478_s29, 2048 }
  0x66   : > { %v1311_v13 = vrot.slane %v8113_v17, 1  ;;  %v1312_v9 = vrot.slane %v8115_v58, 1  ;;  %v10799_v10 = vrot.slane %v7914_v47, 2  ;;  %v10803_v47 = vrot.slane %v7945_v62, 2  ;;  %p7474_p11 = scmp.ne.s32.totalorder %s10676_s15, %s7473_s19  ;;  %p7481_p1 = scmp.lt.s32.totalorder %s7479_s16, %s7473_s19 }
  0x67   : > { %10790 = vst [vmem:[#allocation22_spill] sm:$0xff] %v8138_v36  ;;  %10791 = vst [vmem:[#allocation23_spill] sm:$0xff] %v8140_v19  ;;  %v1308_v61 = vsel %vm1260_vm2, %v1306_v34, %v1307_v23  ;;  %v2091_v62 = vrot.slane %v8025_v44, 2  ;;  %v8276_v44 = vld [vmem:[#allocation2 + $0x158] sm:$0xff] }
  0x68   : > { %6911 = vmatmul.mubr.msk.bf16.vlgmr.msra.gmra.mrb[0].mxu0 %vm433_vm1, %v8030_v46  ;;  %10792 = vst [vmem:[#allocation24_spill] sm:$0xff] %v8145_v40  ;;  %v1313_v34 = vsel %vm1260_vm2, %v1311_v13, %v1312_v9  ;;  %v10798_v46 = vrot.slane %v7916_v48, 2  ;;  %p7475_p12 = pnand %p7474_p11, %p7645_p5  ;;  %p7482_p2 = por %p7481_p1, %p7480_p0 }
  0x69   : > { %6783 = vmatmul.mubr.msk.bf16.gmra.mrb[8].mxu1 %vm433_vm1, %v8023_v42  ;;  %6943 = vmatpush3.bf16.msra.mxu0 %v1867_v50  ;;  %v1299_v50 = vrot.slane %v8078_v28, 1  ;;  %v8166_v42 = vld [vmem:[#allocation2 + $0x118] sm:$0xff] }
  0x6a   : > { %6786 = vmatprep.mubr.msk.bf16.mxu1 %vm433_vm1, %v8035_v51  ;;  %6914 = vmatprep.mubr.msk.bf16.mxu0 %vm433_vm1, %v8039_v56  ;;  %v8162_v51 = vld [vmem:[#allocation2 + $0x120] sm:$0xff]  ;;  %p7476_p13 = pneg %p7475_p12 }
  0x6b   : > { %7401 = vmatprep.subr.msk.bf16.mxu0 %vm677_vm0, %v8045_v4  ;;  %v1300_v55 = vsel %vm1260_vm2, %v1297_v45, %v1299_v50  ;;  %v1309_v45 = vrot.slane %v8127_v39, 1  ;;  %v8148_v50 = vld [vmem:[#allocation2 + $0x100] sm:$0xff] }
  0x6c   : > { %v8156_v14 = vpack.c.bf16 %v1300_v55, %v1298_v29  ;;  %v1316_v55 = vrot.slane %v8123_v57, 1  ;;  %v1314_v33 = vrot.slane %v8148_v50, 1  ;;  %v10796_v29 = vrot.slane %v7880_v22, 2  ;;  %p7483_p3 = pnand %p7482_p2, %p7476_p13 }
  0x6e   : > { %10793 = vst [vmem:[#allocation25_spill] sm:$0xff] %v8156_v14  ;;  %v1315_v13 = vsel %vm1260_vm2, %v1312_v9, %v1314_v33  ;;  %v2081_v9 = vrot.slane %v7964_v11, 2 }
  0x70   : > { %6915 = vmatmul.mubr.msk.bf16.gmra.mrb[4].mxu0 %vm433_vm1, %v8082_v31  ;;  %v8164_v31 = vld [vmem:[#allocation2 + $0x128] sm:$0xff] }
  0x71   : > { %6787 = vmatmul.mubr.msk.bf16.gmra.mrb[12].mxu1 %vm433_vm1, %v8076_v27  ;;  %6918 = vmatprep.mubr.msk.bf16.mxu0 %vm433_vm1, %v8090_v35  ;;  %v1303_v27 = vsel %vm1260_vm2, %v1301_v0, %v1302_v54  ;;  %v1305_v35 = vsel %vm1260_vm2, %v1302_v54, %v1304_v30  ;;  %v8175_v0 = vld [vmem:[#allocation2 + $0x140] sm:$0xff]  ;;  %v8177_v30 = vpack.c.bf16 %v6332_v26, %v6332_v26  ;;  %v1317_v54 = vrot.slane %v8125_v16, 1 }
  0x72   : > { %6790 = vmatprep.mubr.msk.bf16.mxu1 %vm433_vm1, %v8086_v32  ;;  %v8173_v32 = vld [vmem:[#allocation2 + $0x138] sm:$0xff]  ;;  %v8189_v56 = vpack.c.bf16 %v1305_v35, %v1303_v27  ;;  %v10794_v27 = vrot.slane %v7878_v21, 2  ;;  %v10795_v35 = vrot.slane %v7876_v20, 2 }
  0x73   : > { %7396 = vmatprep.subr.msk.bf16.mxu1 %vm677_vm0, %v8177_v30  ;;  %v1318_v22 = vsel %vm1260_vm2, %v1316_v55, %v1317_v54  ;;  %v10805_v55 = vrot.slane %v7952_v1, 2 }
  0x74   : > { %v10797_v26 = vmov %v10794_v27 }
  0x78   : > { %6919 = vmatmul.mubr.msk.bf16.gmra.mrb[8].mxu0 %vm433_vm1, %v8140_v19  ;;  %v8194_v19 = vpack.c.bf16 %v8164_v31, %v8162_v51 }
  0x79   : > { %6791 = vmatmul.mubr.msk.bf16.gmra.mrb[16].mxu1 %vm433_vm1, %v8138_v36  ;;  %v1310_v36 = vsel %vm1260_vm2, %v1307_v23, %v1309_v45  ;;  %6922 = vmatprep.mubr.msk.bf16.mxu0 %vm433_vm1, %v8156_v14  ;;  %v8202_v23 = vpack.c.bf16 %v8175_v0, %v8173_v32  ;;  %v8209_v45 = vsel %vm2062_vm3, %v10795_v35, %v10794_v27  ;;  %v2076_v35 = vrot.slane %v7958_v8, 2 }
  0x7a   : > { %6794 = vmatprep.mubr.msk.bf16.mxu1 %vm433_vm1, %v8145_v40  ;;  %v1319_v40 = vrot.slane %v8166_v42, 1  ;;  %v8216_v14 = vsel %vm2062_vm3, %v10797_v26, %v10796_v29  ;;  %v8218_v12 = vpack.c.bf16 %v1310_v36, %v1308_v61  ;;  %v2075_v27 = vsel %vm2062_vm3, %v10799_v10, %v10798_v46 }
  0x7b   : > { %v2175_v4 = vpack.c.bf16 %v8216_v14, %v8209_v45  ;;  %v10800_v29 = vrot.slane %v7925_v53, 2  ;;  %v10801_v61 = vrot.slane %v7919_v49, 2  ;;  %v10802_v26 = vrot.slane %v7947_v63, 2 }
  0x7c   : > { %v1320_v33 = vsel %vm1260_vm2, %v1317_v54, %v1319_v40  ;;  %v2086_v46 = vrot.slane %v8019_v41, 2  ;;  %v10804_v8 = vrot.slane %v7954_v2, 2  ;;  %v10807_v40 = vrot.slane %v7925_v53, 2 }
  0x7d   : > { %v2080_v36 = vsel %vm2062_vm3, %v10801_v61, %v10800_v29  ;;  %v2085_v10 = vsel %vm2062_vm3, %v10803_v47, %v10802_v26  ;;  %v10806_v29 = vrot.slane %v7916_v48, 2  ;;  %v10808_v61 = vrot.slane %v7986_v25, 2 }
  0x7e   : > { %v2090_v49 = vsel %vm2062_vm3, %v10805_v55, %v10804_v8  ;;  %v2082_v54 = vsel %vm2062_vm3, %v10807_v40, %v2081_v9  ;;  %v10809_v41 = vrot.slane %v7984_v24, 2  ;;  %v2096_v9 = vrot.slane %v8067_v18, 2  ;;  %v8274_v24 = vld [vmem:[#allocation2 + $0x150] sm:$0xff]  ;;  %v8291_v55 = vld [vmem:[#allocation2 + $0x168] sm:$0xff] }
  0x7f   : > { %v2077_v11 = vsel %vm2062_vm3, %v10806_v29, %v2076_v35  ;;  %v8264_v48 = vpack.c.bf16 %v2082_v54, %v2080_v36  ;;  %v10810_v35 = vrot.slane %v7947_v63, 2  ;;  %v10811_v36 = vmov %v10804_v8  ;;  %v8293_v29 = vld [vmem:[#allocation2 + $0x170] sm:$0xff] }
  0x80   : > { %v2095_v26 = vsel %vm2062_vm3, %v10809_v41, %v10808_v61  ;;  %v8262_v1 = vpack.c.bf16 %v2077_v11, %v2075_v27  ;;  %6923 = vmatmul.mubr.msk.bf16.gmra.mrb[12].mxu0 %vm433_vm1, %v8189_v56  ;;  %v2092_v63 = vsel %vm2062_vm3, %v10811_v36, %v2091_v62  ;;  %v10812_v47 = vrot.slane %v8012_v38, 2  ;;  %v8306_v62 = vld [vmem:[#allocation2 + $0x130] sm:$0xff] }
  0x81   : > { %6795 = vmatmul.mubr.msk.bf16.gmra.mrb[20].mxu1 %vm433_vm1, %v8194_v19  ;;  %v2087_v53 = vsel %vm2062_vm3, %v10810_v35, %v2086_v46  ;;  %v10813_v18 = vrot.slane %v8010_v37, 2  ;;  %v2101_v8 = vrot.slane %v8078_v28, 2  ;;  %6926 = vmatprep.mubr.msk.bf16.mxu0 %vm433_vm1, %v8218_v12  ;;  %v10814_v2 = vmov %v10808_v61 }
  0x82   : > { %6798 = vmatprep.mubr.msk.bf16.mxu1 %vm433_vm1, %v8202_v23  ;;  %v8278_v27 = vpack.c.bf16 %v2087_v53, %v2085_v10  ;;  %v8295_v10 = vpack.c.bf16 %v2092_v63, %v2090_v49  ;;  %v2097_v11 = vsel %vm2062_vm3, %v10814_v2, %v2096_v9  ;;  %v10815_v40 = vrot.slane %v8055_v7, 2 }
  0x83   : > { %v2100_v46 = vsel %vm2062_vm3, %v10813_v18, %v10812_v47  ;;  %v10816_v37 = vrot.slane %v8053_v5, 2  ;;  %v2106_v28 = vrot.slane %v8103_v60, 2  ;;  %v8308_v61 = vpack.c.bf16 %v2097_v11, %v2095_v26  ;;  %v8324_v26 = vld [vmem:[#allocation2 + $0x148] sm:$0xff] }
  0x84   : > { %v10817_v41 = vmov %v10812_v47  ;;  %v10818_v25 = vrot.slane %v8063_v15, 2  ;;  %v10819_v35 = vrot.slane %v8061_v6, 2  ;;  %v2111_v5 = vrot.slane %v8127_v39, 2  ;;  %v8357_v15 = vld [vmem:[#allocation2 + $0x180] sm:$0xff] }
  0x85   : > { %v2105_v54 = vsel %vm2062_vm3, %v10816_v37, %v10815_v40  ;;  %v2102_v49 = vsel %vm2062_vm3, %v10817_v41, %v2101_v8  ;;  %v1321_v9 = vrot.slane %v8162_v51, 1  ;;  %v8322_v60 = vpack.c.bf16 %v8276_v44, %v8274_v24 }
  0x86   : > { %v2110_v53 = vsel %vm2062_vm3, %v10819_v35, %v10818_v25  ;;  %v8326_v36 = vpack.c.bf16 %v2102_v49, %v2100_v46  ;;  %v10820_v38 = vmov %v10815_v40  ;;  %v8331_v47 = vpack.c.bf16 %v1315_v13, %v1313_v34 }
  0x87   : > { %v2107_v63 = vsel %vm2062_vm3, %v10820_v38, %v2106_v28  ;;  %v8335_v6 = vpack.c.bf16 %v8293_v29, %v8291_v55  ;;  %v10821_v18 = vmov %v10818_v25  ;;  %v1322_v2 = vrot.slane %v8164_v31, 1  ;;  %v597_v38 = vld [vmem:[#allocation2 + $0x160] sm:$0xff] }
  0x88   : > { %v8337_v39 = vpack.c.bf16 %v2107_v63, %v2105_v54  ;;  %v2112_v8 = vsel %vm2062_vm3, %v10821_v18, %v2111_v5  ;;  %v8343_v46 = vpack.c.bf16 %v1320_v33, %v1318_v22  ;;  %v1324_v7 = vrot.slane %v8306_v62, 1  ;;  %6927 = vmatmul.mubr.msk.bf16.gmra.mrb[16].mxu0 %vm433_vm1, %v8331_v47  ;;  %v8359_v22 = vld [vmem:[#allocation2 + $0x188] sm:$0xff] }
  0x89   : > { %v8346_v11 = vpack.c.bf16 %v2112_v8, %v2110_v53  ;;  %v1326_v34 = vrot.slane %v8173_v32, 1  ;;  %v1327_v13 = vrot.slane %v8175_v0, 1  ;;  %v1329_v40 = vrot.slane %v8324_v26, 1  ;;  %6799 = vmatmul.mubr.msk.bf16.gmra.mrb[24].mxu1 %vm433_vm1, %v8322_v60  ;;  %v600_v8 = vld [vmem:[#allocation2 + $0x178] sm:$0xff] }
  0x8a   : > { %6802 = vmatprep.mubr.msk.bf16.mxu1 %vm433_vm1, %v8335_v6  ;;  %v607_v33 = vpack.c.bf16 %v7878_v21, %v7876_v20  ;;  %v10822_v37 = vrot.slane %v8115_v58, 2  ;;  %v10823_v54 = vrot.slane %v8113_v17, 2  ;;  %v2116_v41 = vrot.slane %v8148_v50, 2  ;;  %6930 = vmatprep.mubr.msk.bf16.mxu0 %vm433_vm1, %v8343_v46 }
  0x8b   : > { %v1323_v49 = vsel %vm1260_vm2, %v1321_v9, %v1322_v2  ;;  %v1325_v25 = vsel %vm1260_vm2, %v1322_v2, %v1324_v7  ;;  %v10824_v35 = vrot.slane %v8125_v16, 2  ;;  %v10825_v53 = vrot.slane %v8123_v57, 2 }
  0x8c   : > { %v2115_v28 = vsel %vm2062_vm3, %v10823_v54, %v10822_v37  ;;  %v2121_v21 = vrot.slane %v8166_v42, 2  ;;  %v2123_v17 = vrot.slane %v8162_v51, 2  ;;  %v1328_v5 = vsel %vm1260_vm2, %v1326_v34, %v1327_v13 }
  0x8d   : > { %v2120_v20 = vsel %vm2062_vm3, %v10825_v53, %v10824_v35  ;;  %v1330_v50 = vsel %vm1260_vm2, %v1327_v13, %v1329_v40  ;;  %v10826_v63 = vmov %v10822_v37  ;;  %v2124_v18 = vrot.slane %v8164_v31, 2 }
  0x8e   : > { %v2117_v9 = vsel %vm2062_vm3, %v10826_v63, %v2116_v41  ;;  %v8388_v57 = vpack.c.bf16 %v8359_v22, %v8357_v15  ;;  %v10827_v42 = vmov %v10824_v35  ;;  %v2128_v7 = vrot.slane %v8173_v32, 2 }
  0x8f   : > { %v8390_v2 = vpack.c.bf16 %v2117_v9, %v2115_v28  ;;  %v2122_v51 = vsel %vm2062_vm3, %v10827_v42, %v2121_v21  ;;  %v2129_v34 = vrot.slane %v8175_v0, 2  ;;  %v8397_v58 = vpack.c.bf16 %v1325_v25, %v1323_v49 }
  0x90   : > { %v8399_v13 = vpack.c.bf16 %v2122_v51, %v2120_v20  ;;  %v1331_v31 = vrot.slane %v8274_v24, 1  ;;  %v1332_v40 = vrot.slane %v8276_v44, 1  ;;  %v8403_v37 = vpack.c.bf16 %v1330_v50, %v1328_v5 }
  0x91   : > { %v1334_v54 = vrot.slane %v597_v38, 1  ;;  %v1336_v28 = vrot.slane %v8291_v55, 1  ;;  %v1337_v16 = vrot.slane %v8293_v29, 1  ;;  %v1339_v41 = vrot.slane %v600_v8, 1  ;;  %6803 = vmatmul.mubr.msk.bf16.gmra.mrb[28].mxu1 %vm433_vm1, %v8388_v57  ;;  %6931 = vmatmul.mubr.msk.bf16.gmra.mrb[20].mxu0 %vm433_vm1, %v8397_v58 }
  0x92   : > { %6808 = vmatprep.mubr.msk.bf16.mxu1 %vm433_vm1, %v607_v33  ;;  %v2125_v32 = vsel %vm2062_vm3, %v2123_v17, %v2124_v18  ;;  %v2126_v0 = vrot.slane %v8306_v62, 2  ;;  %6934 = vmatprep.mubr.msk.bf16.mxu0 %vm433_vm1, %v8403_v37  ;;  %v1333_v49 = vsel %vm1260_vm2, %v1331_v31, %v1332_v40  ;;  %v2130_v35 = vsel %vm2062_vm3, %v2128_v7, %v2129_v34  ;;  %v8422_v33 = vld [vmem:[#allocation2 + $0x190] sm:$0xff] }
  0x93   : > { %v1335_v25 = vsel %vm1260_vm2, %v1332_v40, %v1334_v54  ;;  %v2131_v53 = vrot.slane %v8324_v26, 2  ;;  %v1338_v20 = vsel %vm1260_vm2, %v1336_v28, %v1337_v16  ;;  %v1340_v21 = vsel %vm1260_vm2, %v1337_v16, %v1339_v41 }
  0x94   : > { %v2127_v17 = vsel %vm2062_vm3, %v2124_v18, %v2126_v0  ;;  %v2133_v62 = vrot.slane %v8274_v24, 2  ;;  %v2134_v5 = vrot.slane %v8276_v44, 2  ;;  %v2138_v9 = vrot.slane %v8291_v55, 2  ;;  %v10830_v0 = vld [vmem:[#allocation17_spill] sm:$0xff] }
  0x95   : > { %v8427_v50 = vpack.c.bf16 %v2127_v17, %v2125_v32  ;;  %v2132_v63 = vsel %vm2062_vm3, %v2129_v34, %v2131_v53  ;;  %v2139_v26 = vrot.slane %v8293_v29, 2  ;;  %v8432_v42 = vpack.c.bf16 %v1335_v25, %v1333_v49  ;;  %v10828_v32 = vld [vmem:[#allocation11_spill] sm:$0xff]  ;;  %v10832_v53 = vld [vmem:[#allocation16_spill] sm:$0xff] }
  0x96   : > { %v8434_v51 = vpack.c.bf16 %v2132_v63, %v2130_v35  ;;  %v1639_v7 = vrot.slane %v8357_v15, 1  ;;  %v1640_v18 = vrot.slane %v8359_v22, 1  ;;  %v8438_v31 = vpack.c.bf16 %v1340_v21, %v1338_v20  ;;  %v10831_v35 = vld [vmem:[#allocation12_spill] sm:$0xff]  ;;  %v10833_v20 = vld [vmem:[#allocation13_spill] sm:$0xff]  ;;  %v10834_v21 = vld [vmem:[#allocation19_spill] sm:$0xff] }
  0x97   : > { %v1642_v24 = vrot.slane %v8422_v33, 1  ;;  %v1017_v44 = vsel %vm677_vm0, %v8177_v30, 0  ;;  %v2135_v55 = vsel %vm2062_vm3, %v2133_v62, %v2134_v5  ;;  %v2136_v29 = vrot.slane %v597_v38, 2  ;;  %v10835_v17 = vld [vmem:[#allocation15_spill] sm:$0xff]  ;;  %v10836_v62 = vld [vmem:[#allocation21_spill] sm:$0xff] }
  0x98   : > { %v1641_v34 = vsel %vm1260_vm2, %v1639_v7, %v1640_v18  ;;  %v2140_v30 = vsel %vm2062_vm3, %v2138_v9, %v2139_v26  ;;  %v2243_v49 = vsel %vm677_vm0, %v10830_v0, 0  ;;  %v10838_v63 = vld [vmem:[#allocation23_spill] sm:$0xff]  ;;  %v10839_v9 = vld [vmem:[#allocation20_spill] sm:$0xff]  ;;  %v10841_v7 = vld [vmem:[#allocation22_spill] sm:$0xff] }
  0x99   : > { %6809 = vmatmul.mubr.msk.bf16.vlgmr.msra.gmra.mrb[0].mxu1 %vm433_vm1, %v7912_v43  ;;  %6935 = vmatmul.mubr.msk.bf16.gmra.mrb[24].mxu0 %vm433_vm1, %v8432_v42  ;;  %v1643_v40 = vsel %vm1260_vm2, %v1640_v18, %v1642_v24  ;;  %v2141_v43 = vrot.slane %v600_v8, 2  ;;  %v2137_v54 = vsel %vm2062_vm3, %v2134_v5, %v2136_v29  ;;  %v10829_v8 = vld [vmem:[#allocation14_spill] sm:$0xff]  ;;  %v10842_v18 = vld [vmem:[#allocation24_spill] sm:$0xff]  ;;  %v2438_v29 = vrot.slane %v8357_v15, 2 }
  0x9a   : > { %6812 = vmatprep.mubr.msk.bf16.mxu1 %vm433_vm1, %v7923_v52  ;;  %6938 = vmatprep.mubr.msk.bf16.mxu0 %vm433_vm1, %v8438_v31  ;;  %v8458_v28 = vpack.c.bf16 %v2137_v54, %v2135_v55  ;;  %v1646_v16 = vpack.c.bf16 %v1643_v40, %v1641_v34  ;;  %v10837_v5 = vld [vmem:[#allocation18_spill] sm:$0xff]  ;;  %v8528_v55 = vld [vmem:[#allocation2 + $0x1a8] sm:$0xff]  ;;  %v2439_v34 = vrot.slane %v8359_v22, 2  ;;  %v10843_v22 = vld [vmem:[#allocation9_spill] sm:$0xff] }
  0x9b   : > { %6841 = vmatpush3.bf16.msra.mxu1 %v1017_v44  ;;  %v2142_v38 = vsel %vm2062_vm3, %v2139_v26, %v2141_v43  ;;  %v10840_v26 = vld [vmem:[#allocation25_spill] sm:$0xff]  ;;  %v8524_v24 = vld [vmem:[#allocation2 + $0x198] sm:$0xff]  ;;  %v8526_v44 = vld [vmem:[#allocation2 + $0x1a0] sm:$0xff]  ;;  %v1855_v43 = vrot.slane %v8528_v55, 1  ;;  %v2651_v14 = vrot.slane %v8528_v55, 2 }
  0x9c   : > { %7398 = vmatprep.subr.msk.bf16.mxu1 %vm677_vm0, %v7664_v3  ;;  %v8461_v41 = vpack.c.bf16 %v2142_v38, %v2140_v30  ;;  %v6417_v3 = vld [vmem:[%s10731_s2 + $0x14] sm:$0xf]  ;;  %v1852_v40 = vrot.slane %v8524_v24, 1  ;;  %v1853_v30 = vrot.slane %v8526_v44, 1  ;;  %v2440_v54 = vsel %vm2062_vm3, %v2438_v29, %v2439_v34 }
  0x9d   : > { %v2448_v25 = vpack.c.bf16 %v6417_v3, %v6417_v3  ;;  %v2441_v38 = vrot.slane %v8422_v33, 2  ;;  %v6434_v33 = vld [vmem:[%s10731_s2 + $0x20] sm:$0xf] }
  0x9e   : > { %v1856_v15 = vsel %vm1260_vm2, %v1853_v30, %v1855_v43 }
  0xa1   : > { %6813 = vmatmul.mubr.msk.bf16.gmra.mrb[4].mxu1 %vm433_vm1, %v7938_v59  ;;  %6939 = vmatmul.mubr.msk.bf16.gmra.mrb[28].mxu0 %vm433_vm1, %v1646_v16 }
  0xa2   : > { %6816 = vmatprep.mubr.msk.bf16.mxu1 %vm433_vm1, %v10828_v32  ;;  %6944 = vmatprep.mubr.msk.bf16.mxu0 %vm433_vm1, %v10829_v8 }
  0xa9   : > { %6817 = vmatmul.mubr.msk.bf16.gmra.mrb[8].mxu1 %vm433_vm1, %v10831_v35  ;;  %6945 = vmatmul.mubr.msk.bf16.vlgmr.msra.gmra.mrb[0].mxu0 %vm433_vm1, %v10832_v53 }
  0xaa   : > { %6820 = vmatprep.mubr.msk.bf16.mxu1 %vm433_vm1, %v10833_v20  ;;  %6977 = vmatpush3.bf16.msra.mxu0 %v2243_v49  ;;  %v10844_v49 = vld [vmem:[#allocation10_spill] sm:$0xff] }
  0xab   : > { %6948 = vmatprep.mubr.msk.bf16.mxu0 %vm433_vm1, %v10834_v21  ;;  %7402 = vmatprep.subr.msk.bf16.mxu0 %vm677_vm0, %v2448_v25 }
  0xb1   : > { %6821 = vmatmul.mubr.msk.bf16.gmra.mrb[12].mxu1 %vm433_vm1, %v10835_v17  ;;  %6949 = vmatmul.mubr.msk.bf16.gmra.mrb[4].mxu0 %vm433_vm1, %v10836_v62 }
  0xb2   : > { %6824 = vmatprep.mubr.msk.bf16.mxu1 %vm433_vm1, %v10837_v5  ;;  %6952 = vmatprep.mubr.msk.bf16.mxu0 %vm433_vm1, %v10838_v63 }
  0xb9   : > { %6825 = vmatmul.mubr.msk.bf16.gmra.mrb[16].mxu1 %vm433_vm1, %v10839_v9  ;;  %6953 = vmatmul.mubr.msk.bf16.gmra.mrb[8].mxu0 %vm433_vm1, %v10840_v26 }
  0xba   : > { %6828 = vmatprep.mubr.msk.bf16.mxu1 %vm433_vm1, %v10841_v7  ;;  %6956 = vmatprep.mubr.msk.bf16.mxu0 %vm433_vm1, %v8189_v56 }
  0xc1   : > { %6829 = vmatmul.mubr.msk.bf16.gmra.mrb[20].mxu1 %vm433_vm1, %v10842_v18  ;;  %6957 = vmatmul.mubr.msk.bf16.gmra.mrb[12].mxu0 %vm433_vm1, %v8218_v12 }
  0xc2   : > { %6832 = vmatprep.mubr.msk.bf16.mxu1 %vm433_vm1, %v8194_v19  ;;  %6960 = vmatprep.mubr.msk.bf16.mxu0 %vm433_vm1, %v8331_v47 }
  0xc9   : > { %6833 = vmatmul.mubr.msk.bf16.gmra.mrb[24].mxu1 %vm433_vm1, %v8202_v23  ;;  %6961 = vmatmul.mubr.msk.bf16.gmra.mrb[16].mxu0 %vm433_vm1, %v8343_v46 }
  0xca   : > { %6836 = vmatprep.mubr.msk.bf16.mxu1 %vm433_vm1, %v8322_v60  ;;  %6964 = vmatprep.mubr.msk.bf16.mxu0 %vm433_vm1, %v8397_v58 }
  0xd1   : > { %6837 = vmatmul.mubr.msk.bf16.gmra.mrb[28].mxu1 %vm433_vm1, %v8335_v6  ;;  %6965 = vmatmul.mubr.msk.bf16.gmra.mrb[20].mxu0 %vm433_vm1, %v8403_v37 }
  0xd2   : > { %6842 = vmatprep.mubr.msk.bf16.mxu1 %vm433_vm1, %v7923_v52  ;;  %6968 = vmatprep.mubr.msk.bf16.mxu0 %vm433_vm1, %v8432_v42  ;;  %v1854_v52 = vsel %vm1260_vm2, %v1852_v40, %v1853_v30 }
  0xd3   : > { %v1859_v3 = vpack.c.bf16 %v1856_v15, %v1854_v52 }
  0xd9   : > { %6843 = vmatmul.mubr.msk.bf16.vlgmr.msra.gmra.mrb[0].mxu1 %vm433_vm1, %v7938_v59  ;;  %6969 = vmatmul.mubr.msk.bf16.gmra.mrb[24].mxu0 %vm433_vm1, %v8438_v31  ;;  %v2442_v59 = vsel %vm2062_vm3, %v2439_v34, %v2441_v38 }
  0xda   : > { %6846 = vmatprep.mubr.msk.bf16.mxu1 %vm433_vm1, %v10828_v32  ;;  %6972 = vmatprep.mubr.msk.bf16.mxu0 %vm433_vm1, %v1646_v16  ;;  %v8548_v0 = vpack.c.bf16 %v2442_v59, %v2440_v54  ;;  %v2453_v16 = vsel %vm677_vm0, %v2448_v25, 0  ;;  %v2658_v32 = vpack.c.bf16 %v6434_v33, %v6434_v33  ;;  %v4815_v25 = vld [vmem:[%s10735_s6 + $0x68] sm:$0xff] }
  0xdb   : > { %7137 = vmatpush3.bf16.msra.mxu1 %v10843_v22 }
  0xe1   : > { %6847 = vmatmul.mubr.msk.bf16.gmra.mrb[4].mxu1 %vm433_vm1, %v10831_v35  ;;  %6973 = vmatmul.mubr.msk.bf16.gmra.mrb[28].mxu0 %vm433_vm1, %v1859_v3 }
  0xe2   : > { %6850 = vmatprep.mubr.msk.bf16.mxu1 %vm433_vm1, %v10833_v20  ;;  %6978 = vmatprep.mubr.msk.bf16.mxu0 %vm433_vm1, %v2175_v4  ;;  %v1009_v4 = vpack.c.bf16 %v8526_v44, %v8524_v24  ;;  %v4817_v20 = vld [vmem:[%s10735_s6 + $0x78] sm:$0xff] }
  0xe9   : > { %6851 = vmatmul.mubr.msk.bf16.gmra.mrb[8].mxu1 %vm433_vm1, %v10835_v17  ;;  %6979 = vmatmul.mubr.msk.bf16.vlgmr.msra.gmra.mrb[0].mxu0 %vm433_vm1, %v10844_v49 }
  0xea   : > { %6854 = vmatprep.mubr.msk.bf16.mxu1 %vm433_vm1, %v10837_v5  ;;  %7011 = vmatpush3.bf16.msra.mxu0 %v2453_v16 }
  0xeb   : > { %6982 = vmatprep.mubr.msk.bf16.mxu0 %vm433_vm1, %v8262_v1  ;;  %7403 = vmatprep.subr.msk.bf16.mxu0 %vm677_vm0, %v2658_v32 }
  0xf1   : > { %6855 = vmatmul.mubr.msk.bf16.gmra.mrb[12].mxu1 %vm433_vm1, %v10839_v9  ;;  %6983 = vmatmul.mubr.msk.bf16.gmra.mrb[4].mxu0 %vm433_vm1, %v8264_v48 }
  0xf2   : > { %6858 = vmatprep.mubr.msk.bf16.mxu1 %vm433_vm1, %v10841_v7  ;;  %6986 = vmatprep.mubr.msk.bf16.mxu0 %vm433_vm1, %v8278_v27 }
  0xf9   : > { %6859 = vmatmul.mubr.msk.bf16.gmra.mrb[16].mxu1 %vm433_vm1, %v10842_v18  ;;  %6987 = vmatmul.mubr.msk.bf16.gmra.mrb[8].mxu0 %vm433_vm1, %v8295_v10 }
  0xfa   : > { %6862 = vmatprep.mubr.msk.bf16.mxu1 %vm433_vm1, %v8194_v19  ;;  %6990 = vmatprep.mubr.msk.bf16.mxu0 %vm433_vm1, %v8308_v61  ;;  %v2663_v19 = vsel %vm677_vm0, %v2658_v32, 0 }
 0x101   : > { %6863 = vmatmul.mubr.msk.bf16.gmra.mrb[20].mxu1 %vm433_vm1, %v8202_v23  ;;  %6991 = vmatmul.mubr.msk.bf16.gmra.mrb[12].mxu0 %vm433_vm1, %v8326_v36 }
 0x102   : > { %6866 = vmatprep.mubr.msk.bf16.mxu1 %vm433_vm1, %v8322_v60  ;;  %6994 = vmatprep.mubr.msk.bf16.mxu0 %vm433_vm1, %v8337_v39  ;;  %v4805_v60 = vld [vmem:[%s10735_s6 + $0x18] sm:$0xff] }
 0x109   : > { %6867 = vmatmul.mubr.msk.bf16.gmra.mrb[24].mxu1 %vm433_vm1, %v8335_v6  ;;  %6995 = vmatmul.mubr.msk.bf16.gmra.mrb[16].mxu0 %vm433_vm1, %v8346_v11 }
 0x10a   : > { %6870 = vmatprep.mubr.msk.bf16.mxu1 %vm433_vm1, %v8388_v57  ;;  %6998 = vmatprep.mubr.msk.bf16.mxu0 %vm433_vm1, %v8390_v2  ;;  %v4807_v57 = vld [vmem:[%s10735_s6 + $0x28] sm:$0xff] }
 0x111   : > { %6871 = vmatmul.mubr.msk.bf16.gmra.mrb[28].mxu1 %vm433_vm1, %v1009_v4  ;;  %6999 = vmatmul.mubr.msk.bf16.gmra.mrb[20].mxu0 %vm433_vm1, %v8399_v13 }
 0x112   : > { %6880 = vmatprep.mubr.msk.bf16.mxu1 %vm433_vm1, %v10829_v8  ;;  %7002 = vmatprep.mubr.msk.bf16.mxu0 %vm433_vm1, %v8427_v50  ;;  %v4814_v8 = vld [vmem:[%s10735_s6 + $0x60] sm:$0xff] }
 0x113   : > { %v4824_v35 = vpack.c.bf16 %v4815_v25, %v4814_v8 }
 0x119   : > { %6881 = vmatmul.mubr.msk.bf16.vlgmr.msra.gmra.mrb[4].mxu1 %vm433_vm1, %v10832_v53  ;;  %7003 = vmatmul.mubr.msk.bf16.gmra.mrb[24].mxu0 %vm433_vm1, %v8434_v51  ;;  %v4816_v53 = vld [vmem:[%s10735_s6 + $0x70] sm:$0xff] }
 0x11a   : > { %6884 = vmatprep.mubr.msk.bf16.mxu1 %vm433_vm1, %v10834_v21  ;;  %7006 = vmatprep.mubr.msk.bf16.mxu0 %vm433_vm1, %v8458_v28  ;;  %v4825_v21 = vpack.c.bf16 %v4817_v20, %v4816_v53 }
 0x121   : > { %6885 = vmatmul.mubr.msk.bf16.gmra.mrb[8].mxu1 %vm433_vm1, %v10836_v62  ;;  %7007 = vmatmul.mubr.msk.bf16.gmra.mrb[28].mxu0 %vm433_vm1, %v8461_v41 }
 0x122   : > { %6888 = vmatprep.mubr.msk.bf16.mxu1 %vm433_vm1, %v10838_v63  ;;  %7012 = vmatprep.mubr.msk.bf16.mxu0 %vm433_vm1, %v10844_v49 }
 0x129   : > { %6889 = vmatmul.mubr.msk.bf16.gmra.mrb[12].mxu1 %vm433_vm1, %v10840_v26  ;;  %7013 = vmatmul.mubr.msk.bf16.vlgmr.msra.gmra.mrb[0].mxu0 %vm433_vm1, %v8262_v1 }
 0x12a   : > { %6892 = vmatprep.mubr.msk.bf16.mxu1 %vm433_vm1, %v8189_v56  ;;  %7045 = vmatpush3.bf16.msra.mxu0 %v2663_v19  ;;  %v2649_v56 = vrot.slane %v8526_v44, 2 }
 0x12b   : > { %7016 = vmatprep.mubr.msk.bf16.mxu0 %vm433_vm1, %v8264_v48 }
 0x12c   : > { %v2652_v45 = vsel %vm2062_vm3, %v2649_v56, %v2651_v14 }
 0x131   : > { %6893 = vmatmul.mubr.msk.bf16.gmra.mrb[16].mxu1 %vm433_vm1, %v8218_v12  ;;  %7017 = vmatmul.mubr.msk.bf16.gmra.mrb[4].mxu0 %vm433_vm1, %v8278_v27  ;;  %v2648_v12 = vrot.slane %v8524_v24, 2 }
 0x132   : > { %6896 = vmatprep.mubr.msk.bf16.mxu1 %vm433_vm1, %v8331_v47  ;;  %7020 = vmatprep.mubr.msk.bf16.mxu0 %vm433_vm1, %v8295_v10 }
 0x133   : > { %v2650_v23 = vsel %vm2062_vm3, %v2648_v12, %v2649_v56  ;;  %v8832_v56 = vld [vmem:[%s10732_s3] ss:$0 sm:$0xff] }
 0x139   : > { %6897 = vmatmul.mubr.msk.bf16.gmra.mrb[20].mxu1 %vm433_vm1, %v8343_v46  ;;  %7021 = vmatmul.mubr.msk.bf16.gmra.mrb[8].mxu0 %vm433_vm1, %v8308_v61 }
 0x13a   : > { %6900 = vmatprep.mubr.msk.bf16.mxu1 %vm433_vm1, %v8397_v58  ;;  %7024 = vmatprep.mubr.msk.bf16.mxu0 %vm433_vm1, %v8326_v36  ;;  %v4808_v58 = vld [vmem:[%s10735_s6 + $0x30] sm:$0xff] }
 0x141   : > { %6901 = vmatmul.mubr.msk.bf16.gmra.mrb[24].mxu1 %vm433_vm1, %v8403_v37  ;;  %7025 = vmatmul.mubr.msk.bf16.gmra.mrb[12].mxu0 %vm433_vm1, %v8337_v39 }
 0x142   : > { %6904 = vmatprep.mubr.msk.bf16.mxu1 %vm433_vm1, %v8432_v42  ;;  %7028 = vmatprep.mubr.msk.bf16.mxu0 %vm433_vm1, %v8346_v11  ;;  %v4811_v42 = vld [vmem:[%s10735_s6 + $0x48] sm:$0xff] }
 0x149   : > { %6905 = vmatmul.mubr.msk.bf16.gmra.mrb[28].mxu1 %vm433_vm1, %v8438_v31  ;;  %7029 = vmatmul.mubr.msk.bf16.gmra.mrb[16].mxu0 %vm433_vm1, %v8390_v2  ;;  %v4812_v31 = vld [vmem:[%s10735_s6 + $0x50] sm:$0xff] }
 0x14a   : > { %7032 = vmatprep.mubr.msk.bf16.mxu0 %vm433_vm1, %v8399_v13 }
 0x151   : > { %7033 = vmatmul.mubr.msk.bf16.gmra.mrb[20].mxu0 %vm433_vm1, %v8427_v50 }
 0x152   : > { %7036 = vmatprep.mubr.msk.bf16.mxu0 %vm433_vm1, %v8434_v51 }
 0x159   : > { %7037 = vmatmul.mubr.msk.bf16.gmra.mrb[24].mxu0 %vm433_vm1, %v8458_v28 }
 0x15a   : > { %7040 = vmatprep.mubr.msk.bf16.mxu0 %vm433_vm1, %v8461_v41 }
 0x161   : > { %7041 = vmatmul.mubr.msk.bf16.gmra.mrb[28].mxu0 %vm433_vm1, %v8548_v0 }
 0x162   : > { %7046 = vmatprep.mubr.msk.bf16.mxu0 %vm433_vm1, %v8262_v1  ;;  %v2655_v1 = vpack.c.bf16 %v2652_v45, %v2650_v23  ;;  %v8838_v45 = vld [vmem:[%s10733_s4] ss:$0 sm:$0xff] }
 0x169   : > { %7047 = vmatmul.mubr.msk.bf16.vlgmr.msra.gmra.mrb[0].mxu0 %vm433_vm1, %v8264_v48  ;;  %v4802_v48 = vld [vmem:[%s10735_s6] sm:$0xff] }
 0x16a   : > { %7050 = vmatprep.mubr.msk.bf16.mxu0 %vm433_vm1, %v8278_v27  ;;  %v4803_v27 = vld [vmem:[%s10735_s6 + $0x8] sm:$0xff] }
 0x171   : > { %7051 = vmatmul.mubr.msk.bf16.gmra.mrb[4].mxu0 %vm433_vm1, %v8295_v10  ;;  %v4804_v10 = vld [vmem:[%s10735_s6 + $0x10] sm:$0xff] }
 0x172   : > { %7054 = vmatprep.mubr.msk.bf16.mxu0 %vm433_vm1, %v8308_v61  ;;  %v4818_v61 = vpack.c.bf16 %v4803_v27, %v4802_v48 }
 0x174   : > { %7078 = vmatprep.subr.bf16.mxu1 %v4818_v61 }
 0x175   : > { %7079 = vmatpush3.bf16.msra.mxu1 %v4818_v61 }
 0x179   : > { %7055 = vmatmul.mubr.msk.bf16.gmra.mrb[8].mxu0 %vm433_vm1, %v8326_v36  ;;  %v4819_v36 = vpack.c.bf16 %v4805_v60, %v4804_v10 }
 0x17a   : > { %7058 = vmatprep.mubr.msk.bf16.mxu0 %vm433_vm1, %v8337_v39 }
 0x17b   : > { %7080 = vmatprep.subr.bf16.mxu1 %v4819_v36 }
 0x17c   : > { %7081 = vmatpush3.bf16.msra.mxu1 %v4819_v36 }
 0x181   : > { %7059 = vmatmul.mubr.msk.bf16.gmra.mrb[12].mxu0 %vm433_vm1, %v8346_v11  ;;  %v4806_v11 = vld [vmem:[%s10735_s6 + $0x20] sm:$0xff] }
 0x182   : > { %7062 = vmatprep.mubr.msk.bf16.mxu0 %vm433_vm1, %v8390_v2  ;;  %v4820_v2 = vpack.c.bf16 %v4807_v57, %v4806_v11 }
 0x184   : > { %7082 = vmatprep.subr.bf16.mxu1 %v4820_v2 }
 0x185   : > { %7083 = vmatpush3.bf16.msra.mxu1 %v4820_v2 }
 0x189   : > { %7063 = vmatmul.mubr.msk.bf16.gmra.mrb[16].mxu0 %vm433_vm1, %v8399_v13  ;;  %v4809_v13 = vld [vmem:[%s10735_s6 + $0x38] sm:$0xff] }
 0x18a   : > { %7066 = vmatprep.mubr.msk.bf16.mxu0 %vm433_vm1, %v8427_v50  ;;  %v4821_v37 = vpack.c.bf16 %v4809_v13, %v4808_v58  ;;  %v4810_v50 = vld [vmem:[%s10735_s6 + $0x40] sm:$0xff]  ;;  %v7448_v13 = vld [vmem:[#allocation3] sm:$0xff] }
 0x18c   : > { %7084 = vmatprep.subr.bf16.mxu1 %v4821_v37 }
 0x18d   : > { %7085 = vmatpush3.bf16.msra.mxu1 %v4821_v37 }
 0x191   : > { %7067 = vmatmul.mubr.msk.bf16.gmra.mrb[20].mxu0 %vm433_vm1, %v8434_v51  ;;  %v4822_v51 = vpack.c.bf16 %v4811_v42, %v4810_v50 }
 0x192   : > { %7070 = vmatprep.mubr.msk.bf16.mxu0 %vm433_vm1, %v8458_v28  ;;  %v4813_v28 = vld [vmem:[%s10735_s6 + $0x58] sm:$0xff] }
 0x193   : > { %7086 = vmatprep.subr.bf16.mxu1 %v4822_v51 }
 0x194   : > { %7087 = vmatpush3.bf16.msra.mxu1 %v4822_v51 }
 0x199   : > { %7071 = vmatmul.mubr.msk.bf16.gmra.mrb[24].mxu0 %vm433_vm1, %v8461_v41  ;;  %v4823_v41 = vpack.c.bf16 %v4813_v28, %v4812_v31 }
 0x19a   : > { %7074 = vmatprep.mubr.msk.bf16.mxu0 %vm433_vm1, %v8548_v0  ;;  %v5812_v0 = vld [vmem:[%s10738_s9] sm:$0xf] }
 0x19b   : > { %7088 = vmatprep.subr.bf16.mxu1 %v4823_v41  ;;  %v8817_v16 = vpack.c.bf16 %v5812_v0, %v5812_v0 }
 0x19c   : > { %7089 = vmatpush3.bf16.msra.mxu1 %v4823_v41 }
 0x19d   : > { %7090 = vmatprep.subr.bf16.mxu1 %v4824_v35 }
 0x1a0   : > { %7091 = vmatpush3.bf16.msra.mxu1 %v4824_v35 }
 0x1a1   : > { %7075 = vmatmul.mubr.msk.bf16.gmra.mrb[28].mxu0 %vm433_vm1, %v2655_v1  ;;  %7092 = vmatprep.subr.bf16.mxu1 %v4825_v21 }
 0x1a4   : > { %7093 = vmatpush3.bf16.msra.mxu1 %v4825_v21 }
 0x1a5   : > { %7404 = vmatprep.subr.msk.bf16.mxu1 %vm677_vm0, %v8817_v16 }
 0x1ac   : > { %v8726_v47 = vpop.f32.mrb[0].mxu1 }
 0x1ad   : > { %v8728_v6 = vpop.f32.mrb[1].mxu1 }
 0x1ae   : > { %v8730_v39 = vpop.f32.mrb[2].mxu1 }
 0x1af   : > { %v8732_v46 = vpop.f32.mrb[3].mxu1 }
 0x1ec   : > { %v6882_v17 = vpop.f32.mrb[4].mxu1 }
 0x1ed   : > { %v1493_v62 = vpop.f32.mrb[5].mxu1 }
 0x1ee   : > { %v8770_v5 = vpop.f32.mrb[6].mxu1 }
 0x1ef   : > { %v8772_v63 = vpop.f32.mrb[7].mxu1 }
 0x1f4   : > { %v8774_v9 = vpop.f32.mrb[8].mxu1 }
 0x1f5   : > { %v8776_v26 = vpop.f32.mrb[9].mxu1 }
 0x1f6   : > { %v8778_v7 = vpop.f32.mrb[10].mxu1 }
 0x1f7   : > { %v8780_v18 = vpop.f32.mrb[11].mxu1 }
 0x1fc   : > { %v8782_v24 = vpop.f32.mrb[12].mxu1 }
 0x1fd   : > { %v8784_v44 = vpop.f32.mrb[13].mxu1 }
 0x1fe   : > { %v8786_v55 = vpop.f32.mrb[14].mxu1 }
 0x1ff   : > { %v8788_v29 = vpop.f32.mrb[15].mxu1 }
 0x204   : > { %v8790_v34 = vpop.f32.mrb[16].mxu1 }
 0x205   : > { %v8792_v40 = vpop.f32.mrb[17].mxu1 }
 0x206   : > { %v8794_v30 = vpop.f32.mrb[18].mxu1 }
 0x207   : > { %v8796_v43 = vpop.f32.mrb[19].mxu1 }
 0x20c   : > { %v8798_v52 = vpop.f32.mrb[20].mxu1 }
 0x20d   : > { %v8800_v15 = vpop.f32.mrb[21].mxu1 }
 0x20e   : > { %v8802_v22 = vpop.f32.mrb[22].mxu1 }
 0x20f   : > { %v8804_v54 = vpop.f32.mrb[23].mxu1 }
 0x214   : > { %v8806_v38 = vpop.f32.mrb[24].mxu1 }
 0x215   : > { %v8808_v59 = vpop.f32.mrb[25].mxu1 }
 0x216   : > { %v8810_v3 = vpop.f32.mrb[26].mxu1 }
 0x217   : > { %v8815_v33 = vpop.f32.mrb[27].mxu1 }
 0x21c   : > { %v8821_v32 = vpop.f32.mrb[28].mxu1 }
 0x21d   : > { %v8823_v49 = vpop.f32.mrb[29].mxu1 }
 0x21e   : > { %v8825_v4 = vpop.f32.mrb[30].mxu1 }
 0x21f   : > { %10845 = vst [vmem:[#allocation11_spill] sm:$0xff] %v8825_v4  ;;  %v8827_v19 = vpop.f32.mrb[31].mxu1 }
 0x220   : > { %10846 = vst [vmem:[#allocation14_spill] sm:$0xff] %v8827_v19 }
 0x23c   : > { %v7048_v12 = vpop.f32.mrb[0].mxu0 }
 0x23d   : > { %v7138_v14 = vadd.f32 %v7048_v12, %v8726_v47  ;;  %v2699_v23 = vpop.f32.mrb[1].mxu0 }
 0x23e   : > { %v7139_v1 = vadd.f32 %v2699_v23, %v8728_v6  ;;  %v7049_v48 = vpop.f32.mrb[2].mxu0  ;;  %v8852_v6 = vld [vmem:[%s10734_s5 + $0x1] ss:$0 sm:$0xff] }
 0x23f   : > { %v2867_v27 = vmul.f32 %v7138_v14, %v8832_v56  ;;  %v7140_v10 = vadd.f32 %v7049_v48, %v8730_v39  ;;  %v2702_v61 = vpop.f32.mrb[3].mxu0  ;;  %v8856_v37 = vmul.f32 %v7448_v13, %v8852_v6 }
 0x240   : > { %v2865_v60 = vmul.f32 %v7139_v1, %v8832_v56  ;;  %v7141_v36 = vadd.f32 %v2702_v61, %v8732_v46  ;;  %v8861_v46 = vld [vmem:[%s10734_s5 + $0x2] ss:$0 sm:$0xff] }
 0x241   : > { %v2906_v47 = vadd.f32 %v8838_v45, %v2867_v27  ;;  %v2868_v11 = vmul.f32 %v7140_v10, %v8832_v56  ;;  %v8865_v31 = vmul.f32 %v7448_v13, %v8861_v46  ;;  %v8885_v10 = vld [vmem:[%s10734_s5 + $0x6] ss:$0 sm:$0xff] }
 0x242   : > { %v2904_v57 = vadd.f32 %v8838_v45, %v2865_v60  ;;  %v2866_v2 = vmul.f32 %v7141_v36, %v8832_v56 }
 0x243   : > { %v2938_v58 = vmax.f32 %v2906_v47, 0.0  ;;  %v2907_v39 = vadd.f32 %v8838_v45, %v2868_v11  ;;  %v8897_v47 = vld [vmem:[%s10734_s5 + $0x3] ss:$0 sm:$0xff]  ;;  %v8902_v11 = vld [vmem:[%s10734_s5 + $0x4] ss:$0 sm:$0xff] }
 0x244   : > { %v2936_v50 = vmax.f32 %v2904_v57, 0.0  ;;  %v2905_v42 = vadd.f32 %v8838_v45, %v2866_v2  ;;  %v7052_v51 = vpop.f32.mrb[4].mxu0 }
 0x245   : > { %3025 = vst [vmem:[#allocation3 + $0x31] sm:$0xff] %v2938_v58  ;;  %v2939_v28 = vmax.f32 %v2907_v39, 0.0  ;;  %v7142_v41 = vadd.f32 %v7052_v51, %v6882_v17  ;;  %v2715_v8 = vpop.f32.mrb[5].mxu0  ;;  %v8875_v17 = vld [vmem:[%s10734_s5] ss:$0 sm:$0xff] }
 0x246   : > { %3023 = vst [vmem:[#allocation3 + $0x19] sm:$0xff] %v2936_v50  ;;  %v2937_v25 = vmax.f32 %v2905_v42, 0.0  ;;  %v7143_v35 = vadd.f32 %v2715_v8, %v1493_v62  ;;  %v7053_v53 = vpop.f32.mrb[6].mxu0  ;;  %v3114_v36 = vmul.f32 %v7448_v13, %v8875_v17  ;;  %v8909_v50 = vsel %vm677_vm0, %v8817_v16, 0 }
 0x247   : > { %3026 = vst [vmem:[#allocation3 + $0x39] sm:$0xff] %v2939_v28  ;;  %v2871_v20 = vmul.f32 %v7142_v41, %v8832_v56  ;;  %v7144_v21 = vadd.f32 %v7053_v53, %v8770_v5  ;;  %v2718_v0 = vpop.f32.mrb[7].mxu0 }
 0x248   : > { %3024 = vst [vmem:[#allocation3 + $0x21] sm:$0xff] %v2937_v25  ;;  %v2869_v14 = vmul.f32 %v7143_v35, %v8832_v56  ;;  %v7145_v23 = vadd.f32 %v2718_v0, %v8772_v63  ;;  %v8890_v63 = vld [vmem:[%s10734_s5 + $0x7] ss:$0 sm:$0xff] }
 0x249   : > { %v2910_v1 = vadd.f32 %v8838_v45, %v2871_v20  ;;  %v2872_v48 = vmul.f32 %v7144_v21, %v8832_v56 }
 0x24a   : > { %v2908_v5 = vadd.f32 %v8838_v45, %v2869_v14  ;;  %v2870_v27 = vmul.f32 %v7145_v23, %v8832_v56 }
 0x24b   : > { %v2942_v61 = vmax.f32 %v2910_v1, 0.0  ;;  %v2911_v60 = vadd.f32 %v8838_v45, %v2872_v48 }
 0x24c   : > { %v2940_v57 = vmax.f32 %v2908_v5, 0.0  ;;  %v2909_v2 = vadd.f32 %v8838_v45, %v2870_v27  ;;  %v7056_v58 = vpop.f32.mrb[8].mxu0  ;;  %v8905_v39 = vld [vmem:[#allocation3 + $0x30] sm:$0xff] }
 0x24d   : > { %3029 = vst [vmem:[#allocation3 + $0x61] sm:$0xff] %v2942_v61  ;;  %v2943_v13 = vmax.f32 %v2911_v60, 0.0  ;;  %v7146_v42 = vadd.f32 %v7056_v58, %v8774_v9  ;;  %v2731_v51 = vpop.f32.mrb[9].mxu0  ;;  %v8912_v28 = vld [vmem:[#allocation3 + $0x18] sm:$0xff]  ;;  %v3252_v41 = vmul.f32 %v8885_v10, %v8905_v39  ;;  %v8918_v8 = vmul.f32 %v8890_v63, %v8905_v39 }
 0x24e   : > { %3027 = vst [vmem:[#allocation3 + $0x49] sm:$0xff] %v2940_v57  ;;  %v2941_v25 = vmax.f32 %v2909_v2, 0.0  ;;  %v7147_v35 = vadd.f32 %v2731_v51, %v8776_v26  ;;  %v7057_v16 = vpop.f32.mrb[10].mxu0  ;;  %v8921_v53 = vld [vmem:[#allocation3 + $0x38] sm:$0xff]  ;;  %v3183_v9 = vmul.f32 %v8897_v47, %v8912_v28  ;;  %v3566_v20 = vmul.f32 %v8902_v11, %v8912_v28  ;;  %v8958_v62 = vld [vmem:[#allocation3 + $0x40] sm:$0xff] }
 0x24f   : > { %3030 = vst [vmem:[#allocation3 + $0x69] sm:$0xff] %v2943_v13  ;;  %v2875_v21 = vmul.f32 %v7146_v42, %v8832_v56  ;;  %v7148_v0 = vadd.f32 %v7057_v16, %v8778_v7  ;;  %v2734_v14 = vpop.f32.mrb[11].mxu0  ;;  %v8929_v23 = vld [vmem:[#allocation3 + $0x20] sm:$0xff]  ;;  %v8931_v1 = vld [vmem:[#allocation3 + $0x28] sm:$0xff]  ;;  %v3253_v26 = vmul.f32 %v8885_v10, %v8921_v53  ;;  %v8937_v48 = vmul.f32 %v8890_v63, %v8921_v53 }
 0x250   : > { %3028 = vst [vmem:[#allocation3 + $0x51] sm:$0xff] %v2941_v25  ;;  %v2873_v5 = vmul.f32 %v7147_v35, %v8832_v56  ;;  %v7149_v27 = vadd.f32 %v2734_v14, %v8780_v18  ;;  %v3184_v7 = vmul.f32 %v8897_v47, %v8929_v23  ;;  %v3215_v61 = vadd.f32 %v3183_v9, %v3114_v36 }
 0x251   : > { %v2914_v60 = vadd.f32 %v8838_v45, %v2875_v21  ;;  %v2876_v57 = vmul.f32 %v7148_v0, %v8832_v56  ;;  %v8947_v2 = vmul.f32 %v8852_v6, %v8931_v1  ;;  %v3567_v58 = vmul.f32 %v8902_v11, %v8929_v23 }
 0x252   : > { %v2912_v13 = vadd.f32 %v8838_v45, %v2873_v5  ;;  %v2874_v42 = vmul.f32 %v7149_v27, %v8832_v56  ;;  %v3216_v18 = vadd.f32 %v3184_v7, %v3114_v36  ;;  %v3284_v51 = vadd.f32 %v3252_v41, %v3215_v61 }
 0x253   : > { %v2946_v25 = vmax.f32 %v2914_v60, 0.0  ;;  %v2915_v35 = vadd.f32 %v8838_v45, %v2876_v57  ;;  %v3568_v9 = vmul.f32 %v8902_v11, %v8931_v1  ;;  %v10847_v5 = vrot.slane %v8856_v37, 1 }
 0x254   : > { %v2944_v21 = vmax.f32 %v2912_v13, 0.0  ;;  %v2913_v0 = vadd.f32 %v8838_v45, %v2874_v42  ;;  %v7060_v14 = vpop.f32.mrb[12].mxu0  ;;  %v3285_v12 = vadd.f32 %v3253_v26, %v3216_v18  ;;  %v3662_v61 = vrot.slane %v3566_v20, 1 }
 0x255   : > { %v3529_v27 = vadd.f32 %v10847_v5, %v3284_v51  ;;  %3033 = vst [vmem:[#allocation3 + $0x91] sm:$0xff] %v2946_v25  ;;  %v2947_v36 = vmax.f32 %v2915_v35, 0.0  ;;  %v7150_v41 = vadd.f32 %v7060_v14, %v8782_v24  ;;  %v2747_v7 = vpop.f32.mrb[13].mxu0  ;;  %v3663_v60 = vrot.slane %v3567_v58, 1  ;;  %v8977_v25 = vld [vmem:[%s10734_s5 + $0x5] ss:$0 sm:$0xff] }
 0x256   : > { %3031 = vst [vmem:[#allocation3 + $0x79] sm:$0xff] %v2944_v21  ;;  %v2945_v57 = vmax.f32 %v2913_v0, 0.0  ;;  %v7151_v13 = vadd.f32 %v2747_v7, %v8784_v44  ;;  %v7061_v16 = vpop.f32.mrb[14].mxu0  ;;  %v10848_v42 = vmov %v10847_v5  ;;  %v3665_v4 = vrot.slane %v3568_v9, 1 }
 0x257   : > { %v3530_v19 = vadd.f32 %v10848_v42, %v3285_v12  ;;  %3034 = vst [vmem:[#allocation3 + $0x99] sm:$0xff] %v2947_v36  ;;  %v2879_v26 = vmul.f32 %v7150_v41, %v8832_v56  ;;  %v7152_v18 = vadd.f32 %v7061_v16, %v8786_v55  ;;  %v2750_v51 = vpop.f32.mrb[15].mxu0  ;;  %v3664_v24 = vsel %vm1260_vm2, %v3662_v61, %v3663_v60 }
 0x258   : > { %v3813_v20 = vmul.f32 %v8890_v63, %v8958_v62  ;;  %3032 = vst [vmem:[#allocation3 + $0x81] sm:$0xff] %v2945_v57  ;;  %v2877_v58 = vmul.f32 %v7151_v13, %v8832_v56  ;;  %v7153_v44 = vadd.f32 %v2750_v51, %v8788_v29  ;;  %v3666_v37 = vsel %vm1260_vm2, %v3663_v60, %v3665_v4 }
 0x259   : > { %v3774_v12 = vadd.f32 %v3664_v24, %v3529_v27  ;;  %v2918_v55 = vadd.f32 %v8838_v45, %v2879_v26  ;;  %v2880_v35 = vmul.f32 %v7152_v18, %v8832_v56  ;;  %v3775_v16 = vadd.f32 %v3666_v37, %v3530_v19 }
 0x25a   : > { %v3907_v9 = vrot.slane %v8918_v8, 1  ;;  %v2916_v21 = vadd.f32 %v8838_v45, %v2877_v58  ;;  %v2878_v0 = vmul.f32 %v7153_v44, %v8832_v56  ;;  %v3908_v29 = vrot.slane %v8937_v48, 1  ;;  %v9003_v58 = vld [vmem:[%s10734_s5 + $0x8] ss:$0 sm:$0xff] }
 0x25b   : > { %v3910_v4 = vrot.slane %v3813_v20, 1  ;;  %v2950_v14 = vmax.f32 %v2918_v55, 0.0  ;;  %v2919_v5 = vadd.f32 %v8838_v45, %v2880_v35  ;;  %v8988_v27 = vmul.f32 %v8861_v46, %v8931_v1 }
 0x25c   : > { %v4301_v36 = vmul.f32 %v8977_v25, %v8912_v28  ;;  %v2948_v19 = vmax.f32 %v2916_v21, 0.0  ;;  %v2917_v8 = vadd.f32 %v8838_v45, %v2878_v0  ;;  %v7064_v41 = vpop.f32.mrb[16].mxu0  ;;  %v3909_v7 = vsel %vm1260_vm2, %v3907_v9, %v3908_v29 }
 0x25d   : > { %v3911_v61 = vsel %vm1260_vm2, %v3908_v29, %v3910_v4  ;;  %3037 = vst [vmem:[#allocation3 + $0xc1] sm:$0xff] %v2950_v14  ;;  %v2951_v48 = vmax.f32 %v2919_v5, 0.0  ;;  %v7154_v60 = vadd.f32 %v7064_v41, %v8790_v34  ;;  %v2763_v57 = vpop.f32.mrb[17].mxu0  ;;  %v4019_v13 = vadd.f32 %v3909_v7, %v3774_v12 }
 0x25e   : > { %v4020_v42 = vadd.f32 %v3911_v61, %v3775_v16  ;;  %3035 = vst [vmem:[#allocation3 + $0xa9] sm:$0xff] %v2948_v19  ;;  %v2949_v26 = vmax.f32 %v2917_v8, 0.0  ;;  %v7155_v18 = vadd.f32 %v2763_v57, %v8792_v40  ;;  %v7065_v51 = vpop.f32.mrb[18].mxu0  ;;  %v4160_v24 = vrot.slane %v8988_v27, 2 }
 0x25f   : > { %v4302_v20 = vmul.f32 %v8977_v25, %v8929_v23  ;;  %3038 = vst [vmem:[#allocation3 + $0xc9] sm:$0xff] %v2951_v48  ;;  %v2883_v34 = vmul.f32 %v7154_v60, %v8832_v56  ;;  %v7156_v44 = vadd.f32 %v7065_v51, %v8794_v30  ;;  %v2766_v37 = vpop.f32.mrb[19].mxu0  ;;  %v10849_v12 = vrot.slane %v8865_v31, 2 }
 0x260   : > { %3036 = vst [vmem:[#allocation3 + $0xb1] sm:$0xff] %v2949_v26  ;;  %v2881_v16 = vmul.f32 %v7155_v18, %v8832_v56  ;;  %v7157_v9 = vadd.f32 %v2766_v37, %v8796_v43  ;;  %v4303_v21 = vmul.f32 %v8977_v25, %v8931_v1  ;;  %v4397_v0 = vrot.slane %v4301_v36, 2 }
 0x261   : > { %v4264_v40 = vadd.f32 %v10849_v12, %v4019_v13  ;;  %v10850_v55 = vmov %v10849_v12  ;;  %v2922_v29 = vadd.f32 %v8838_v45, %v2883_v34  ;;  %v2884_v30 = vmul.f32 %v7156_v44, %v8832_v56 }
 0x262   : > { %v4265_v35 = vadd.f32 %v10850_v55, %v4020_v42  ;;  %v4398_v4 = vrot.slane %v4302_v20, 2  ;;  %v4546_v14 = vmul.f32 %v9003_v58, %v8905_v39  ;;  %v2920_v31 = vadd.f32 %v8838_v45, %v2881_v16 }
 0x263   : > { %v2882_v5 = vmul.f32 %v7157_v9, %v8832_v56  ;;  %v4400_v19 = vrot.slane %v4303_v21, 2  ;;  %v4547_v43 = vmul.f32 %v9003_v58, %v8921_v53  ;;  %v2954_v8 = vmax.f32 %v2922_v29, 0.0  ;;  %v9041_v29 = vld [vmem:[#allocation3 + $0x48] sm:$0xff] }
 0x264   : > { %v2923_v1 = vadd.f32 %v8838_v45, %v2884_v30  ;;  %v4399_v36 = vsel %vm2062_vm3, %v4397_v0, %v4398_v4  ;;  %v4548_v41 = vmul.f32 %v9003_v58, %v8958_v62  ;;  %v2952_v7 = vmax.f32 %v2920_v31, 0.0  ;;  %v7068_v48 = vpop.f32.mrb[20].mxu0 }
 0x265   : > { %v2921_v61 = vadd.f32 %v8838_v45, %v2882_v5  ;;  %v4401_v60 = vsel %vm2062_vm3, %v4398_v4, %v4400_v19  ;;  %v4509_v57 = vadd.f32 %v4399_v36, %v4264_v40  ;;  %3041 = vst [vmem:[#allocation3 + $0xf1] sm:$0xff] %v2954_v8  ;;  %v7158_v42 = vadd.f32 %v7068_v48, %v8798_v52  ;;  %v2779_v51 = vpop.f32.mrb[21].mxu0  ;;  %v9047_v19 = vld [vmem:[#allocation3 + $0x50] sm:$0xff] }
 0x266   : > { %v2955_v13 = vmax.f32 %v2923_v1, 0.0  ;;  %v4510_v26 = vadd.f32 %v4401_v60, %v4265_v35  ;;  %v4642_v18 = vrot.slane %v4546_v14, 2  ;;  %3039 = vst [vmem:[#allocation3 + $0xd9] sm:$0xff] %v2952_v7  ;;  %v4643_v34 = vrot.slane %v4547_v43, 2  ;;  %v7069_v12 = vpop.f32.mrb[22].mxu0 }
 0x267   : > { %v2953_v20 = vmax.f32 %v2921_v61, 0.0  ;;  %v4645_v44 = vrot.slane %v4548_v41, 2  ;;  %v7159_v37 = vadd.f32 %v2779_v51, %v8800_v15  ;;  %v2887_v55 = vmul.f32 %v7158_v42, %v8832_v56  ;;  %v2782_v40 = vpop.f32.mrb[23].mxu0 }
 0x268   : > { %3042 = vst [vmem:[#allocation3 + $0xf9] sm:$0xff] %v2955_v13  ;;  %v7160_v16 = vadd.f32 %v7069_v12, %v8802_v22  ;;  %v3116_v9 = vmul.f32 %v8875_v17, %v8912_v28  ;;  %v3117_v52 = vmul.f32 %v8875_v17, %v8929_v23  ;;  %v4644_v35 = vsel %vm2062_vm3, %v4642_v18, %v4643_v34 }
 0x269   : > { %3040 = vst [vmem:[#allocation3 + $0xe1] sm:$0xff] %v2953_v20  ;;  %v4646_v21 = vsel %vm2062_vm3, %v4643_v34, %v4645_v44  ;;  %v2885_v15 = vmul.f32 %v7159_v37, %v8832_v56  ;;  %v7161_v0 = vadd.f32 %v2782_v40, %v8804_v54  ;;  %v2926_v22 = vadd.f32 %v8838_v45, %v2887_v55  ;;  %v9067_v34 = vld [vmem:[#allocation3 + $0x58] sm:$0xff] }
 0x26a   : > { %v4754_v30 = vadd.f32 %v4644_v35, %v4509_v57  ;;  %v4755_v4 = vadd.f32 %v4646_v21, %v4510_v26  ;;  %v2888_v14 = vmul.f32 %v7160_v16, %v8832_v56  ;;  %v3185_v43 = vmul.f32 %v8897_v47, %v8905_v39 }
 0x26b   : > { %v2924_v31 = vadd.f32 %v8838_v45, %v2885_v15  ;;  %v2886_v5 = vmul.f32 %v7161_v0, %v8832_v56  ;;  %v3186_v54 = vmul.f32 %v8897_v47, %v8921_v53  ;;  %v2958_v8 = vmax.f32 %v2926_v22, 0.0 }
 0x26c   : > { %v4786_v1 = vpack.c.bf16 %v4755_v4, %v4754_v30  ;;  %v2927_v36 = vadd.f32 %v8838_v45, %v2888_v14  ;;  %v3254_v41 = vmul.f32 %v8885_v10, %v9041_v29  ;;  %v3217_v48 = vadd.f32 %v3185_v43, %v3116_v9  ;;  %v9057_v57 = vpop.f32.mrb[24].mxu0 }
 0x26d   : > { %v2956_v7 = vmax.f32 %v2924_v31, 0.0  ;;  %v2925_v61 = vadd.f32 %v8838_v45, %v2886_v5  ;;  %v3218_v60 = vadd.f32 %v3186_v54, %v3117_v52  ;;  %3045 = vst [vmem:[#allocation3 + $0x121] sm:$0xff] %v2958_v8  ;;  %v3255_v42 = vmul.f32 %v8885_v10, %v9047_v19  ;;  %v9065_v51 = vpop.f32.mrb[25].mxu0 }
 0x26e   : > { %7094 = vmatprep.mubr.bf16.mxu1 %v4786_v1  ;;  %v2959_v13 = vmax.f32 %v2927_v36, 0.0  ;;  %v3324_v26 = vmul.f32 %v8852_v6, %v8912_v28  ;;  %v3325_v18 = vmul.f32 %v8852_v6, %v8929_v23  ;;  %v3286_v44 = vadd.f32 %v3254_v41, %v3217_v48  ;;  %v9073_v55 = vpop.f32.mrb[26].mxu0 }
 0x26f   : > { %3043 = vst [vmem:[#allocation3 + $0x109] sm:$0xff] %v2956_v7  ;;  %v2957_v20 = vmax.f32 %v2925_v61, 0.0  ;;  %v3569_v37 = vmul.f32 %v8902_v11, %v8905_v39  ;;  %v3570_v12 = vmul.f32 %v8902_v11, %v8921_v53  ;;  %v3287_v16 = vadd.f32 %v3255_v42, %v3218_v60  ;;  %v9077_v35 = vpop.f32.mrb[27].mxu0 }
 0x270   : > { %3046 = vst [vmem:[#allocation3 + $0x129] sm:$0xff] %v2959_v13  ;;  %v3422_v40 = vrot.slane %v3324_v26, 1  ;;  %v3423_v9 = vrot.slane %v3325_v18, 1  ;;  %v3571_v52 = vmul.f32 %v8902_v11, %v8958_v62  ;;  %v3814_v0 = vmul.f32 %v8890_v63, %v9041_v29 }
 0x271   : > { %3044 = vst [vmem:[#allocation3 + $0x111] sm:$0xff] %v2957_v20  ;;  %v3667_v21 = vrot.slane %v3569_v37, 1  ;;  %v3668_v15 = vrot.slane %v3570_v12, 1  ;;  %v3815_v22 = vmul.f32 %v8890_v63, %v9047_v19  ;;  %v10851_v4 = vrot.slane %v8947_v2, 1 }
 0x272   : > { %v3424_v30 = vsel %vm1260_vm2, %v3422_v40, %v3423_v9  ;;  %v3670_v31 = vrot.slane %v3571_v52, 1  ;;  %v3816_v5 = vmul.f32 %v8890_v63, %v9067_v34  ;;  %v3912_v1 = vrot.slane %v3814_v0, 1 }
 0x273   : > { %v3426_v14 = vsel %vm1260_vm2, %v3423_v9, %v10851_v4  ;;  %v3531_v43 = vadd.f32 %v3424_v30, %v3286_v44  ;;  %v3669_v8 = vsel %vm1260_vm2, %v3667_v21, %v3668_v15  ;;  %v3913_v41 = vrot.slane %v3815_v22, 1 }
 0x274   : > { %v3532_v54 = vadd.f32 %v3426_v14, %v3287_v16  ;;  %v3671_v36 = vsel %vm1260_vm2, %v3668_v15, %v3670_v31  ;;  %v3915_v7 = vrot.slane %v3816_v5, 1  ;;  %v4059_v61 = vmul.f32 %v8861_v46, %v8912_v28  ;;  %v9097_v42 = vpop.f32.mrb[28].mxu0 }
 0x275   : > { %v3776_v48 = vadd.f32 %v3669_v8, %v3531_v43  ;;  %v4060_v60 = vmul.f32 %v8861_v46, %v8929_v23  ;;  %v4304_v13 = vmul.f32 %v8977_v25, %v8905_v39  ;;  %v3914_v26 = vsel %vm1260_vm2, %v3912_v1, %v3913_v41  ;;  %v9103_v37 = vpop.f32.mrb[29].mxu0 }
 0x276   : > { %v3777_v2 = vadd.f32 %v3671_v36, %v3532_v54  ;;  %v3916_v18 = vsel %vm1260_vm2, %v3913_v41, %v3915_v7  ;;  %v4157_v20 = vrot.slane %v4059_v61, 2  ;;  %v4305_v44 = vmul.f32 %v8977_v25, %v8921_v53  ;;  %v9107_v40 = vpop.f32.mrb[30].mxu0  ;;  %v9125_v7 = vld [vmem:[#allocation3 + $0x60] sm:$0xff]  ;;  %v9127_v61 = vld [vmem:[#allocation3 + $0x68] sm:$0xff] }
 0x277   : > { %v4021_v28 = vadd.f32 %v3914_v26, %v3776_v48  ;;  %v4158_v16 = vrot.slane %v4060_v60, 2  ;;  %v4306_v23 = vmul.f32 %v8977_v25, %v8958_v62  ;;  %v4402_v9 = vrot.slane %v4304_v13, 2  ;;  %v9113_v0 = vpop.f32.mrb[31].mxu0 }
 0x278   : > { %v4022_v12 = vadd.f32 %v3916_v18, %v3777_v2  ;;  %v4403_v52 = vrot.slane %v4305_v44, 2  ;;  %v4549_v21 = vmul.f32 %v9003_v58, %v9041_v29  ;;  %v4550_v15 = vmul.f32 %v9003_v58, %v9047_v19 }
 0x279   : > { %v4159_v22 = vsel %vm2062_vm3, %v4157_v20, %v4158_v16  ;;  %v4161_v30 = vsel %vm2062_vm3, %v4158_v16, %v4160_v24  ;;  %v4405_v4 = vrot.slane %v4306_v23, 2  ;;  %v4551_v14 = vmul.f32 %v9003_v58, %v9067_v34 }
 0x27a   : > { %v4266_v31 = vadd.f32 %v4159_v22, %v4021_v28  ;;  %v4267_v5 = vadd.f32 %v4161_v30, %v4022_v12  ;;  %v4404_v43 = vsel %vm2062_vm3, %v4402_v9, %v4403_v52  ;;  %v4647_v54 = vrot.slane %v4549_v21, 2  ;;  %v9151_v30 = vld [vmem:[#allocation3 + $0x70] sm:$0xff] }
 0x27b   : > { %v4406_v8 = vsel %vm2062_vm3, %v4403_v52, %v4405_v4  ;;  %v4648_v1 = vrot.slane %v4550_v15, 2  ;;  %v4650_v36 = vrot.slane %v4551_v14, 2  ;;  %v7162_v41 = vadd.f32 %v9057_v57, %v8806_v38 }
 0x27c   : > { %v4511_v27 = vadd.f32 %v4404_v43, %v4266_v31  ;;  %v4512_v24 = vadd.f32 %v4406_v8, %v4267_v5  ;;  %v3118_v48 = vmul.f32 %v8875_v17, %v8905_v39  ;;  %v3119_v2 = vmul.f32 %v8875_v17, %v8921_v53 }
 0x27d   : > { %v4649_v60 = vsel %vm2062_vm3, %v4647_v54, %v4648_v1  ;;  %v4651_v13 = vsel %vm2062_vm3, %v4648_v1, %v4650_v36  ;;  %v2891_v26 = vmul.f32 %v7162_v41, %v8832_v56  ;;  %v3187_v38 = vmul.f32 %v8897_v47, %v9041_v29 }
 0x27e   : > { %v4756_v57 = vadd.f32 %v4649_v60, %v4511_v27  ;;  %v4757_v18 = vadd.f32 %v4651_v13, %v4512_v24  ;;  %v3188_v20 = vmul.f32 %v8897_v47, %v9047_v19  ;;  %v3256_v44 = vmul.f32 %v8885_v10, %v9125_v7 }
 0x27f   : > { %v2930_v28 = vadd.f32 %v8838_v45, %v2891_v26  ;;  %v3219_v12 = vadd.f32 %v3187_v38, %v3118_v48  ;;  %v3257_v16 = vmul.f32 %v8885_v10, %v9127_v61  ;;  %v3327_v23 = vmul.f32 %v8852_v6, %v8905_v39 }
 0x280   : > { %v4787_v9 = vpack.c.bf16 %v4757_v18, %v4756_v57  ;;  %v3220_v52 = vadd.f32 %v3188_v20, %v3119_v2  ;;  %v3328_v21 = vmul.f32 %v8852_v6, %v8921_v53  ;;  %v3329_v15 = vmul.f32 %v8852_v6, %v8958_v62 }
 0x281   : > { %v2962_v22 = vmax.f32 %v2930_v28, 0.0  ;;  %v3288_v4 = vadd.f32 %v3256_v44, %v3219_v12  ;;  %v3427_v14 = vrot.slane %v3327_v23, 1  ;;  %v3572_v31 = vmul.f32 %v8902_v11, %v9041_v29 }
 0x282   : > { %7095 = vmatmul.mubr.bf16.vlgmr.msra.gmra.mrb[32].mxu1 %v4787_v9  ;;  %v3289_v5 = vadd.f32 %v3257_v16, %v3220_v52  ;;  %v3428_v43 = vrot.slane %v3328_v21, 1  ;;  %v3430_v54 = vrot.slane %v3329_v15, 1  ;;  %v3573_v8 = vmul.f32 %v8902_v11, %v9047_v19 }
 0x283   : > { %3049 = vst [vmem:[#allocation3 + $0x151] sm:$0xff] %v2962_v22  ;;  %v3574_v1 = vmul.f32 %v8902_v11, %v9067_v34  ;;  %v3672_v36 = vrot.slane %v3572_v31, 1  ;;  %v3817_v41 = vmul.f32 %v8890_v63, %v9125_v7  ;;  %v3818_v27 = vmul.f32 %v8890_v63, %v9127_v61  ;;  %7127 = vmatpush3.bf16.msra.mxu1 %v8909_v50 }
 0x284   : > { %v3429_v24 = vsel %vm1260_vm2, %v3427_v14, %v3428_v43  ;;  %v3431_v48 = vsel %vm1260_vm2, %v3428_v43, %v3430_v54  ;;  %v3673_v2 = vrot.slane %v3573_v8, 1  ;;  %v3819_v60 = vmul.f32 %v8890_v63, %v9151_v30 }
 0x285   : > { %v3533_v13 = vadd.f32 %v3429_v24, %v3288_v4  ;;  %v3534_v26 = vadd.f32 %v3431_v48, %v3289_v5  ;;  %v3675_v38 = vrot.slane %v3574_v1, 1  ;;  %v3917_v57 = vrot.slane %v3817_v41, 1 }
 0x286   : > { %v3674_v18 = vsel %vm1260_vm2, %v3672_v36, %v3673_v2  ;;  %v3918_v20 = vrot.slane %v3818_v27, 1  ;;  %v3920_v44 = vrot.slane %v3819_v60, 1  ;;  %v4062_v28 = vmul.f32 %v8861_v46, %v8905_v39 }
 0x287   : > { %v3676_v50 = vsel %vm1260_vm2, %v3673_v2, %v3675_v38  ;;  %v3778_v12 = vadd.f32 %v3674_v18, %v3533_v13  ;;  %v4063_v16 = vmul.f32 %v8861_v46, %v8921_v53  ;;  %v4064_v23 = vmul.f32 %v8861_v46, %v8958_v62 }
 0x288   : > { %v3779_v9 = vadd.f32 %v3676_v50, %v3534_v26  ;;  %v3919_v52 = vsel %vm1260_vm2, %v3917_v57, %v3918_v20  ;;  %v3921_v21 = vsel %vm1260_vm2, %v3918_v20, %v3920_v44  ;;  %v4162_v15 = vrot.slane %v4062_v28, 2 }
 0x289   : > { %v4023_v22 = vadd.f32 %v3919_v52, %v3778_v12  ;;  %v4163_v4 = vrot.slane %v4063_v16, 2  ;;  %v4165_v14 = vrot.slane %v4064_v23, 2  ;;  %v4307_v39 = vmul.f32 %v8977_v25, %v9041_v29  ;;  %v9206_v23 = vld [vmem:[#allocation3 + $0x80] sm:$0xff] }
 0x28a   : > { %v4024_v31 = vadd.f32 %v3921_v21, %v3779_v9  ;;  %v4308_v5 = vmul.f32 %v8977_v25, %v9047_v19  ;;  %v4309_v53 = vmul.f32 %v8977_v25, %v9067_v34  ;;  %v4552_v62 = vmul.f32 %v9003_v58, %v9125_v7 }
 0x28b   : > { %v4164_v43 = vsel %vm2062_vm3, %v4162_v15, %v4163_v4  ;;  %v4166_v54 = vsel %vm2062_vm3, %v4163_v4, %v4165_v14  ;;  %v4407_v8 = vrot.slane %v4307_v39, 2  ;;  %v4553_v1 = vmul.f32 %v9003_v58, %v9127_v61 }
 0x28c   : > { %v4268_v36 = vadd.f32 %v4164_v43, %v4023_v22  ;;  %v4269_v41 = vadd.f32 %v4166_v54, %v4024_v31  ;;  %v4408_v27 = vrot.slane %v4308_v5, 2  ;;  %v4410_v24 = vrot.slane %v4309_v53, 2 }
 0x28d   : > { %v4554_v48 = vmul.f32 %v9003_v58, %v9151_v30  ;;  %v4652_v2 = vrot.slane %v4552_v62, 2  ;;  %v4653_v60 = vrot.slane %v4553_v1, 2  ;;  %v7163_v13 = vadd.f32 %v9065_v51, %v8808_v59  ;;  %v9204_v51 = vld [vmem:[#allocation3 + $0x78] sm:$0xff] }
 0x28e   : > { %v4409_v26 = vsel %vm2062_vm3, %v4407_v8, %v4408_v27  ;;  %v4411_v38 = vsel %vm2062_vm3, %v4408_v27, %v4410_v24  ;;  %v7164_v57 = vadd.f32 %v9073_v55, %v8810_v3  ;;  %v7165_v18 = vadd.f32 %v9077_v35, %v8815_v33 }
 0x28f   : > { %v4513_v20 = vadd.f32 %v4409_v26, %v4268_v36  ;;  %v4514_v44 = vadd.f32 %v4411_v38, %v4269_v41  ;;  %v4654_v28 = vsel %vm2062_vm3, %v4652_v2, %v4653_v60  ;;  %v4655_v50 = vrot.slane %v4554_v48, 2  ;;  %v9228_v41 = vld [vmem:[#allocation3 + $0x88] sm:$0xff] }
 0x290   : > { %v2889_v12 = vmul.f32 %v7163_v13, %v8832_v56  ;;  %v2892_v16 = vmul.f32 %v7164_v57, %v8832_v56  ;;  %v2890_v59 = vmul.f32 %v7165_v18, %v8832_v56  ;;  %v3120_v3 = vmul.f32 %v8875_v17, %v9041_v29 }
 0x291   : > { %v4656_v33 = vsel %vm2062_vm3, %v4653_v60, %v4655_v50  ;;  %v4758_v55 = vadd.f32 %v4654_v28, %v4513_v20  ;;  %v3121_v35 = vmul.f32 %v8875_v17, %v9047_v19  ;;  %v3189_v9 = vmul.f32 %v8897_v47, %v9125_v7 }
 0x292   : > { %v4759_v52 = vadd.f32 %v4656_v33, %v4514_v44  ;;  %v2928_v21 = vadd.f32 %v8838_v45, %v2889_v12  ;;  %v2931_v15 = vadd.f32 %v8838_v45, %v2892_v16  ;;  %v2929_v22 = vadd.f32 %v8838_v45, %v2890_v59 }
 0x293   : > { %v3190_v4 = vmul.f32 %v8897_v47, %v9127_v61  ;;  %v3221_v14 = vadd.f32 %v3189_v9, %v3120_v3  ;;  %v3258_v39 = vmul.f32 %v8885_v10, %v9204_v51  ;;  %v3259_v31 = vmul.f32 %v8885_v10, %v9206_v23 }
 0x294   : > { %v4788_v5 = vpack.c.bf16 %v4759_v52, %v4758_v55  ;;  %v2960_v53 = vmax.f32 %v2928_v21, 0.0  ;;  %v2963_v62 = vmax.f32 %v2931_v15, 0.0  ;;  %v2961_v43 = vmax.f32 %v2929_v22, 0.0 }
 0x295   : > { %v3222_v54 = vadd.f32 %v3190_v4, %v3121_v35  ;;  %v3290_v8 = vadd.f32 %v3258_v39, %v3221_v14  ;;  %v3330_v1 = vmul.f32 %v8852_v6, %v9041_v29  ;;  %v3331_v36 = vmul.f32 %v8852_v6, %v9047_v19 }
 0x296   : > { %7098 = vmatprep.mubr.bf16.mxu1 %v4788_v5  ;;  %3047 = vst [vmem:[#allocation3 + $0x139] sm:$0xff] %v2960_v53  ;;  %3050 = vst [vmem:[#allocation3 + $0x159] sm:$0xff] %v2963_v62  ;;  %v3332_v27 = vmul.f32 %v8852_v6, %v9067_v34  ;;  %v3575_v24 = vmul.f32 %v8902_v11, %v9125_v7  ;;  %v3576_v48 = vmul.f32 %v8902_v11, %v9127_v61 }
 0x297   : > { %3048 = vst [vmem:[#allocation3 + $0x141] sm:$0xff] %v2961_v43  ;;  %v3577_v2 = vmul.f32 %v8902_v11, %v9151_v30  ;;  %v3291_v60 = vadd.f32 %v3259_v31, %v3222_v54  ;;  %v3432_v13 = vrot.slane %v3330_v1, 1  ;;  %v3433_v26 = vrot.slane %v3331_v36, 1 }
 0x298   : > { %v3820_v38 = vmul.f32 %v8890_v63, %v9204_v51  ;;  %v3435_v57 = vrot.slane %v3332_v27, 1  ;;  %v3677_v18 = vrot.slane %v3575_v24, 1  ;;  %v3678_v20 = vrot.slane %v3576_v48, 1 }
 0x299   : > { %v3680_v44 = vrot.slane %v3577_v2, 1  ;;  %v3434_v28 = vsel %vm1260_vm2, %v3432_v13, %v3433_v26  ;;  %v3821_v50 = vmul.f32 %v8890_v63, %v9206_v23  ;;  %v3822_v12 = vmul.f32 %v8890_v63, %v9228_v41 }
 0x29a   : > { %v3922_v16 = vrot.slane %v3820_v38, 1  ;;  %v3436_v59 = vsel %vm1260_vm2, %v3433_v26, %v3435_v57  ;;  %v3535_v3 = vadd.f32 %v3434_v28, %v3290_v8  ;;  %v3679_v33 = vsel %vm1260_vm2, %v3677_v18, %v3678_v20 }
 0x29b   : > { %v3681_v55 = vsel %vm1260_vm2, %v3678_v20, %v3680_v44  ;;  %v3536_v35 = vadd.f32 %v3436_v59, %v3291_v60  ;;  %v3923_v9 = vrot.slane %v3821_v50, 1  ;;  %v3925_v52 = vrot.slane %v3822_v12, 1  ;;  %v9274_v12 = vld [vmem:[#allocation3 + $0x90] sm:$0xff] }
 0x29c   : > { %v4065_v21 = vmul.f32 %v8861_v46, %v9041_v29  ;;  %v3780_v15 = vadd.f32 %v3679_v33, %v3535_v3  ;;  %v4066_v22 = vmul.f32 %v8861_v46, %v9047_v19  ;;  %v4067_v4 = vmul.f32 %v8861_v46, %v9067_v34 }
 0x29d   : > { %v4310_v14 = vmul.f32 %v8977_v25, %v9125_v7  ;;  %v3781_v39 = vadd.f32 %v3681_v55, %v3536_v35  ;;  %v3924_v31 = vsel %vm1260_vm2, %v3922_v16, %v3923_v9  ;;  %v3926_v5 = vsel %vm1260_vm2, %v3923_v9, %v3925_v52  ;;  %v9276_v16 = vld [vmem:[#allocation3 + $0x98] sm:$0xff] }
 0x29e   : > { %v4167_v53 = vrot.slane %v4065_v21, 2  ;;  %v4025_v62 = vadd.f32 %v3924_v31, %v3780_v15  ;;  %v4168_v43 = vrot.slane %v4066_v22, 2  ;;  %v4170_v54 = vrot.slane %v4067_v4, 2 }
 0x29f   : > { %v4311_v29 = vmul.f32 %v8977_v25, %v9127_v61  ;;  %v4026_v8 = vadd.f32 %v3926_v5, %v3781_v39  ;;  %v4312_v19 = vmul.f32 %v8977_v25, %v9151_v30  ;;  %v4412_v34 = vrot.slane %v4310_v14, 2 }
 0x2a0   : > { %v4555_v1 = vmul.f32 %v9003_v58, %v9204_v51  ;;  %v4169_v36 = vsel %vm2062_vm3, %v4167_v53, %v4168_v43  ;;  %v4171_v27 = vsel %vm2062_vm3, %v4168_v43, %v4170_v54  ;;  %v4556_v48 = vmul.f32 %v9003_v58, %v9206_v23 }
 0x2a1   : > { %v4413_v24 = vrot.slane %v4311_v29, 2  ;;  %v4270_v2 = vadd.f32 %v4169_v36, %v4025_v62  ;;  %v4271_v60 = vadd.f32 %v4171_v27, %v4026_v8  ;;  %v4415_v13 = vrot.slane %v4312_v19, 2 }
 0x2a2   : > { %v4557_v26 = vmul.f32 %v9003_v58, %v9228_v41  ;;  %v4657_v57 = vrot.slane %v4555_v1, 2  ;;  %v4658_v18 = vrot.slane %v4556_v48, 2  ;;  %v7166_v20 = vadd.f32 %v9097_v42, %v8821_v32 }
 0x2a3   : > { %v4414_v38 = vsel %vm2062_vm3, %v4412_v34, %v4413_v24  ;;  %v4416_v44 = vsel %vm2062_vm3, %v4413_v24, %v4415_v13  ;;  %v3122_v59 = vmul.f32 %v8875_v17, %v9125_v7  ;;  %v3123_v35 = vmul.f32 %v8875_v17, %v9127_v61 }
 0x2a4   : > { %v4515_v28 = vadd.f32 %v4414_v38, %v4270_v2  ;;  %v4660_v50 = vrot.slane %v4557_v26, 2  ;;  %v4516_v3 = vadd.f32 %v4416_v44, %v4271_v60  ;;  %v4659_v33 = vsel %vm2062_vm3, %v4657_v57, %v4658_v18 }
 0x2a5   : > { %v2895_v55 = vmul.f32 %v7166_v20, %v8832_v56  ;;  %v3191_v9 = vmul.f32 %v8897_v47, %v9204_v51  ;;  %v3192_v52 = vmul.f32 %v8897_v47, %v9206_v23  ;;  %v3260_v22 = vmul.f32 %v8885_v10, %v9274_v12  ;;  %v9298_v47 = vld [vmem:[#allocation3 + $0xa0] sm:$0xff] }
 0x2a6   : > { %v4661_v32 = vsel %vm2062_vm3, %v4658_v18, %v4660_v50  ;;  %v4760_v42 = vadd.f32 %v4659_v33, %v4515_v28  ;;  %v3261_v56 = vmul.f32 %v8885_v10, %v9276_v16  ;;  %v3333_v14 = vmul.f32 %v8852_v6, %v9125_v7 }
 0x2a7   : > { %v4761_v21 = vadd.f32 %v4661_v32, %v4516_v3  ;;  %v2934_v15 = vadd.f32 %v8838_v45, %v2895_v55  ;;  %v3223_v4 = vadd.f32 %v3191_v9, %v3122_v59  ;;  %v3224_v17 = vadd.f32 %v3192_v52, %v3123_v35 }
 0x2a8   : > { %v3334_v39 = vmul.f32 %v8852_v6, %v9127_v61  ;;  %v3335_v45 = vmul.f32 %v8852_v6, %v9151_v30  ;;  %v3578_v53 = vmul.f32 %v8902_v11, %v9204_v51  ;;  %v3437_v43 = vrot.slane %v3333_v14, 1 }
 0x2a9   : > { %v4789_v31 = vpack.c.bf16 %v4761_v21, %v4760_v42  ;;  %v2966_v5 = vmax.f32 %v2934_v15, 0.0  ;;  %v3292_v62 = vadd.f32 %v3260_v22, %v3223_v4  ;;  %v3293_v10 = vadd.f32 %v3261_v56, %v3224_v17 }
 0x2aa   : > { %v3438_v54 = vrot.slane %v3334_v39, 1  ;;  %v3440_v29 = vrot.slane %v3335_v45, 1  ;;  %v3579_v8 = vmul.f32 %v8902_v11, %v9206_v23  ;;  %v3580_v19 = vmul.f32 %v8902_v11, %v9228_v41 }
 0x2ab   : > { %7099 = vmatmul.mubr.bf16.gmra.mrb[36].mxu1 %v4789_v31  ;;  %3053 = vst [vmem:[#allocation3 + $0x181] sm:$0xff] %v2966_v5  ;;  %v3682_v34 = vrot.slane %v3578_v53, 1  ;;  %v3823_v6 = vmul.f32 %v8890_v63, %v9274_v12  ;;  %v3824_v36 = vmul.f32 %v8890_v63, %v9276_v16  ;;  %v3825_v27 = vmul.f32 %v8890_v63, %v9298_v47 }
 0x2ac   : > { %v3439_v1 = vsel %vm1260_vm2, %v3437_v43, %v3438_v54  ;;  %v3441_v24 = vsel %vm1260_vm2, %v3438_v54, %v3440_v29  ;;  %v3683_v2 = vrot.slane %v3579_v8, 1  ;;  %v3685_v60 = vrot.slane %v3580_v19, 1  ;;  %v7449_v43 = vld [vmem:[%s10732_s3] ss:$0 sm:$0xff] }
 0x2ad   : > { %v3537_v48 = vadd.f32 %v3439_v1, %v3292_v62  ;;  %v3538_v13 = vadd.f32 %v3441_v24, %v3293_v10  ;;  %v3927_v26 = vrot.slane %v3823_v6, 1  ;;  %v3928_v11 = vrot.slane %v3824_v36, 1  ;;  %v10852_v29 = vld [vmem:[#allocation11_spill] sm:$0xff]  ;;  %v9352_v1 = vld [vmem:[#allocation3 + $0xa8] sm:$0xff] }
 0x2ae   : > { %v3930_v38 = vrot.slane %v3825_v27, 1  ;;  %v3684_v57 = vsel %vm1260_vm2, %v3682_v34, %v3683_v2  ;;  %v3686_v18 = vsel %vm1260_vm2, %v3683_v2, %v3685_v60  ;;  %v4068_v20 = vmul.f32 %v8861_v46, %v9125_v7  ;;  %v9357_v6 = vld [vmem:[%s10734_s5] ss:$0 sm:$0xff] }
 0x2af   : > { %v4069_v44 = vmul.f32 %v8861_v46, %v9127_v61  ;;  %v3782_v63 = vadd.f32 %v3684_v57, %v3537_v48  ;;  %v3783_v28 = vadd.f32 %v3686_v18, %v3538_v13  ;;  %v3929_v50 = vsel %vm1260_vm2, %v3927_v26, %v3928_v11 }
 0x2b0   : > { %v3931_v59 = vsel %vm1260_vm2, %v3928_v11, %v3930_v38  ;;  %v4070_v3 = vmul.f32 %v8861_v46, %v9151_v30  ;;  %v4172_v33 = vrot.slane %v4068_v20, 2  ;;  %v4313_v35 = vmul.f32 %v8977_v25, %v9204_v51  ;;  %v9372_v11 = vld [vmem:[%s10734_s5 + $0x3] ss:$0 sm:$0xff] }
 0x2b1   : > { %v4173_v55 = vrot.slane %v4069_v44, 2  ;;  %v4027_v32 = vadd.f32 %v3929_v50, %v3782_v63  ;;  %v4028_v42 = vadd.f32 %v3931_v59, %v3783_v28  ;;  %v4314_v7 = vmul.f32 %v8977_v25, %v9206_v23  ;;  %v9381_v44 = vld [vmem:[%s10734_s5 + $0x6] ss:$0 sm:$0xff] }
 0x2b2   : > { %v4315_v61 = vmul.f32 %v8977_v25, %v9228_v41  ;;  %v4175_v52 = vrot.slane %v4070_v3, 2  ;;  %v4417_v21 = vrot.slane %v4313_v35, 2  ;;  %v4558_v46 = vmul.f32 %v9003_v58, %v9274_v12  ;;  %v9390_v35 = vld [vmem:[%s10734_s5 + $0x1] ss:$0 sm:$0xff] }
 0x2b3   : > { %v4174_v9 = vsel %vm2062_vm3, %v4172_v33, %v4173_v55  ;;  %v4418_v15 = vrot.slane %v4314_v7, 2  ;;  %v4559_v56 = vmul.f32 %v9003_v58, %v9276_v16  ;;  %v4560_v17 = vmul.f32 %v9003_v58, %v9298_v47 }
 0x2b4   : > { %v4272_v30 = vadd.f32 %v4174_v9, %v4027_v32  ;;  %v4420_v22 = vrot.slane %v4315_v61, 2  ;;  %v4176_v4 = vsel %vm2062_vm3, %v4173_v55, %v4175_v52  ;;  %v4662_v14 = vrot.slane %v4558_v46, 2  ;;  %v9396_v61 = vld [vmem:[#allocation3 + $0xb8] sm:$0xff] }
 0x2b5   : > { %v7167_v39 = vadd.f32 %v9103_v37, %v8823_v49  ;;  %v4273_v31 = vadd.f32 %v4176_v4, %v4028_v42  ;;  %v4419_v5 = vsel %vm2062_vm3, %v4417_v21, %v4418_v15  ;;  %v4663_v53 = vrot.slane %v4559_v56, 2  ;;  %v10853_v49 = vld [vmem:[#allocation14_spill] sm:$0xff]  ;;  %v9403_v21 = vld [vmem:[%s10734_s5 + $0x4] ss:$0 sm:$0xff] }
 0x2b6   : > { %v4421_v45 = vsel %vm2062_vm3, %v4418_v15, %v4420_v22  ;;  %v4517_v62 = vadd.f32 %v4419_v5, %v4272_v30  ;;  %v4665_v10 = vrot.slane %v4560_v17, 2  ;;  %v7168_v8 = vadd.f32 %v9107_v40, %v10852_v29  ;;  %v7451_v40 = vld [vmem:[%s10733_s4] ss:$0 sm:$0xff] }
 0x2b7   : > { %v2893_v54 = vmul.f32 %v7449_v43, %v7167_v39  ;;  %v4518_v19 = vadd.f32 %v4421_v45, %v4273_v31  ;;  %v4664_v34 = vsel %vm2062_vm3, %v4662_v14, %v4663_v53  ;;  %v7169_v37 = vadd.f32 %v9113_v0, %v10853_v49  ;;  %v9365_v0 = vld [vmem:[#allocation3 + $0xb0] sm:$0xff] }
 0x2b8   : > { %v3124_v36 = vmul.f32 %v9357_v6, %v9204_v51  ;;  %v4666_v27 = vsel %vm2062_vm3, %v4663_v53, %v4665_v10  ;;  %v4762_v24 = vadd.f32 %v4664_v34, %v4517_v62  ;;  %v2896_v2 = vmul.f32 %v7449_v43, %v7168_v8  ;;  %v9414_v39 = vld [vmem:[%s10734_s5 + $0x7] ss:$0 sm:$0xff] }
 0x2b9   : > { %v2932_v48 = vadd.f32 %v7451_v40, %v2893_v54  ;;  %v4763_v60 = vadd.f32 %v4666_v27, %v4518_v19  ;;  %v2894_v13 = vmul.f32 %v7449_v43, %v7169_v37  ;;  %v3125_v26 = vmul.f32 %v9357_v6, %v9206_v23  ;;  %v9429_v27 = vld [vmem:[%s10734_s5 + $0x2] ss:$0 sm:$0xff] }
 0x2ba   : > { %v3193_v38 = vmul.f32 %v9372_v11, %v9274_v12  ;;  %v2935_v18 = vadd.f32 %v7451_v40, %v2896_v2  ;;  %v3194_v20 = vmul.f32 %v9372_v11, %v9276_v16  ;;  %v3262_v63 = vmul.f32 %v9381_v44, %v9352_v1 }
 0x2bb   : > { %v2964_v57 = vmax.f32 %v2932_v48, 0.0  ;;  %v4790_v28 = vpack.c.bf16 %v4763_v60, %v4762_v24  ;;  %v2933_v50 = vadd.f32 %v7451_v40, %v2894_v13  ;;  %v3263_v3 = vmul.f32 %v9381_v44, %v9365_v0 }
 0x2bc   : > { %v3225_v59 = vadd.f32 %v3193_v38, %v3124_v36  ;;  %v2967_v33 = vmax.f32 %v2935_v18, 0.0  ;;  %v3226_v55 = vadd.f32 %v3194_v20, %v3125_v26  ;;  %v3336_v32 = vmul.f32 %v9390_v35, %v9204_v51 }
 0x2bd   : > { %3051 = vst [vmem:[#allocation3 + $0x169] sm:$0xff] %v2964_v57  ;;  %v3337_v42 = vmul.f32 %v9390_v35, %v9206_v23  ;;  %7102 = vmatprep.mubr.bf16.mxu1 %v4790_v28  ;;  %v2965_v7 = vmax.f32 %v2933_v50, 0.0  ;;  %v3338_v52 = vmul.f32 %v9390_v35, %v9228_v41  ;;  %v3581_v46 = vmul.f32 %v9403_v21, %v9274_v12 }
 0x2be   : > { %v3294_v9 = vadd.f32 %v3262_v63, %v3225_v59  ;;  %3054 = vst [vmem:[#allocation3 + $0x189] sm:$0xff] %v2967_v33  ;;  %v3295_v30 = vadd.f32 %v3263_v3, %v3226_v55  ;;  %v3442_v15 = vrot.slane %v3336_v32, 1  ;;  %v3582_v56 = vmul.f32 %v9403_v21, %v9276_v16 }
 0x2bf   : > { %v3443_v22 = vrot.slane %v3337_v42, 1  ;;  %3052 = vst [vmem:[#allocation3 + $0x171] sm:$0xff] %v2965_v7  ;;  %v3445_v4 = vrot.slane %v3338_v52, 1  ;;  %v3583_v17 = vmul.f32 %v9403_v21, %v9298_v47  ;;  %v3687_v14 = vrot.slane %v3581_v46, 1  ;;  %v9453_v52 = vld [vmem:[#allocation3 + $0xc0] sm:$0xff]  ;;  %v9455_v46 = vld [vmem:[#allocation3 + $0xc8] sm:$0xff] }
 0x2c0   : > { %v3826_v31 = vmul.f32 %v9414_v39, %v9352_v1  ;;  %v3688_v45 = vrot.slane %v3582_v56, 1  ;;  %v3827_v53 = vmul.f32 %v9414_v39, %v9365_v0  ;;  %v3828_v62 = vmul.f32 %v9414_v39, %v9396_v61 }
 0x2c1   : > { %v3444_v5 = vsel %vm1260_vm2, %v3442_v15, %v3443_v22  ;;  %v3446_v10 = vsel %vm1260_vm2, %v3443_v22, %v3445_v4  ;;  %v3690_v54 = vrot.slane %v3583_v17, 1  ;;  %v4071_v24 = vmul.f32 %v9429_v27, %v9204_v51 }
 0x2c2   : > { %v3539_v43 = vadd.f32 %v3444_v5, %v3294_v9  ;;  %v3932_v29 = vrot.slane %v3826_v31, 1  ;;  %v3540_v8 = vadd.f32 %v3446_v10, %v3295_v30  ;;  %v3689_v19 = vsel %vm1260_vm2, %v3687_v14, %v3688_v45 }
 0x2c3   : > { %v3933_v34 = vrot.slane %v3827_v53, 1  ;;  %v3935_v49 = vrot.slane %v3828_v62, 1  ;;  %v3691_v37 = vsel %vm1260_vm2, %v3688_v45, %v3690_v54  ;;  %v4072_v40 = vmul.f32 %v9429_v27, %v9206_v23 }
 0x2c4   : > { %v3784_v36 = vadd.f32 %v3689_v19, %v3539_v43  ;;  %v3785_v48 = vadd.f32 %v3691_v37, %v3540_v8  ;;  %v4073_v13 = vmul.f32 %v9429_v27, %v9228_v41  ;;  %v4177_v38 = vrot.slane %v4071_v24, 2 }
 0x2c5   : > { %v3934_v2 = vsel %vm1260_vm2, %v3932_v29, %v3933_v34  ;;  %v3936_v60 = vsel %vm1260_vm2, %v3933_v34, %v3935_v49  ;;  %v4178_v57 = vrot.slane %v4072_v40, 2  ;;  %v4316_v18 = vmul.f32 %v8977_v25, %v9274_v12 }
 0x2c6   : > { %v4029_v26 = vadd.f32 %v3934_v2, %v3784_v36  ;;  %v4030_v20 = vadd.f32 %v3936_v60, %v3785_v48  ;;  %v4180_v63 = vrot.slane %v4073_v13, 2  ;;  %v4317_v51 = vmul.f32 %v8977_v25, %v9276_v16  ;;  %v9483_v48 = vld [vmem:[#allocation3 + $0xd0] sm:$0xff] }
 0x2c7   : > { %v4318_v23 = vmul.f32 %v8977_v25, %v9298_v47  ;;  %v4179_v28 = vsel %vm2062_vm3, %v4177_v38, %v4178_v57  ;;  %v4422_v50 = vrot.slane %v4316_v18, 2  ;;  %v4561_v41 = vmul.f32 %v9003_v58, %v9352_v1 }
 0x2c8   : > { %v4562_v59 = vmul.f32 %v9003_v58, %v9365_v0  ;;  %v4181_v3 = vsel %vm2062_vm3, %v4178_v57, %v4180_v63  ;;  %v4274_v33 = vadd.f32 %v4179_v28, %v4029_v26  ;;  %v4423_v55 = vrot.slane %v4317_v51, 2 }
 0x2c9   : > { %v4425_v32 = vrot.slane %v4318_v23, 2  ;;  %v4275_v42 = vadd.f32 %v4181_v3, %v4030_v20  ;;  %v4563_v7 = vmul.f32 %v9003_v58, %v9396_v61  ;;  %v4667_v9 = vrot.slane %v4561_v41, 2 }
 0x2ca   : > { %v4668_v25 = vrot.slane %v4562_v59, 2  ;;  %v4424_v30 = vsel %vm2062_vm3, %v4422_v50, %v4423_v55  ;;  %v3126_v22 = vmul.f32 %v9357_v6, %v9274_v12  ;;  %v3127_v56 = vmul.f32 %v9357_v6, %v9276_v16 }
 0x2cb   : > { %v4426_v15 = vsel %vm2062_vm3, %v4423_v55, %v4425_v32  ;;  %v4519_v4 = vadd.f32 %v4424_v30, %v4274_v33  ;;  %v4670_v14 = vrot.slane %v4563_v7, 2  ;;  %v3195_v31 = vmul.f32 %v9372_v11, %v9352_v1 }
 0x2cc   : > { %v4520_v17 = vadd.f32 %v4426_v15, %v4275_v42  ;;  %v4669_v58 = vsel %vm2062_vm3, %v4667_v9, %v4668_v25  ;;  %v3196_v5 = vmul.f32 %v9372_v11, %v9365_v0  ;;  %v3264_v45 = vmul.f32 %v9381_v44, %v9453_v52 }
 0x2cd   : > { %v3265_v53 = vmul.f32 %v9381_v44, %v9455_v46  ;;  %v4671_v62 = vsel %vm2062_vm3, %v4668_v25, %v4670_v14  ;;  %v4764_v10 = vadd.f32 %v4669_v58, %v4519_v4  ;;  %v3339_v43 = vmul.f32 %v9390_v35, %v9274_v12 }
 0x2ce   : > { %v3340_v54 = vmul.f32 %v9390_v35, %v9276_v16  ;;  %v4765_v29 = vadd.f32 %v4671_v62, %v4520_v17  ;;  %v3227_v8 = vadd.f32 %v3195_v31, %v3126_v22  ;;  %v3228_v19 = vadd.f32 %v3196_v5, %v3127_v56  ;;  %v9507_v56 = vld [vmem:[%s10734_s5 + $0x5] ss:$0 sm:$0xff]  ;;  %v9521_v62 = vld [vmem:[%s10734_s5 + $0x8] ss:$0 sm:$0xff] }
 0x2cf   : > { %v3341_v34 = vmul.f32 %v9390_v35, %v9298_v47  ;;  %v3447_v49 = vrot.slane %v3339_v43, 1  ;;  %v3584_v36 = vmul.f32 %v9403_v21, %v9352_v1  ;;  %v3585_v24 = vmul.f32 %v9403_v21, %v9365_v0 }
 0x2d0   : > { %v3448_v37 = vrot.slane %v3340_v54, 1  ;;  %v4791_v40 = vpack.c.bf16 %v4765_v29, %v4764_v10  ;;  %v3296_v2 = vadd.f32 %v3264_v45, %v3227_v8  ;;  %v3297_v60 = vadd.f32 %v3265_v53, %v3228_v19 }
 0x2d1   : > { %v3450_v13 = vrot.slane %v3341_v34, 1  ;;  %v3586_v38 = vmul.f32 %v9403_v21, %v9396_v61  ;;  %v3692_v57 = vrot.slane %v3584_v36, 1  ;;  %v3693_v18 = vrot.slane %v3585_v24, 1  ;;  %v9529_v36 = vld [vmem:[#allocation3 + $0xd8] sm:$0xff]  ;;  %v9531_v24 = vld [vmem:[#allocation3 + $0xe0] sm:$0xff] }
 0x2d2   : > { %v3449_v26 = vsel %vm1260_vm2, %v3447_v49, %v3448_v37  ;;  %7103 = vmatmul.mubr.bf16.gmra.mrb[40].mxu1 %v4791_v40  ;;  %v3829_v51 = vmul.f32 %v9414_v39, %v9453_v52  ;;  %v3830_v23 = vmul.f32 %v9414_v39, %v9455_v46  ;;  %v3831_v59 = vmul.f32 %v9414_v39, %v9483_v48 }
 0x2d3   : > { %v3451_v20 = vsel %vm1260_vm2, %v3448_v37, %v3450_v13  ;;  %v3541_v63 = vadd.f32 %v3449_v26, %v3296_v2  ;;  %v3694_v50 = vsel %vm1260_vm2, %v3692_v57, %v3693_v18  ;;  %v3695_v41 = vrot.slane %v3586_v38, 1 }
 0x2d4   : > { %v3542_v28 = vadd.f32 %v3451_v20, %v3297_v60  ;;  %v3937_v33 = vrot.slane %v3829_v51, 1  ;;  %v3938_v55 = vrot.slane %v3830_v23, 1  ;;  %v4074_v32 = vmul.f32 %v9429_v27, %v9274_v12 }
 0x2d5   : > { %v3786_v3 = vadd.f32 %v3694_v50, %v3541_v63  ;;  %v3696_v42 = vsel %vm1260_vm2, %v3693_v18, %v3695_v41  ;;  %v3940_v7 = vrot.slane %v3831_v59, 1  ;;  %v4075_v9 = vmul.f32 %v9429_v27, %v9276_v16 }
 0x2d6   : > { %v4076_v25 = vmul.f32 %v9429_v27, %v9298_v47  ;;  %v3787_v30 = vadd.f32 %v3696_v42, %v3542_v28  ;;  %v3939_v15 = vsel %vm1260_vm2, %v3937_v33, %v3938_v55  ;;  %v4182_v22 = vrot.slane %v4074_v32, 2 }
 0x2d7   : > { %v4319_v12 = vmul.f32 %v9507_v56, %v9352_v1  ;;  %v3941_v4 = vsel %vm1260_vm2, %v3938_v55, %v3940_v7  ;;  %v4031_v17 = vadd.f32 %v3939_v15, %v3786_v3  ;;  %v4183_v58 = vrot.slane %v4075_v9, 2 }
 0x2d8   : > { %v4185_v16 = vrot.slane %v4076_v25, 2  ;;  %v4032_v14 = vadd.f32 %v3941_v4, %v3787_v30  ;;  %v4320_v47 = vmul.f32 %v9507_v56, %v9365_v0  ;;  %v4321_v31 = vmul.f32 %v9507_v56, %v9396_v61 }
 0x2d9   : > { %v4427_v5 = vrot.slane %v4319_v12, 2  ;;  %v4184_v45 = vsel %vm2062_vm3, %v4182_v22, %v4183_v58  ;;  %v4564_v10 = vmul.f32 %v9521_v62, %v9453_v52  ;;  %v4565_v43 = vmul.f32 %v9521_v62, %v9455_v46  ;;  %v9559_v22 = vld [vmem:[#allocation3 + $0xe8] sm:$0xff] }
 0x2da   : > { %v4186_v53 = vsel %vm2062_vm3, %v4183_v58, %v4185_v16  ;;  %v4276_v54 = vadd.f32 %v4184_v45, %v4031_v17  ;;  %v4428_v8 = vrot.slane %v4320_v47, 2  ;;  %v4430_v19 = vrot.slane %v4321_v31, 2 }
 0x2db   : > { %v4277_v29 = vadd.f32 %v4186_v53, %v4032_v14  ;;  %v4566_v34 = vmul.f32 %v9521_v62, %v9483_v48  ;;  %v4672_v49 = vrot.slane %v4564_v10, 2  ;;  %v4673_v37 = vrot.slane %v4565_v43, 2 }
 0x2dc   : > { %v3128_v40 = vmul.f32 %v9357_v6, %v9352_v1  ;;  %v4429_v2 = vsel %vm2062_vm3, %v4427_v5, %v4428_v8  ;;  %v4431_v60 = vsel %vm2062_vm3, %v4428_v8, %v4430_v19  ;;  %v3129_v13 = vmul.f32 %v9357_v6, %v9365_v0 }
 0x2dd   : > { %v3197_v26 = vmul.f32 %v9372_v11, %v9453_v52  ;;  %v4521_v38 = vadd.f32 %v4429_v2, %v4276_v54  ;;  %v4522_v57 = vadd.f32 %v4431_v60, %v4277_v29  ;;  %v4674_v18 = vsel %vm2062_vm3, %v4672_v49, %v4673_v37 }
 0x2de   : > { %v4675_v20 = vrot.slane %v4566_v34, 2  ;;  %v3198_v63 = vmul.f32 %v9372_v11, %v9455_v46  ;;  %v3266_v23 = vmul.f32 %v9381_v44, %v9529_v36  ;;  %v3267_v28 = vmul.f32 %v9381_v44, %v9531_v24 }
 0x2df   : > { %v3229_v51 = vadd.f32 %v3197_v26, %v3128_v40  ;;  %v4766_v41 = vadd.f32 %v4674_v18, %v4521_v38  ;;  %v3342_v59 = vmul.f32 %v9390_v35, %v9352_v1  ;;  %v3343_v3 = vmul.f32 %v9390_v35, %v9365_v0 }
 0x2e0   : > { %v4676_v50 = vsel %vm2062_vm3, %v4673_v37, %v4675_v20  ;;  %v3230_v55 = vadd.f32 %v3198_v63, %v3129_v13  ;;  %v3344_v42 = vmul.f32 %v9390_v35, %v9396_v61  ;;  %v3587_v25 = vmul.f32 %v9403_v21, %v9453_v52 }
 0x2e1   : > { %v4767_v33 = vadd.f32 %v4676_v50, %v4522_v57  ;;  %v3298_v32 = vadd.f32 %v3266_v23, %v3229_v51  ;;  %v3452_v7 = vrot.slane %v3342_v59, 1  ;;  %v3453_v9 = vrot.slane %v3343_v3, 1 }
 0x2e2   : > { %v3588_v30 = vmul.f32 %v9403_v21, %v9455_v46  ;;  %v3299_v12 = vadd.f32 %v3267_v28, %v3230_v55  ;;  %v3455_v4 = vrot.slane %v3344_v42, 1  ;;  %v3589_v17 = vmul.f32 %v9403_v21, %v9483_v48 }
 0x2e3   : > { %v4792_v15 = vpack.c.bf16 %v4767_v33, %v4766_v41  ;;  %v3454_v58 = vsel %vm1260_vm2, %v3452_v7, %v3453_v9  ;;  %v3697_v16 = vrot.slane %v3587_v25, 1  ;;  %v3832_v47 = vmul.f32 %v9414_v39, %v9529_v36  ;;  %v9596_v25 = vld [vmem:[#allocation3 + $0xf0] sm:$0xff] }
 0x2e4   : > { %v3698_v14 = vrot.slane %v3588_v30, 1  ;;  %v3456_v31 = vsel %vm1260_vm2, %v3453_v9, %v3455_v4  ;;  %v3543_v5 = vadd.f32 %v3454_v58, %v3298_v32  ;;  %v3700_v45 = vrot.slane %v3589_v17, 1  ;;  %v9598_v30 = vld [vmem:[#allocation3 + $0xf8] sm:$0xff] }
 0x2e5   : > { %7106 = vmatprep.mubr.bf16.mxu1 %v4792_v15  ;;  %v3833_v53 = vmul.f32 %v9414_v39, %v9531_v24  ;;  %v3544_v10 = vadd.f32 %v3456_v31, %v3299_v12  ;;  %v3834_v54 = vmul.f32 %v9414_v39, %v9559_v22  ;;  %v3942_v29 = vrot.slane %v3832_v47, 1 }
 0x2e6   : > { %v3699_v43 = vsel %vm1260_vm2, %v3697_v16, %v3698_v14  ;;  %v3701_v8 = vsel %vm1260_vm2, %v3698_v14, %v3700_v45  ;;  %v4077_v49 = vmul.f32 %v9429_v27, %v9352_v1  ;;  %v4078_v2 = vmul.f32 %v9429_v27, %v9365_v0 }
 0x2e7   : > { %v3788_v19 = vadd.f32 %v3699_v43, %v3543_v5  ;;  %v3943_v34 = vrot.slane %v3833_v53, 1  ;;  %v3789_v37 = vadd.f32 %v3701_v8, %v3544_v10  ;;  %v3945_v40 = vrot.slane %v3834_v54, 1 }
 0x2e8   : > { %v4079_v60 = vmul.f32 %v9429_v27, %v9396_v61  ;;  %v4187_v26 = vrot.slane %v4077_v49, 2  ;;  %v4322_v38 = vmul.f32 %v9507_v56, %v9453_v52  ;;  %v4323_v57 = vmul.f32 %v9507_v56, %v9455_v46 }
 0x2e9   : > { %v3944_v13 = vsel %vm1260_vm2, %v3942_v29, %v3943_v34  ;;  %v3946_v18 = vsel %vm1260_vm2, %v3943_v34, %v3945_v40  ;;  %v4188_v20 = vrot.slane %v4078_v2, 2  ;;  %v4324_v0 = vmul.f32 %v9507_v56, %v9483_v48  ;;  %v9623_v40 = vld [vmem:[#allocation3 + $0x100] sm:$0xff] }
 0x2ea   : > { %v4033_v1 = vadd.f32 %v3944_v13, %v3788_v19  ;;  %v4190_v63 = vrot.slane %v4079_v60, 2  ;;  %v4034_v51 = vadd.f32 %v3946_v18, %v3789_v37  ;;  %v4432_v23 = vrot.slane %v4322_v38, 2 }
 0x2eb   : > { %v4433_v61 = vrot.slane %v4323_v57, 2  ;;  %v4189_v28 = vsel %vm2062_vm3, %v4187_v26, %v4188_v20  ;;  %v4567_v41 = vmul.f32 %v9521_v62, %v9529_v36  ;;  %v4568_v59 = vmul.f32 %v9521_v62, %v9531_v24 }
 0x2ec   : > { %v4191_v50 = vsel %vm2062_vm3, %v4188_v20, %v4190_v63  ;;  %v4278_v3 = vadd.f32 %v4189_v28, %v4033_v1  ;;  %v4435_v32 = vrot.slane %v4324_v0, 2  ;;  %v4569_v42 = vmul.f32 %v9521_v62, %v9559_v22 }
 0x2ed   : > { %v4279_v33 = vadd.f32 %v4191_v50, %v4034_v51  ;;  %v4434_v55 = vsel %vm2062_vm3, %v4432_v23, %v4433_v61  ;;  %v4677_v7 = vrot.slane %v4567_v41, 2  ;;  %v4678_v9 = vrot.slane %v4568_v59, 2 }
 0x2ee   : > { %v3130_v15 = vmul.f32 %v9357_v6, %v9453_v52  ;;  %v4436_v12 = vsel %vm2062_vm3, %v4433_v61, %v4435_v32  ;;  %v4523_v4 = vadd.f32 %v4434_v55, %v4278_v3  ;;  %v3131_v17 = vmul.f32 %v9357_v6, %v9455_v46 }
 0x2ef   : > { %v3199_v58 = vmul.f32 %v9372_v11, %v9529_v36  ;;  %v4524_v16 = vadd.f32 %v4436_v12, %v4279_v33  ;;  %v4679_v14 = vsel %vm2062_vm3, %v4677_v7, %v4678_v9  ;;  %v4680_v47 = vrot.slane %v4569_v42, 2 }
 0x2f0   : > { %v3200_v31 = vmul.f32 %v9372_v11, %v9531_v24  ;;  %v4768_v5 = vadd.f32 %v4679_v14, %v4523_v4  ;;  %v3268_v53 = vmul.f32 %v9381_v44, %v9596_v25  ;;  %v3269_v10 = vmul.f32 %v9381_v44, %v9598_v30 }
 0x2f1   : > { %v3231_v45 = vadd.f32 %v3199_v58, %v3130_v15  ;;  %v4681_v43 = vsel %vm2062_vm3, %v4678_v9, %v4680_v47  ;;  %v3345_v29 = vmul.f32 %v9390_v35, %v9453_v52  ;;  %v3346_v8 = vmul.f32 %v9390_v35, %v9455_v46 }
 0x2f2   : > { %v3232_v54 = vadd.f32 %v3200_v31, %v3131_v17  ;;  %v4769_v19 = vadd.f32 %v4681_v43, %v4524_v16  ;;  %v3347_v49 = vmul.f32 %v9390_v35, %v9483_v48  ;;  %v3590_v37 = vmul.f32 %v9403_v21, %v9529_v36 }
 0x2f3   : > { %v3300_v34 = vadd.f32 %v3268_v53, %v3231_v45  ;;  %v3457_v60 = vrot.slane %v3345_v29, 1  ;;  %v3458_v13 = vrot.slane %v3346_v8, 1  ;;  %v3591_v26 = vmul.f32 %v9403_v21, %v9531_v24 }
 0x2f4   : > { %v3301_v2 = vadd.f32 %v3269_v10, %v3232_v54  ;;  %v4793_v38 = vpack.c.bf16 %v4769_v19, %v4768_v5  ;;  %v3460_v57 = vrot.slane %v3347_v49, 1  ;;  %v3592_v18 = vmul.f32 %v9403_v21, %v9559_v22 }
 0x2f5   : > { %v3702_v1 = vrot.slane %v3590_v37, 1  ;;  %v3459_v20 = vsel %vm1260_vm2, %v3457_v60, %v3458_v13  ;;  %v3703_v63 = vrot.slane %v3591_v26, 1  ;;  %v3835_v51 = vmul.f32 %v9414_v39, %v9596_v25  ;;  %v9664_v26 = vld [vmem:[#allocation3 + $0x110] sm:$0xff] }
 0x2f6   : > { %v3836_v0 = vmul.f32 %v9414_v39, %v9598_v30  ;;  %7107 = vmatmul.mubr.bf16.gmra.mrb[44].mxu1 %v4793_v38  ;;  %v3461_v23 = vsel %vm1260_vm2, %v3458_v13, %v3460_v57  ;;  %v3545_v61 = vadd.f32 %v3459_v20, %v3300_v34  ;;  %v3705_v28 = vrot.slane %v3592_v18, 1  ;;  %v9662_v13 = vld [vmem:[#allocation3 + $0x108] sm:$0xff] }
 0x2f7   : > { %v3837_v50 = vmul.f32 %v9414_v39, %v9623_v40  ;;  %v3546_v41 = vadd.f32 %v3461_v23, %v3301_v2  ;;  %v3704_v59 = vsel %vm1260_vm2, %v3702_v1, %v3703_v63  ;;  %v3947_v3 = vrot.slane %v3835_v51, 1 }
 0x2f8   : > { %v3948_v33 = vrot.slane %v3836_v0, 1  ;;  %v3706_v55 = vsel %vm1260_vm2, %v3703_v63, %v3705_v28  ;;  %v3790_v32 = vadd.f32 %v3704_v59, %v3545_v61  ;;  %v4080_v7 = vmul.f32 %v9429_v27, %v9453_v52 }
 0x2f9   : > { %v3950_v42 = vrot.slane %v3837_v50, 1  ;;  %v3791_v9 = vadd.f32 %v3706_v55, %v3546_v41  ;;  %v4081_v12 = vmul.f32 %v9429_v27, %v9455_v46  ;;  %v4082_v4 = vmul.f32 %v9429_v27, %v9483_v48 }
 0x2fa   : > { %v3949_v15 = vsel %vm1260_vm2, %v3947_v3, %v3948_v33  ;;  %v4192_v16 = vrot.slane %v4080_v7, 2  ;;  %v4325_v14 = vmul.f32 %v9507_v56, %v9529_v36  ;;  %v4326_v52 = vmul.f32 %v9507_v56, %v9531_v24 }
 0x2fb   : > { %v3951_v17 = vsel %vm1260_vm2, %v3948_v33, %v3950_v42  ;;  %v4035_v58 = vadd.f32 %v3949_v15, %v3790_v32  ;;  %v4193_v31 = vrot.slane %v4081_v12, 2  ;;  %v4195_v5 = vrot.slane %v4082_v4, 2  ;;  %v9685_v32 = vld [vmem:[#allocation3 + $0x118] sm:$0xff] }
 0x2fc   : > { %v4036_v47 = vadd.f32 %v3951_v17, %v3791_v9  ;;  %v4327_v45 = vmul.f32 %v9507_v56, %v9559_v22  ;;  %v4437_v46 = vrot.slane %v4325_v14, 2  ;;  %v4570_v48 = vmul.f32 %v9521_v62, %v9596_v25 }
 0x2fd   : > { %v4571_v53 = vmul.f32 %v9521_v62, %v9598_v30  ;;  %v4194_v10 = vsel %vm2062_vm3, %v4192_v16, %v4193_v31  ;;  %v4196_v43 = vsel %vm2062_vm3, %v4193_v31, %v4195_v5  ;;  %v4438_v54 = vrot.slane %v4326_v52, 2 }
 0x2fe   : > { %v4572_v29 = vmul.f32 %v9521_v62, %v9623_v40  ;;  %v4280_v8 = vadd.f32 %v4194_v10, %v4035_v58  ;;  %v4281_v19 = vadd.f32 %v4196_v43, %v4036_v47  ;;  %v4440_v34 = vrot.slane %v4327_v45, 2 }
 0x2ff   : > { %v4682_v49 = vrot.slane %v4570_v48, 2  ;;  %v4439_v37 = vsel %vm2062_vm3, %v4437_v46, %v4438_v54  ;;  %v4683_v2 = vrot.slane %v4571_v53, 2  ;;  %v3132_v38 = vmul.f32 %v9357_v6, %v9529_v36 }
 0x300   : > { %v4685_v60 = vrot.slane %v4572_v29, 2  ;;  %v4441_v57 = vsel %vm2062_vm3, %v4438_v54, %v4440_v34  ;;  %v4525_v18 = vadd.f32 %v4439_v37, %v4280_v8  ;;  %v3133_v1 = vmul.f32 %v9357_v6, %v9531_v24 }
 0x301   : > { %v3201_v20 = vmul.f32 %v9372_v11, %v9596_v25  ;;  %v4526_v63 = vadd.f32 %v4441_v57, %v4281_v19  ;;  %v4684_v51 = vsel %vm2062_vm3, %v4682_v49, %v4683_v2  ;;  %v3202_v23 = vmul.f32 %v9372_v11, %v9598_v30 }
 0x302   : > { %v4686_v0 = vsel %vm2062_vm3, %v4683_v2, %v4685_v60  ;;  %v4770_v61 = vadd.f32 %v4684_v51, %v4525_v18  ;;  %v3270_v50 = vmul.f32 %v9381_v44, %v9662_v13  ;;  %v3271_v41 = vmul.f32 %v9381_v44, %v9664_v26 }
 0x303   : > { %v3233_v28 = vadd.f32 %v3201_v20, %v3132_v38  ;;  %v4771_v59 = vadd.f32 %v4686_v0, %v4526_v63  ;;  %v3234_v3 = vadd.f32 %v3202_v23, %v3133_v1  ;;  %v3348_v33 = vmul.f32 %v9390_v35, %v9529_v36 }
 0x304   : > { %v3349_v55 = vmul.f32 %v9390_v35, %v9531_v24  ;;  %v3350_v7 = vmul.f32 %v9390_v35, %v9559_v22  ;;  %v3593_v9 = vmul.f32 %v9403_v21, %v9596_v25  ;;  %v3594_v15 = vmul.f32 %v9403_v21, %v9598_v30 }
 0x305   : > { %v3302_v42 = vadd.f32 %v3270_v50, %v3233_v28  ;;  %v4794_v12 = vpack.c.bf16 %v4771_v59, %v4770_v61  ;;  %v3303_v4 = vadd.f32 %v3271_v41, %v3234_v3  ;;  %v3462_v17 = vrot.slane %v3348_v33, 1 }
 0x306   : > { %v3463_v58 = vrot.slane %v3349_v55, 1  ;;  %v3465_v16 = vrot.slane %v3350_v7, 1  ;;  %v3595_v14 = vmul.f32 %v9403_v21, %v9623_v40  ;;  %v3707_v47 = vrot.slane %v3593_v9, 1 }
 0x307   : > { %v3708_v31 = vrot.slane %v3594_v15, 1  ;;  %7110 = vmatprep.mubr.bf16.mxu1 %v4794_v12  ;;  %v3838_v52 = vmul.f32 %v9414_v39, %v9662_v13  ;;  %v3839_v45 = vmul.f32 %v9414_v39, %v9664_v26  ;;  %v3840_v46 = vmul.f32 %v9414_v39, %v9685_v32  ;;  %v9727_v15 = vld [vmem:[#allocation3 + $0x120] sm:$0xff]  ;;  %v9729_v12 = vld [vmem:[#allocation3 + $0x128] sm:$0xff] }
 0x308   : > { %v3464_v5 = vsel %vm1260_vm2, %v3462_v17, %v3463_v58  ;;  %v3466_v48 = vsel %vm1260_vm2, %v3463_v58, %v3465_v16  ;;  %v3710_v43 = vrot.slane %v3595_v14, 1  ;;  %v4083_v37 = vmul.f32 %v9429_v27, %v9529_v36 }
 0x309   : > { %v3547_v53 = vadd.f32 %v3464_v5, %v3302_v42  ;;  %v3709_v10 = vsel %vm1260_vm2, %v3707_v47, %v3708_v31  ;;  %v3548_v54 = vadd.f32 %v3466_v48, %v3303_v4  ;;  %v3952_v29 = vrot.slane %v3838_v52, 1 }
 0x30a   : > { %v3953_v8 = vrot.slane %v3839_v45, 1  ;;  %v3955_v19 = vrot.slane %v3840_v46, 1  ;;  %v3711_v34 = vsel %vm1260_vm2, %v3708_v31, %v3710_v43  ;;  %v4084_v2 = vmul.f32 %v9429_v27, %v9531_v24 }
 0x30b   : > { %v3792_v49 = vadd.f32 %v3709_v10, %v3547_v53  ;;  %v3793_v60 = vadd.f32 %v3711_v34, %v3548_v54  ;;  %v4085_v18 = vmul.f32 %v9429_v27, %v9559_v22  ;;  %v4197_v20 = vrot.slane %v4083_v37, 2 }
 0x30c   : > { %v3954_v38 = vsel %vm1260_vm2, %v3952_v29, %v3953_v8  ;;  %v3956_v57 = vsel %vm1260_vm2, %v3953_v8, %v3955_v19  ;;  %v4198_v63 = vrot.slane %v4084_v2, 2  ;;  %v4328_v51 = vmul.f32 %v9507_v56, %v9596_v25 }
 0x30d   : > { %v4037_v1 = vadd.f32 %v3954_v38, %v3792_v49  ;;  %v4038_v0 = vadd.f32 %v3956_v57, %v3793_v60  ;;  %v4200_v23 = vrot.slane %v4085_v18, 2  ;;  %v4329_v36 = vmul.f32 %v9507_v56, %v9598_v30  ;;  %v9757_v57 = vld [vmem:[#allocation3 + $0x130] sm:$0xff] }
 0x30e   : > { %v4330_v24 = vmul.f32 %v9507_v56, %v9623_v40  ;;  %v4199_v61 = vsel %vm2062_vm3, %v4197_v20, %v4198_v63  ;;  %v4442_v28 = vrot.slane %v4328_v51, 2  ;;  %v4573_v22 = vmul.f32 %v9521_v62, %v9662_v13 }
 0x30f   : > { %v4574_v50 = vmul.f32 %v9521_v62, %v9664_v26  ;;  %v4201_v41 = vsel %vm2062_vm3, %v4198_v63, %v4200_v23  ;;  %v4282_v59 = vadd.f32 %v4199_v61, %v4037_v1  ;;  %v4443_v3 = vrot.slane %v4329_v36, 2 }
 0x310   : > { %v4445_v33 = vrot.slane %v4330_v24, 2  ;;  %v4283_v55 = vadd.f32 %v4201_v41, %v4038_v0  ;;  %v4575_v42 = vmul.f32 %v9521_v62, %v9685_v32  ;;  %v4687_v7 = vrot.slane %v4573_v22, 2 }
 0x311   : > { %v4688_v9 = vrot.slane %v4574_v50, 2  ;;  %v4444_v4 = vsel %vm2062_vm3, %v4442_v28, %v4443_v3  ;;  %v3134_v58 = vmul.f32 %v9357_v6, %v9596_v25  ;;  %v3135_v16 = vmul.f32 %v9357_v6, %v9598_v30 }
 0x312   : > { %v4446_v17 = vsel %vm2062_vm3, %v4443_v3, %v4445_v33  ;;  %v4527_v14 = vadd.f32 %v4444_v4, %v4282_v59  ;;  %v4690_v5 = vrot.slane %v4575_v42, 2  ;;  %v3203_v52 = vmul.f32 %v9372_v11, %v9662_v13 }
 0x313   : > { %v4528_v47 = vadd.f32 %v4446_v17, %v4283_v55  ;;  %v4689_v31 = vsel %vm2062_vm3, %v4687_v7, %v4688_v9  ;;  %v3204_v45 = vmul.f32 %v9372_v11, %v9664_v26  ;;  %v3272_v46 = vmul.f32 %v9381_v44, %v9727_v15 }
 0x314   : > { %v3273_v48 = vmul.f32 %v9381_v44, %v9729_v12  ;;  %v4691_v53 = vsel %vm2062_vm3, %v4688_v9, %v4690_v5  ;;  %v4772_v10 = vadd.f32 %v4689_v31, %v4527_v14  ;;  %v3351_v43 = vmul.f32 %v9390_v35, %v9596_v25 }
 0x315   : > { %v3352_v54 = vmul.f32 %v9390_v35, %v9598_v30  ;;  %v4773_v29 = vadd.f32 %v4691_v53, %v4528_v47  ;;  %v3235_v8 = vadd.f32 %v3203_v52, %v3134_v58  ;;  %v3236_v19 = vadd.f32 %v3204_v45, %v3135_v16 }
 0x316   : > { %v3353_v34 = vmul.f32 %v9390_v35, %v9623_v40  ;;  %v3467_v49 = vrot.slane %v3351_v43, 1  ;;  %v3596_v2 = vmul.f32 %v9403_v21, %v9662_v13  ;;  %v3597_v60 = vmul.f32 %v9403_v21, %v9664_v26 }
 0x317   : > { %v3468_v37 = vrot.slane %v3352_v54, 1  ;;  %v4795_v38 = vpack.c.bf16 %v4773_v29, %v4772_v10  ;;  %v3304_v18 = vadd.f32 %v3272_v46, %v3235_v8  ;;  %v3305_v1 = vadd.f32 %v3273_v48, %v3236_v19 }
 0x318   : > { %v3470_v20 = vrot.slane %v3353_v34, 1  ;;  %v3598_v51 = vmul.f32 %v9403_v21, %v9685_v32  ;;  %v3712_v0 = vrot.slane %v3596_v2, 1  ;;  %v3713_v23 = vrot.slane %v3597_v60, 1  ;;  %v9793_v2 = vld [vmem:[#allocation3 + $0x138] sm:$0xff]  ;;  %v9795_v60 = vld [vmem:[#allocation3 + $0x140] sm:$0xff] }
 0x319   : > { %v3469_v63 = vsel %vm1260_vm2, %v3467_v49, %v3468_v37  ;;  %7111 = vmatmul.mubr.bf16.gmra.mrb[48].mxu1 %v4795_v38  ;;  %v3841_v61 = vmul.f32 %v9414_v39, %v9727_v15  ;;  %v3842_v28 = vmul.f32 %v9414_v39, %v9729_v12  ;;  %v3843_v59 = vmul.f32 %v9414_v39, %v9757_v57 }
 0x31a   : > { %v3471_v36 = vsel %vm1260_vm2, %v3468_v37, %v3470_v20  ;;  %v3549_v24 = vadd.f32 %v3469_v63, %v3304_v18  ;;  %v3714_v50 = vsel %vm1260_vm2, %v3712_v0, %v3713_v23  ;;  %v3715_v41 = vrot.slane %v3598_v51, 1 }
 0x31b   : > { %v3550_v22 = vadd.f32 %v3471_v36, %v3305_v1  ;;  %v3957_v33 = vrot.slane %v3841_v61, 1  ;;  %v3958_v55 = vrot.slane %v3842_v28, 1  ;;  %v4086_v42 = vmul.f32 %v9429_v27, %v9596_v25 }
 0x31c   : > { %v3794_v3 = vadd.f32 %v3714_v50, %v3549_v24  ;;  %v3716_v7 = vsel %vm1260_vm2, %v3713_v23, %v3715_v41  ;;  %v3960_v9 = vrot.slane %v3843_v59, 1  ;;  %v4087_v4 = vmul.f32 %v9429_v27, %v9598_v30 }
 0x31d   : > { %v4088_v17 = vmul.f32 %v9429_v27, %v9623_v40  ;;  %v3795_v58 = vadd.f32 %v3716_v7, %v3550_v22  ;;  %v3959_v16 = vsel %vm1260_vm2, %v3957_v33, %v3958_v55  ;;  %v4202_v14 = vrot.slane %v4086_v42, 2 }
 0x31e   : > { %v4331_v47 = vmul.f32 %v9507_v56, %v9662_v13  ;;  %v3961_v31 = vsel %vm1260_vm2, %v3958_v55, %v3960_v9  ;;  %v4039_v5 = vadd.f32 %v3959_v16, %v3794_v3  ;;  %v4203_v25 = vrot.slane %v4087_v4, 2 }
 0x31f   : > { %v4205_v52 = vrot.slane %v4088_v17, 2  ;;  %v4040_v45 = vadd.f32 %v3961_v31, %v3795_v58  ;;  %v4332_v46 = vmul.f32 %v9507_v56, %v9664_v26  ;;  %v4333_v30 = vmul.f32 %v9507_v56, %v9685_v32  ;;  %v9823_v17 = vld [vmem:[#allocation3 + $0x148] sm:$0xff] }
 0x320   : > { %v4447_v40 = vrot.slane %v4331_v47, 2  ;;  %v4204_v48 = vsel %vm2062_vm3, %v4202_v14, %v4203_v25  ;;  %v4576_v10 = vmul.f32 %v9521_v62, %v9727_v15  ;;  %v4577_v43 = vmul.f32 %v9521_v62, %v9729_v12 }
 0x321   : > { %v4206_v53 = vsel %vm2062_vm3, %v4203_v25, %v4205_v52  ;;  %v4284_v54 = vadd.f32 %v4204_v48, %v4039_v5  ;;  %v4448_v8 = vrot.slane %v4332_v46, 2  ;;  %v4450_v19 = vrot.slane %v4333_v30, 2 }
 0x322   : > { %v4285_v29 = vadd.f32 %v4206_v53, %v4040_v45  ;;  %v4578_v34 = vmul.f32 %v9521_v62, %v9757_v57  ;;  %v4692_v49 = vrot.slane %v4576_v10, 2  ;;  %v4693_v37 = vrot.slane %v4577_v43, 2 }
 0x323   : > { %v3136_v38 = vmul.f32 %v9357_v6, %v9662_v13  ;;  %v4449_v18 = vsel %vm2062_vm3, %v4447_v40, %v4448_v8  ;;  %v4451_v1 = vsel %vm2062_vm3, %v4448_v8, %v4450_v19  ;;  %v3137_v20 = vmul.f32 %v9357_v6, %v9664_v26 }
 0x324   : > { %v3205_v63 = vmul.f32 %v9372_v11, %v9727_v15  ;;  %v4529_v51 = vadd.f32 %v4449_v18, %v4284_v54  ;;  %v4530_v0 = vadd.f32 %v4451_v1, %v4285_v29  ;;  %v4694_v23 = vsel %vm2062_vm3, %v4692_v49, %v4693_v37 }
 0x325   : > { %v4695_v36 = vrot.slane %v4578_v34, 2  ;;  %v3206_v24 = vmul.f32 %v9372_v11, %v9729_v12  ;;  %v3274_v28 = vmul.f32 %v9381_v44, %v9793_v2  ;;  %v3275_v22 = vmul.f32 %v9381_v44, %v9795_v60 }
 0x326   : > { %v3237_v61 = vadd.f32 %v3205_v63, %v3136_v38  ;;  %v4774_v50 = vadd.f32 %v4694_v23, %v4529_v51  ;;  %v3354_v41 = vmul.f32 %v9390_v35, %v9662_v13  ;;  %v3355_v59 = vmul.f32 %v9390_v35, %v9664_v26 }
 0x327   : > { %v4696_v6 = vsel %vm2062_vm3, %v4693_v37, %v4695_v36  ;;  %v3238_v33 = vadd.f32 %v3206_v24, %v3137_v20  ;;  %v3356_v11 = vmul.f32 %v9390_v35, %v9685_v32  ;;  %v3599_v44 = vmul.f32 %v9403_v21, %v9727_v15 }
 0x328   : > { %v4775_v3 = vadd.f32 %v4696_v6, %v4530_v0  ;;  %v3306_v55 = vadd.f32 %v3274_v28, %v3237_v61  ;;  %v3472_v42 = vrot.slane %v3354_v41, 1  ;;  %v3473_v7 = vrot.slane %v3355_v59, 1  ;;  %v9860_v59 = vld [vmem:[#allocation3 + $0x150] sm:$0xff] }
 0x329   : > { %v3600_v9 = vmul.f32 %v9403_v21, %v9729_v12  ;;  %v3307_v58 = vadd.f32 %v3275_v22, %v3238_v33  ;;  %v3475_v16 = vrot.slane %v3356_v11, 1  ;;  %v3601_v14 = vmul.f32 %v9403_v21, %v9757_v57  ;;  %v9867_v33 = vld [vmem:[%s10734_s5] ss:$0 sm:$0xff] }
 0x32a   : > { %v4796_v4 = vpack.c.bf16 %v4775_v3, %v4774_v50  ;;  %v3474_v47 = vsel %vm1260_vm2, %v3472_v42, %v3473_v7  ;;  %v3717_v31 = vrot.slane %v3599_v44, 1  ;;  %v3844_v5 = vmul.f32 %v9414_v39, %v9793_v2  ;;  %v9862_v3 = vld [vmem:[#allocation3 + $0x158] sm:$0xff]  ;;  %v9877_v44 = vld [vmem:[%s10734_s5 + $0x3] ss:$0 sm:$0xff] }
 0x32b   : > { %v3718_v35 = vrot.slane %v3600_v9, 1  ;;  %v3476_v25 = vsel %vm1260_vm2, %v3473_v7, %v3475_v16  ;;  %v3551_v52 = vadd.f32 %v3474_v47, %v3306_v55  ;;  %v3720_v45 = vrot.slane %v3601_v14, 1 }
 0x32c   : > { %7114 = vmatprep.mubr.bf16.mxu1 %v4796_v4  ;;  %v3845_v46 = vmul.f32 %v9414_v39, %v9795_v60  ;;  %v3552_v30 = vadd.f32 %v3476_v25, %v3307_v58  ;;  %v3846_v21 = vmul.f32 %v9414_v39, %v9823_v17  ;;  %v3962_v48 = vrot.slane %v3844_v5, 1 }
 0x32d   : > { %v3719_v40 = vsel %vm1260_vm2, %v3717_v31, %v3718_v35  ;;  %v3721_v53 = vsel %vm1260_vm2, %v3718_v35, %v3720_v45  ;;  %v4089_v54 = vmul.f32 %v9429_v27, %v9662_v13  ;;  %v4090_v19 = vmul.f32 %v9429_v27, %v9664_v26  ;;  %v9887_v35 = vld [vmem:[%s10734_s5 + $0x6] ss:$0 sm:$0xff] }
 0x32e   : > { %v3796_v10 = vadd.f32 %v3719_v40, %v3551_v52  ;;  %v3963_v43 = vrot.slane %v3845_v46, 1  ;;  %v3797_v29 = vadd.f32 %v3721_v53, %v3552_v30  ;;  %v3965_v8 = vrot.slane %v3846_v21, 1  ;;  %v9897_v46 = vld [vmem:[%s10734_s5 + $0x1] ss:$0 sm:$0xff] }
 0x32f   : > { %v4091_v34 = vmul.f32 %v9429_v27, %v9685_v32  ;;  %v4207_v37 = vrot.slane %v4089_v54, 2  ;;  %v4334_v39 = vmul.f32 %v9507_v56, %v9727_v15  ;;  %v4335_v38 = vmul.f32 %v9507_v56, %v9729_v12  ;;  %v9912_v54 = vld [vmem:[#allocation3 + $0x160] sm:$0xff] }
 0x330   : > { %v3964_v49 = vsel %vm1260_vm2, %v3962_v48, %v3963_v43  ;;  %v3966_v18 = vsel %vm1260_vm2, %v3963_v43, %v3965_v8  ;;  %v4208_v1 = vrot.slane %v4090_v19, 2  ;;  %v4336_v26 = vmul.f32 %v9507_v56, %v9757_v57 }
 0x331   : > { %v4041_v13 = vadd.f32 %v3964_v49, %v3796_v10  ;;  %v4210_v20 = vrot.slane %v4091_v34, 2  ;;  %v4042_v63 = vadd.f32 %v3966_v18, %v3797_v29  ;;  %v4452_v51 = vrot.slane %v4334_v39, 2  ;;  %v9908_v10 = vld [vmem:[%s10734_s5 + $0x4] ss:$0 sm:$0xff] }
 0x332   : > { %v4453_v27 = vrot.slane %v4335_v38, 2  ;;  %v4209_v32 = vsel %vm2062_vm3, %v4207_v37, %v4208_v1  ;;  %v4579_v23 = vmul.f32 %v9521_v62, %v9793_v2  ;;  %v4580_v36 = vmul.f32 %v9521_v62, %v9795_v60 }
 0x333   : > { %v4211_v0 = vsel %vm2062_vm3, %v4208_v1, %v4210_v20  ;;  %v4286_v24 = vadd.f32 %v4209_v32, %v4041_v13  ;;  %v4455_v22 = vrot.slane %v4336_v26, 2  ;;  %v4581_v6 = vmul.f32 %v9521_v62, %v9823_v17  ;;  %v9922_v1 = vld [vmem:[%s10734_s5 + $0x7] ss:$0 sm:$0xff] }
 0x334   : > { %v4287_v61 = vadd.f32 %v4211_v0, %v4042_v63  ;;  %v4454_v28 = vsel %vm2062_vm3, %v4452_v51, %v4453_v27  ;;  %v4697_v50 = vrot.slane %v4579_v23, 2  ;;  %v4698_v41 = vrot.slane %v4580_v36, 2 }
 0x335   : > { %v3138_v55 = vmul.f32 %v9867_v33, %v9727_v15  ;;  %v4456_v11 = vsel %vm2062_vm3, %v4453_v27, %v4455_v22  ;;  %v4531_v42 = vadd.f32 %v4454_v28, %v4286_v24  ;;  %v3139_v7 = vmul.f32 %v9867_v33, %v9729_v12 }
 0x336   : > { %v3207_v9 = vmul.f32 %v9877_v44, %v9793_v2  ;;  %v4532_v4 = vadd.f32 %v4456_v11, %v4287_v61  ;;  %v4699_v58 = vsel %vm2062_vm3, %v4697_v50, %v4698_v41  ;;  %v4700_v16 = vrot.slane %v4581_v6, 2  ;;  %v9936_v6 = vld [vmem:[%s10734_s5 + $0x2] ss:$0 sm:$0xff] }
 0x337   : > { %v3208_v14 = vmul.f32 %v9877_v44, %v9795_v60  ;;  %v4776_v47 = vadd.f32 %v4699_v58, %v4531_v42  ;;  %v3276_v5 = vmul.f32 %v9887_v35, %v9860_v59  ;;  %v3277_v25 = vmul.f32 %v9887_v35, %v9862_v3 }
 0x338   : > { %v3239_v31 = vadd.f32 %v3207_v9, %v3138_v55  ;;  %v4701_v52 = vsel %vm2062_vm3, %v4698_v41, %v4700_v16  ;;  %v3357_v30 = vmul.f32 %v9897_v46, %v9727_v15  ;;  %v3358_v40 = vmul.f32 %v9897_v46, %v9729_v12 }
 0x339   : > { %v3240_v45 = vadd.f32 %v3208_v14, %v3139_v7  ;;  %v4777_v21 = vadd.f32 %v4701_v52, %v4532_v4  ;;  %v3359_v53 = vmul.f32 %v9897_v46, %v9757_v57  ;;  %v3602_v43 = vmul.f32 %v9908_v10, %v9793_v2 }
 0x33a   : > { %v3308_v48 = vadd.f32 %v3276_v5, %v3239_v31  ;;  %v3477_v8 = vrot.slane %v3357_v30, 1  ;;  %v3478_v19 = vrot.slane %v3358_v40, 1  ;;  %v3603_v34 = vmul.f32 %v9908_v10, %v9795_v60 }
 0x33b   : > { %v3309_v29 = vadd.f32 %v3277_v25, %v3240_v45  ;;  %v4797_v49 = vpack.c.bf16 %v4777_v21, %v4776_v47  ;;  %v3480_v37 = vrot.slane %v3359_v53, 1  ;;  %v3604_v39 = vmul.f32 %v9908_v10, %v9823_v17 }
 0x33c   : > { %v3722_v38 = vrot.slane %v3602_v43, 1  ;;  %v3479_v18 = vsel %vm1260_vm2, %v3477_v8, %v3478_v19  ;;  %v3723_v13 = vrot.slane %v3603_v34, 1  ;;  %v3847_v20 = vmul.f32 %v9922_v1, %v9860_v59  ;;  %v9961_v8 = vld [vmem:[#allocation3 + $0x168] sm:$0xff] }
 0x33d   : > { %v3848_v63 = vmul.f32 %v9922_v1, %v9862_v3  ;;  %7115 = vmatmul.mubr.bf16.gmra.mrb[52].mxu1 %v4797_v49  ;;  %v3481_v26 = vsel %vm1260_vm2, %v3478_v19, %v3480_v37  ;;  %v3553_v51 = vadd.f32 %v3479_v18, %v3308_v48  ;;  %v3725_v27 = vrot.slane %v3604_v39, 1  ;;  %v9963_v19 = vld [vmem:[#allocation3 + $0x170] sm:$0xff] }
 0x33e   : > { %v3849_v32 = vmul.f32 %v9922_v1, %v9912_v54  ;;  %v3554_v0 = vadd.f32 %v3481_v26, %v3309_v29  ;;  %v3724_v23 = vsel %vm1260_vm2, %v3722_v38, %v3723_v13  ;;  %v3967_v36 = vrot.slane %v3847_v20, 1 }
 0x33f   : > { %v3968_v24 = vrot.slane %v3848_v63, 1  ;;  %v3726_v61 = vsel %vm1260_vm2, %v3723_v13, %v3725_v27  ;;  %v3798_v28 = vadd.f32 %v3724_v23, %v3553_v51  ;;  %v4092_v50 = vmul.f32 %v9936_v6, %v9727_v15 }
 0x340   : > { %v3970_v22 = vrot.slane %v3849_v32, 1  ;;  %v3799_v41 = vadd.f32 %v3726_v61, %v3554_v0  ;;  %v4093_v11 = vmul.f32 %v9936_v6, %v9729_v12  ;;  %v4094_v42 = vmul.f32 %v9936_v6, %v9757_v57 }
 0x341   : > { %v3969_v55 = vsel %vm1260_vm2, %v3967_v36, %v3968_v24  ;;  %v4212_v4 = vrot.slane %v4092_v50, 2  ;;  %v4337_v58 = vmul.f32 %v9507_v56, %v9793_v2  ;;  %v4338_v15 = vmul.f32 %v9507_v56, %v9795_v60 }
 0x342   : > { %v3971_v7 = vsel %vm1260_vm2, %v3968_v24, %v3970_v22  ;;  %v4043_v9 = vadd.f32 %v3969_v55, %v3798_v28  ;;  %v4213_v14 = vrot.slane %v4093_v11, 2  ;;  %v4215_v47 = vrot.slane %v4094_v42, 2  ;;  %v9984_v24 = vld [vmem:[#allocation3 + $0x178] sm:$0xff] }
 0x343   : > { %v4044_v16 = vadd.f32 %v3971_v7, %v3799_v41  ;;  %v4339_v31 = vmul.f32 %v9507_v56, %v9823_v17  ;;  %v4457_v12 = vrot.slane %v4337_v58, 2  ;;  %v4582_v57 = vmul.f32 %v9521_v62, %v9860_v59 }
 0x344   : > { %v4583_v5 = vmul.f32 %v9521_v62, %v9862_v3  ;;  %v4214_v25 = vsel %vm2062_vm3, %v4212_v4, %v4213_v14  ;;  %v4216_v52 = vsel %vm2062_vm3, %v4213_v14, %v4215_v47  ;;  %v4458_v45 = vrot.slane %v4338_v15, 2 }
 0x345   : > { %v4584_v30 = vmul.f32 %v9521_v62, %v9912_v54  ;;  %v4288_v40 = vadd.f32 %v4214_v25, %v4043_v9  ;;  %v4289_v21 = vadd.f32 %v4216_v52, %v4044_v16  ;;  %v4460_v48 = vrot.slane %v4339_v31, 2 }
 0x346   : > { %v4702_v53 = vrot.slane %v4582_v57, 2  ;;  %v4459_v56 = vsel %vm2062_vm3, %v4457_v12, %v4458_v45  ;;  %v4703_v43 = vrot.slane %v4583_v5, 2  ;;  %v3140_v34 = vmul.f32 %v9867_v33, %v9793_v2 }
 0x347   : > { %v4705_v29 = vrot.slane %v4584_v30, 2  ;;  %v4461_v49 = vsel %vm2062_vm3, %v4458_v45, %v4460_v48  ;;  %v4533_v37 = vadd.f32 %v4459_v56, %v4288_v40  ;;  %v3141_v62 = vmul.f32 %v9867_v33, %v9795_v60 }
 0x348   : > { %v3209_v39 = vmul.f32 %v9877_v44, %v9860_v59  ;;  %v4534_v38 = vadd.f32 %v4461_v49, %v4289_v21  ;;  %v4704_v18 = vsel %vm2062_vm3, %v4702_v53, %v4703_v43  ;;  %v3210_v20 = vmul.f32 %v9877_v44, %v9862_v3 }
 0x349   : > { %v4706_v13 = vsel %vm2062_vm3, %v4703_v43, %v4705_v29  ;;  %v4778_v63 = vadd.f32 %v4704_v18, %v4533_v37  ;;  %v3278_v51 = vmul.f32 %v9887_v35, %v9961_v8  ;;  %v3279_v27 = vmul.f32 %v9887_v35, %v9963_v19 }
 0x34a   : > { %v3241_v26 = vadd.f32 %v3209_v39, %v3140_v34  ;;  %v4779_v32 = vadd.f32 %v4706_v13, %v4534_v38  ;;  %v3242_v0 = vadd.f32 %v3210_v20, %v3141_v62  ;;  %v3360_v23 = vmul.f32 %v9897_v46, %v9793_v2  ;;  %v10015_v39 = vld [vmem:[%s10734_s5 + $0x5] ss:$0 sm:$0xff] }
 0x34b   : > { %v3361_v36 = vmul.f32 %v9897_v46, %v9795_v60  ;;  %v3362_v28 = vmul.f32 %v9897_v46, %v9823_v17  ;;  %v3605_v22 = vmul.f32 %v9908_v10, %v9860_v59  ;;  %v3606_v50 = vmul.f32 %v9908_v10, %v9862_v3 }
 0x34c   : > { %v3310_v61 = vadd.f32 %v3278_v51, %v3241_v26  ;;  %v4798_v41 = vpack.c.bf16 %v4779_v32, %v4778_v63  ;;  %v3311_v55 = vadd.f32 %v3279_v27, %v3242_v0  ;;  %v3482_v11 = vrot.slane %v3360_v23, 1  ;;  %v10027_v63 = vld [vmem:[%s10734_s5 + $0x8] ss:$0 sm:$0xff] }
 0x34d   : > { %v3483_v42 = vrot.slane %v3361_v36, 1  ;;  %v3485_v7 = vrot.slane %v3362_v28, 1  ;;  %v3607_v9 = vmul.f32 %v9908_v10, %v9912_v54  ;;  %v3727_v4 = vrot.slane %v3605_v22, 1 }
 0x34e   : > { %v3728_v58 = vrot.slane %v3606_v50, 1  ;;  %7118 = vmatprep.mubr.bf16.mxu1 %v4798_v41  ;;  %v3850_v14 = vmul.f32 %v9922_v1, %v9961_v8  ;;  %v3851_v47 = vmul.f32 %v9922_v1, %v9963_v19  ;;  %v3852_v15 = vmul.f32 %v9922_v1, %v9984_v24 }
 0x34f   : > { %v3484_v16 = vsel %vm1260_vm2, %v3482_v11, %v3483_v42  ;;  %v3486_v31 = vsel %vm1260_vm2, %v3483_v42, %v3485_v7  ;;  %v3730_v5 = vrot.slane %v3607_v9, 1  ;;  %v4095_v48 = vmul.f32 %v9936_v6, %v9793_v2  ;;  %v10042_v11 = vld [vmem:[#allocation3 + $0x188] sm:$0xff] }
 0x350   : > { %v3555_v12 = vadd.f32 %v3484_v16, %v3310_v61  ;;  %v3729_v57 = vsel %vm1260_vm2, %v3727_v4, %v3728_v58  ;;  %v3556_v25 = vadd.f32 %v3486_v31, %v3311_v55  ;;  %v3972_v52 = vrot.slane %v3850_v14, 1  ;;  %v10040_v55 = vld [vmem:[#allocation3 + $0x180] sm:$0xff] }
 0x351   : > { %v3973_v45 = vrot.slane %v3851_v47, 1  ;;  %v3975_v30 = vrot.slane %v3852_v15, 1  ;;  %v3731_v40 = vsel %vm1260_vm2, %v3728_v58, %v3730_v5  ;;  %v4096_v53 = vmul.f32 %v9936_v6, %v9795_v60 }
 0x352   : > { %v3800_v21 = vadd.f32 %v3729_v57, %v3555_v12  ;;  %v3801_v56 = vadd.f32 %v3731_v40, %v3556_v25  ;;  %v4097_v34 = vmul.f32 %v9936_v6, %v9823_v17  ;;  %v4217_v37 = vrot.slane %v4095_v48, 2 }
 0x353   : > { %v3974_v43 = vsel %vm1260_vm2, %v3972_v52, %v3973_v45  ;;  %v3976_v29 = vsel %vm1260_vm2, %v3973_v45, %v3975_v30  ;;  %v4218_v62 = vrot.slane %v4096_v53, 2  ;;  %v4340_v2 = vmul.f32 %v10015_v39, %v9860_v59 }
 0x354   : > { %v4045_v49 = vadd.f32 %v3974_v43, %v3800_v21  ;;  %v4046_v60 = vadd.f32 %v3976_v29, %v3801_v56  ;;  %v4220_v38 = vrot.slane %v4097_v34, 2  ;;  %v4341_v18 = vmul.f32 %v10015_v39, %v9862_v3 }
 0x355   : > { %v4342_v13 = vmul.f32 %v10015_v39, %v9912_v54  ;;  %v4219_v17 = vsel %vm2062_vm3, %v4217_v37, %v4218_v62  ;;  %v4462_v20 = vrot.slane %v4340_v2, 2  ;;  %v4585_v26 = vmul.f32 %v10027_v63, %v9961_v8  ;;  %v10033_v27 = vpop.f32.mrb[32].mxu1 }
 0x356   : > { %v4586_v51 = vmul.f32 %v10027_v63, %v9963_v19  ;;  %v4221_v32 = vsel %vm2062_vm3, %v4218_v62, %v4220_v38  ;;  %v4290_v0 = vadd.f32 %v4219_v17, %v4045_v49  ;;  %v4463_v23 = vrot.slane %v4341_v18, 2  ;;  %v10036_v61 = vpop.f32.mrb[33].mxu1  ;;  %v10074_v62 = vld [vmem:[#allocation3 + $0x190] sm:$0xff] }
 0x357   : > { %v4465_v36 = vrot.slane %v4342_v13, 2  ;;  %v4291_v28 = vadd.f32 %v4221_v32, %v4046_v60  ;;  %v4587_v22 = vmul.f32 %v10027_v63, %v9984_v24  ;;  %v4707_v50 = vrot.slane %v4585_v26, 2  ;;  %v10044_v42 = vpop.f32.mrb[34].mxu1 }
 0x358   : > { %v4708_v41 = vrot.slane %v4586_v51, 2  ;;  %v4464_v7 = vsel %vm2062_vm3, %v4462_v20, %v4463_v23  ;;  %v3142_v4 = vmul.f32 %v9867_v33, %v9860_v59  ;;  %v3143_v58 = vmul.f32 %v9867_v33, %v9862_v3  ;;  %v10052_v16 = vpop.f32.mrb[35].mxu1 }
 0x359   : > { %v4466_v9 = vsel %vm2062_vm3, %v4463_v23, %v4465_v36  ;;  %v4535_v14 = vadd.f32 %v4464_v7, %v4290_v0  ;;  %v4710_v31 = vrot.slane %v4587_v22, 2  ;;  %v3211_v12 = vmul.f32 %v9877_v44, %v9961_v8 }
 0x35a   : > { %v4536_v47 = vadd.f32 %v4466_v9, %v4291_v28  ;;  %v4709_v15 = vsel %vm2062_vm3, %v4707_v50, %v4708_v41  ;;  %v3212_v57 = vmul.f32 %v9877_v44, %v9963_v19  ;;  %v3280_v5 = vmul.f32 %v9887_v35, %v10040_v55 }
 0x35b   : > { %v3281_v25 = vmul.f32 %v9887_v35, %v10042_v11  ;;  %v4711_v52 = vsel %vm2062_vm3, %v4708_v41, %v4710_v31  ;;  %v4780_v45 = vadd.f32 %v4709_v15, %v4535_v14  ;;  %v3363_v30 = vmul.f32 %v9897_v46, %v9860_v59 }
 0x35c   : > { %v3364_v40 = vmul.f32 %v9897_v46, %v9862_v3  ;;  %v4781_v21 = vadd.f32 %v4711_v52, %v4536_v47  ;;  %v3243_v48 = vadd.f32 %v3211_v12, %v3142_v4  ;;  %v3244_v53 = vadd.f32 %v3212_v57, %v3143_v58 }
 0x35d   : > { %v3365_v56 = vmul.f32 %v9897_v46, %v9912_v54  ;;  %v3487_v43 = vrot.slane %v3363_v30, 1  ;;  %v3608_v34 = vmul.f32 %v9908_v10, %v9961_v8  ;;  %v3609_v49 = vmul.f32 %v9908_v10, %v9963_v19 }
 0x35e   : > { %v3488_v29 = vrot.slane %v3364_v40, 1  ;;  %v4799_v37 = vpack.c.bf16 %v4781_v21, %v4780_v45  ;;  %v3312_v2 = vadd.f32 %v3280_v5, %v3243_v48  ;;  %v3313_v60 = vadd.f32 %v3281_v25, %v3244_v53 }
 0x35f   : > { %v3490_v38 = vrot.slane %v3365_v56, 1  ;;  %v3610_v13 = vmul.f32 %v9908_v10, %v9984_v24  ;;  %v3732_v17 = vrot.slane %v3608_v34, 1  ;;  %v3733_v20 = vrot.slane %v3609_v49, 1 }
 0x360   : > { %v3489_v18 = vsel %vm1260_vm2, %v3487_v43, %v3488_v29  ;;  %7119 = vmatmul.mubr.bf16.gmra.mrb[56].mxu1 %v4799_v37  ;;  %v3853_v32 = vmul.f32 %v9922_v1, %v10040_v55  ;;  %v3854_v0 = vmul.f32 %v9922_v1, %v10042_v11  ;;  %v3855_v22 = vmul.f32 %v9922_v1, %v10074_v62 }
 0x361   : > { %v3491_v26 = vsel %vm1260_vm2, %v3488_v29, %v3490_v38  ;;  %v3557_v51 = vadd.f32 %v3489_v18, %v3312_v2  ;;  %v3734_v36 = vsel %vm1260_vm2, %v3732_v17, %v3733_v20  ;;  %v3735_v28 = vrot.slane %v3610_v13, 1 }
 0x362   : > { %v3558_v23 = vadd.f32 %v3491_v26, %v3313_v60  ;;  %v3977_v41 = vrot.slane %v3853_v32, 1  ;;  %v3978_v7 = vrot.slane %v3854_v0, 1  ;;  %v4098_v9 = vmul.f32 %v9936_v6, %v9860_v59 }
 0x363   : > { %v3802_v50 = vadd.f32 %v3734_v36, %v3557_v51  ;;  %v3736_v4 = vsel %vm1260_vm2, %v3733_v20, %v3735_v28  ;;  %v3980_v58 = vrot.slane %v3855_v22, 1  ;;  %v4099_v14 = vmul.f32 %v9936_v6, %v9862_v3  ;;  %v7469_v36 = vld [vmem:[#allocation3] sm:$0xff] }
 0x364   : > { %v4100_v47 = vmul.f32 %v9936_v6, %v9912_v54  ;;  %v3803_v15 = vadd.f32 %v3736_v4, %v3558_v23  ;;  %v3979_v31 = vsel %vm1260_vm2, %v3977_v41, %v3978_v7  ;;  %v4222_v12 = vrot.slane %v4098_v9, 2 }
 0x365   : > { %v4343_v57 = vmul.f32 %v10015_v39, %v9961_v8  ;;  %v3981_v5 = vsel %vm1260_vm2, %v3978_v7, %v3980_v58  ;;  %v4047_v25 = vadd.f32 %v3979_v31, %v3802_v50  ;;  %v4223_v59 = vrot.slane %v4099_v14, 2 }
 0x366   : > { %v4225_v52 = vrot.slane %v4100_v47, 2  ;;  %v4048_v45 = vadd.f32 %v3981_v5, %v3803_v15  ;;  %v4344_v30 = vmul.f32 %v10015_v39, %v9963_v19  ;;  %v4345_v3 = vmul.f32 %v10015_v39, %v9984_v24 }
 0x367   : > { %v4467_v54 = vrot.slane %v4343_v57, 2  ;;  %v4224_v40 = vsel %vm2062_vm3, %v4222_v12, %v4223_v59  ;;  %v4588_v48 = vmul.f32 %v10027_v63, %v10040_v55  ;;  %v4589_v53 = vmul.f32 %v10027_v63, %v10042_v11 }
 0x368   : > { %v4226_v21 = vsel %vm2062_vm3, %v4223_v59, %v4225_v52  ;;  %v4292_v56 = vadd.f32 %v4224_v40, %v4047_v25  ;;  %v4468_v29 = vrot.slane %v4344_v30, 2  ;;  %v4470_v34 = vrot.slane %v4345_v3, 2 }
 0x369   : > { %v4293_v43 = vadd.f32 %v4226_v21, %v4048_v45  ;;  %v4590_v49 = vmul.f32 %v10027_v63, %v10074_v62  ;;  %v4712_v37 = vrot.slane %v4588_v48, 2  ;;  %v4713_v2 = vrot.slane %v4589_v53, 2 }
 0x36a   : > { %v3144_v60 = vmul.f32 %v9867_v33, %v9961_v8  ;;  %v4469_v38 = vsel %vm2062_vm3, %v4467_v54, %v4468_v29  ;;  %v4471_v18 = vsel %vm2062_vm3, %v4468_v29, %v4470_v34  ;;  %v3145_v13 = vmul.f32 %v9867_v33, %v9963_v19 }
 0x36b   : > { %v3213_v17 = vmul.f32 %v9877_v44, %v10040_v55  ;;  %v4537_v20 = vadd.f32 %v4469_v38, %v4292_v56  ;;  %v4538_v26 = vadd.f32 %v4471_v18, %v4293_v43  ;;  %v4714_v51 = vsel %vm2062_vm3, %v4712_v37, %v4713_v2 }
 0x36c   : > { %v4715_v32 = vrot.slane %v4590_v49, 2  ;;  %v3214_v0 = vmul.f32 %v9877_v44, %v10042_v11  ;;  %v3282_v28 = vmul.f32 %v7469_v36, %v9887_v35  ;;  %v3366_v22 = vmul.f32 %v9897_v46, %v9961_v8 }
 0x36d   : > { %v3245_v23 = vadd.f32 %v3213_v17, %v3144_v60  ;;  %v4782_v50 = vadd.f32 %v4714_v51, %v4537_v20  ;;  %v3367_v41 = vmul.f32 %v9897_v46, %v9963_v19  ;;  %v3368_v7 = vmul.f32 %v9897_v46, %v9984_v24 }
 0x36e   : > { %v4716_v33 = vsel %vm2062_vm3, %v4713_v2, %v4715_v32  ;;  %v3246_v4 = vadd.f32 %v3214_v0, %v3145_v13  ;;  %v3492_v44 = vrot.slane %v3366_v22, 1  ;;  %v3611_v35 = vmul.f32 %v9908_v10, %v10040_v55  ;;  %v10179_v0 = vld [vmem:[%s10166_s17] sm:$0xff] }
 0x36f   : > { %v4783_v9 = vadd.f32 %v4716_v33, %v4538_v26  ;;  %v3314_v58 = vadd.f32 %v3282_v28, %v3245_v23  ;;  %v3493_v14 = vrot.slane %v3367_v41, 1  ;;  %v3495_v47 = vrot.slane %v3368_v7, 1  ;;  %v10182_v23 = vld [vmem:[%s10166_s17 + $0x8] sm:$0xff] }
 0x370   : > { %v3612_v15 = vmul.f32 %v9908_v10, %v10042_v11  ;;  %v3315_v12 = vadd.f32 %v3282_v28, %v3246_v4  ;;  %v3613_v57 = vmul.f32 %v9908_v10, %v10074_v62  ;;  %v3856_v5 = vmul.f32 %v7469_v36, %v9922_v1 }
 0x371   : > { %v4800_v31 = vpack.c.bf16 %v4783_v9, %v4782_v50  ;;  %v3494_v46 = vsel %vm1260_vm2, %v3492_v44, %v3493_v14  ;;  %v3496_v25 = vsel %vm1260_vm2, %v3493_v14, %v3495_v47  ;;  %v3737_v59 = vrot.slane %v3611_v35, 1 }
 0x372   : > { %v3738_v52 = vrot.slane %v3612_v15, 1  ;;  %v3559_v45 = vadd.f32 %v3494_v46, %v3314_v58  ;;  %v3560_v30 = vadd.f32 %v3496_v25, %v3315_v12  ;;  %v3740_v3 = vrot.slane %v3613_v57, 1  ;;  %v5803_v46 = vld [vmem:[%s10166_s17 + $0x18] sm:$0xff] }
 0x373   : > { %7122 = vmatprep.mubr.bf16.mxu1 %v4800_v31  ;;  %v3982_v54 = vrot.slane %v3856_v5, 1  ;;  %v4101_v21 = vmul.f32 %v9936_v6, %v9961_v8  ;;  %v4102_v10 = vmul.f32 %v9936_v6, %v9963_v19  ;;  %v4103_v1 = vmul.f32 %v9936_v6, %v9984_v24  ;;  %v5802_v5 = vld [vmem:[%s10166_s17 + $0x10] sm:$0xff] }
 0x374   : > { %v3739_v40 = vsel %vm1260_vm2, %v3737_v59, %v3738_v52  ;;  %v3741_v48 = vsel %vm1260_vm2, %v3738_v52, %v3740_v3  ;;  %v4346_v56 = vmul.f32 %v10015_v39, %v10040_v55  ;;  %v4347_v8 = vmul.f32 %v10015_v39, %v10042_v11  ;;  %v10160_v55 = vld [vmem:[%s10736_s7] ss:$0 sm:$0xff]  ;;  %v5805_v52 = vld [vmem:[%s10166_s17 + $0x28] sm:$0xff] }
 0x375   : > { %v3804_v53 = vadd.f32 %v3739_v40, %v3559_v45  ;;  %v3805_v43 = vadd.f32 %v3741_v48, %v3560_v30  ;;  %v4227_v29 = vrot.slane %v4101_v21, 2  ;;  %v4228_v34 = vrot.slane %v4102_v10, 2  ;;  %v5804_v59 = vld [vmem:[%s10166_s17 + $0x20] sm:$0xff]  ;;  %v5806_v40 = vld [vmem:[%s10166_s17 + $0x30] sm:$0xff]  ;;  %v5807_v21 = vld [vmem:[%s10166_s17 + $0x38] sm:$0xff] }
 0x376   : > { %v4230_v49 = vrot.slane %v4103_v1, 2  ;;  %v4348_v19 = vmul.f32 %v10015_v39, %v10074_v62  ;;  %v4472_v24 = vrot.slane %v4346_v56, 2  ;;  %v10155_v60 = vmul.f32 %v7469_v36, %v10027_v63  ;;  %v10172_v62 = vld [vmem:[%s10737_s8] ss:$0 sm:$0xff] }
 0x377   : > { %v4049_v37 = vadd.f32 %v3982_v54, %v3804_v53  ;;  %v4050_v2 = vadd.f32 %v3982_v54, %v3805_v43  ;;  %v4229_v6 = vsel %vm2062_vm3, %v4227_v29, %v4228_v34  ;;  %v4473_v13 = vrot.slane %v4347_v8, 2 }
 0x378   : > { %v4231_v38 = vsel %vm2062_vm3, %v4228_v34, %v4230_v49  ;;  %v4475_v11 = vrot.slane %v4348_v19, 2  ;;  %v4717_v63 = vrot.slane %v10155_v60, 2  ;;  %v4996_v26 = vmul.f32 %v10033_v27, %v10160_v55 }
 0x379   : > { %v4294_v18 = vadd.f32 %v4229_v6, %v4049_v37  ;;  %v4295_v39 = vadd.f32 %v4231_v38, %v4050_v2  ;;  %v4474_v17 = vsel %vm2062_vm3, %v4472_v24, %v4473_v13  ;;  %v7538_v28 = vmov -3e+38  }
 0x37a   : > { %v4476_v20 = vsel %vm2062_vm3, %v4473_v13, %v4475_v11  ;;  %v5035_v36 = vadd.f32 %v10172_v62, %v4996_v26  ;;  %5071 = vst [vmem:[#allocation4 + $0x30] sm:$0xff] %v7538_v28  ;;  %5072 = vst [vmem:[#allocation4 + $0x38] sm:$0xff] %v7538_v28  ;;  %v4994_v27 = vmul.f32 %v10160_v55, %v10036_v61  ;;  %v5318_v3 = vrot.slane %v7538_v28, 1 }
 0x37b   : > { %v4539_v51 = vadd.f32 %v4474_v17, %v4294_v18  ;;  %v4540_v32 = vadd.f32 %v4476_v20, %v4295_v39  ;;  %5065 = vst [vmem:[#allocation4] sm:$0xff] %v7538_v28  ;;  %5068 = vst [vmem:[#allocation4 + $0x18] sm:$0xff] %v7538_v28  ;;  %v4997_v50 = vmul.f32 %v10044_v42, %v10160_v55  ;;  %v5546_v29 = vrot.slane %v7538_v28, 2 }
 0x37c   : > { %5069 = vst [vmem:[#allocation4 + $0x20] sm:$0xff] %v7538_v28  ;;  %5070 = vst [vmem:[#allocation4 + $0x28] sm:$0xff] %v7538_v28  ;;  %v4995_v41 = vmul.f32 %v10160_v55, %v10052_v16  ;;  %v5808_v9 = vpack.c.bf16 %v10182_v23, %v10179_v0  ;;  %v5033_v4 = vadd.f32 %v10172_v62, %v4994_v27 }
 0x37d   : > { %5073 = vst [vmem:[#allocation4 + $0x40] sm:$0xff] %v7538_v28  ;;  %5074 = vst [vmem:[#allocation4 + $0x48] sm:$0xff] %v7538_v28  ;;  %v4784_v22 = vadd.f32 %v4717_v63, %v4539_v51  ;;  %v4785_v33 = vadd.f32 %v4717_v63, %v4540_v32  ;;  %v5036_v14 = vadd.f32 %v10172_v62, %v4997_v50 }
 0x37e   : > { %5075 = vst [vmem:[#allocation4 + $0x50] sm:$0xff] %v7538_v28  ;;  %5076 = vst [vmem:[#allocation4 + $0x58] sm:$0xff] %v7538_v28  ;;  %v7100_v7 = vpop.f32.mrb[36].mxu1  ;;  %v5034_v42 = vadd.f32 %v10172_v62, %v4995_v41  ;;  %v5809_v30 = vpack.c.bf16 %v5803_v46, %v5802_v5  ;;  %v5810_v54 = vpack.c.bf16 %v5805_v52, %v5804_v59 }
 0x37f   : > { %5077 = vst [vmem:[#allocation4 + $0x60] sm:$0xff] %v7538_v28  ;;  %5078 = vst [vmem:[#allocation4 + $0x68] sm:$0xff] %v7538_v28  ;;  %v5000_v58 = vmul.f32 %v7100_v7, %v10160_v55  ;;  %v4876_v44 = vpop.f32.mrb[37].mxu1  ;;  %v4801_v61 = vpack.c.bf16 %v4785_v33, %v4784_v22  ;;  %v5811_v6 = vpack.c.bf16 %v5807_v21, %v5806_v40 }
 0x380   : > { %5079 = vst [vmem:[#allocation4 + $0x70] sm:$0xff] %v7538_v28  ;;  %5080 = vst [vmem:[#allocation4 + $0x78] sm:$0xff] %v7538_v28  ;;  %v4998_v47 = vmul.f32 %v10160_v55, %v4876_v44  ;;  %v7101_v16 = vpop.f32.mrb[38].mxu1 }
 0x381   : > { %5081 = vst [vmem:[#allocation4 + $0x80] sm:$0xff] %v7538_v28  ;;  %5082 = vst [vmem:[#allocation4 + $0x88] sm:$0xff] %v7538_v28  ;;  %v5039_v35 = vadd.f32 %v10172_v62, %v5000_v58  ;;  %v5001_v15 = vmul.f32 %v7101_v16, %v10160_v55  ;;  %v4879_v31 = vpop.f32.mrb[39].mxu1  ;;  %7123 = vmatmul.mubr.bf16.gmra.mrb[60].mxu1 %v4801_v61 }
 0x382   : > { %5083 = vst [vmem:[#allocation4 + $0x90] sm:$0xff] %v7538_v28  ;;  %5084 = vst [vmem:[#allocation4 + $0x98] sm:$0xff] %v7538_v28  ;;  %v5037_v12 = vadd.f32 %v10172_v62, %v4998_v47  ;;  %v4999_v57 = vmul.f32 %v10160_v55, %v4879_v31  ;;  %7128 = vmatprep.mubr.msk.bf16.mxu1 %vm433_vm1, %v5808_v9 }
 0x383   : > { %5085 = vst [vmem:[#allocation4 + $0xa0] sm:$0xff] %v7538_v28  ;;  %5086 = vst [vmem:[#allocation4 + $0xa8] sm:$0xff] %v7538_v28  ;;  %v5040_v25 = vadd.f32 %v10172_v62, %v5001_v15 }
 0x384   : > { %5087 = vst [vmem:[#allocation4 + $0xb0] sm:$0xff] %v7538_v28  ;;  %5088 = vst [vmem:[#allocation4 + $0xb8] sm:$0xff] %v7538_v28  ;;  %v5038_v45 = vadd.f32 %v10172_v62, %v4999_v57 }
 0x385   : > { %5089 = vst [vmem:[#allocation4 + $0xc0] sm:$0xff] %v7538_v28  ;;  %5090 = vst [vmem:[#allocation4 + $0xc8] sm:$0xff] %v7538_v28 }
 0x386   : > { %5091 = vst [vmem:[#allocation4 + $0xd0] sm:$0xff] %v7538_v28  ;;  %5092 = vst [vmem:[#allocation4 + $0xd8] sm:$0xff] %v7538_v28 }
 0x387   : > { %5093 = vst [vmem:[#allocation4 + $0xe0] sm:$0xff] %v7538_v28  ;;  %5094 = vst [vmem:[#allocation4 + $0xe8] sm:$0xff] %v7538_v28 }
 0x388   : > { %5095 = vst [vmem:[#allocation4 + $0xf0] sm:$0xff] %v7538_v28  ;;  %5096 = vst [vmem:[#allocation4 + $0xf8] sm:$0xff] %v7538_v28 }
 0x389   : > { %5097 = vst [vmem:[#allocation4 + $0x100] sm:$0xff] %v7538_v28  ;;  %5098 = vst [vmem:[#allocation4 + $0x108] sm:$0xff] %v7538_v28  ;;  %7129 = vmatmul.mubr.msk.bf16.vlgmr.msra.gmra.mrb[64].mxu1 %vm433_vm1, %v5809_v30 }
 0x38a   : > { %5099 = vst [vmem:[#allocation4 + $0x110] sm:$0xff] %v7538_v28  ;;  %5100 = vst [vmem:[#allocation4 + $0x118] sm:$0xff] %v7538_v28  ;;  %7132 = vmatprep.mubr.msk.bf16.mxu1 %vm433_vm1, %v5810_v54 }
 0x38b   : > { %5101 = vst [vmem:[#allocation4 + $0x120] sm:$0xff] %v7538_v28  ;;  %5102 = vst [vmem:[#allocation4 + $0x128] sm:$0xff] %v7538_v28 }
 0x38c   : > { %5103 = vst [vmem:[#allocation4 + $0x130] sm:$0xff] %v7538_v28  ;;  %5104 = vst [vmem:[#allocation4 + $0x138] sm:$0xff] %v7538_v28 }
 0x38d   : > { %5105 = vst [vmem:[#allocation4 + $0x140] sm:$0xff] %v7538_v28  ;;  %5106 = vst [vmem:[#allocation4 + $0x148] sm:$0xff] %v7538_v28 }
 0x38e   : > { %5107 = vst [vmem:[#allocation4 + $0x150] sm:$0xff] %v7538_v28  ;;  %5108 = vst [vmem:[#allocation4 + $0x158] sm:$0xff] %v7538_v28 }
 0x38f   : > { %5109 = vst [vmem:[#allocation4 + $0x160] sm:$0xff] %v7538_v28  ;;  %5110 = vst [vmem:[#allocation4 + $0x168] sm:$0xff] %v7538_v28 }
 0x390   : > { %5111 = vst [vmem:[#allocation4 + $0x170] sm:$0xff] %v7538_v28  ;;  %5112 = vst [vmem:[#allocation4 + $0x178] sm:$0xff] %v7538_v28 }
 0x391   : > { %5113 = vst [vmem:[#allocation4 + $0x180] sm:$0xff] %v7538_v28  ;;  %5114 = vst [vmem:[#allocation4 + $0x188] sm:$0xff] %v7538_v28  ;;  %7133 = vmatmul.mubr.msk.bf16.gmra.mrb[68].mxu1 %vm433_vm1, %v5811_v6 }
 0x392   : > { %5115 = vst [vmem:[#allocation4 + $0x190] sm:$0xff] %v7538_v28  ;;  %5122 = vst [vmem:[#allocation4 + $0x31] sm:$0xff] %v5035_v36 }
 0x393   : > { %5120 = vst [vmem:[#allocation4 + $0x19] sm:$0xff] %v5033_v4  ;;  %5123 = vst [vmem:[#allocation4 + $0x39] sm:$0xff] %v5036_v14 }
 0x394   : > { %5121 = vst [vmem:[#allocation4 + $0x21] sm:$0xff] %v5034_v42  ;;  %5126 = vst [vmem:[#allocation4 + $0x61] sm:$0xff] %v5039_v35 }
 0x395   : > { %5124 = vst [vmem:[#allocation4 + $0x49] sm:$0xff] %v5037_v12  ;;  %5127 = vst [vmem:[#allocation4 + $0x69] sm:$0xff] %v5040_v25 }
 0x396   : > { %5125 = vst [vmem:[#allocation4 + $0x51] sm:$0xff] %v5038_v45 }
 0x399   : > { %v5158_v1 = vld [vmem:[#allocation4 + $0x30] sm:$0xff] }
 0x39a   : > { %v5155_v10 = vld [vmem:[#allocation4 + $0x18] sm:$0xff]  ;;  %v5160_v37 = vld [vmem:[#allocation4 + $0x40] sm:$0xff]  ;;  %v5328_v24 = vrot.slane %v5158_v1, 1  ;;  %v5556_v28 = vrot.slane %v5158_v1, 2 }
 0x39b   : > { %v5206_v48 = vmax.f32 %v5155_v10, -3e+38  ;;  %v5159_v53 = vld [vmem:[#allocation4 + $0x38] sm:$0xff]  ;;  %v5156_v56 = vld [vmem:[#allocation4 + $0x20] sm:$0xff]  ;;  %v5323_v43 = vrot.slane %v5155_v10, 1  ;;  %v5157_v34 = vld [vmem:[#allocation4 + $0x28] sm:$0xff] }
 0x39c   : > { %v5329_v8 = vrot.slane %v5159_v53, 1  ;;  %v5207_v19 = vmax.f32 %v5156_v56, -3e+38  ;;  %v5324_v2 = vrot.slane %v5156_v56, 1  ;;  %v10264_v60 = vld [vmem:[#allocation4 + $0x48] sm:$0xff]  ;;  %v5326_v13 = vrot.slane %v5157_v34, 1 }
 0x39d   : > { %v5238_v49 = vmax.f32 %v5206_v48, %v5158_v1  ;;  %v5331_v39 = vrot.slane %v5160_v37, 1  ;;  %v5557_v63 = vrot.slane %v5159_v53, 2  ;;  %v5210_v51 = vmax.f32 %v5158_v1, %v10264_v60  ;;  %v10270_v36 = vld [vmem:[#allocation4 + $0x60] sm:$0xff]  ;;  %v10273_v50 = vld [vmem:[#allocation4 + $0x68] sm:$0xff]  ;;  %v5162_v4 = vld [vmem:[#allocation4 + $0x50] sm:$0xff] }
 0x39e   : > { %v5239_v38 = vmax.f32 %v5207_v19, %v5159_v53  ;;  %v5325_v18 = vsel %vm1260_vm2, %v5323_v43, %v5324_v2  ;;  %v5330_v17 = vsel %vm1260_vm2, %v5328_v24, %v5329_v8  ;;  %v5327_v32 = vsel %vm1260_vm2, %v5324_v2, %v5326_v13  ;;  %v5163_v35 = vld [vmem:[#allocation4 + $0x58] sm:$0xff]  ;;  %v5166_v57 = vld [vmem:[#allocation4 + $0x70] sm:$0xff] }
 0x39f   : > { %v5430_v11 = vmax.f32 %v5238_v49, %v5318_v3  ;;  %v5552_v0 = vrot.slane %v5156_v56, 2  ;;  %v5554_v23 = vrot.slane %v5157_v34, 2  ;;  %v5242_v33 = vmax.f32 %v5210_v51, %v10270_v36 }
 0x3a0   : > { %v5431_v20 = vmax.f32 %v5239_v38, %v5318_v3  ;;  %v5551_v41 = vrot.slane %v5155_v10, 2  ;;  %v5332_v7 = vsel %vm1260_vm2, %v5329_v8, %v5331_v39  ;;  %v5559_v9 = vrot.slane %v5160_v37, 2 }
 0x3a1   : > { %v5472_v26 = vmax.f32 %v5430_v11, %v5325_v18  ;;  %v5558_v58 = vsel %vm2062_vm3, %v5556_v28, %v5557_v63  ;;  %v5555_v42 = vsel %vm2062_vm3, %v5552_v0, %v5554_v23  ;;  %v5338_v47 = vrot.slane %v10270_v36, 1 }
 0x3a2   : > { %v5473_v27 = vmax.f32 %v5431_v20, %v5327_v32  ;;  %v5553_v14 = vsel %vm2062_vm3, %v5551_v41, %v5552_v0  ;;  %v5339_v16 = vrot.slane %v10273_v50, 1  ;;  %v5434_v12 = vmax.f32 %v5242_v33, %v5330_v17 }
 0x3a3   : > { %v5514_v22 = vmax.f32 %v5472_v26, %v5330_v17  ;;  %v5211_v5 = vmax.f32 %v5159_v53, %v5162_v4  ;;  %v5333_v46 = vrot.slane %v10264_v60, 1  ;;  %v5334_v25 = vrot.slane %v5162_v4, 1 }
 0x3a4   : > { %v5515_v44 = vmax.f32 %v5473_v27, %v5332_v7  ;;  %v5336_v30 = vrot.slane %v5163_v35, 1  ;;  %v5560_v3 = vsel %vm2062_vm3, %v5557_v63, %v5559_v9  ;;  %v5341_v54 = vrot.slane %v5166_v57, 1 }
 0x3a5   : > { %v5658_v61 = vmax.f32 %v5514_v22, %v5546_v29  ;;  %v5243_v45 = vmax.f32 %v5211_v5, %v10273_v50  ;;  %v5335_v40 = vsel %vm1260_vm2, %v5333_v46, %v5334_v25  ;;  %v10287_v10 = vsel %vm1260_vm2, %v5338_v47, %v5339_v16  ;;  %v7104_v26 = vpop.f32.mrb[40].mxu1 }
 0x3a6   : > { %v5659_v15 = vmax.f32 %v5515_v44, %v5546_v29  ;;  %v5476_v48 = vmax.f32 %v5434_v12, %v5335_v40  ;;  %v5337_v53 = vsel %vm1260_vm2, %v5334_v25, %v5336_v30  ;;  %v5562_v56 = vrot.slane %v5162_v4, 2  ;;  %v4892_v32 = vpop.f32.mrb[41].mxu1 }
 0x3a7   : > { %v5697_v31 = vmax.f32 %v5658_v61, %v5553_v14  ;;  %v5435_v1 = vmax.f32 %v5243_v45, %v5332_v7  ;;  %v5561_v43 = vrot.slane %v10264_v60, 2  ;;  %v5567_v29 = vrot.slane %v10273_v50, 2  ;;  %v7105_v23 = vpop.f32.mrb[42].mxu1 }
 0x3a8   : > { %v5698_v59 = vmax.f32 %v5659_v15, %v5555_v42  ;;  %v5518_v49 = vmax.f32 %v5476_v48, %v10287_v10  ;;  %v5342_v37 = vsel %vm1260_vm2, %v5339_v16, %v5341_v54  ;;  %v5564_v8 = vrot.slane %v5163_v35, 2  ;;  %v4895_v22 = vpop.f32.mrb[43].mxu1 }
 0x3a9   : > { %v5736_v52 = vmax.f32 %v5697_v31, %v5558_v58  ;;  %v5477_v34 = vmax.f32 %v5435_v1, %v5337_v53  ;;  %v5566_v19 = vrot.slane %v10270_v36, 2  ;;  %v5569_v24 = vrot.slane %v5166_v57, 2 }
 0x3aa   : > { %v5737_v21 = vmax.f32 %v5698_v59, %v5560_v3  ;;  %v5662_v6 = vmax.f32 %v5518_v49, %v5558_v58  ;;  %v5563_v38 = vsel %vm2062_vm3, %v5561_v43, %v5562_v56  ;;  %v5565_v60 = vsel %vm2062_vm3, %v5562_v56, %v5564_v8 }
 0x3ab   : > { %5768 = vst [vmem:[#allocation5] sm:$0xff] %v5736_v52  ;;  %v5519_v2 = vmax.f32 %v5477_v34, %v5342_v37  ;;  %v5568_v11 = vsel %vm2062_vm3, %v5566_v19, %v5567_v29  ;;  %v5570_v17 = vsel %vm2062_vm3, %v5567_v29, %v5569_v24  ;;  %v5004_v51 = vmul.f32 %v7104_v26, %v10160_v55 }
 0x3ac   : > { %5769 = vst [vmem:[#allocation5 + $0x8] sm:$0xff] %v5737_v21  ;;  %v5701_v13 = vmax.f32 %v5662_v6, %v5563_v38  ;;  %v5002_v0 = vmul.f32 %v10160_v55, %v4892_v32  ;;  %v5005_v27 = vmul.f32 %v7105_v23, %v10160_v55  ;;  %v5003_v41 = vmul.f32 %v10160_v55, %v4895_v22 }
 0x3ad   : > { %v5663_v18 = vmax.f32 %v5519_v2, %v5560_v3  ;;  %v5043_v28 = vadd.f32 %v10172_v62, %v5004_v51 }
 0x3ae   : > { %v5740_v63 = vmax.f32 %v5701_v13, %v5568_v11  ;;  %v5041_v33 = vadd.f32 %v10172_v62, %v5002_v0  ;;  %v5044_v7 = vadd.f32 %v10172_v62, %v5005_v27  ;;  %v5042_v9 = vadd.f32 %v10172_v62, %v5003_v41 }
 0x3af   : > { %v5702_v39 = vmax.f32 %v5663_v18, %v5565_v60  ;;  %5130 = vst [vmem:[#allocation4 + $0x91] sm:$0xff] %v5043_v28 }
 0x3b0   : > { %5772 = vst [vmem:[#allocation5 + $0x20] sm:$0xff] %v5740_v63  ;;  %5128 = vst [vmem:[#allocation4 + $0x79] sm:$0xff] %v5041_v33 }
 0x3b1   : > { %v5741_v20 = vmax.f32 %v5702_v39, %v5570_v17  ;;  %5131 = vst [vmem:[#allocation4 + $0x99] sm:$0xff] %v5044_v7  ;;  %5129 = vst [vmem:[#allocation4 + $0x81] sm:$0xff] %v5042_v9 }
 0x3b3   : > { %5773 = vst [vmem:[#allocation5 + $0x28] sm:$0xff] %v5741_v20 }
 0x3b6   : > { %v10308_v44 = vld [vmem:[#allocation4 + $0x90] sm:$0xff] }
 0x3b7   : > { %v5167_v4 = vld [vmem:[#allocation4 + $0x78] sm:$0xff]  ;;  %v5348_v25 = vrot.slane %v10308_v44, 1  ;;  %v5576_v29 = vrot.slane %v10308_v44, 2 }
 0x3b8   : > { %v5214_v58 = vmax.f32 %v10270_v36, %v5167_v4  ;;  %v10310_v61 = vld [vmem:[#allocation4 + $0x98] sm:$0xff]  ;;  %v5168_v14 = vld [vmem:[#allocation4 + $0x80] sm:$0xff]  ;;  %v5169_v16 = vld [vmem:[#allocation4 + $0x88] sm:$0xff]  ;;  %v5343_v15 = vrot.slane %v5167_v4, 1  ;;  %v5571_v1 = vrot.slane %v5167_v4, 2 }
 0x3b9   : > { %v5172_v47 = vld [vmem:[#allocation4 + $0xa0] sm:$0xff]  ;;  %v5215_v35 = vmax.f32 %v10273_v50, %v5168_v14  ;;  %v5349_v12 = vrot.slane %v10310_v61, 1  ;;  %v5344_v36 = vrot.slane %v5168_v14, 1  ;;  %v5346_v46 = vrot.slane %v5169_v16, 1 }
 0x3ba   : > { %v5246_v42 = vmax.f32 %v5214_v58, %v10308_v44  ;;  %v5351_v57 = vrot.slane %v5172_v47, 1  ;;  %v5572_v40 = vrot.slane %v5168_v14, 2  ;;  %v5574_v21 = vrot.slane %v5169_v16, 2 }
 0x3bb   : > { %v5247_v5 = vmax.f32 %v5215_v35, %v10310_v61  ;;  %v5345_v52 = vsel %vm1260_vm2, %v5343_v15, %v5344_v36  ;;  %v5347_v45 = vsel %vm1260_vm2, %v5344_v36, %v5346_v46  ;;  %v5350_v50 = vsel %vm1260_vm2, %v5348_v25, %v5349_v12 }
 0x3bc   : > { %v5438_v31 = vmax.f32 %v5246_v42, %v10287_v10  ;;  %v5352_v3 = vsel %vm1260_vm2, %v5349_v12, %v5351_v57  ;;  %v5577_v48 = vrot.slane %v10310_v61, 2  ;;  %v5579_v56 = vrot.slane %v5172_v47, 2 }
 0x3bd   : > { %v5439_v59 = vmax.f32 %v5247_v5, %v5342_v37  ;;  %v5573_v34 = vsel %vm2062_vm3, %v5571_v1, %v5572_v40  ;;  %v5575_v37 = vsel %vm2062_vm3, %v5572_v40, %v5574_v21 }
 0x3be   : > { %v5480_v30 = vmax.f32 %v5438_v31, %v5345_v52  ;;  %v5578_v19 = vsel %vm2062_vm3, %v5576_v29, %v5577_v48  ;;  %v5580_v6 = vsel %vm2062_vm3, %v5577_v48, %v5579_v56 }
 0x3bf   : > { %v5481_v54 = vmax.f32 %v5439_v59, %v5347_v45 }
 0x3c0   : > { %v5522_v10 = vmax.f32 %v5480_v30, %v5350_v50 }
 0x3c1   : > { %v5523_v53 = vmax.f32 %v5481_v54, %v5352_v3 }
 0x3c2   : > { %v5666_v43 = vmax.f32 %v5522_v10, %v5568_v11 }
 0x3c3   : > { %v5667_v49 = vmax.f32 %v5523_v53, %v5570_v17 }
 0x3c4   : > { %v5705_v8 = vmax.f32 %v5666_v43, %v5573_v34 }
 0x3c5   : > { %v5706_v2 = vmax.f32 %v5667_v49, %v5575_v37 }
 0x3c6   : > { %v5744_v24 = vmax.f32 %v5705_v8, %v5578_v19 }
 0x3c7   : > { %v5745_v38 = vmax.f32 %v5706_v2, %v5580_v6 }
 0x3c8   : > { %5776 = vst [vmem:[#allocation5 + $0x40] sm:$0xff] %v5744_v24 }
 0x3c9   : > { %5777 = vst [vmem:[#allocation5 + $0x48] sm:$0xff] %v5745_v38  ;;  %v7108_v18 = vpop.f32.mrb[44].mxu1 }
 0x3ca   : > { %v5008_v13 = vmul.f32 %v7108_v18, %v10160_v55  ;;  %v4908_v11 = vpop.f32.mrb[45].mxu1 }
 0x3cb   : > { %v5006_v60 = vmul.f32 %v10160_v55, %v4908_v11  ;;  %v7109_v39 = vpop.f32.mrb[46].mxu1 }
 0x3cc   : > { %v5047_v63 = vadd.f32 %v10172_v62, %v5008_v13  ;;  %v5009_v17 = vmul.f32 %v7109_v39, %v10160_v55  ;;  %v4911_v20 = vpop.f32.mrb[47].mxu1 }
 0x3cd   : > { %v5045_v26 = vadd.f32 %v10172_v62, %v5006_v60  ;;  %v5007_v51 = vmul.f32 %v10160_v55, %v4911_v20 }
 0x3ce   : > { %5134 = vst [vmem:[#allocation4 + $0xc1] sm:$0xff] %v5047_v63  ;;  %v5048_v32 = vadd.f32 %v10172_v62, %v5009_v17 }
 0x3cf   : > { %5132 = vst [vmem:[#allocation4 + $0xa9] sm:$0xff] %v5045_v26  ;;  %v5046_v0 = vadd.f32 %v10172_v62, %v5007_v51 }
 0x3d0   : > { %5135 = vst [vmem:[#allocation4 + $0xc9] sm:$0xff] %v5048_v32 }
 0x3d1   : > { %5133 = vst [vmem:[#allocation4 + $0xb1] sm:$0xff] %v5046_v0 }
 0x3d5   : > { %v10337_v27 = vld [vmem:[#allocation4 + $0xc0] sm:$0xff] }
 0x3d6   : > { %v5173_v23 = vld [vmem:[#allocation4 + $0xa8] sm:$0xff]  ;;  %v5358_v15 = vrot.slane %v10337_v27, 1 }
 0x3d7   : > { %v5218_v28 = vmax.f32 %v10308_v44, %v5173_v23  ;;  %v10339_v22 = vld [vmem:[#allocation4 + $0xc8] sm:$0xff]  ;;  %v5178_v7 = vld [vmem:[#allocation4 + $0xd0] sm:$0xff]  ;;  %v5353_v58 = vrot.slane %v5173_v23, 1  ;;  %v5581_v45 = vrot.slane %v5173_v23, 2 }
 0x3d8   : > { %v5174_v33 = vld [vmem:[#allocation4 + $0xb0] sm:$0xff]  ;;  %v5175_v9 = vld [vmem:[#allocation4 + $0xb8] sm:$0xff]  ;;  %v5359_v42 = vrot.slane %v10339_v22, 1  ;;  %v5361_v47 = vrot.slane %v5178_v7, 1  ;;  %v5587_v30 = vrot.slane %v10339_v22, 2  ;;  %v5589_v54 = vrot.slane %v5178_v7, 2 }
 0x3d9   : > { %v5250_v41 = vmax.f32 %v5218_v28, %v10337_v27  ;;  %v5219_v4 = vmax.f32 %v10310_v61, %v5174_v33  ;;  %v5354_v35 = vrot.slane %v5174_v33, 1  ;;  %v5356_v44 = vrot.slane %v5175_v9, 1 }
 0x3da   : > { %v5360_v36 = vsel %vm1260_vm2, %v5358_v15, %v5359_v42  ;;  %v5362_v61 = vsel %vm1260_vm2, %v5359_v42, %v5361_v47  ;;  %v5582_v25 = vrot.slane %v5174_v33, 2  ;;  %v5584_v59 = vrot.slane %v5175_v9, 2 }
 0x3db   : > { %v5442_v14 = vmax.f32 %v5250_v41, %v5350_v50  ;;  %v5251_v16 = vmax.f32 %v5219_v4, %v10339_v22  ;;  %v5355_v12 = vsel %vm1260_vm2, %v5353_v58, %v5354_v35  ;;  %v5357_v57 = vsel %vm1260_vm2, %v5354_v35, %v5356_v44 }
 0x3dc   : > { %v5583_v21 = vsel %vm2062_vm3, %v5581_v45, %v5582_v25  ;;  %v5585_v1 = vsel %vm2062_vm3, %v5582_v25, %v5584_v59  ;;  %v5590_v43 = vsel %vm2062_vm3, %v5587_v30, %v5589_v54 }
 0x3dd   : > { %v5443_v31 = vmax.f32 %v5251_v16, %v5352_v3  ;;  %v5484_v5 = vmax.f32 %v5442_v14, %v5355_v12  ;;  %v5586_v3 = vrot.slane %v10337_v27, 2 }
 0x3df   : > { %v5485_v46 = vmax.f32 %v5443_v31, %v5357_v57  ;;  %v5526_v52 = vmax.f32 %v5484_v5, %v5360_v36  ;;  %v5588_v53 = vsel %vm2062_vm3, %v5586_v3, %v5587_v30 }
 0x3e1   : > { %v5527_v50 = vmax.f32 %v5485_v46, %v5362_v61  ;;  %v5670_v40 = vmax.f32 %v5526_v52, %v5578_v19 }
 0x3e3   : > { %v5671_v10 = vmax.f32 %v5527_v50, %v5580_v6  ;;  %v5709_v48 = vmax.f32 %v5670_v40, %v5583_v21 }
 0x3e5   : > { %v5710_v56 = vmax.f32 %v5671_v10, %v5585_v1  ;;  %v5748_v29 = vmax.f32 %v5709_v48, %v5588_v53 }
 0x3e7   : > { %v5749_v34 = vmax.f32 %v5710_v56, %v5590_v43  ;;  %5780 = vst [vmem:[#allocation5 + $0x60] sm:$0xff] %v5748_v29 }
 0x3e9   : > { %5781 = vst [vmem:[#allocation5 + $0x68] sm:$0xff] %v5749_v34 }
 0x3ec   : > { %v7112_v49 = vpop.f32.mrb[48].mxu1 }
 0x3ed   : > { %v5012_v37 = vmul.f32 %v7112_v49, %v10160_v55  ;;  %v4924_v8 = vpop.f32.mrb[49].mxu1 }
 0x3ee   : > { %v5010_v19 = vmul.f32 %v10160_v55, %v4924_v8  ;;  %v7113_v2 = vpop.f32.mrb[50].mxu1 }
 0x3ef   : > { %v5051_v6 = vadd.f32 %v10172_v62, %v5012_v37  ;;  %v5013_v24 = vmul.f32 %v7113_v2, %v10160_v55  ;;  %v4927_v38 = vpop.f32.mrb[51].mxu1 }
 0x3f0   : > { %v5049_v18 = vadd.f32 %v10172_v62, %v5010_v19  ;;  %v5011_v13 = vmul.f32 %v10160_v55, %v4927_v38 }
 0x3f1   : > { %5138 = vst [vmem:[#allocation4 + $0xf1] sm:$0xff] %v5051_v6  ;;  %v5052_v11 = vadd.f32 %v10172_v62, %v5013_v24 }
 0x3f2   : > { %5136 = vst [vmem:[#allocation4 + $0xd9] sm:$0xff] %v5049_v18  ;;  %v5050_v60 = vadd.f32 %v10172_v62, %v5011_v13 }
 0x3f3   : > { %5139 = vst [vmem:[#allocation4 + $0xf9] sm:$0xff] %v5052_v11 }
 0x3f4   : > { %5137 = vst [vmem:[#allocation4 + $0xe1] sm:$0xff] %v5050_v60 }
 0x3f8   : > { %v10365_v17 = vld [vmem:[#allocation4 + $0xf0] sm:$0xff] }
 0x3f9   : > { %v5179_v39 = vld [vmem:[#allocation4 + $0xd8] sm:$0xff]  ;;  %v5368_v58 = vrot.slane %v10365_v17, 1 }
 0x3fa   : > { %v5222_v63 = vmax.f32 %v10337_v27, %v5179_v39  ;;  %v10367_v20 = vld [vmem:[#allocation4 + $0xf8] sm:$0xff]  ;;  %v5184_v32 = vld [vmem:[#allocation4 + $0x100] sm:$0xff]  ;;  %v5363_v28 = vrot.slane %v5179_v39, 1  ;;  %v5591_v57 = vrot.slane %v5179_v39, 2 }
 0x3fb   : > { %v5180_v26 = vld [vmem:[#allocation4 + $0xe0] sm:$0xff]  ;;  %v5181_v0 = vld [vmem:[#allocation4 + $0xe8] sm:$0xff]  ;;  %v5369_v41 = vrot.slane %v10367_v20, 1  ;;  %v5371_v7 = vrot.slane %v5184_v32, 1  ;;  %v5597_v5 = vrot.slane %v10367_v20, 2  ;;  %v5599_v46 = vrot.slane %v5184_v32, 2 }
 0x3fc   : > { %v5254_v51 = vmax.f32 %v5222_v63, %v10365_v17  ;;  %v5223_v23 = vmax.f32 %v10339_v22, %v5180_v26  ;;  %v5364_v4 = vrot.slane %v5180_v26, 1  ;;  %v5366_v27 = vrot.slane %v5181_v0, 1 }
 0x3fd   : > { %v5370_v35 = vsel %vm1260_vm2, %v5368_v58, %v5369_v41  ;;  %v5372_v22 = vsel %vm1260_vm2, %v5369_v41, %v5371_v7  ;;  %v5592_v15 = vrot.slane %v5180_v26, 2  ;;  %v5594_v31 = vrot.slane %v5181_v0, 2 }
 0x3fe   : > { %v5446_v33 = vmax.f32 %v5254_v51, %v5360_v36  ;;  %v5255_v9 = vmax.f32 %v5223_v23, %v10367_v20  ;;  %v5365_v42 = vsel %vm1260_vm2, %v5363_v28, %v5364_v4  ;;  %v5367_v47 = vsel %vm1260_vm2, %v5364_v4, %v5366_v27 }
 0x3ff   : > { %v5593_v59 = vsel %vm2062_vm3, %v5591_v57, %v5592_v15  ;;  %v5595_v45 = vsel %vm2062_vm3, %v5592_v15, %v5594_v31  ;;  %v5600_v40 = vsel %vm2062_vm3, %v5597_v5, %v5599_v46 }
 0x400   : > { %v5447_v14 = vmax.f32 %v5255_v9, %v5362_v61  ;;  %v5488_v16 = vmax.f32 %v5446_v33, %v5365_v42  ;;  %v5596_v61 = vrot.slane %v10365_v17, 2 }
 0x402   : > { %v5489_v44 = vmax.f32 %v5447_v14, %v5367_v47  ;;  %v5530_v12 = vmax.f32 %v5488_v16, %v5370_v35  ;;  %v5598_v50 = vsel %vm2062_vm3, %v5596_v61, %v5597_v5 }
 0x404   : > { %v5531_v36 = vmax.f32 %v5489_v44, %v5372_v22  ;;  %v5674_v25 = vmax.f32 %v5530_v12, %v5588_v53 }
 0x406   : > { %v5675_v52 = vmax.f32 %v5531_v36, %v5590_v43  ;;  %v5713_v30 = vmax.f32 %v5674_v25, %v5593_v59  ;;  %v10418_v59 = vld [vmem:[%s10736_s7] ss:$0 sm:$0xff] }
 0x408   : > { %v5714_v54 = vmax.f32 %v5675_v52, %v5595_v45  ;;  %v5752_v3 = vmax.f32 %v5713_v30, %v5598_v50 }
 0x40a   : > { %v5753_v21 = vmax.f32 %v5714_v54, %v5600_v40  ;;  %5784 = vst [vmem:[#allocation5 + $0x80] sm:$0xff] %v5752_v3  ;;  %v10425_v54 = vld [vmem:[%s10737_s8] ss:$0 sm:$0xff] }
 0x40c   : > { %5785 = vst [vmem:[#allocation5 + $0x88] sm:$0xff] %v5753_v21 }
 0x410   : > { %v7116_v10 = vpop.f32.mrb[52].mxu1 }
 0x411   : > { %v5016_v1 = vmul.f32 %v7116_v10, %v10160_v55  ;;  %v4940_v48 = vpop.f32.mrb[53].mxu1 }
 0x412   : > { %v5014_v53 = vmul.f32 %v10160_v55, %v4940_v48  ;;  %v7117_v56 = vpop.f32.mrb[54].mxu1 }
 0x413   : > { %v5055_v43 = vadd.f32 %v10172_v62, %v5016_v1  ;;  %v5017_v29 = vmul.f32 %v7117_v56, %v10160_v55  ;;  %v4943_v34 = vpop.f32.mrb[55].mxu1 }
 0x414   : > { %v5053_v49 = vadd.f32 %v10172_v62, %v5014_v53  ;;  %v5015_v37 = vmul.f32 %v10160_v55, %v4943_v34 }
 0x415   : > { %5142 = vst [vmem:[#allocation4 + $0x121] sm:$0xff] %v5055_v43  ;;  %v5056_v8 = vadd.f32 %v10172_v62, %v5017_v29 }
 0x416   : > { %5140 = vst [vmem:[#allocation4 + $0x109] sm:$0xff] %v5053_v49  ;;  %v5054_v19 = vadd.f32 %v10172_v62, %v5015_v37 }
 0x417   : > { %5143 = vst [vmem:[#allocation4 + $0x129] sm:$0xff] %v5056_v8 }
 0x418   : > { %5141 = vst [vmem:[#allocation4 + $0x111] sm:$0xff] %v5054_v19 }
 0x41c   : > { %v10393_v24 = vld [vmem:[#allocation4 + $0x120] sm:$0xff] }
 0x41d   : > { %v5185_v2 = vld [vmem:[#allocation4 + $0x108] sm:$0xff]  ;;  %v5378_v0 = vrot.slane %v10393_v24, 1 }
 0x41e   : > { %v5226_v6 = vmax.f32 %v10365_v17, %v5185_v2  ;;  %v10395_v38 = vld [vmem:[#allocation4 + $0x128] sm:$0xff]  ;;  %v5190_v11 = vld [vmem:[#allocation4 + $0x130] sm:$0xff]  ;;  %v5373_v39 = vrot.slane %v5185_v2, 1  ;;  %v5601_v14 = vrot.slane %v5185_v2, 2 }
 0x41f   : > { %v5186_v18 = vld [vmem:[#allocation4 + $0x110] sm:$0xff]  ;;  %v5187_v55 = vld [vmem:[#allocation4 + $0x118] sm:$0xff]  ;;  %v5379_v62 = vrot.slane %v10395_v38, 1  ;;  %v5381_v26 = vrot.slane %v5190_v11, 1  ;;  %v5607_v42 = vrot.slane %v10395_v38, 2  ;;  %v5609_v16 = vrot.slane %v5190_v11, 2 }
 0x420   : > { %v5258_v13 = vmax.f32 %v5226_v6, %v10393_v24  ;;  %v5227_v60 = vmax.f32 %v10367_v20, %v5186_v18  ;;  %v5374_v32 = vrot.slane %v5186_v18, 1  ;;  %v5376_v17 = vrot.slane %v5187_v55, 1 }
 0x421   : > { %v5380_v7 = vsel %vm1260_vm2, %v5378_v0, %v5379_v62  ;;  %v10406_v20 = vsel %vm1260_vm2, %v5379_v62, %v5381_v26  ;;  %v5602_v4 = vrot.slane %v5186_v18, 2  ;;  %v5604_v27 = vrot.slane %v5187_v55, 2 }
 0x422   : > { %v5450_v63 = vmax.f32 %v5258_v13, %v5370_v35  ;;  %v5259_v51 = vmax.f32 %v5227_v60, %v10395_v38  ;;  %v5375_v28 = vsel %vm1260_vm2, %v5373_v39, %v5374_v32  ;;  %v5377_v33 = vsel %vm1260_vm2, %v5374_v32, %v5376_v17 }
 0x423   : > { %v5603_v44 = vsel %vm2062_vm3, %v5601_v14, %v5602_v4  ;;  %v5605_v31 = vsel %vm2062_vm3, %v5602_v4, %v5604_v27  ;;  %v5610_v36 = vsel %vm2062_vm3, %v5607_v42, %v5609_v16 }
 0x424   : > { %v5451_v23 = vmax.f32 %v5259_v51, %v5372_v22  ;;  %v5492_v41 = vmax.f32 %v5450_v63, %v5375_v28  ;;  %v5606_v22 = vrot.slane %v10393_v24, 2 }
 0x426   : > { %v5493_v9 = vmax.f32 %v5451_v23, %v5377_v33  ;;  %v5534_v58 = vmax.f32 %v5492_v41, %v5380_v7  ;;  %v5608_v57 = vsel %vm2062_vm3, %v5606_v22, %v5607_v42 }
 0x428   : > { %v5535_v47 = vmax.f32 %v5493_v9, %v10406_v20  ;;  %v5678_v35 = vmax.f32 %v5534_v58, %v5598_v50 }
 0x42a   : > { %v5679_v15 = vmax.f32 %v5535_v47, %v5600_v40  ;;  %v5717_v12 = vmax.f32 %v5678_v35, %v5603_v44 }
 0x42c   : > { %v5718_v5 = vmax.f32 %v5679_v15, %v5605_v31  ;;  %v5756_v46 = vmax.f32 %v5717_v12, %v5608_v57 }
 0x42e   : > { %v5757_v25 = vmax.f32 %v5718_v5, %v5610_v36  ;;  %5788 = vst [vmem:[#allocation5 + $0xa0] sm:$0xff] %v5756_v46 }
 0x430   : > { %5789 = vst [vmem:[#allocation5 + $0xa8] sm:$0xff] %v5757_v25 }
 0x433   : > { %v7120_v61 = vpop.f32.mrb[56].mxu1 }
 0x434   : > { %v5020_v52 = vmul.f32 %v10418_v59, %v7120_v61  ;;  %v4956_v45 = vpop.f32.mrb[57].mxu1 }
 0x435   : > { %v5018_v30 = vmul.f32 %v10418_v59, %v4956_v45  ;;  %v7121_v50 = vpop.f32.mrb[58].mxu1 }
 0x436   : > { %v5059_v40 = vadd.f32 %v10425_v54, %v5020_v52  ;;  %v5021_v3 = vmul.f32 %v10418_v59, %v7121_v50  ;;  %v4959_v21 = vpop.f32.mrb[59].mxu1  ;;  %v10478_v50 = vld [vmem:[%s10739_s10] ss:$0 sm:$0xff] }
 0x437   : > { %v5057_v10 = vadd.f32 %v10425_v54, %v5018_v30  ;;  %v5019_v1 = vmul.f32 %v10418_v59, %v4959_v21 }
 0x438   : > { %5146 = vst [vmem:[#allocation4 + $0x151] sm:$0xff] %v5059_v40  ;;  %v5060_v48 = vadd.f32 %v10425_v54, %v5021_v3 }
 0x439   : > { %5144 = vst [vmem:[#allocation4 + $0x139] sm:$0xff] %v5057_v10  ;;  %v5058_v53 = vadd.f32 %v10425_v54, %v5019_v1 }
 0x43a   : > { %5147 = vst [vmem:[#allocation4 + $0x159] sm:$0xff] %v5060_v48 }
 0x43b   : > { %5145 = vst [vmem:[#allocation4 + $0x141] sm:$0xff] %v5058_v53 }
 0x43f   : > { %v10434_v29 = vld [vmem:[#allocation4 + $0x150] sm:$0xff] }
 0x440   : > { %v5191_v56 = vld [vmem:[#allocation4 + $0x138] sm:$0xff]  ;;  %v5388_v39 = vrot.slane %v10434_v29, 1  ;;  %v5616_v4 = vrot.slane %v10434_v29, 2 }
 0x441   : > { %v5230_v43 = vmax.f32 %v10393_v24, %v5191_v56  ;;  %v10436_v34 = vld [vmem:[#allocation4 + $0x158] sm:$0xff]  ;;  %v5196_v8 = vld [vmem:[#allocation4 + $0x160] sm:$0xff]  ;;  %v5383_v6 = vrot.slane %v5191_v56, 1  ;;  %v5611_v33 = vrot.slane %v5191_v56, 2 }
 0x442   : > { %v5192_v49 = vld [vmem:[#allocation4 + $0x140] sm:$0xff]  ;;  %v5193_v19 = vld [vmem:[#allocation4 + $0x148] sm:$0xff]  ;;  %v5389_v13 = vrot.slane %v10436_v34, 1  ;;  %v5391_v11 = vrot.slane %v5196_v8, 1  ;;  %v5617_v41 = vrot.slane %v10436_v34, 2 }
 0x443   : > { %v5262_v37 = vmax.f32 %v5230_v43, %v10434_v29  ;;  %v5231_v2 = vmax.f32 %v10395_v38, %v5192_v49  ;;  %v5384_v60 = vrot.slane %v5192_v49, 1  ;;  %v5386_v24 = vrot.slane %v5193_v19, 1 }
 0x444   : > { %v10447_v38 = vsel %vm1260_vm2, %v5388_v39, %v5389_v13  ;;  %v10450_v32 = vsel %vm1260_vm2, %v5389_v13, %v5391_v11  ;;  %v5612_v0 = vrot.slane %v5192_v49, 2  ;;  %v5614_v23 = vrot.slane %v5193_v19, 2 }
 0x445   : > { %v5454_v18 = vmax.f32 %v5262_v37, %v5380_v7  ;;  %v5263_v55 = vmax.f32 %v5231_v2, %v10436_v34  ;;  %v5385_v62 = vsel %vm1260_vm2, %v5383_v6, %v5384_v60  ;;  %v5387_v26 = vsel %vm1260_vm2, %v5384_v60, %v5386_v24 }
 0x446   : > { %v5613_v27 = vsel %vm2062_vm3, %v5611_v33, %v5612_v0  ;;  %v5615_v14 = vsel %vm2062_vm3, %v5612_v0, %v5614_v23  ;;  %v10459_v47 = vsel %vm2062_vm3, %v5616_v4, %v5617_v41 }
 0x447   : > { %v5455_v63 = vmax.f32 %v5263_v55, %v10406_v20  ;;  %v5496_v51 = vmax.f32 %v5454_v18, %v5385_v62  ;;  %v5619_v20 = vrot.slane %v5196_v8, 2 }
 0x449   : > { %v5497_v17 = vmax.f32 %v5455_v63, %v5387_v26  ;;  %v5538_v28 = vmax.f32 %v5496_v51, %v10447_v38  ;;  %v10462_v35 = vsel %vm2062_vm3, %v5617_v41, %v5619_v20 }
 0x44b   : > { %v5539_v7 = vmax.f32 %v5497_v17, %v10450_v32  ;;  %v5682_v9 = vmax.f32 %v5538_v28, %v5608_v57 }
 0x44d   : > { %v5683_v58 = vmax.f32 %v5539_v7, %v5610_v36  ;;  %v5721_v42 = vmax.f32 %v5682_v9, %v5613_v27 }
 0x44f   : > { %v5722_v16 = vmax.f32 %v5683_v58, %v5615_v14  ;;  %v5760_v22 = vmax.f32 %v5721_v42, %v10459_v47 }
 0x451   : > { %v5761_v44 = vmax.f32 %v5722_v16, %v10462_v35  ;;  %5792 = vst [vmem:[#allocation5 + $0xc0] sm:$0xff] %v5760_v22 }
 0x453   : > { %5793 = vst [vmem:[#allocation5 + $0xc8] sm:$0xff] %v5761_v44 }
 0x454   : > { %v7124_v15 = vpop.f32.mrb[60].mxu1 }
 0x455   : > { %v5024_v31 = vmul.f32 %v10418_v59, %v7124_v15  ;;  %v4972_v12 = vpop.f32.mrb[61].mxu1 }
 0x456   : > { %v5022_v57 = vmul.f32 %v10418_v59, %v4972_v12  ;;  %v7125_v5 = vpop.f32.mrb[62].mxu1 }
 0x457   : > { %v5063_v36 = vadd.f32 %v10425_v54, %v5024_v31  ;;  %v5025_v46 = vmul.f32 %v10418_v59, %v7125_v5  ;;  %v4975_v25 = vpop.f32.mrb[63].mxu1 }
 0x458   : > { %v5061_v61 = vadd.f32 %v10425_v54, %v5022_v57  ;;  %v5023_v52 = vmul.f32 %v10418_v59, %v4975_v25  ;;  %v10485_v59 = vld [vmem:[%s10740_s11] ss:$0 sm:$0xff]  ;;  %v6005_v25 = vld [vmem:[#allocation5 + $0x42] sm:$0x1] }
 0x459   : > { %5150 = vst [vmem:[#allocation4 + $0x181] sm:$0xff] %v5063_v36  ;;  %v5064_v45 = vadd.f32 %v10425_v54, %v5025_v46  ;;  %v6001_v36 = vld [vmem:[#allocation5 + $0x40] sm:$0x1] }
 0x45a   : > { %5148 = vst [vmem:[#allocation4 + $0x169] sm:$0xff] %v5061_v61  ;;  %v5062_v30 = vadd.f32 %v10425_v54, %v5023_v52 }
 0x45b   : > { %5151 = vst [vmem:[#allocation4 + $0x189] sm:$0xff] %v5064_v45 }
 0x45c   : > { %5149 = vst [vmem:[#allocation4 + $0x171] sm:$0xff] %v5062_v30  ;;  %v7130_v40 = vpop.f32.mrb[64].mxu1 }
 0x45d   : > { %v5903_v3 = vmul.f32 %v7130_v40, %v10478_v50  ;;  %v5863_v21 = vpop.f32.mrb[65].mxu1  ;;  %v6009_v40 = vld [vmem:[#allocation5 + $0x44] sm:$0x1] }
 0x45e   : > { %v5901_v54 = vmul.f32 %v10478_v50, %v5863_v21  ;;  %v7131_v10 = vpop.f32.mrb[66].mxu1 }
 0x45f   : > { %v5918_v1 = vadd.f32 %v10485_v59, %v5903_v3  ;;  %v5904_v48 = vmul.f32 %v7131_v10, %v10478_v50  ;;  %v5866_v53 = vpop.f32.mrb[67].mxu1  ;;  %v6013_v3 = vld [vmem:[#allocation5 + $0x46] sm:$0x1]  ;;  %v6017_v10 = vld [vmem:[#allocation5 + $0x48] sm:$0x1] }
 0x460   : > { %v5200_v56 = vld [vmem:[#allocation4 + $0x180] sm:$0xff]  ;;  %v5916_v43 = vadd.f32 %v10485_v59, %v5901_v54  ;;  %v5902_v2 = vmul.f32 %v10478_v50, %v5866_v53 }
 0x461   : > { %v5465_v49 = vrot.slane %v5200_v56, 1  ;;  %v5690_v37 = vrot.slane %v5200_v56, 2  ;;  %v5197_v8 = vld [vmem:[#allocation4 + $0x168] sm:$0xff]  ;;  %5926 = vst [vmem:[%s10492_s28 + $0x10] sm:$0xff] %v5918_v1  ;;  %v5919_v19 = vadd.f32 %v10485_v59, %v5904_v48  ;;  %v6021_v48 = vld [vmem:[#allocation5 + $0x4a] sm:$0x1] }
 0x462   : > { %v5234_v6 = vmax.f32 %v10434_v29, %v5197_v8  ;;  %v5393_v18 = vrot.slane %v5197_v8, 1  ;;  %v5201_v13 = vld [vmem:[#allocation4 + $0x188] sm:$0xff]  ;;  %v5202_v11 = vld [vmem:[#allocation4 + $0x190] sm:$0xff]  ;;  %5924 = vst [vmem:[%s10492_s28] sm:$0xff] %v5916_v43  ;;  %v5621_v55 = vrot.slane %v5197_v8, 2  ;;  %v5917_v42 = vadd.f32 %v10485_v59, %v5902_v2 }
 0x463   : > { %v5466_v60 = vrot.slane %v5201_v13, 1  ;;  %v5468_v24 = vrot.slane %v5202_v11, 1  ;;  %v5691_v39 = vrot.slane %v5201_v13, 2  ;;  %v5198_v63 = vld [vmem:[#allocation4 + $0x170] sm:$0xff]  ;;  %5927 = vst [vmem:[%s10492_s28 + $0x18] sm:$0xff] %v5919_v19  ;;  %v5693_v26 = vrot.slane %v5202_v11, 2 }
 0x464   : > { %v5266_v62 = vmax.f32 %v5234_v6, %v5200_v56  ;;  %v5199_v51 = vld [vmem:[#allocation4 + $0x178] sm:$0xff]  ;;  %v10500_v17 = vpop.f32.mrb[68].mxu1  ;;  %v5235_v28 = vmax.f32 %v10436_v34, %v5198_v63  ;;  %v5394_v4 = vrot.slane %v5198_v63, 1  ;;  %v5622_v14 = vrot.slane %v5198_v63, 2  ;;  %5925 = vst [vmem:[%s10492_s28 + $0x8] sm:$0xff] %v5917_v42 }
 0x465   : > { %v5467_v0 = vsel %vm1260_vm2, %v5465_v49, %v5466_v60  ;;  %v5469_v23 = vsel %vm1260_vm2, %v5466_v60, %v5468_v24  ;;  %v10505_v29 = vsel %vm2062_vm3, %v5690_v37, %v5691_v39  ;;  %v10508_v33 = vpop.f32.mrb[69].mxu1  ;;  %v10512_v7 = vsel %vm2062_vm3, %v5691_v39, %v5693_v26  ;;  %v6025_v37 = vld [vmem:[#allocation5 + $0x4c] sm:$0x1]  ;;  %v6029_v6 = vld [vmem:[#allocation5 + $0x4e] sm:$0x1] }
 0x466   : > { %v5458_v41 = vmax.f32 %v5266_v62, %v10447_v38  ;;  %v10514_v20 = vpop.f32.mrb[70].mxu1  ;;  %v5267_v9 = vmax.f32 %v5235_v28, %v5201_v13  ;;  %v5396_v27 = vrot.slane %v5199_v51, 1  ;;  %v5624_v34 = vrot.slane %v5199_v51, 2  ;;  %v5937_v39 = vld [vmem:[#allocation5 + $0x2] sm:$0x1] }
 0x467   : > { %v10516_v58 = vpop.f32.mrb[71].mxu1  ;;  %v5395_v16 = vsel %vm1260_vm2, %v5393_v18, %v5394_v4  ;;  %v5623_v57 = vsel %vm2062_vm3, %v5621_v55, %v5622_v14  ;;  %v5933_v18 = vld [vmem:[#allocation5] sm:$0x1]  ;;  %v5941_v63 = vld [vmem:[#allocation5 + $0x4] sm:$0x1] }
 0x468   : > { %v5397_v38 = vsel %vm1260_vm2, %v5394_v4, %v5396_v27  ;;  %v5459_v22 = vmax.f32 %v5267_v9, %v10450_v32  ;;  %v5500_v44 = vmax.f32 %v5458_v41, %v5395_v16  ;;  %v6486_v15 = vld [vmem:[%s10492_s28 + $0x10] sm:$0x1]  ;;  %v6488_v31 = vld [vmem:[%s10492_s28 + $0x11] sm:$0x1]  ;;  %v5625_v5 = vsel %vm2062_vm3, %v5622_v14, %v5624_v34  ;;  %v6490_v61 = vld [vmem:[%s10492_s28 + $0x12] sm:$0x1] }
 0x469   : > { %v6492_v52 = vld [vmem:[%s10492_s28 + $0x13] sm:$0x1]  ;;  %v6002_v45 = vadd.f32 %v6486_v15, %v6001_v36  ;;  %v6006_v30 = vadd.f32 %v6488_v31, %v6005_v25  ;;  %v6494_v54 = vld [vmem:[%s10492_s28 + $0x14] sm:$0x1]  ;;  %v6496_v1 = vld [vmem:[%s10492_s28 + $0x15] sm:$0x1]  ;;  %v6010_v43 = vadd.f32 %v6490_v61, %v6009_v40 }
 0x46a   : > { %v5501_v12 = vmax.f32 %v5459_v22, %v5397_v38  ;;  %v5542_v46 = vmax.f32 %v5500_v44, %v5467_v0  ;;  %v6498_v53 = vld [vmem:[%s10492_s28 + $0x16] sm:$0x1]  ;;  %v6014_v49 = vadd.f32 %v6492_v52, %v6013_v3  ;;  %v6500_v8 = vld [vmem:[%s10492_s28 + $0x17] sm:$0x1]  ;;  %v5936_v19 = vld [vmem:[%s10492_s28 + $0x1] sm:$0x1]  ;;  %v6018_v60 = vadd.f32 %v6494_v54, %v6017_v10 }
 0x46b   : > { %6487 = vst [vmem:[%s10492_s28 + $0x10] sm:$0x1] %v6002_v45  ;;  %6489 = vst [vmem:[%s10492_s28 + $0x11] sm:$0x1] %v6006_v30  ;;  %v5940_v13 = vld [vmem:[%s10492_s28 + $0x2] sm:$0x1]  ;;  %v6022_v24 = vadd.f32 %v6496_v1, %v6021_v48  ;;  %v6030_v16 = vadd.f32 %v6500_v8, %v6029_v6 }
 0x46c   : > { %v5543_v32 = vmax.f32 %v5501_v12, %v5469_v23  ;;  %v5686_v21 = vmax.f32 %v5542_v46, %v10459_v47  ;;  %v5932_v47 = vld [vmem:[%s10492_s28] sm:$0x1]  ;;  %v5944_v11 = vld [vmem:[%s10492_s28 + $0x3] sm:$0x1]  ;;  %v5948_v55 = vld [vmem:[%s10492_s28 + $0x4] sm:$0x1]  ;;  %v6026_v23 = vadd.f32 %v6498_v53, %v6025_v37 }
 0x46d   : > { %6491 = vst [vmem:[%s10492_s28 + $0x12] sm:$0x1] %v6010_v43  ;;  %6493 = vst [vmem:[%s10492_s28 + $0x13] sm:$0x1] %v6014_v49  ;;  %v5952_v62 = vld [vmem:[%s10492_s28 + $0x5] sm:$0x1]  ;;  %v5934_v38 = vadd.f32 %v5933_v18, %v5932_v47 }
 0x46e   : > { %v5687_v56 = vmax.f32 %v5543_v32, %v10462_v35  ;;  %v5725_v2 = vmax.f32 %v5686_v21, %v5623_v57  ;;  %v5956_v26 = vld [vmem:[%s10492_s28 + $0x6] sm:$0x1]  ;;  %v5960_v51 = vld [vmem:[%s10492_s28 + $0x7] sm:$0x1]  ;;  %v5949_v41 = vld [vmem:[#allocation5 + $0x8] sm:$0x1] }
 0x46f   : > { %v5945_v28 = vld [vmem:[#allocation5 + $0x6] sm:$0x1]  ;;  %v5953_v9 = vld [vmem:[#allocation5 + $0xa] sm:$0x1]  ;;  %v5957_v4 = vld [vmem:[#allocation5 + $0xc] sm:$0x1]  ;;  %v5950_v40 = vadd.f32 %v5949_v41, %v5948_v55 }
 0x470   : > { %v5726_v35 = vmax.f32 %v5687_v56, %v5625_v5  ;;  %v5764_v0 = vmax.f32 %v5725_v2, %v10505_v29  ;;  %v6502_v27 = vld [vmem:[%s10492_s28 + $0x18] sm:$0x1]  ;;  %v6504_v14 = vld [vmem:[%s10492_s28 + $0x19] sm:$0x1]  ;;  %v6506_v34 = vld [vmem:[%s10492_s28 + $0x1a] sm:$0x1]  ;;  %v5938_v5 = vadd.f32 %v5937_v39, %v5936_v19  ;;  %v5946_v30 = vadd.f32 %v5945_v28, %v5944_v11 }
 0x471   : > { %6495 = vst [vmem:[%s10492_s28 + $0x14] sm:$0x1] %v6018_v60  ;;  %6497 = vst [vmem:[%s10492_s28 + $0x15] sm:$0x1] %v6022_v24  ;;  %v5961_v29 = vld [vmem:[#allocation5 + $0xe] sm:$0x1]  ;;  %v5954_v3 = vadd.f32 %v5953_v9, %v5952_v62  ;;  %v5958_v21 = vadd.f32 %v5957_v4, %v5956_v26 }
 0x472   : > { %v5765_v42 = vmax.f32 %v5726_v35, %v10512_v7  ;;  %v6035_v22 = vld [vmem:[#allocation5 + $0x60] sm:$0x1]  ;;  %v6039_v44 = vld [vmem:[#allocation5 + $0x62] sm:$0x1]  ;;  %v6043_v15 = vld [vmem:[#allocation5 + $0x64] sm:$0x1]  ;;  %v5942_v7 = vadd.f32 %v5941_v63, %v5940_v13  ;;  %v5962_v43 = vadd.f32 %v5961_v29, %v5960_v51 }
 0x473   : > { %v6508_v31 = vld [vmem:[%s10492_s28 + $0x1b] sm:$0x1]  ;;  %v6510_v12 = vld [vmem:[%s10492_s28 + $0x1c] sm:$0x1]  ;;  %v6512_v57 = vld [vmem:[%s10492_s28 + $0x1d] sm:$0x1]  ;;  %v6036_v49 = vadd.f32 %v6502_v27, %v6035_v22  ;;  %v6040_v37 = vadd.f32 %v6504_v14, %v6039_v44  ;;  %v6044_v8 = vadd.f32 %v6506_v34, %v6043_v15  ;;  %v5907_v14 = vmul.f32 %v10500_v17, %v10478_v50 }
 0x474   : > { %5796 = vst [vmem:[#allocation5 + $0xe0] sm:$0xff] %v5764_v0  ;;  %6499 = vst [vmem:[%s10492_s28 + $0x16] sm:$0x1] %v6026_v23  ;;  %v6047_v36 = vld [vmem:[#allocation5 + $0x66] sm:$0x1]  ;;  %v5905_v34 = vmul.f32 %v10478_v50, %v10508_v33 }
 0x475   : > { %v6051_v46 = vld [vmem:[#allocation5 + $0x68] sm:$0x1]  ;;  %v6055_v25 = vld [vmem:[#allocation5 + $0x6a] sm:$0x1]  ;;  %v6514_v61 = vld [vmem:[%s10492_s28 + $0x1e] sm:$0x1]  ;;  %v6048_v6 = vadd.f32 %v6508_v31, %v6047_v36 }
 0x476   : > { %v6059_v52 = vld [vmem:[#allocation5 + $0x6c] sm:$0x1]  ;;  %v6516_v32 = vld [vmem:[%s10492_s28 + $0x1f] sm:$0x1]  ;;  %v6470_v45 = vld [vmem:[%s10492_s28 + $0x8] sm:$0x1]  ;;  %v6052_v18 = vadd.f32 %v6510_v12, %v6051_v46  ;;  %v6056_v13 = vadd.f32 %v6512_v57, %v6055_v25  ;;  %v5920_v17 = vadd.f32 %v10485_v59, %v5905_v34 }
 0x477   : > { %5797 = vst [vmem:[#allocation5 + $0xe8] sm:$0xff] %v5765_v42  ;;  %6501 = vst [vmem:[%s10492_s28 + $0x17] sm:$0x1] %v6030_v16  ;;  %v5967_v54 = vld [vmem:[#allocation5 + $0x20] sm:$0x1]  ;;  %v6060_v11 = vadd.f32 %v6514_v61, %v6059_v52  ;;  %v5908_v42 = vmul.f32 %v10514_v20, %v10478_v50  ;;  %v5906_v16 = vmul.f32 %v10478_v50, %v10516_v58 }
 0x478   : > { %5935 = vst [vmem:[%s10492_s28] sm:$0x1] %v5934_v38  ;;  %v6472_v10 = vld [vmem:[%s10492_s28 + $0x9] sm:$0x1]  ;;  %v5971_v1 = vld [vmem:[#allocation5 + $0x22] sm:$0x1]  ;;  %v5968_v39 = vadd.f32 %v6470_v45, %v5967_v54  ;;  %v5922_v38 = vadd.f32 %v10485_v59, %v5907_v14  ;;  %5928 = vst [vmem:[%s10492_s28 + $0x20] sm:$0xff] %v5920_v17 }
 0x479   : > { %v6474_v48 = vld [vmem:[%s10492_s28 + $0xa] sm:$0x1]  ;;  %v5975_v53 = vld [vmem:[#allocation5 + $0x24] sm:$0x1]  ;;  %v6476_v56 = vld [vmem:[%s10492_s28 + $0xb] sm:$0x1]  ;;  %v5972_v63 = vadd.f32 %v6472_v10, %v5971_v1  ;;  %v5923_v29 = vadd.f32 %v10485_v59, %v5908_v42  ;;  %v5921_v33 = vadd.f32 %v10485_v59, %v5906_v16 }
 0x47a   : > { %5939 = vst [vmem:[%s10492_s28 + $0x1] sm:$0x1] %v5938_v5  ;;  %5943 = vst [vmem:[%s10492_s28 + $0x2] sm:$0x1] %v5942_v7  ;;  %v6478_v47 = vld [vmem:[%s10492_s28 + $0xc] sm:$0x1]  ;;  %v5976_v62 = vadd.f32 %v6474_v48, %v5975_v53 }
 0x47b   : > { %v6480_v19 = vld [vmem:[%s10492_s28 + $0xd] sm:$0x1]  ;;  %v6482_v2 = vld [vmem:[%s10492_s28 + $0xe] sm:$0x1]  ;;  %5947 = vst [vmem:[%s10492_s28 + $0x3] sm:$0x1] %v5946_v30 }
 0x47c   : > { %5951 = vst [vmem:[%s10492_s28 + $0x4] sm:$0x1] %v5950_v40  ;;  %5955 = vst [vmem:[%s10492_s28 + $0x5] sm:$0x1] %v5954_v3  ;;  %v6063_v55 = vld [vmem:[#allocation5 + $0x6e] sm:$0x1] }
 0x47d   : > { %5959 = vst [vmem:[%s10492_s28 + $0x6] sm:$0x1] %v5958_v21  ;;  %v5979_v35 = vld [vmem:[#allocation5 + $0x26] sm:$0x1]  ;;  %v6484_v60 = vld [vmem:[%s10492_s28 + $0xf] sm:$0x1]  ;;  %v6064_v24 = vadd.f32 %v6516_v32, %v6063_v55 }
 0x47e   : > { %5963 = vst [vmem:[%s10492_s28 + $0x7] sm:$0x1] %v5962_v43  ;;  %6503 = vst [vmem:[%s10492_s28 + $0x18] sm:$0x1] %v6036_v49  ;;  %v5983_v26 = vld [vmem:[#allocation5 + $0x28] sm:$0x1]  ;;  %v5980_v23 = vadd.f32 %v6476_v56, %v5979_v35 }
 0x47f   : > { %6505 = vst [vmem:[%s10492_s28 + $0x19] sm:$0x1] %v6040_v37  ;;  %6507 = vst [vmem:[%s10492_s28 + $0x1a] sm:$0x1] %v6044_v8  ;;  %v5987_v51 = vld [vmem:[#allocation5 + $0x2a] sm:$0x1]  ;;  %v5984_v28 = vadd.f32 %v6478_v47, %v5983_v26 }
 0x480   : > { %v5991_v0 = vld [vmem:[#allocation5 + $0x2c] sm:$0x1]  ;;  %6509 = vst [vmem:[%s10492_s28 + $0x1b] sm:$0x1] %v6048_v6  ;;  %6511 = vst [vmem:[%s10492_s28 + $0x1c] sm:$0x1] %v6052_v18  ;;  %v5988_v41 = vadd.f32 %v6480_v19, %v5987_v51 }
 0x481   : > { %6513 = vst [vmem:[%s10492_s28 + $0x1d] sm:$0x1] %v6056_v13  ;;  %6515 = vst [vmem:[%s10492_s28 + $0x1e] sm:$0x1] %v6060_v11  ;;  %v5992_v9 = vadd.f32 %v6482_v2, %v5991_v0  ;;  %v5995_v4 = vld [vmem:[#allocation5 + $0x2e] sm:$0x1] }
 0x482   : > { %6517 = vst [vmem:[%s10492_s28 + $0x1f] sm:$0x1] %v6064_v24  ;;  %6471 = vst [vmem:[%s10492_s28 + $0x8] sm:$0x1] %v5968_v39  ;;  %v5996_v27 = vadd.f32 %v6484_v60, %v5995_v4  ;;  %v6137_v20 = vld [vmem:[#allocation5 + $0xc0] sm:$0x1] }
 0x483   : > { %6473 = vst [vmem:[%s10492_s28 + $0x9] sm:$0x1] %v5972_v63  ;;  %6475 = vst [vmem:[%s10492_s28 + $0xa] sm:$0x1] %v5976_v62  ;;  %v6141_v22 = vld [vmem:[#allocation5 + $0xc2] sm:$0x1] }
 0x484   : > { %6477 = vst [vmem:[%s10492_s28 + $0xb] sm:$0x1] %v5980_v23  ;;  %6479 = vst [vmem:[%s10492_s28 + $0xc] sm:$0x1] %v5984_v28  ;;  %v6145_v50 = vld [vmem:[#allocation5 + $0xc4] sm:$0x1] }
 0x485   : > { %6481 = vst [vmem:[%s10492_s28 + $0xd] sm:$0x1] %v5988_v41  ;;  %6483 = vst [vmem:[%s10492_s28 + $0xe] sm:$0x1] %v5992_v9  ;;  %v6149_v58 = vld [vmem:[#allocation5 + $0xc6] sm:$0x1] }
 0x486   : > { %6485 = vst [vmem:[%s10492_s28 + $0xf] sm:$0x1] %v5996_v27  ;;  %5930 = vst [vmem:[%s10492_s28 + $0x30] sm:$0xff] %v5922_v38  ;;  %v6153_v44 = vld [vmem:[#allocation5 + $0xc8] sm:$0x1] }
 0x487   : > { %5931 = vst [vmem:[%s10492_s28 + $0x38] sm:$0xff] %v5923_v29  ;;  %5929 = vst [vmem:[%s10492_s28 + $0x28] sm:$0xff] %v5921_v33  ;;  %v6157_v15 = vld [vmem:[#allocation5 + $0xca] sm:$0x1]  ;;  %v6161_v31 = vld [vmem:[#allocation5 + $0xcc] sm:$0x1] }
 0x488   : > { %v6165_v12 = vld [vmem:[#allocation5 + $0xce] sm:$0x1]  ;;  %v6069_v7 = vld [vmem:[#allocation5 + $0x80] sm:$0x1]  ;;  %v6073_v45 = vld [vmem:[#allocation5 + $0x82] sm:$0x1] }
 0x489   : > { %v6077_v30 = vld [vmem:[#allocation5 + $0x84] sm:$0x1]  ;;  %v6081_v40 = vld [vmem:[#allocation5 + $0x86] sm:$0x1]  ;;  %v6171_v3 = vld [vmem:[#allocation5 + $0xe0] sm:$0x1] }
 0x48a   : > { %v6175_v21 = vld [vmem:[#allocation5 + $0xe2] sm:$0x1]  ;;  %v6518_v56 = vld [vmem:[%s10492_s28 + $0x20] sm:$0x1]  ;;  %v6085_v43 = vld [vmem:[#allocation5 + $0x88] sm:$0x1] }
 0x48b   : > { %v6089_v49 = vld [vmem:[#allocation5 + $0x8a] sm:$0x1]  ;;  %v6093_v37 = vld [vmem:[#allocation5 + $0x8c] sm:$0x1]  ;;  %v6179_v8 = vld [vmem:[#allocation5 + $0xe4] sm:$0x1]  ;;  %v6070_v18 = vadd.f32 %v6518_v56, %v6069_v7 }
 0x48c   : > { %v6183_v47 = vld [vmem:[#allocation5 + $0xe6] sm:$0x1]  ;;  %v6187_v19 = vld [vmem:[#allocation5 + $0xe8] sm:$0x1]  ;;  %v6520_v13 = vld [vmem:[%s10492_s28 + $0x21] sm:$0x1] }
 0x48d   : > { %v6550_v59 = vld [vmem:[%s10492_s28 + $0x30] sm:$0x1]  ;;  %v6552_v57 = vld [vmem:[%s10492_s28 + $0x31] sm:$0x1]  ;;  %v6554_v5 = vld [vmem:[%s10492_s28 + $0x32] sm:$0x1]  ;;  %v6074_v63 = vadd.f32 %v6520_v13, %v6073_v45 }
 0x48e   : > { %v6138_v36 = vadd.f32 %v6550_v59, %v6137_v20  ;;  %v6142_v46 = vadd.f32 %v6552_v57, %v6141_v22  ;;  %v6146_v25 = vadd.f32 %v6554_v5, %v6145_v50  ;;  %v6556_v61 = vld [vmem:[%s10492_s28 + $0x33] sm:$0x1]  ;;  %v6558_v52 = vld [vmem:[%s10492_s28 + $0x34] sm:$0x1]  ;;  %v6560_v32 = vld [vmem:[%s10492_s28 + $0x35] sm:$0x1] }
 0x48f   : > { %v6150_v54 = vadd.f32 %v6556_v61, %v6149_v58  ;;  %v6154_v10 = vadd.f32 %v6558_v52, %v6153_v44  ;;  %v6158_v1 = vadd.f32 %v6560_v32, %v6157_v15  ;;  %v6562_v48 = vld [vmem:[%s10492_s28 + $0x36] sm:$0x1]  ;;  %v6564_v53 = vld [vmem:[%s10492_s28 + $0x37] sm:$0x1]  ;;  %v6522_v11 = vld [vmem:[%s10492_s28 + $0x22] sm:$0x1] }
 0x490   : > { %6551 = vst [vmem:[%s10492_s28 + $0x30] sm:$0x1] %v6138_v36  ;;  %6553 = vst [vmem:[%s10492_s28 + $0x31] sm:$0x1] %v6142_v46  ;;  %v6162_v2 = vadd.f32 %v6562_v48, %v6161_v31  ;;  %v6166_v6 = vadd.f32 %v6564_v53, %v6165_v12  ;;  %v6524_v55 = vld [vmem:[%s10492_s28 + $0x23] sm:$0x1]  ;;  %v6078_v62 = vadd.f32 %v6522_v11, %v6077_v30 }
 0x491   : > { %6555 = vst [vmem:[%s10492_s28 + $0x32] sm:$0x1] %v6146_v25  ;;  %v6097_v35 = vld [vmem:[#allocation5 + $0x8e] sm:$0x1]  ;;  %v6191_v60 = vld [vmem:[#allocation5 + $0xea] sm:$0x1]  ;;  %v6082_v26 = vadd.f32 %v6524_v55, %v6081_v40 }
 0x492   : > { %v6195_v24 = vld [vmem:[#allocation5 + $0xec] sm:$0x1]  ;;  %v6199_v39 = vld [vmem:[#allocation5 + $0xee] sm:$0x1]  ;;  %6557 = vst [vmem:[%s10492_s28 + $0x33] sm:$0x1] %v6150_v54 }
 0x493   : > { %6559 = vst [vmem:[%s10492_s28 + $0x34] sm:$0x1] %v6154_v10  ;;  %6561 = vst [vmem:[%s10492_s28 + $0x35] sm:$0x1] %v6158_v1  ;;  %v6526_v51 = vld [vmem:[%s10492_s28 + $0x24] sm:$0x1] }
 0x494   : > { %v6528_v0 = vld [vmem:[%s10492_s28 + $0x25] sm:$0x1]  ;;  %v6530_v23 = vld [vmem:[%s10492_s28 + $0x26] sm:$0x1]  ;;  %6563 = vst [vmem:[%s10492_s28 + $0x36] sm:$0x1] %v6162_v2  ;;  %v6086_v28 = vadd.f32 %v6526_v51, %v6085_v43 }
 0x495   : > { %6565 = vst [vmem:[%s10492_s28 + $0x37] sm:$0x1] %v6166_v6  ;;  %6519 = vst [vmem:[%s10492_s28 + $0x20] sm:$0x1] %v6070_v18  ;;  %v6090_v41 = vadd.f32 %v6528_v0, %v6089_v49  ;;  %v6094_v9 = vadd.f32 %v6530_v23, %v6093_v37  ;;  %v6532_v4 = vld [vmem:[%s10492_s28 + $0x27] sm:$0x1] }
 0x496   : > { %v6566_v27 = vld [vmem:[%s10492_s28 + $0x38] sm:$0x1]  ;;  %v6568_v14 = vld [vmem:[%s10492_s28 + $0x39] sm:$0x1]  ;;  %6521 = vst [vmem:[%s10492_s28 + $0x21] sm:$0x1] %v6074_v63  ;;  %v6098_v34 = vadd.f32 %v6532_v4, %v6097_v35 }
 0x497   : > { %6523 = vst [vmem:[%s10492_s28 + $0x22] sm:$0x1] %v6078_v62  ;;  %6525 = vst [vmem:[%s10492_s28 + $0x23] sm:$0x1] %v6082_v26  ;;  %v6172_v42 = vadd.f32 %v6566_v27, %v6171_v3  ;;  %v6176_v16 = vadd.f32 %v6568_v14, %v6175_v21  ;;  %v6570_v38 = vld [vmem:[%s10492_s28 + $0x3a] sm:$0x1] }
 0x498   : > { %v6572_v17 = vld [vmem:[%s10492_s28 + $0x3b] sm:$0x1]  ;;  %v6574_v29 = vld [vmem:[%s10492_s28 + $0x3c] sm:$0x1]  ;;  %v6103_v33 = vld [vmem:[#allocation5 + $0xa0] sm:$0x1]  ;;  %v6180_v50 = vadd.f32 %v6570_v38, %v6179_v8 }
 0x499   : > { %v6107_v20 = vld [vmem:[#allocation5 + $0xa2] sm:$0x1]  ;;  %v6111_v22 = vld [vmem:[#allocation5 + $0xa4] sm:$0x1]  ;;  %6527 = vst [vmem:[%s10492_s28 + $0x24] sm:$0x1] %v6086_v28  ;;  %v6184_v58 = vadd.f32 %v6572_v17, %v6183_v47  ;;  %v6188_v44 = vadd.f32 %v6574_v29, %v6187_v19 }
 0x49a   : > { %6529 = vst [vmem:[%s10492_s28 + $0x25] sm:$0x1] %v6090_v41  ;;  %6531 = vst [vmem:[%s10492_s28 + $0x26] sm:$0x1] %v6094_v9  ;;  %v6576_v15 = vld [vmem:[%s10492_s28 + $0x3d] sm:$0x1] }
 0x49b   : > { %v6578_v31 = vld [vmem:[%s10492_s28 + $0x3e] sm:$0x1]  ;;  %v6580_v12 = vld [vmem:[%s10492_s28 + $0x3f] sm:$0x1]  ;;  %v6115_v59 = vld [vmem:[#allocation5 + $0xa6] sm:$0x1]  ;;  %v6192_v7 = vadd.f32 %v6576_v15, %v6191_v60 }
 0x49c   : > { %v6119_v57 = vld [vmem:[#allocation5 + $0xa8] sm:$0x1]  ;;  %v6123_v5 = vld [vmem:[#allocation5 + $0xaa] sm:$0x1]  ;;  %6533 = vst [vmem:[%s10492_s28 + $0x27] sm:$0x1] %v6098_v34  ;;  %v6196_v36 = vadd.f32 %v6578_v31, %v6195_v24  ;;  %v6200_v46 = vadd.f32 %v6580_v12, %v6199_v39 }
 0x49d   : > { %6567 = vst [vmem:[%s10492_s28 + $0x38] sm:$0x1] %v6172_v42  ;;  %6569 = vst [vmem:[%s10492_s28 + $0x39] sm:$0x1] %v6176_v16  ;;  %v6534_v25 = vld [vmem:[%s10492_s28 + $0x28] sm:$0x1] }
 0x49e   : > { %v6536_v61 = vld [vmem:[%s10492_s28 + $0x29] sm:$0x1]  ;;  %v6538_v52 = vld [vmem:[%s10492_s28 + $0x2a] sm:$0x1]  ;;  %v6127_v32 = vld [vmem:[#allocation5 + $0xac] sm:$0x1]  ;;  %v6104_v45 = vadd.f32 %v6534_v25, %v6103_v33 }
 0x49f   : > { %6571 = vst [vmem:[%s10492_s28 + $0x3a] sm:$0x1] %v6180_v50  ;;  %6573 = vst [vmem:[%s10492_s28 + $0x3b] sm:$0x1] %v6184_v58  ;;  %v6108_v30 = vadd.f32 %v6536_v61, %v6107_v20  ;;  %v6112_v40 = vadd.f32 %v6538_v52, %v6111_v22  ;;  %v6540_v3 = vld [vmem:[%s10492_s28 + $0x2b] sm:$0x1] }
 0x4a0   : > { %6575 = vst [vmem:[%s10492_s28 + $0x3c] sm:$0x1] %v6188_v44  ;;  %v6542_v21 = vld [vmem:[%s10492_s28 + $0x2c] sm:$0x1]  ;;  %v6544_v54 = vld [vmem:[%s10492_s28 + $0x2d] sm:$0x1]  ;;  %v6116_v10 = vadd.f32 %v6540_v3, %v6115_v59 }
 0x4a1   : > { %6577 = vst [vmem:[%s10492_s28 + $0x3d] sm:$0x1] %v6192_v7  ;;  %6579 = vst [vmem:[%s10492_s28 + $0x3e] sm:$0x1] %v6196_v36  ;;  %v6120_v1 = vadd.f32 %v6542_v21, %v6119_v57  ;;  %v6124_v48 = vadd.f32 %v6544_v54, %v6123_v5  ;;  %v6546_v53 = vld [vmem:[%s10492_s28 + $0x2e] sm:$0x1] }
 0x4a2   : > { %6581 = vst [vmem:[%s10492_s28 + $0x3f] sm:$0x1] %v6200_v46  ;;  %v6548_v56 = vld [vmem:[%s10492_s28 + $0x2f] sm:$0x1]  ;;  %v6131_v43 = vld [vmem:[#allocation5 + $0xae] sm:$0x1]  ;;  %v6128_v49 = vadd.f32 %v6546_v53, %v6127_v32 }
 0x4a3   : > { %6535 = vst [vmem:[%s10492_s28 + $0x28] sm:$0x1] %v6104_v45  ;;  %6537 = vst [vmem:[%s10492_s28 + $0x29] sm:$0x1] %v6108_v30  ;;  %v6132_v37 = vadd.f32 %v6548_v56, %v6131_v43 }
 0x4a4   : > { %6539 = vst [vmem:[%s10492_s28 + $0x2a] sm:$0x1] %v6112_v40  ;;  %6541 = vst [vmem:[%s10492_s28 + $0x2b] sm:$0x1] %v6116_v10 }
 0x4a5   : > { %6543 = vst [vmem:[%s10492_s28 + $0x2c] sm:$0x1] %v6120_v1  ;;  %6545 = vst [vmem:[%s10492_s28 + $0x2d] sm:$0x1] %v6124_v48 }
 0x4a6   : > { %6547 = vst [vmem:[%s10492_s28 + $0x2e] sm:$0x1] %v6128_v49  ;;  %6549 = vst [vmem:[%s10492_s28 + $0x2f] sm:$0x1] %v6132_v37 }
 0x4a7   : > { %7486 = shalt.err (!%p7483_p3)
}
 0x4a8   : > { %s7487_s26 = scalar_lea.hbm %s10672_s18, 1024  ;;  %s7491_s20 = scalar_lea.hbm %s10741_s12, 2048 }
 0x4a9   : > { %p7488_p4 = scmp.ne.s32.totalorder %s10672_s18, %s7487_s26  ;;  %p7492_p9 = scmp.lt.u32.totalorder %s10672_s18, %s10741_s12 }
 0x4aa   : > { %p7493_p10 = scmp.lt.u32.totalorder %s7491_s20, %s7487_s26  ;;  %p7495_p12 = scmp.lt.u32.totalorder %s7487_s26, %s10672_s18 }
 0x4ab   : > { %p7489_p7 = pnand %p7488_p4, %p7645_p5 }
 0x4ac   : > { %p7494_p11 = por %p7493_p10, %p7492_p9 }
 0x4ad   : > { %p7490_p8 = pneg %p7489_p7 }
 0x4ae   : > { %p7496_p13 = por %p7495_p12, %p7494_p11 }
 0x4b0   : > { %p7497_p0 = pnand %p7496_p13, %p7490_p8 }
 0x4b2   : > { %7500 = shalt.err (!%p7497_p0)
}
 0x4b3   : > { %s7540_s19 = smov 128   ;;  %s7541_s16 = smov 8  }
 0x4b4   : > { %7405 = dma.vmem_to_hbm [thread:$0]  (%p7645_p5), %s10676_s15, 1024, %s10672_s18, %s10688_s25, %s7540_s19, %s7540_s19, %s7541_s16  }
 0x4b5 PF: > { %p7411_p1 = scmp.ge.s32.totalorder %s7535_s24, 2  ;;  %s6231_s0 = sand.u32 1, %s7523_s21  }
 0x4b6   : > { %s6232_s26 = scalar_lea.sflag [#allocation7], %s6231_s0 }
 0x4b7   : > { %p7408_p2 = pnand %p7411_p1, %p7649_p6 }
 0x4b9   : > { %7518 = dma.done.wait (!%p7408_p2), %s6232_s26, 1024  }
 0x4ba   : > { %7520 = vsyncadd (!%p7408_p2), %s6232_s26, 4294966272  ;;  %p22_p3 = scmp.ge.s32.totalorder %s7632_s27, 4   ;;  %s10854_s21 = smov %s7527_s22 }
 0x4bb   : > { %s10855_s22 = smov %s7531_s23  ;;  %s10856_s23 = smov %s7643_s30 }
 0x4bc   : > { %s10857_s24 = smov %s7632_s27  ;;  %24 = sbr.rel (!%p22_p3) target bundleno = 5 (0x5), region = 131 }
 0x4c3   :  { %6237 = vsyncpa [#allocation7], 1 }
 0x4c4   :  { %6239 = vsyncpa [#allocation7 + $0x1], 1 }

</bundles_post_ra>
